<compile_context>
chip_gen: v5e
topology: v5e:2x2
jax: 0.10.0
libtpu: 0.0.40
codegen_flags: <defaults>
</compile_context>

<pallas_src>
import functools

import jax
import jax.numpy as jnp
from jax.experimental import pallas as pl
from jax.experimental.pallas import tpu as pltpu

NEG_SLOPE = 0.01   # LeakyReLU negative_slope
BN_EPS = 1e-5      # torch BatchNorm default eps

_ROW_TILE_CAP = 512                 # rows per block (multiple of 8)
_COL_TILE_CAP = 1024                # output-feature lanes per block
_VMEM_LIMIT = 48 * 1024 * 1024      # <= 48 MiB: leaves headroom on v7x (64 MiB)


# ---------------------------------------------------------------------------
# small helpers
# ---------------------------------------------------------------------------
def _round_up(v, m):
    return ((v + m - 1) // m) * m


def _pick_tiles(m, n):
    """Row tile (multiple of 8), padded row count, and column tile (multiple of
    128 dividing n, or n itself when small)."""
    tm = min(_ROW_TILE_CAP, _round_up(m, 8))
    m_pad = _round_up(m, tm)
    if n <= _COL_TILE_CAP:
        tn = n
    else:
        cands = [t for t in range(128, _COL_TILE_CAP + 1, 128) if n % t == 0]
        tn = max(cands) if cands else n
    return tm, m_pad, tn


def _cparams(dims):
    return pltpu.CompilerParams(dimension_semantics=dims,
                                vmem_limit_bytes=_VMEM_LIMIT)


def _pad_rows(x, m_pad):
    m = x.shape[0]
    return x if m_pad == m else jnp.pad(x, ((0, m_pad - m), (0, 0)))


# ---------------------------------------------------------------------------
# Pallas kernel bodies
# ---------------------------------------------------------------------------
def _mm_leaky_bnstats_kernel(x_ref, w_ref, b_ref, y_ref, sum_ref, ssq_ref,
                             *, tile_m, m_real, mask_rows):
    """y = LeakyReLU(x @ w + b); accumulate per-column sum / sumsq over valid
    rows (row grid axis is innermost + arbitrary -> stats blocks stay resident)."""
    i = pl.program_id(1)  # row-tile index (inner axis)
    y = jnp.dot(x_ref[...], w_ref[...], preferred_element_type=jnp.float32)
    y = y + b_ref[...]
    y = jnp.where(y >= 0, y, NEG_SLOPE * y)
    y_ref[...] = y

    @pl.when(i == 0)
    def _():
        sum_ref[...] = jnp.zeros_like(sum_ref)
        ssq_ref[...] = jnp.zeros_like(ssq_ref)

    if mask_rows:  # static: only emitted when the row dim was padded
        rows = i * tile_m + jax.lax.broadcasted_iota(jnp.int32, (tile_m, 1), 0)
        ys = jnp.where(rows < m_real, y, 0.0)
    else:
        ys = y
    sum_ref[...] += jnp.sum(ys, axis=0, keepdims=True)
    ssq_ref[...] += jnp.sum(ys * ys, axis=0, keepdims=True)


def _mm_leaky_kernel(x_ref, w_ref, b_ref, y_ref):
    y = jnp.dot(x_ref[...], w_ref[...], preferred_element_type=jnp.float32)
    y = y + b_ref[...]
    y_ref[...] = jnp.where(y >= 0, y, NEG_SLOPE * y)


def _mm_tanh_kernel(x_ref, w_ref, b_ref, y_ref):
    y = jnp.dot(x_ref[...], w_ref[...], preferred_element_type=jnp.float32)
    y_ref[...] = jnp.tanh(y + b_ref[...])


def _colstats_kernel(y_ref, sum_ref, ssq_ref):
    """Per-column sum / sumsq accumulated over row tiles (zero-padded rows are
    neutral, so no mask is needed)."""
    @pl.when(pl.program_id(0) == 0)
    def _():
        sum_ref[...] = jnp.zeros_like(sum_ref)
        ssq_ref[...] = jnp.zeros_like(ssq_ref)

    y = y_ref[...]
    sum_ref[...] += jnp.sum(y, axis=0, keepdims=True)
    ssq_ref[...] += jnp.sum(y * y, axis=0, keepdims=True)


def _scale_shift_kernel(y_ref, sc_ref, sh_ref, o_ref):
    o_ref[...] = (y_ref[...] * sc_ref[...] + sh_ref[...]).astype(o_ref.dtype)


# ---------------------------------------------------------------------------
# Pallas wrappers
# ---------------------------------------------------------------------------
def mm_leaky_bnstats(x, w, b):
    """LeakyReLU(x @ w + b) in f32, plus per-column sum / sum-of-squares over
    the M real rows (for BatchNorm1d).  w must already be bf16."""
    m, k = x.shape
    _, n = w.shape
    tm, m_pad, tn = _pick_tiles(m, n)
    xp = _pad_rows(x, m_pad).astype(jnp.bfloat16)
    kernel = functools.partial(_mm_leaky_bnstats_kernel,
                               tile_m=tm, m_real=m, mask_rows=(m_pad != m))
    y, s, q = pl.pallas_call(
        kernel,
        out_shape=(jax.ShapeDtypeStruct((m_pad, n), jnp.float32),
                   jax.ShapeDtypeStruct((1, n), jnp.float32),
                   jax.ShapeDtypeStruct((1, n), jnp.float32)),
        grid_spec=pltpu.PrefetchScalarGridSpec(
            num_scalar_prefetch=0,
            grid=(n // tn, m_pad // tm),          # reduction (row) axis last
            in_specs=[
                pl.BlockSpec((tm, k), lambda j, i: (i, 0)),
                pl.BlockSpec((k, tn), lambda j, i: (0, j)),
                pl.BlockSpec((1, tn), lambda j, i: (0, j)),
            ],
            out_specs=(
                pl.BlockSpec((tm, tn), lambda j, i: (i, j)),
                pl.BlockSpec((1, tn), lambda j, i: (0, j)),
                pl.BlockSpec((1, tn), lambda j, i: (0, j)),
            )),
        compiler_params=_cparams(("parallel", "arbitrary")),
    )(xp, w, b)
    return y[:m], s, q


def mm_leaky(x, w, b):
    """LeakyReLU(x @ w + b) in f32 (parity-packed conv matmul)."""
    m, k = x.shape
    _, n = w.shape
    tm, m_pad, tn = _pick_tiles(m, n)
    xp = _pad_rows(x, m_pad).astype(jnp.bfloat16)
    y = pl.pallas_call(
        _mm_leaky_kernel,
        out_shape=jax.ShapeDtypeStruct((m_pad, n), jnp.float32),
        grid_spec=pltpu.PrefetchScalarGridSpec(
            num_scalar_prefetch=0,
            grid=(m_pad // tm, n // tn),
            in_specs=[
                pl.BlockSpec((tm, k), lambda i, j: (i, 0)),
                pl.BlockSpec((k, tn), lambda i, j: (0, j)),
                pl.BlockSpec((1, tn), lambda i, j: (0, j)),
            ],
            out_specs=pl.BlockSpec((tm, tn), lambda i, j: (i, j))),
        compiler_params=_cparams(("parallel", "parallel")),
    )(xp, w, b)
    return y[:m]


def mm_tanh(x, w, b):
    """tanh(x @ w + b) in f32 (final parity-packed conv matmul)."""
    m, k = x.shape
    _, n = w.shape
    tm, m_pad, tn = _pick_tiles(m, n)
    xp = _pad_rows(x, m_pad).astype(jnp.bfloat16)
    y = pl.pallas_call(
        _mm_tanh_kernel,
        out_shape=jax.ShapeDtypeStruct((m_pad, n), jnp.float32),
        grid_spec=pltpu.PrefetchScalarGridSpec(
            num_scalar_prefetch=0,
            grid=(m_pad // tm, n // tn),
            in_specs=[
                pl.BlockSpec((tm, k), lambda i, j: (i, 0)),
                pl.BlockSpec((k, tn), lambda i, j: (0, j)),
                pl.BlockSpec((1, tn), lambda i, j: (0, j)),
            ],
            out_specs=pl.BlockSpec((tm, tn), lambda i, j: (i, j))),
        compiler_params=_cparams(("parallel", "parallel")),
    )(xp, w, b)
    return y[:m]


def col_stats(y):
    """Per-column sum / sum-of-squares of a (M, C) f32 array (BatchNorm2d stats
    on the flattened NHWC conv activation).  Zero row padding is neutral."""
    m, c = y.shape
    tm, m_pad, _ = _pick_tiles(m, c)
    yp = _pad_rows(y, m_pad)
    s, q = pl.pallas_call(
        _colstats_kernel,
        out_shape=(jax.ShapeDtypeStruct((1, c), jnp.float32),
                   jax.ShapeDtypeStruct((1, c), jnp.float32)),
        grid_spec=pltpu.PrefetchScalarGridSpec(
            num_scalar_prefetch=0,
            grid=(m_pad // tm,),
            in_specs=[pl.BlockSpec((tm, c), lambda i: (i, 0))],
            out_specs=(pl.BlockSpec((1, c), lambda i: (0, 0)),
                       pl.BlockSpec((1, c), lambda i: (0, 0)))),
        compiler_params=_cparams(("arbitrary",)),
    )(yp)
    return s, q


def bn_apply(y, scale, shift):
    """Per-column affine y*scale + shift; output bf16 (next matmul's input)."""
    m, c = y.shape
    tm, m_pad, tn = _pick_tiles(m, c)
    yp = _pad_rows(y, m_pad)
    o = pl.pallas_call(
        _scale_shift_kernel,
        out_shape=jax.ShapeDtypeStruct((m_pad, c), jnp.bfloat16),
        grid_spec=pltpu.PrefetchScalarGridSpec(
            num_scalar_prefetch=0,
            grid=(m_pad // tm, c // tn),
            in_specs=[
                pl.BlockSpec((tm, tn), lambda i, j: (i, j)),
                pl.BlockSpec((1, tn), lambda i, j: (0, j)),
                pl.BlockSpec((1, tn), lambda i, j: (0, j)),
            ],
            out_specs=pl.BlockSpec((tm, tn), lambda i, j: (i, j))),
        compiler_params=_cparams(("parallel", "parallel")),
    )(yp, scale, shift)
    return o[:m]


def bn_scale_shift(s, q, count, gamma, beta):
    """Turn accumulated sum / sumsq into per-column scale & shift (f32, glue)."""
    mean = s / count
    var = jnp.maximum(q / count - mean * mean, 0.0)   # biased variance
    scale = gamma * jax.lax.rsqrt(var + BN_EPS)
    shift = beta - mean * scale
    return scale, shift


# ---------------------------------------------------------------------------
# ConvTranspose2d (k=4, s=2, p=1) parity-decomposition glue (thin JAX reshapes)
# ---------------------------------------------------------------------------
def pack_convT_weight(wt):
    """torch ConvTranspose2d weight (Cin, Cout, 4, 4) -> (4*Cin, 4*Cout).
    Rows ordered (dy, dx, cin) [2x2 input-window offset, cin fastest];
    cols ordered (py, px, cout) [output parity within the 2x2 block].
    W_pack[(dy,dx,ci),(py,px,co)] = wt[ci, co, py + 2 - 2*dy, px + 2 - 2*dx]."""
    cin, cout, k, _ = wt.shape
    assert k == 4
    rows = []
    for dy in (0, 1):
        for dx in (0, 1):
            cols = []
            for py in (0, 1):
                for px in (0, 1):
                    cols.append(wt[:, :, py + 2 - 2 * dy, px + 2 - 2 * dx])
            rows.append(jnp.stack(cols, axis=1))      # (Cin, 4, Cout)
    w = jnp.stack(rows, axis=0)                       # (4, Cin, 4, Cout)
    return w.reshape(4 * cin, 4 * cout)


def extract_parity_patches(z_nhwc):
    """(N, H, W, C) -> (N*(H+1)*(W+1), 4*C): 2x2 windows of the 1-padded input,
    columns ordered (dy, dx, c) with c fastest."""
    n, h, w, c = z_nhwc.shape
    zp = jnp.pad(z_nhwc, ((0, 0), (1, 1), (1, 1), (0, 0)))
    blocks = []
    for dy in (0, 1):
        for dx in (0, 1):
            blocks.append(zp[:, dy:dy + h + 1, dx:dx + w + 1, :])
    p = jnp.stack(blocks, axis=3)                     # (N, H+1, W+1, 4, C)
    return p.reshape(n * (h + 1) * (w + 1), 4 * c)


def interleave_crop(y_packed, n, h, w, cout):
    """Packed matmul output (N*(H+1)*(W+1), 4*Cout) -> NHWC (N, 2H, 2W, Cout)."""
    y = y_packed.reshape(n, h + 1, w + 1, 2, 2, cout)
    y = jnp.transpose(y, (0, 1, 3, 2, 4, 5))          # (N, H+1, py, W+1, px, C)
    y = y.reshape(n, 2 * (h + 1), 2 * (w + 1), cout)
    return y[:, 1:2 * h + 1, 1:2 * w + 1, :]


# ---------------------------------------------------------------------------
# Parameter prep: bf16 matmul weights, NHWC column order, packed conv weights
# ---------------------------------------------------------------------------
def prepare_params(p):
    bf = jnp.bfloat16

    def to_nhwc_cols(a):           # torch (C,H,W) column order -> (H,W,C)
        return a.reshape(a.shape[0], 128, 7, 7).transpose(0, 2, 3, 1) \
                .reshape(a.shape[0], -1)

    return {
        'w1': p['w1'].astype(bf),
        'b1': p['b1'], 'g1': p['g1'], 'be1': p['be1'],
        'w2': to_nhwc_cols(p['w2']).astype(bf),
        'b2': to_nhwc_cols(p['b2']),
        'g2': to_nhwc_cols(p['g2']),
        'be2': to_nhwc_cols(p['be2']),
        'wd1': pack_convT_weight(p['wd1_t']).astype(bf),   # (512, 256)
        'bd1': jnp.tile(p['bd1'], (1, 4)),                 # (1, 256)
        'g3': p['g3'], 'be3': p['be3'],                    # (1, 64)
        'wd2': pack_convT_weight(p['wd2_t']).astype(bf),   # (256, 4)
        'bd2': jnp.tile(p['bd2'], (1, 4)),                 # (1, 4)
    }


# ---------------------------------------------------------------------------
# Decoder forward
# ---------------------------------------------------------------------------
@jax.jit
def decoder_forward(x, kp):
    n = x.shape[0]
    # Linear(noise, 1024) + LeakyReLU + BatchNorm1d
    y, s, q = mm_leaky_bnstats(x, kp['w1'], kp['b1'])
    sc, sh = bn_scale_shift(s, q, n, kp['g1'], kp['be1'])
    h = bn_apply(y, sc, sh)                                   # (N, 1024) bf16
    # Linear(1024, 7*7*128) + LeakyReLU + BatchNorm1d (NHWC column order)
    y, s, q = mm_leaky_bnstats(h, kp['w2'], kp['b2'])
    sc, sh = bn_scale_shift(s, q, n, kp['g2'], kp['be2'])
    h = bn_apply(y, sc, sh)                                   # (N, 6272) bf16
    h = h.reshape(n, 7, 7, 128)                               # NHWC
    # ConvTranspose2d(128, 64, 4, s=2, p=1) + LeakyReLU + BatchNorm2d
    cols = extract_parity_patches(h)                          # (N*64, 512)
    a = mm_leaky(cols, kp['wd1'], kp['bd1'])                  # (N*64, 256) f32
    a = interleave_crop(a, n, 7, 7, 64)                       # (N, 14, 14, 64)
    a = a.reshape(n * 14 * 14, 64)
    s, q = col_stats(a)
    sc, sh = bn_scale_shift(s, q, n * 14 * 14, kp['g3'], kp['be3'])
    z = bn_apply(a, sc, sh).reshape(n, 14, 14, 64)            # bf16
    # ConvTranspose2d(64, 1, 4, s=2, p=1) + Tanh
    cols = extract_parity_patches(z)                          # (N*225, 256)
    y = mm_tanh(cols, kp['wd2'], kp['bd2'])                   # (N*225, 4) f32
    y = interleave_crop(y, n, 14, 14, 1)                      # (N, 28, 28, 1)
    return y.reshape(n, 1, 28, 28)                            # C=1: free reshape


# ---------------------------------------------------------------------------
# Deterministic synthetic parameters (torch layouts, N(0, 0.02) weights)
# ---------------------------------------------------------------------------
def init_params(key, noise_dim):
    ks = jax.random.split(key, 8)
    nrm = lambda k, s: (0.02 * jax.random.normal(k, s)).astype(jnp.float32)
    return {
        'w1': nrm(ks[0], (noise_dim, 1024)),
        'b1': nrm(ks[1], (1, 1024)),
        'g1': jnp.ones((1, 1024), jnp.float32),
        'be1': jnp.zeros((1, 1024), jnp.float32),
        'w2': nrm(ks[2], (1024, 7 * 7 * 128)),
        'b2': nrm(ks[3], (1, 7 * 7 * 128)),
        'g2': jnp.ones((1, 7 * 7 * 128), jnp.float32),
        'be2': jnp.zeros((1, 7 * 7 * 128), jnp.float32),
        'wd1_t': nrm(ks[4], (128, 64, 4, 4)),   # torch ConvTranspose2d layout
        'bd1': nrm(ks[5], (1, 64)),
        'g3': jnp.ones((1, 64), jnp.float32),
        'be3': jnp.zeros((1, 64), jnp.float32),
        'wd2_t': nrm(ks[6], (64, 1, 4, 4)),
        'bd2': nrm(ks[7], (1, 1)),
    }


# ---------------------------------------------------------------------------
# Reference: torch-equivalent math (NCHW, lax conv), with the SAME bf16
# rounding points as the kernels (matmul/conv inputs, stored activations).
# ---------------------------------------------------------------------------
def reference_forward(x, p):
    bf, f32 = jnp.bfloat16, jnp.float32
    leaky = lambda v: jnp.where(v >= 0, v, NEG_SLOPE * v)

    def bn(v, g, b, axes):
        m = jnp.mean(v, axis=axes, keepdims=True)
        var = jnp.mean((v - m) ** 2, axis=axes, keepdims=True)
        return (v - m) / jnp.sqrt(var + BN_EPS) * g + b

    def dot_bf16(a, w):
        return jnp.dot(a.astype(bf), w.astype(bf), preferred_element_type=f32)

    def convT_bf16(v, wt, bias, cout):
        k = wt.shape[-1]
        w = jnp.transpose(wt[:, :, ::-1, ::-1], (1, 0, 2, 3)).astype(bf)  # OIHW
        y = jax.lax.conv_general_dilated(
            v.astype(bf), w, window_strides=(1, 1),
            padding=[(k - 2, k - 2)] * 2, lhs_dilation=(2, 2),
            rhs_dilation=(1, 1), dimension_numbers=('NCHW', 'OIHW', 'NCHW'),
            preferred_element_type=f32)
        return y + bias.reshape(1, cout, 1, 1)

    h = bn(leaky(dot_bf16(x, p['w1']) + p['b1']), p['g1'], p['be1'], (0,))
    h = h.astype(bf).astype(f32)
    h = bn(leaky(dot_bf16(h, p['w2']) + p['b2']), p['g2'], p['be2'], (0,))
    h = h.astype(bf).astype(f32)
    h = h.reshape(-1, 128, 7, 7)
    h = leaky(convT_bf16(h, p['wd1_t'], p['bd1'], 64))
    h = bn(h, p['g3'].reshape(1, 64, 1, 1), p['be3'].reshape(1, 64, 1, 1),
           (0, 2, 3))
    h = h.astype(bf).astype(f32)
    h = convT_bf16(h, p['wd2_t'], p['bd2'], 1)
    return jnp.tanh(h)


if __name__ == "__main__":
    key = jax.random.PRNGKey(0)
    noise_dim = 32
    batch = 2
    pkey, xkey = jax.random.split(key)
    params = init_params(pkey, noise_dim)
    x = jax.random.normal(xkey, (batch, noise_dim), dtype=jnp.float32)

    kparams = prepare_params(params)
    out = jax.block_until_ready(decoder_forward(x, kparams))
    assert out.shape == (batch, 1, 28, 28), out.shape

    ref = jax.block_until_ready(reference_forward(x, params))
    max_err = float(jnp.max(jnp.abs(out - ref)))
    assert max_err < 5e-3, f"mismatch vs reference: {max_err}"

    print("KERNEL_OK")
</pallas_src>

<mosaic_0001>
module attributes {stable_mosaic.version = 11 : i64} {
  func.func @_mm_leaky_bnstats_kernel(%arg0: i32, %arg1: i32, %arg2: memref<8x32xbf16, #tpu.memory_space<vmem>>, %arg3: memref<32x1024xbf16, #tpu.memory_space<vmem>>, %arg4: memref<1x1024xf32, #tpu.memory_space<vmem>>, %arg5: memref<8x1024xf32, #tpu.memory_space<vmem>>, %arg6: memref<1x1024xf32, #tpu.memory_space<vmem>>, %arg7: memref<1x1024xf32, #tpu.memory_space<vmem>>) attributes {dimension_semantics = [#tpu.dimension_semantics<parallel>, #tpu.dimension_semantics<arbitrary>], iteration_bounds = array<i64: 1, 1>, scalar_prefetch = 0 : i64, scratch_operands = 0 : i64, tpu.core_type = #tpu.core_type<tc>, window_params = [{transform_indices = @transform_0, window_bounds = array<i64: 8, 32>}, {transform_indices = @transform_1, window_bounds = array<i64: 32, 1024>}, {transform_indices = @transform_2, window_bounds = array<i64: 1, 1024>}, {transform_indices = @transform_3, window_bounds = array<i64: 8, 1024>}, {transform_indices = @transform_4, window_bounds = array<i64: 1, 1024>}, {transform_indices = @transform_5, window_bounds = array<i64: 1, 1024>}]} {
    %c0 = arith.constant 0 : index
    %c0_0 = arith.constant 0 : index
    %0 = vector.load %arg2[%c0, %c0_0] : memref<8x32xbf16, #tpu.memory_space<vmem>>, vector<8x32xbf16>
    %c0_1 = arith.constant 0 : index
    %c0_2 = arith.constant 0 : index
    %1 = vector.load %arg3[%c0_1, %c0_2] : memref<32x1024xbf16, #tpu.memory_space<vmem>>, vector<32x1024xbf16>
    %cst = arith.constant dense<0.000000e+00> : vector<8x1024xf32>
    %2 = tpu.matmul %0, %1, %cst {dimension_numbers = #tpu.dot_dimension_numbers<[1], [0], [0], [1], [0, 0, 1, 1], [], []>} : vector<8x32xbf16>, vector<32x1024xbf16>, vector<8x1024xf32> -> vector<8x1024xf32>
    %c0_3 = arith.constant 0 : index
    %c0_4 = arith.constant 0 : index
    %3 = vector.load %arg4[%c0_3, %c0_4] : memref<1x1024xf32, #tpu.memory_space<vmem>>, vector<1x1024xf32>
    %4 = vector.broadcast %3 : vector<1x1024xf32> to vector<8x1024xf32>
    %5 = arith.addf %2, %4 : vector<8x1024xf32>
    %cst_5 = arith.constant 0.000000e+00 : f32
    %6 = vector.broadcast %cst_5 : f32 to vector<8x1024xf32>
    %7 = arith.cmpf oge, %5, %6 : vector<8x1024xf32>
    %cst_6 = arith.constant 0.00999999977 : f32
    %8 = vector.broadcast %cst_6 : f32 to vector<8x1024xf32>
    %9 = arith.mulf %8, %5 : vector<8x1024xf32>
    %10 = arith.select %7, %5, %9 : vector<8x1024xi1>, vector<8x1024xf32>
    %c0_7 = arith.constant 0 : index
    %c0_8 = arith.constant 0 : index
    %11 = vector.load %arg5[%c0_7, %c0_8] : memref<8x1024xf32, #tpu.memory_space<vmem>>, vector<8x1024xf32>
    tpu.vector_store %arg5[%c0_7, %c0_8], %10 {strides = array<i32>} : memref<8x1024xf32, #tpu.memory_space<vmem>>, vector<8x1024xf32>,
    %c0_i32 = arith.constant 0 : i32
    %12 = arith.cmpi eq, %arg1, %c0_i32 : i32
    %13 = arith.extui %12 : i1 to i32
    %c0_i32_9 = arith.constant 0 : i32
    %14 = arith.cmpi ne, %13, %c0_i32_9 : i32
    scf.if %14 {
      %cst_21 = arith.constant 0.000000e+00 : f32
      %36 = vector.broadcast %cst_21 : f32 to vector<1x1024xf32>
      %c0_22 = arith.constant 0 : index
      %c0_23 = arith.constant 0 : index
      %37 = vector.load %arg6[%c0_22, %c0_23] : memref<1x1024xf32, #tpu.memory_space<vmem>>, vector<1x1024xf32>
      tpu.vector_store %arg6[%c0_22, %c0_23], %36 {strides = array<i32>} : memref<1x1024xf32, #tpu.memory_space<vmem>>, vector<1x1024xf32>,
      %cst_24 = arith.constant 0.000000e+00 : f32
      %38 = vector.broadcast %cst_24 : f32 to vector<1x1024xf32>
      %c0_25 = arith.constant 0 : index
      %c0_26 = arith.constant 0 : index
      %39 = vector.load %arg7[%c0_25, %c0_26] : memref<1x1024xf32, #tpu.memory_space<vmem>>, vector<1x1024xf32>
      tpu.vector_store %arg7[%c0_25, %c0_26], %38 {strides = array<i32>} : memref<1x1024xf32, #tpu.memory_space<vmem>>, vector<1x1024xf32>,
    } else {
    }
    %c8_i32 = arith.constant 8 : i32
    %15 = arith.muli %arg1, %c8_i32 : i32
    %16 = tpu.iota {dimensions = array<i32: 0>} : vector<8x1xi32>
    %17 = vector.broadcast %15 : i32 to vector<8x1xi32>
    %18 = arith.addi %17, %16 : vector<8x1xi32>
    %c2_i32 = arith.constant 2 : i32
    %19 = vector.broadcast %c2_i32 : i32 to vector<8x1xi32>
    %20 = arith.cmpi slt, %18, %19 : vector<8x1xi32>
    %cst_10 = arith.constant 0.000000e+00 : f32
    %21 = vector.shape_cast %20 : vector<8x1xi1> to vector<8x1xi1>
    %22 = vector.broadcast %21 : vector<8x1xi1> to vector<8x1024xi1>
    %23 = vector.broadcast %cst_10 : f32 to vector<8x1024xf32>
    %24 = arith.select %22, %10, %23 : vector<8x1024xi1>, vector<8x1024xf32>
    %c0_11 = arith.constant 0 : index
    %c0_12 = arith.constant 0 : index
    %25 = vector.load %arg6[%c0_11, %c0_12] : memref<1x1024xf32, #tpu.memory_space<vmem>>, vector<1x1024xf32>
    %cst_13 = arith.constant dense<0.000000e+00> : vector<1024xf32>
    %26 = vector.multi_reduction <add>, %24, %cst_13 [0] : vector<8x1024xf32> to vector<1024xf32>
    %27 = vector.shape_cast %26 : vector<1024xf32> to vector<1x1024xf32>
    %28 = arith.addf %25, %27 : vector<1x1024xf32>
    %c0_14 = arith.constant 0 : index
    %c0_15 = arith.constant 0 : index
    %29 = vector.load %arg6[%c0_14, %c0_15] : memref<1x1024xf32, #tpu.memory_space<vmem>>, vector<1x1024xf32>
    tpu.vector_store %arg6[%c0_14, %c0_15], %28 {strides = array<i32>} : memref<1x1024xf32, #tpu.memory_space<vmem>>, vector<1x1024xf32>,
    %c0_16 = arith.constant 0 : index
    %c0_17 = arith.constant 0 : index
    %30 = vector.load %arg7[%c0_16, %c0_17] : memref<1x1024xf32, #tpu.memory_space<vmem>>, vector<1x1024xf32>
    %31 = arith.mulf %24, %24 : vector<8x1024xf32>
    %cst_18 = arith.constant dense<0.000000e+00> : vector<1024xf32>
    %32 = vector.multi_reduction <add>, %31, %cst_18 [0] : vector<8x1024xf32> to vector<1024xf32>
    %33 = vector.shape_cast %32 : vector<1024xf32> to vector<1x1024xf32>
    %34 = arith.addf %30, %33 : vector<1x1024xf32>
    %c0_19 = arith.constant 0 : index
    %c0_20 = arith.constant 0 : index
    %35 = vector.load %arg7[%c0_19, %c0_20] : memref<1x1024xf32, #tpu.memory_space<vmem>>, vector<1x1024xf32>
    tpu.vector_store %arg7[%c0_19, %c0_20], %34 {strides = array<i32>} : memref<1x1024xf32, #tpu.memory_space<vmem>>, vector<1x1024xf32>,
    return
  }
  func.func @transform_0(%arg0: i32, %arg1: i32) -> (i32, i32) {
    %c0_i32 = arith.constant 0 : i32
    %c0_i32_0 = arith.constant 0 : i32
    return %arg1, %c0_i32 : i32, i32
  }
  func.func @transform_1(%arg0: i32, %arg1: i32) -> (i32, i32) {
    %c0_i32 = arith.constant 0 : i32
    %c0_i32_0 = arith.constant 0 : i32
    return %c0_i32, %arg0 : i32, i32
  }
  func.func @transform_2(%arg0: i32, %arg1: i32) -> (i32, i32) {
    %c0_i32 = arith.constant 0 : i32
    %c0_i32_0 = arith.constant 0 : i32
    return %c0_i32, %arg0 : i32, i32
  }
  func.func @transform_3(%arg0: i32, %arg1: i32) -> (i32, i32) {
    %c0_i32 = arith.constant 0 : i32
    return %arg1, %arg0 : i32, i32
  }
  func.func @transform_4(%arg0: i32, %arg1: i32) -> (i32, i32) {
    %c0_i32 = arith.constant 0 : i32
    %c0_i32_0 = arith.constant 0 : i32
    return %c0_i32, %arg0 : i32, i32
  }
  func.func @transform_5(%arg0: i32, %arg1: i32) -> (i32, i32) {
    %c0_i32 = arith.constant 0 : i32
    %c0_i32_0 = arith.constant 0 : i32
    return %c0_i32, %arg0 : i32, i32
  }
}

module attributes {stable_mosaic.version = 11 : i64} {
  func.func @_mm_leaky_bnstats_kernel(%arg0: i32, %arg1: i32, %arg2: memref<8x1024xbf16, #tpu.memory_space<vmem>>, %arg3: memref<1024x896xbf16, #tpu.memory_space<vmem>>, %arg4: memref<1x896xf32, #tpu.memory_space<vmem>>, %arg5: memref<8x896xf32, #tpu.memory_space<vmem>>, %arg6: memref<1x896xf32, #tpu.memory_space<vmem>>, %arg7: memref<1x896xf32, #tpu.memory_space<vmem>>) attributes {dimension_semantics = [#tpu.dimension_semantics<parallel>, #tpu.dimension_semantics<arbitrary>], iteration_bounds = array<i64: 7, 1>, scalar_prefetch = 0 : i64, scratch_operands = 0 : i64, tpu.core_type = #tpu.core_type<tc>, window_params = [{transform_indices = @transform_0, window_bounds = array<i64: 8, 1024>}, {transform_indices = @transform_1, window_bounds = array<i64: 1024, 896>}, {transform_indices = @transform_2, window_bounds = array<i64: 1, 896>}, {transform_indices = @transform_3, window_bounds = array<i64: 8, 896>}, {transform_indices = @transform_4, window_bounds = array<i64: 1, 896>}, {transform_indices = @transform_5, window_bounds = array<i64: 1, 896>}]} {
    %c0 = arith.constant 0 : index
    %c0_0 = arith.constant 0 : index
    %0 = vector.load %arg2[%c0, %c0_0] : memref<8x1024xbf16, #tpu.memory_space<vmem>>, vector<8x1024xbf16>
    %c0_1 = arith.constant 0 : index
    %c0_2 = arith.constant 0 : index
    %1 = vector.load %arg3[%c0_1, %c0_2] : memref<1024x896xbf16, #tpu.memory_space<vmem>>, vector<1024x896xbf16>
    %cst = arith.constant dense<0.000000e+00> : vector<8x896xf32>
    %2 = tpu.matmul %0, %1, %cst {dimension_numbers = #tpu.dot_dimension_numbers<[1], [0], [0], [1], [0, 0, 1, 1], [], []>} : vector<8x1024xbf16>, vector<1024x896xbf16>, vector<8x896xf32> -> vector<8x896xf32>
    %c0_3 = arith.constant 0 : index
    %c0_4 = arith.constant 0 : index
    %3 = vector.load %arg4[%c0_3, %c0_4] : memref<1x896xf32, #tpu.memory_space<vmem>>, vector<1x896xf32>
    %4 = vector.broadcast %3 : vector<1x896xf32> to vector<8x896xf32>
    %5 = arith.addf %2, %4 : vector<8x896xf32>
    %cst_5 = arith.constant 0.000000e+00 : f32
    %6 = vector.broadcast %cst_5 : f32 to vector<8x896xf32>
    %7 = arith.cmpf oge, %5, %6 : vector<8x896xf32>
    %cst_6 = arith.constant 0.00999999977 : f32
    %8 = vector.broadcast %cst_6 : f32 to vector<8x896xf32>
    %9 = arith.mulf %8, %5 : vector<8x896xf32>
    %10 = arith.select %7, %5, %9 : vector<8x896xi1>, vector<8x896xf32>
    %c0_7 = arith.constant 0 : index
    %c0_8 = arith.constant 0 : index
    %11 = vector.load %arg5[%c0_7, %c0_8] : memref<8x896xf32, #tpu.memory_space<vmem>>, vector<8x896xf32>
    tpu.vector_store %arg5[%c0_7, %c0_8], %10 {strides = array<i32>} : memref<8x896xf32, #tpu.memory_space<vmem>>, vector<8x896xf32>,
    %c0_i32 = arith.constant 0 : i32
    %12 = arith.cmpi eq, %arg1, %c0_i32 : i32
    %13 = arith.extui %12 : i1 to i32
    %c0_i32_9 = arith.constant 0 : i32
    %14 = arith.cmpi ne, %13, %c0_i32_9 : i32
    scf.if %14 {
      %cst_21 = arith.constant 0.000000e+00 : f32
      %36 = vector.broadcast %cst_21 : f32 to vector<1x896xf32>
      %c0_22 = arith.constant 0 : index
      %c0_23 = arith.constant 0 : index
      %37 = vector.load %arg6[%c0_22, %c0_23] : memref<1x896xf32, #tpu.memory_space<vmem>>, vector<1x896xf32>
      tpu.vector_store %arg6[%c0_22, %c0_23], %36 {strides = array<i32>} : memref<1x896xf32, #tpu.memory_space<vmem>>, vector<1x896xf32>,
      %cst_24 = arith.constant 0.000000e+00 : f32
      %38 = vector.broadcast %cst_24 : f32 to vector<1x896xf32>
      %c0_25 = arith.constant 0 : index
      %c0_26 = arith.constant 0 : index
      %39 = vector.load %arg7[%c0_25, %c0_26] : memref<1x896xf32, #tpu.memory_space<vmem>>, vector<1x896xf32>
      tpu.vector_store %arg7[%c0_25, %c0_26], %38 {strides = array<i32>} : memref<1x896xf32, #tpu.memory_space<vmem>>, vector<1x896xf32>,
    } else {
    }
    %c8_i32 = arith.constant 8 : i32
    %15 = arith.muli %arg1, %c8_i32 : i32
    %16 = tpu.iota {dimensions = array<i32: 0>} : vector<8x1xi32>
    %17 = vector.broadcast %15 : i32 to vector<8x1xi32>
    %18 = arith.addi %17, %16 : vector<8x1xi32>
    %c2_i32 = arith.constant 2 : i32
    %19 = vector.broadcast %c2_i32 : i32 to vector<8x1xi32>
    %20 = arith.cmpi slt, %18, %19 : vector<8x1xi32>
    %cst_10 = arith.constant 0.000000e+00 : f32
    %21 = vector.shape_cast %20 : vector<8x1xi1> to vector<8x1xi1>
    %22 = vector.broadcast %21 : vector<8x1xi1> to vector<8x896xi1>
    %23 = vector.broadcast %cst_10 : f32 to vector<8x896xf32>
    %24 = arith.select %22, %10, %23 : vector<8x896xi1>, vector<8x896xf32>
    %c0_11 = arith.constant 0 : index
    %c0_12 = arith.constant 0 : index
    %25 = vector.load %arg6[%c0_11, %c0_12] : memref<1x896xf32, #tpu.memory_space<vmem>>, vector<1x896xf32>
    %cst_13 = arith.constant dense<0.000000e+00> : vector<896xf32>
    %26 = vector.multi_reduction <add>, %24, %cst_13 [0] : vector<8x896xf32> to vector<896xf32>
    %27 = vector.shape_cast %26 : vector<896xf32> to vector<1x896xf32>
    %28 = arith.addf %25, %27 : vector<1x896xf32>
    %c0_14 = arith.constant 0 : index
    %c0_15 = arith.constant 0 : index
    %29 = vector.load %arg6[%c0_14, %c0_15] : memref<1x896xf32, #tpu.memory_space<vmem>>, vector<1x896xf32>
    tpu.vector_store %arg6[%c0_14, %c0_15], %28 {strides = array<i32>} : memref<1x896xf32, #tpu.memory_space<vmem>>, vector<1x896xf32>,
    %c0_16 = arith.constant 0 : index
    %c0_17 = arith.constant 0 : index
    %30 = vector.load %arg7[%c0_16, %c0_17] : memref<1x896xf32, #tpu.memory_space<vmem>>, vector<1x896xf32>
    %31 = arith.mulf %24, %24 : vector<8x896xf32>
    %cst_18 = arith.constant dense<0.000000e+00> : vector<896xf32>
    %32 = vector.multi_reduction <add>, %31, %cst_18 [0] : vector<8x896xf32> to vector<896xf32>
    %33 = vector.shape_cast %32 : vector<896xf32> to vector<1x896xf32>
    %34 = arith.addf %30, %33 : vector<1x896xf32>
    %c0_19 = arith.constant 0 : index
    %c0_20 = arith.constant 0 : index
    %35 = vector.load %arg7[%c0_19, %c0_20] : memref<1x896xf32, #tpu.memory_space<vmem>>, vector<1x896xf32>
    tpu.vector_store %arg7[%c0_19, %c0_20], %34 {strides = array<i32>} : memref<1x896xf32, #tpu.memory_space<vmem>>, vector<1x896xf32>,
    return
  }
  func.func @transform_0(%arg0: i32, %arg1: i32) -> (i32, i32) {
    %c0_i32 = arith.constant 0 : i32
    %c0_i32_0 = arith.constant 0 : i32
    return %arg1, %c0_i32 : i32, i32
  }
  func.func @transform_1(%arg0: i32, %arg1: i32) -> (i32, i32) {
    %c0_i32 = arith.constant 0 : i32
    %c0_i32_0 = arith.constant 0 : i32
    return %c0_i32, %arg0 : i32, i32
  }
  func.func @transform_2(%arg0: i32, %arg1: i32) -> (i32, i32) {
    %c0_i32 = arith.constant 0 : i32
    %c0_i32_0 = arith.constant 0 : i32
    return %c0_i32, %arg0 : i32, i32
  }
  func.func @transform_3(%arg0: i32, %arg1: i32) -> (i32, i32) {
    %c0_i32 = arith.constant 0 : i32
    return %arg1, %arg0 : i32, i32
  }
  func.func @transform_4(%arg0: i32, %arg1: i32) -> (i32, i32) {
    %c0_i32 = arith.constant 0 : i32
    %c0_i32_0 = arith.constant 0 : i32
    return %c0_i32, %arg0 : i32, i32
  }
  func.func @transform_5(%arg0: i32, %arg1: i32) -> (i32, i32) {
    %c0_i32 = arith.constant 0 : i32
    %c0_i32_0 = arith.constant 0 : i32
    return %c0_i32, %arg0 : i32, i32
  }
}

module attributes {stable_mosaic.version = 11 : i64} {
  func.func @_scale_shift_kernel(%arg0: i32, %arg1: i32, %arg2: memref<8x1024xf32, #tpu.memory_space<vmem>>, %arg3: memref<1x1024xf32, #tpu.memory_space<vmem>>, %arg4: memref<1x1024xf32, #tpu.memory_space<vmem>>, %arg5: memref<8x1024xbf16, #tpu.memory_space<vmem>>) attributes {dimension_semantics = [#tpu.dimension_semantics<parallel>, #tpu.dimension_semantics<parallel>], iteration_bounds = array<i64: 1, 1>, scalar_prefetch = 0 : i64, scratch_operands = 0 : i64, tpu.core_type = #tpu.core_type<tc>, window_params = [{transform_indices = @transform_0, window_bounds = array<i64: 8, 1024>}, {transform_indices = @transform_1, window_bounds = array<i64: 1, 1024>}, {transform_indices = @transform_2, window_bounds = array<i64: 1, 1024>}, {transform_indices = @transform_3, window_bounds = array<i64: 8, 1024>}]} {
    %c0 = arith.constant 0 : index
    %c0_0 = arith.constant 0 : index
    %0 = vector.load %arg2[%c0, %c0_0] : memref<8x1024xf32, #tpu.memory_space<vmem>>, vector<8x1024xf32>
    %c0_1 = arith.constant 0 : index
    %c0_2 = arith.constant 0 : index
    %1 = vector.load %arg3[%c0_1, %c0_2] : memref<1x1024xf32, #tpu.memory_space<vmem>>, vector<1x1024xf32>
    %2 = vector.broadcast %1 : vector<1x1024xf32> to vector<8x1024xf32>
    %3 = arith.mulf %0, %2 : vector<8x1024xf32>
    %c0_3 = arith.constant 0 : index
    %c0_4 = arith.constant 0 : index
    %4 = vector.load %arg4[%c0_3, %c0_4] : memref<1x1024xf32, #tpu.memory_space<vmem>>, vector<1x1024xf32>
    %5 = vector.broadcast %4 : vector<1x1024xf32> to vector<8x1024xf32>
    %6 = arith.addf %3, %5 : vector<8x1024xf32>
    %7 = arith.truncf %6 : vector<8x1024xf32> to vector<8x1024xbf16>
    %c0_5 = arith.constant 0 : index
    %c0_6 = arith.constant 0 : index
    %8 = vector.load %arg5[%c0_5, %c0_6] : memref<8x1024xbf16, #tpu.memory_space<vmem>>, vector<8x1024xbf16>
    tpu.vector_store %arg5[%c0_5, %c0_6], %7 {strides = array<i32>} : memref<8x1024xbf16, #tpu.memory_space<vmem>>, vector<8x1024xbf16>,
    return
  }
  func.func @transform_0(%arg0: i32, %arg1: i32) -> (i32, i32) {
    %c0_i32 = arith.constant 0 : i32
    return %arg0, %arg1 : i32, i32
  }
  func.func @transform_1(%arg0: i32, %arg1: i32) -> (i32, i32) {
    %c0_i32 = arith.constant 0 : i32
    %c0_i32_0 = arith.constant 0 : i32
    return %c0_i32, %arg1 : i32, i32
  }
  func.func @transform_2(%arg0: i32, %arg1: i32) -> (i32, i32) {
    %c0_i32 = arith.constant 0 : i32
    %c0_i32_0 = arith.constant 0 : i32
    return %c0_i32, %arg1 : i32, i32
  }
  func.func @transform_3(%arg0: i32, %arg1: i32) -> (i32, i32) {
    %c0_i32 = arith.constant 0 : i32
    return %arg0, %arg1 : i32, i32
  }
}

module attributes {stable_mosaic.version = 11 : i64} {
  func.func @_scale_shift_kernel(%arg0: i32, %arg1: i32, %arg2: memref<8x896xf32, #tpu.memory_space<vmem>>, %arg3: memref<1x896xf32, #tpu.memory_space<vmem>>, %arg4: memref<1x896xf32, #tpu.memory_space<vmem>>, %arg5: memref<8x896xbf16, #tpu.memory_space<vmem>>) attributes {dimension_semantics = [#tpu.dimension_semantics<parallel>, #tpu.dimension_semantics<parallel>], iteration_bounds = array<i64: 1, 7>, scalar_prefetch = 0 : i64, scratch_operands = 0 : i64, tpu.core_type = #tpu.core_type<tc>, window_params = [{transform_indices = @transform_0, window_bounds = array<i64: 8, 896>}, {transform_indices = @transform_1, window_bounds = array<i64: 1, 896>}, {transform_indices = @transform_2, window_bounds = array<i64: 1, 896>}, {transform_indices = @transform_3, window_bounds = array<i64: 8, 896>}]} {
    %c0 = arith.constant 0 : index
    %c0_0 = arith.constant 0 : index
    %0 = vector.load %arg2[%c0, %c0_0] : memref<8x896xf32, #tpu.memory_space<vmem>>, vector<8x896xf32>
    %c0_1 = arith.constant 0 : index
    %c0_2 = arith.constant 0 : index
    %1 = vector.load %arg3[%c0_1, %c0_2] : memref<1x896xf32, #tpu.memory_space<vmem>>, vector<1x896xf32>
    %2 = vector.broadcast %1 : vector<1x896xf32> to vector<8x896xf32>
    %3 = arith.mulf %0, %2 : vector<8x896xf32>
    %c0_3 = arith.constant 0 : index
    %c0_4 = arith.constant 0 : index
    %4 = vector.load %arg4[%c0_3, %c0_4] : memref<1x896xf32, #tpu.memory_space<vmem>>, vector<1x896xf32>
    %5 = vector.broadcast %4 : vector<1x896xf32> to vector<8x896xf32>
    %6 = arith.addf %3, %5 : vector<8x896xf32>
    %7 = arith.truncf %6 : vector<8x896xf32> to vector<8x896xbf16>
    %c0_5 = arith.constant 0 : index
    %c0_6 = arith.constant 0 : index
    %8 = vector.load %arg5[%c0_5, %c0_6] : memref<8x896xbf16, #tpu.memory_space<vmem>>, vector<8x896xbf16>
    tpu.vector_store %arg5[%c0_5, %c0_6], %7 {strides = array<i32>} : memref<8x896xbf16, #tpu.memory_space<vmem>>, vector<8x896xbf16>,
    return
  }
  func.func @transform_0(%arg0: i32, %arg1: i32) -> (i32, i32) {
    %c0_i32 = arith.constant 0 : i32
    return %arg0, %arg1 : i32, i32
  }
  func.func @transform_1(%arg0: i32, %arg1: i32) -> (i32, i32) {
    %c0_i32 = arith.constant 0 : i32
    %c0_i32_0 = arith.constant 0 : i32
    return %c0_i32, %arg1 : i32, i32
  }
  func.func @transform_2(%arg0: i32, %arg1: i32) -> (i32, i32) {
    %c0_i32 = arith.constant 0 : i32
    %c0_i32_0 = arith.constant 0 : i32
    return %c0_i32, %arg1 : i32, i32
  }
  func.func @transform_3(%arg0: i32, %arg1: i32) -> (i32, i32) {
    %c0_i32 = arith.constant 0 : i32
    return %arg0, %arg1 : i32, i32
  }
}

module attributes {stable_mosaic.version = 11 : i64} {
  func.func @_mm_leaky_kernel(%arg0: i32, %arg1: i32, %arg2: memref<128x512xbf16, #tpu.memory_space<vmem>>, %arg3: memref<512x256xbf16, #tpu.memory_space<vmem>>, %arg4: memref<1x256xf32, #tpu.memory_space<vmem>>, %arg5: memref<128x256xf32, #tpu.memory_space<vmem>>) attributes {dimension_semantics = [#tpu.dimension_semantics<parallel>, #tpu.dimension_semantics<parallel>], iteration_bounds = array<i64: 1, 1>, scalar_prefetch = 0 : i64, scratch_operands = 0 : i64, tpu.core_type = #tpu.core_type<tc>, window_params = [{transform_indices = @transform_0, window_bounds = array<i64: 128, 512>}, {transform_indices = @transform_1, window_bounds = array<i64: 512, 256>}, {transform_indices = @transform_2, window_bounds = array<i64: 1, 256>}, {transform_indices = @transform_3, window_bounds = array<i64: 128, 256>}]} {
    %c0 = arith.constant 0 : index
    %c0_0 = arith.constant 0 : index
    %0 = vector.load %arg2[%c0, %c0_0] : memref<128x512xbf16, #tpu.memory_space<vmem>>, vector<128x512xbf16>
    %c0_1 = arith.constant 0 : index
    %c0_2 = arith.constant 0 : index
    %1 = vector.load %arg3[%c0_1, %c0_2] : memref<512x256xbf16, #tpu.memory_space<vmem>>, vector<512x256xbf16>
    %cst = arith.constant dense<0.000000e+00> : vector<128x256xf32>
    %2 = tpu.matmul %0, %1, %cst {dimension_numbers = #tpu.dot_dimension_numbers<[1], [0], [0], [1], [0, 0, 1, 1], [], []>} : vector<128x512xbf16>, vector<512x256xbf16>, vector<128x256xf32> -> vector<128x256xf32>
    %c0_3 = arith.constant 0 : index
    %c0_4 = arith.constant 0 : index
    %3 = vector.load %arg4[%c0_3, %c0_4] : memref<1x256xf32, #tpu.memory_space<vmem>>, vector<1x256xf32>
    %4 = vector.broadcast %3 : vector<1x256xf32> to vector<128x256xf32>
    %5 = arith.addf %2, %4 : vector<128x256xf32>
    %cst_5 = arith.constant 0.000000e+00 : f32
    %6 = vector.broadcast %cst_5 : f32 to vector<128x256xf32>
    %7 = arith.cmpf oge, %5, %6 : vector<128x256xf32>
    %cst_6 = arith.constant 0.00999999977 : f32
    %8 = vector.broadcast %cst_6 : f32 to vector<128x256xf32>
    %9 = arith.mulf %8, %5 : vector<128x256xf32>
    %10 = arith.select %7, %5, %9 : vector<128x256xi1>, vector<128x256xf32>
    %c0_7 = arith.constant 0 : index
    %c0_8 = arith.constant 0 : index
    %11 = vector.load %arg5[%c0_7, %c0_8] : memref<128x256xf32, #tpu.memory_space<vmem>>, vector<128x256xf32>
    tpu.vector_store %arg5[%c0_7, %c0_8], %10 {strides = array<i32>} : memref<128x256xf32, #tpu.memory_space<vmem>>, vector<128x256xf32>,
    return
  }
  func.func @transform_0(%arg0: i32, %arg1: i32) -> (i32, i32) {
    %c0_i32 = arith.constant 0 : i32
    %c0_i32_0 = arith.constant 0 : i32
    return %arg0, %c0_i32 : i32, i32
  }
  func.func @transform_1(%arg0: i32, %arg1: i32) -> (i32, i32) {
    %c0_i32 = arith.constant 0 : i32
    %c0_i32_0 = arith.constant 0 : i32
    return %c0_i32, %arg1 : i32, i32
  }
  func.func @transform_2(%arg0: i32, %arg1: i32) -> (i32, i32) {
    %c0_i32 = arith.constant 0 : i32
    %c0_i32_0 = arith.constant 0 : i32
    return %c0_i32, %arg1 : i32, i32
  }
  func.func @transform_3(%arg0: i32, %arg1: i32) -> (i32, i32) {
    %c0_i32 = arith.constant 0 : i32
    return %arg0, %arg1 : i32, i32
  }
}

module attributes {stable_mosaic.version = 11 : i64} {
  func.func @_colstats_kernel(%arg0: i32, %arg1: memref<392x64xf32, #tpu.memory_space<vmem>>, %arg2: memref<1x64xf32, #tpu.memory_space<vmem>>, %arg3: memref<1x64xf32, #tpu.memory_space<vmem>>) attributes {dimension_semantics = [#tpu.dimension_semantics<arbitrary>], iteration_bounds = array<i64: 1>, scalar_prefetch = 0 : i64, scratch_operands = 0 : i64, tpu.core_type = #tpu.core_type<tc>, window_params = [{transform_indices = @transform_0, window_bounds = array<i64: 392, 64>}, {pipeline_mode = #tpu.pipeline_mode<synchronous>, transform_indices = @transform_1, window_bounds = array<i64: 1, 64>}, {pipeline_mode = #tpu.pipeline_mode<synchronous>, transform_indices = @transform_2, window_bounds = array<i64: 1, 64>}]} {
    %c0_i32 = arith.constant 0 : i32
    %0 = arith.cmpi eq, %arg0, %c0_i32 : i32
    %1 = arith.extui %0 : i1 to i32
    %c0_i32_0 = arith.constant 0 : i32
    %2 = arith.cmpi ne, %1, %c0_i32_0 : i32
    scf.if %2 {
      %cst_11 = arith.constant 0.000000e+00 : f32
      %15 = vector.broadcast %cst_11 : f32 to vector<1x64xf32>
      %c0_12 = arith.constant 0 : index
      %c0_13 = arith.constant 0 : index
      %16 = vector.load %arg2[%c0_12, %c0_13] : memref<1x64xf32, #tpu.memory_space<vmem>>, vector<1x64xf32>
      tpu.vector_store %arg2[%c0_12, %c0_13], %15 {strides = array<i32>} : memref<1x64xf32, #tpu.memory_space<vmem>>, vector<1x64xf32>,
      %cst_14 = arith.constant 0.000000e+00 : f32
      %17 = vector.broadcast %cst_14 : f32 to vector<1x64xf32>
      %c0_15 = arith.constant 0 : index
      %c0_16 = arith.constant 0 : index
      %18 = vector.load %arg3[%c0_15, %c0_16] : memref<1x64xf32, #tpu.memory_space<vmem>>, vector<1x64xf32>
      tpu.vector_store %arg3[%c0_15, %c0_16], %17 {strides = array<i32>} : memref<1x64xf32, #tpu.memory_space<vmem>>, vector<1x64xf32>,
    } else {
    }
    %c0 = arith.constant 0 : index
    %c0_1 = arith.constant 0 : index
    %3 = vector.load %arg1[%c0, %c0_1] : memref<392x64xf32, #tpu.memory_space<vmem>>, vector<392x64xf32>
    %c0_2 = arith.constant 0 : index
    %c0_3 = arith.constant 0 : index
    %4 = vector.load %arg2[%c0_2, %c0_3] : memref<1x64xf32, #tpu.memory_space<vmem>>, vector<1x64xf32>
    %cst = arith.constant dense<0.000000e+00> : vector<64xf32>
    %5 = vector.multi_reduction <add>, %3, %cst [0] : vector<392x64xf32> to vector<64xf32>
    %6 = vector.shape_cast %5 : vector<64xf32> to vector<1x64xf32>
    %7 = arith.addf %4, %6 : vector<1x64xf32>
    %c0_4 = arith.constant 0 : index
    %c0_5 = arith.constant 0 : index
    %8 = vector.load %arg2[%c0_4, %c0_5] : memref<1x64xf32, #tpu.memory_space<vmem>>, vector<1x64xf32>
    tpu.vector_store %arg2[%c0_4, %c0_5], %7 {strides = array<i32>} : memref<1x64xf32, #tpu.memory_space<vmem>>, vector<1x64xf32>,
    %c0_6 = arith.constant 0 : index
    %c0_7 = arith.constant 0 : index
    %9 = vector.load %arg3[%c0_6, %c0_7] : memref<1x64xf32, #tpu.memory_space<vmem>>, vector<1x64xf32>
    %10 = arith.mulf %3, %3 : vector<392x64xf32>
    %cst_8 = arith.constant dense<0.000000e+00> : vector<64xf32>
    %11 = vector.multi_reduction <add>, %10, %cst_8 [0] : vector<392x64xf32> to vector<64xf32>
    %12 = vector.shape_cast %11 : vector<64xf32> to vector<1x64xf32>
    %13 = arith.addf %9, %12 : vector<1x64xf32>
    %c0_9 = arith.constant 0 : index
    %c0_10 = arith.constant 0 : index
    %14 = vector.load %arg3[%c0_9, %c0_10] : memref<1x64xf32, #tpu.memory_space<vmem>>, vector<1x64xf32>
    tpu.vector_store %arg3[%c0_9, %c0_10], %13 {strides = array<i32>} : memref<1x64xf32, #tpu.memory_space<vmem>>, vector<1x64xf32>,
    return
  }
  func.func @transform_0(%arg0: i32) -> (i32, i32) {
    %c0_i32 = arith.constant 0 : i32
    %c0_i32_0 = arith.constant 0 : i32
    return %arg0, %c0_i32 : i32, i32
  }
  func.func @transform_1(%arg0: i32) -> (i32, i32) {
    %c0_i32 = arith.constant 0 : i32
    %c0_i32_0 = arith.constant 0 : i32
    %c0_i32_1 = arith.constant 0 : i32
    return %c0_i32, %c0_i32_0 : i32, i32
  }
  func.func @transform_2(%arg0: i32) -> (i32, i32) {
    %c0_i32 = arith.constant 0 : i32
    %c0_i32_0 = arith.constant 0 : i32
    %c0_i32_1 = arith.constant 0 : i32
    return %c0_i32, %c0_i32_0 : i32, i32
  }
}

module attributes {stable_mosaic.version = 11 : i64} {
  func.func @_scale_shift_kernel(%arg0: i32, %arg1: i32, %arg2: memref<392x64xf32, #tpu.memory_space<vmem>>, %arg3: memref<1x64xf32, #tpu.memory_space<vmem>>, %arg4: memref<1x64xf32, #tpu.memory_space<vmem>>, %arg5: memref<392x64xbf16, #tpu.memory_space<vmem>>) attributes {dimension_semantics = [#tpu.dimension_semantics<parallel>, #tpu.dimension_semantics<parallel>], iteration_bounds = array<i64: 1, 1>, scalar_prefetch = 0 : i64, scratch_operands = 0 : i64, tpu.core_type = #tpu.core_type<tc>, window_params = [{transform_indices = @transform_0, window_bounds = array<i64: 392, 64>}, {transform_indices = @transform_1, window_bounds = array<i64: 1, 64>}, {transform_indices = @transform_2, window_bounds = array<i64: 1, 64>}, {transform_indices = @transform_3, window_bounds = array<i64: 392, 64>}]} {
    %c0 = arith.constant 0 : index
    %c0_0 = arith.constant 0 : index
    %0 = vector.load %arg2[%c0, %c0_0] : memref<392x64xf32, #tpu.memory_space<vmem>>, vector<392x64xf32>
    %c0_1 = arith.constant 0 : index
    %c0_2 = arith.constant 0 : index
    %1 = vector.load %arg3[%c0_1, %c0_2] : memref<1x64xf32, #tpu.memory_space<vmem>>, vector<1x64xf32>
    %2 = vector.broadcast %1 : vector<1x64xf32> to vector<392x64xf32>
    %3 = arith.mulf %0, %2 : vector<392x64xf32>
    %c0_3 = arith.constant 0 : index
    %c0_4 = arith.constant 0 : index
    %4 = vector.load %arg4[%c0_3, %c0_4] : memref<1x64xf32, #tpu.memory_space<vmem>>, vector<1x64xf32>
    %5 = vector.broadcast %4 : vector<1x64xf32> to vector<392x64xf32>
    %6 = arith.addf %3, %5 : vector<392x64xf32>
    %7 = arith.truncf %6 : vector<392x64xf32> to vector<392x64xbf16>
    %c0_5 = arith.constant 0 : index
    %c0_6 = arith.constant 0 : index
    %8 = vector.load %arg5[%c0_5, %c0_6] : memref<392x64xbf16, #tpu.memory_space<vmem>>, vector<392x64xbf16>
    tpu.vector_store %arg5[%c0_5, %c0_6], %7 {strides = array<i32>} : memref<392x64xbf16, #tpu.memory_space<vmem>>, vector<392x64xbf16>,
    return
  }
  func.func @transform_0(%arg0: i32, %arg1: i32) -> (i32, i32) {
    %c0_i32 = arith.constant 0 : i32
    return %arg0, %arg1 : i32, i32
  }
  func.func @transform_1(%arg0: i32, %arg1: i32) -> (i32, i32) {
    %c0_i32 = arith.constant 0 : i32
    %c0_i32_0 = arith.constant 0 : i32
    return %c0_i32, %arg1 : i32, i32
  }
  func.func @transform_2(%arg0: i32, %arg1: i32) -> (i32, i32) {
    %c0_i32 = arith.constant 0 : i32
    %c0_i32_0 = arith.constant 0 : i32
    return %c0_i32, %arg1 : i32, i32
  }
  func.func @transform_3(%arg0: i32, %arg1: i32) -> (i32, i32) {
    %c0_i32 = arith.constant 0 : i32
    return %arg0, %arg1 : i32, i32
  }
}

module attributes {stable_mosaic.version = 11 : i64} {
  func.func @_mm_tanh_kernel(%arg0: i32, %arg1: i32, %arg2: memref<456x256xbf16, #tpu.memory_space<vmem>>, %arg3: memref<256x4xbf16, #tpu.memory_space<vmem>>, %arg4: memref<1x4xf32, #tpu.memory_space<vmem>>, %arg5: memref<456x4xf32, #tpu.memory_space<vmem>>) attributes {dimension_semantics = [#tpu.dimension_semantics<parallel>, #tpu.dimension_semantics<parallel>], iteration_bounds = array<i64: 1, 1>, scalar_prefetch = 0 : i64, scratch_operands = 0 : i64, tpu.core_type = #tpu.core_type<tc>, window_params = [{transform_indices = @transform_0, window_bounds = array<i64: 456, 256>}, {transform_indices = @transform_1, window_bounds = array<i64: 256, 4>}, {transform_indices = @transform_2, window_bounds = array<i64: 1, 4>}, {transform_indices = @transform_3, window_bounds = array<i64: 456, 4>}]} {
    %c0 = arith.constant 0 : index
    %c0_0 = arith.constant 0 : index
    %0 = vector.load %arg2[%c0, %c0_0] : memref<456x256xbf16, #tpu.memory_space<vmem>>, vector<456x256xbf16>
    %c0_1 = arith.constant 0 : index
    %c0_2 = arith.constant 0 : index
    %1 = vector.load %arg3[%c0_1, %c0_2] : memref<256x4xbf16, #tpu.memory_space<vmem>>, vector<256x4xbf16>
    %cst = arith.constant dense<0.000000e+00> : vector<456x4xf32>
    %2 = tpu.matmul %0, %1, %cst {dimension_numbers = #tpu.dot_dimension_numbers<[1], [0], [0], [1], [0, 0, 1, 1], [], []>} : vector<456x256xbf16>, vector<256x4xbf16>, vector<456x4xf32> -> vector<456x4xf32>
    %c0_3 = arith.constant 0 : index
    %c0_4 = arith.constant 0 : index
    %3 = vector.load %arg4[%c0_3, %c0_4] : memref<1x4xf32, #tpu.memory_space<vmem>>, vector<1x4xf32>
    %4 = vector.broadcast %3 : vector<1x4xf32> to vector<456x4xf32>
    %5 = arith.addf %2, %4 : vector<456x4xf32>
    %6 = math.tanh %5 : vector<456x4xf32>
    %c0_5 = arith.constant 0 : index
    %c0_6 = arith.constant 0 : index
    %7 = vector.load %arg5[%c0_5, %c0_6] : memref<456x4xf32, #tpu.memory_space<vmem>>, vector<456x4xf32>
    tpu.vector_store %arg5[%c0_5, %c0_6], %6 {strides = array<i32>} : memref<456x4xf32, #tpu.memory_space<vmem>>, vector<456x4xf32>,
    return
  }
  func.func @transform_0(%arg0: i32, %arg1: i32) -> (i32, i32) {
    %c0_i32 = arith.constant 0 : i32
    %c0_i32_0 = arith.constant 0 : i32
    return %arg0, %c0_i32 : i32, i32
  }
  func.func @transform_1(%arg0: i32, %arg1: i32) -> (i32, i32) {
    %c0_i32 = arith.constant 0 : i32
    %c0_i32_0 = arith.constant 0 : i32
    return %c0_i32, %arg1 : i32, i32
  }
  func.func @transform_2(%arg0: i32, %arg1: i32) -> (i32, i32) {
    %c0_i32 = arith.constant 0 : i32
    %c0_i32_0 = arith.constant 0 : i32
    return %c0_i32, %arg1 : i32, i32
  }
  func.func @transform_3(%arg0: i32, %arg1: i32) -> (i32, i32) {
    %c0_i32 = arith.constant 0 : i32
    return %arg0, %arg1 : i32, i32
  }
}

</mosaic_0001>

<bundles_post_ra>
// kernel: decoder_forward.9
= control target key start
LH: loop header
LB: loop body
LE: loop exit
PB: predicated region body
PF: predicated region fallthrough
CT: control target
= control target key end

     0   :  { %s148_s0 = inlined_call_operand.vmem [shape: f32[8,1024], index: 0, kind: input, shape index: {}]   ;;  %s149_s1 = inlined_call_operand.vmem [shape: f32[1,1024], index: 1, kind: input, shape index: {}]   ;;  %s150_s2 = inlined_call_operand.vmem [shape: f32[1,1024], index: 2, kind: input, shape index: {}]   ;;  %s151_s3 = inlined_call_operand.vmem [shape: bf16[8,1024], index: 3, kind: output, shape index: {}]  }
   0x1   :  { %v14_v0 = vld [vmem:[%s148_s0] sm:$0xff]  ;;  %v15_v1 = vld [vmem:[%s148_s0 + $0x8] sm:$0xff]  ;;  %v16_v6 = vld [vmem:[%s148_s0 + $0x10] sm:$0xff] }
   0x2   :  { %v22_v2 = vld [vmem:[%s149_s1] sm:$0xff]  ;;  %v17_v7 = vld [vmem:[%s148_s0 + $0x18] sm:$0xff]  ;;  %v19_v18 = vld [vmem:[%s148_s0 + $0x28] sm:$0xff] }
   0x3   :  { %v24_v3 = vperm.slane %v22_v2, 0  ;;  %v25_v4 = vperm.slane %v22_v2, 1  ;;  %v48_v5 = vld [vmem:[%s150_s2] sm:$0xff]  ;;  %v26_v8 = vperm.slane %v22_v2, 2  ;;  %v27_v11 = vperm.slane %v22_v2, 3  ;;  %v20_v27 = vld [vmem:[%s148_s0 + $0x30] sm:$0xff] }
   0x4   :  { %v50_v9 = vperm.slane %v48_v5, 0  ;;  %v51_v10 = vperm.slane %v48_v5, 1  ;;  %v52_v12 = vperm.slane %v48_v5, 2  ;;  %v53_v16 = vperm.slane %v48_v5, 3  ;;  %v18_v17 = vld [vmem:[%s148_s0 + $0x20] sm:$0xff]  ;;  %v21_v31 = vld [vmem:[%s148_s0 + $0x38] sm:$0xff] }
   0x5   :  { %v40_v13 = vmul.f32 %v24_v3, %v14_v0  ;;  %v41_v14 = vmul.f32 %v25_v4, %v15_v1  ;;  %v42_v15 = vmul.f32 %v26_v8, %v16_v6  ;;  %v43_v19 = vmul.f32 %v27_v11, %v17_v7 }
   0x6   :  { %v28_v20 = vperm.slane %v22_v2, 4  ;;  %v29_v21 = vperm.slane %v22_v2, 5  ;;  %v54_v22 = vperm.slane %v48_v5, 4  ;;  %v55_v26 = vperm.slane %v48_v5, 5 }
   0x7   :  { %v66_v23 = vadd.f32 %v50_v9, %v40_v13  ;;  %v67_v24 = vadd.f32 %v51_v10, %v41_v14  ;;  %v68_v25 = vadd.f32 %v52_v12, %v42_v15  ;;  %v69_v28 = vadd.f32 %v53_v16, %v43_v19 }
   0x8   :  { %v44_v29 = vmul.f32 %v28_v20, %v18_v17  ;;  %v45_v30 = vmul.f32 %v29_v21, %v19_v18  ;;  %v30_v32 = vperm.slane %v22_v2, 6  ;;  %v31_v34 = vperm.slane %v22_v2, 7 }
   0x9   :  { %v74_v33 = vpack.c.bf16 %v67_v24, %v66_v23  ;;  %v56_v35 = vperm.slane %v48_v5, 6  ;;  %v57_v36 = vperm.slane %v48_v5, 7  ;;  %v75_v37 = vpack.c.bf16 %v69_v28, %v68_v25 }
   0xa   :  { %v70_v38 = vadd.f32 %v54_v22, %v44_v29  ;;  %v71_v39 = vadd.f32 %v55_v26, %v45_v30  ;;  %v46_v40 = vmul.f32 %v30_v32, %v20_v27  ;;  %v47_v41 = vmul.f32 %v31_v34, %v21_v31 }
   0xb   :  { %78 = vst [vmem:[%s151_s3] sm:$0xff] %v74_v33 }
   0xc   :  { %79 = vst [vmem:[%s151_s3 + $0x8] sm:$0xff] %v75_v37  ;;  %v76_v42 = vpack.c.bf16 %v71_v39, %v70_v38  ;;  %v72_v43 = vadd.f32 %v56_v35, %v46_v40  ;;  %v73_v44 = vadd.f32 %v57_v36, %v47_v41 }
   0xe   :  { %80 = vst [vmem:[%s151_s3 + $0x10] sm:$0xff] %v76_v42  ;;  %v77_v45 = vpack.c.bf16 %v73_v44, %v72_v43 }
  0x10   :  { %81 = vst [vmem:[%s151_s3 + $0x18] sm:$0xff] %v77_v45 }

// kernel: decoder_forward.8
= control target key start
LH: loop header
LB: loop body
LE: loop exit
PB: predicated region body
PF: predicated region fallthrough
CT: control target
= control target key end

     0   :  { %11 = vsyncpa [#allocation3], 0  ;;  %s789_s0 = inlined_call_operand.vmem [shape: bf16[8,32], index: 0, kind: input, shape index: {}]   ;;  %s790_s1 = inlined_call_operand.hbm [shape: bf16[32,1024], index: 1, kind: input, shape index: {}]   ;;  %s791_s2 = inlined_call_operand.hbm [shape: f32[1,1024], index: 2, kind: input, shape index: {}]   ;;  %s792_s3 = inlined_call_operand.vmem [shape: f32[8,1024], index: 3, kind: output, shape index: {0}]   ;;  %s793_s4 = inlined_call_operand.vmem [shape: f32[1,1024], index: 4, kind: output, shape index: {1}]   ;;  %s794_s5 = inlined_call_operand.vmem [shape: f32[1,1024], index: 5, kind: output, shape index: {2}]  }
   0x1   :  { %s19_s20 = sshll.u32 %s790_s1, 4  ;;  %s20_s20 = int_to_ptr.hbm [resolvable:$true] %s19_s20 }
   0x2   :  { %12 = vsyncpa [#allocation5], 0  ;;  %s647_s21 = smov [#allocation2]   ;;  %s33_s25 = sshll.u32 %s791_s2, 4  ;;  %s34_s25 = int_to_ptr.hbm [resolvable:$true] %s33_s25 }
   0x3   :  { %s21_s22 = sshll.u32 %s647_s21, 4  ;;  %s648_s26 = smov 512   ;;  %s22_s22 = int_to_ptr.vmem [resolvable:$true] %s21_s22 }
   0x4   :  { %s649_s27 = smov 32   ;;  %s650_s28 = smov [#allocation4]  }
   0x5   :  { %27 = dma.hbm_to_vmem [thread:$0]  %s20_s20, 2048, %s22_s22, [#allocation3], %s648_s26, %s648_s26, %s649_s27  }
   0x6   :  { %s35_s29 = sshll.u32 %s650_s28, 4  ;;  %s36_s29 = int_to_ptr.vmem [resolvable:$true] %s35_s29 }
   0x7   :  { %38 = dma.hbm_to_vmem [thread:$0]  %s34_s25, 128, %s36_s29, [#allocation5]  }
   0x8   :  { %643 = dma.done.wait [#allocation3], 2048  }
   0x9   :  { %644 = vsyncadd [#allocation3], 4294965248 }
   0xa   :  { %645 = dma.done.wait [#allocation5], 128  }
   0xb   :  { %646 = vsyncadd [#allocation5], 4294967168  ;;  %vm163_vm0 = vcmask 261120   ;;  %v536_v0 = vld [vmem:[#allocation2 + $0x40] sm:$0xf]  ;;  %v310_v50 = vlaneseq  ;;  %vm389_vm10 = vcmask 1040384  }
   0xc   :  { %v586_v1 = vld [vmem:[#allocation2 + $0x5c] sm:$0xf0]  ;;  %v582_v2 = vld [vmem:[#allocation2 + $0x44] sm:$0xf]  ;;  %v544_v5 = vld [vmem:[#allocation2 + $0x48] sm:$0xf] }
   0xd   :  { %v537_v3 = vor.u32 %v586_v1, %v536_v0  ;;  %v538_v4 = vld [vmem:[#allocation2 + $0x60] sm:$0xf0]  ;;  %v587_v6 = vld [vmem:[#allocation2 + $0x64] sm:$0xf0]  ;;  %v583_v9 = vld [vmem:[#allocation2 + $0x4c] sm:$0xf] }
   0xe   :  { %v541_v7 = vor.u32 %v582_v2, %v538_v4  ;;  %v545_v8 = vor.u32 %v587_v6, %v544_v5  ;;  %v546_v10 = vld [vmem:[#allocation2 + $0x68] sm:$0xf0]  ;;  %v504_v11 = vld [vmem:[#allocation2] sm:$0xf]  ;;  %v574_v14 = vld [vmem:[#allocation2 + $0x4] sm:$0xf] }
   0xf   :  { %173 = vmatpush.bf16.msra.mxu0 %v537_v3  ;;  %v549_v12 = vor.u32 %v583_v9, %v546_v10  ;;  %v578_v13 = vld [vmem:[#allocation2 + $0x1c] sm:$0xf0]  ;;  %v506_v15 = vld [vmem:[#allocation2 + $0x20] sm:$0xf0]  ;;  %v512_v18 = vld [vmem:[#allocation2 + $0x8] sm:$0xf] }
  0x10   :  { %186 = vmatpush.bf16.msra.mxu1 %v541_v7  ;;  %199 = vmatpush.bf16.msra.mxu2 %v545_v8  ;;  %v505_v16 = vor.u32 %v578_v13, %v504_v11  ;;  %v509_v17 = vor.u32 %v574_v14, %v506_v15  ;;  %v579_v19 = vld [vmem:[#allocation2 + $0x24] sm:$0xf0]  ;;  %v575_v20 = vld [vmem:[#allocation2 + $0xc] sm:$0xf]  ;;  %v48_v23 = vld [vmem:[%s789_s0] sm:$0xf] }
  0x11   :  { %212 = vmatpush.bf16.msra.mxu3 %v549_v12  ;;  %v513_v21 = vor.u32 %v579_v19, %v512_v18  ;;  %v514_v22 = vld [vmem:[#allocation2 + $0x28] sm:$0xf0]  ;;  %v560_v24 = vld [vmem:[#allocation2 + $0x58] sm:$0xf]  ;;  %v585_v27 = vld [vmem:[#allocation2 + $0x5c] sm:$0xf] }
  0x12   :  { %v517_v25 = vor.u32 %v575_v20, %v514_v22  ;;  %v589_v26 = vld [vmem:[#allocation2 + $0x74] sm:$0xf0]  ;;  %v562_v28 = vld [vmem:[#allocation2 + $0x78] sm:$0xf0]  ;;  %v552_v31 = vld [vmem:[#allocation2 + $0x50] sm:$0xf] }
  0x13   :  { %174 = vmatpush.bf16.msra.mxu0 %v505_v16  ;;  %v561_v29 = vor.u32 %v589_v26, %v560_v24  ;;  %v565_v30 = vor.u32 %v585_v27, %v562_v28  ;;  %v588_v32 = vld [vmem:[#allocation2 + $0x6c] sm:$0xf0]  ;;  %v584_v33 = vld [vmem:[#allocation2 + $0x54] sm:$0xf]  ;;  %v528_v36 = vld [vmem:[#allocation2 + $0x18] sm:$0xf] }
  0x14   :  { %187 = vmatpush.bf16.msra.mxu1 %v509_v17  ;;  %200 = vmatpush.bf16.msra.mxu2 %v513_v21  ;;  %v553_v34 = vor.u32 %v588_v32, %v552_v31  ;;  %v554_v35 = vld [vmem:[#allocation2 + $0x70] sm:$0xf0]  ;;  %v581_v37 = vld [vmem:[#allocation2 + $0x34] sm:$0xf0]  ;;  %v577_v40 = vld [vmem:[#allocation2 + $0x1c] sm:$0xf] }
  0x15   :  { %213 = vmatpush.bf16.msra.mxu3 %v517_v25  ;;  %v557_v38 = vor.u32 %v584_v33, %v554_v35  ;;  %v529_v39 = vor.u32 %v581_v37, %v528_v36  ;;  %v530_v41 = vld [vmem:[#allocation2 + $0x38] sm:$0xf0]  ;;  %v520_v42 = vld [vmem:[#allocation2 + $0x10] sm:$0xf]  ;;  %v576_v45 = vld [vmem:[#allocation2 + $0x14] sm:$0xf] }
  0x16   :  { %566 = vmatmul.msk.bf16.vlgmr.msra.gmra.mxu0 %vm163_vm0, %v48_v23  ;;  %v533_v43 = vor.u32 %v577_v40, %v530_v41  ;;  %v580_v44 = vld [vmem:[#allocation2 + $0x2c] sm:$0xf0]  ;;  %v522_v46 = vld [vmem:[#allocation2 + $0x30] sm:$0xf0]  ;;  %v698_v49 = vld [vmem:[#allocation4] sm:$0xff]  ;;  %v702_v53 = vshrl.u32 %v310_v50, 7 }
  0x17   :  { %567 = vmatmul.msk.bf16.vlgmr.msra.gmra.mxu1 %vm163_vm0, %v48_v23  ;;  %568 = vmatmul.msk.bf16.vlgmr.msra.gmra.mxu2 %vm163_vm0, %v48_v23  ;;  %v521_v47 = vor.u32 %v580_v44, %v520_v42  ;;  %v525_v48 = vor.u32 %v576_v45, %v522_v46  ;;  %v67_v51 = vperm.slane %v698_v49, 0  ;;  %v68_v52 = vperm.slane %v698_v49, 1 }
  0x18   :  { %251 = vmatpush.bf16.msrb.mxu2 %v561_v29  ;;  %569 = vmatmul.msk.bf16.vlgmr.msra.gmra.mxu3 %vm163_vm0, %v48_v23  ;;  %vm314_vm2 = vcmp.lt.s32.totalorder %v702_v53, 2  ;;  %v69_v60 = vperm.slane %v698_v49, 2  ;;  %v70_v62 = vperm.slane %v698_v49, 3  ;;  %v71_v22 = vperm.slane %v698_v49, 4 }
  0x19   :  { %264 = vmatpush.bf16.msrb.mxu3 %v565_v30  ;;  %225 = vmatpush.bf16.msrb.mxu0 %v553_v34  ;;  %v72_v33 = vperm.slane %v698_v49, 5  ;;  %v73_v41 = vperm.slane %v698_v49, 6  ;;  %vm391_vm11 = vcmask 1042434   ;;  %vm395_vm12 = vcmask 1044484  }
  0x1a   :  { %238 = vmatpush.bf16.msrb.mxu1 %v557_v38  ;;  %vm393_vm13 = vcmask 1041408   ;;  %vm397_vm14 = vcmask 1046534   ;;  %vm399_vm15 = vcmask 1045508  }
  0x1c   :  { %252 = vmatpush.bf16.msrb.mxu2 %v529_v39 }
  0x1d   :  { %265 = vmatpush.bf16.msrb.mxu3 %v533_v43  ;;  %226 = vmatpush.bf16.msrb.mxu0 %v521_v47 }
  0x1e   :  { %239 = vmatpush.bf16.msrb.mxu1 %v525_v48 }
  0x26   :  { %570 = vmatmul.msk.bf16.vlgmr.msrb.gmra.mxu0 %vm163_vm0, %v48_v23 }
  0x27   :  { %571 = vmatmul.msk.bf16.vlgmr.msrb.gmra.mxu1 %vm163_vm0, %v48_v23  ;;  %572 = vmatmul.msk.bf16.vlgmr.msrb.gmra.mxu2 %vm163_vm0, %v48_v23 }
  0x28   :  { %573 = vmatmul.msk.bf16.vlgmr.msrb.gmra.mxu3 %vm163_vm0, %v48_v23  ;;  %vm401_vm0 = vcmask 1043456  }
  0x93   :  { %v176_v54 = vpop.f32.mrf.mxu0 }
  0x94   :  { %v177_v55 = vadd.f32 %v176_v54, %v67_v51  ;;  %v189_v56 = vpop.f32.mrf.mxu1 }
  0x95   :  { %v190_v57 = vadd.f32 %v189_v56, %v68_v52 }
  0x96   :  { %vm271_vm1 = vcmp.ge.f32.partialorder %v177_v55, 0.0  ;;  %v279_v58 = vmul.f32 0.01, %v177_v55 }
  0x97   :  { %vm272_vm3 = vcmp.ge.f32.partialorder %v190_v57, 0.0  ;;  %v280_v59 = vmul.f32 0.01, %v190_v57 }
  0x98   :  { %v287_v61 = vsel %vm271_vm1, %v177_v55, %v279_v58 }
  0x99   :  { %295 = vst [vmem:[%s792_s3] sm:$0xff] %v287_v61  ;;  %v317_v63 = vsel %vm314_vm2, %v287_v61, 0.0  ;;  %v288_v0 = vsel %vm272_vm3, %v190_v57, %v280_v59  ;;  %v74_v61 = vperm.slane %v698_v49, 7 }
  0x9a   :  { %296 = vst [vmem:[%s792_s3 + $0x8] sm:$0xff] %v288_v0  ;;  %v318_v1 = vsel %vm314_vm2, %v288_v0, 0.0  ;;  %v202_v2 = vpop.f32.mrf.mxu2  ;;  %v326_v3 = vrot.slane %v317_v63, 4  ;;  %v407_v4 = vmul.f32 %v317_v63, %v317_v63 }
  0x9b   :  { %v203_v5 = vadd.f32 %v202_v2, %v69_v60  ;;  %v215_v6 = vpop.f32.mrf.mxu3  ;;  %v178_v7 = vpop.f32.mrf.mxu0  ;;  %v332_v10 = vrot.slane %v318_v1, 4  ;;  %v408_v12 = vmul.f32 %v318_v1, %v318_v1 }
  0x9c   :  { %v216_v8 = vadd.f32 %v215_v6, %v70_v62  ;;  %v191_v9 = vpop.f32.mrf.mxu1  ;;  %v327_v14 = vadd.f32 %v326_v3, %v317_v63  ;;  %v415_v15 = vrot.slane %v407_v4, 4 }
  0x9d   :  { %vm273_vm4 = vcmp.ge.f32.partialorder %v203_v5, 0.0  ;;  %v281_v11 = vmul.f32 0.01, %v203_v5  ;;  %v333_v18 = vadd.f32 %v332_v10, %v318_v1  ;;  %v421_v20 = vrot.slane %v408_v12, 4 }
  0x9e   :  { %vm274_vm5 = vcmp.ge.f32.partialorder %v216_v8, 0.0  ;;  %v282_v13 = vmul.f32 0.01, %v216_v8  ;;  %v328_v23 = vrot.slane %v327_v14, 2  ;;  %v416_v24 = vadd.f32 %v415_v15, %v407_v4 }
  0x9f   :  { %v289_v16 = vsel %vm273_vm4, %v203_v5, %v281_v11  ;;  %v334_v29 = vrot.slane %v333_v18, 2  ;;  %v422_v31 = vadd.f32 %v421_v20, %v408_v12 }
  0xa0   :  { %297 = vst [vmem:[%s792_s3 + $0x10] sm:$0xff] %v289_v16  ;;  %v290_v17 = vsel %vm274_vm5, %v216_v8, %v282_v13  ;;  %v319_v19 = vsel %vm314_vm2, %v289_v16, 0.0  ;;  %v329_v34 = vadd.f32 %v328_v23, %v327_v14  ;;  %v417_v35 = vrot.slane %v416_v24, 2 }
  0xa1   :  { %298 = vst [vmem:[%s792_s3 + $0x18] sm:$0xff] %v290_v17  ;;  %v338_v27 = vrot.slane %v319_v19, 4  ;;  %v320_v30 = vsel %vm314_vm2, %v290_v17, 0.0  ;;  %v409_v36 = vmul.f32 %v319_v19, %v319_v19  ;;  %v335_v40 = vadd.f32 %v334_v29, %v333_v18 }
  0xa2   :  { %v204_v21 = vpop.f32.mrf.mxu2  ;;  %v344_v38 = vrot.slane %v320_v30, 4  ;;  %v423_v42 = vrot.slane %v422_v31, 2  ;;  %v410_v43 = vmul.f32 %v320_v30, %v320_v30  ;;  %v330_v47 = vrot.slane %v329_v34, 1 }
  0xa3   :  { %v217_v25 = vpop.f32.mrf.mxu3  ;;  %v228_v26 = vpop.f32.mrf.mxu0  ;;  %v339_v37 = vadd.f32 %v338_v27, %v319_v19  ;;  %v730_v48 = vadd.f32 %v417_v35, %v416_v24  ;;  %v427_v50 = vrot.slane %v409_v36, 4  ;;  %v336_v62 = vrot.slane %v335_v40, 1 }
  0xa4   :  { %v241_v28 = vpop.f32.mrf.mxu1  ;;  %v229_v32 = vadd.f32 %v228_v26, %v71_v22  ;;  %v345_v56 = vadd.f32 %v344_v38, %v320_v30  ;;  %v738_v63 = vadd.f32 %v423_v42, %v422_v31  ;;  %v433_v0 = vrot.slane %v410_v43, 4 }
  0xa5   :  { %v242_v45 = vadd.f32 %v241_v28, %v72_v33  ;;  %v340_v55 = vrot.slane %v339_v37, 2  ;;  %v740_v2 = vadd.f32 %v330_v47, %v329_v34  ;;  %v419_v6 = vrot.slane %v730_v48, 1 }
  0xa6   :  { %vm275_vm6 = vcmp.ge.f32.partialorder %v229_v32, 0.0  ;;  %v283_v39 = vmul.f32 0.01, %v229_v32  ;;  %v428_v8 = vadd.f32 %v427_v50, %v409_v36  ;;  %v346_v9 = vrot.slane %v345_v56, 2 }
  0xa7   :  { %vm276_vm7 = vcmp.ge.f32.partialorder %v242_v45, 0.0  ;;  %v284_v60 = vmul.f32 0.01, %v242_v45  ;;  %v341_v7 = vadd.f32 %v340_v55, %v339_v37  ;;  %v748_v12 = vadd.f32 %v336_v62, %v335_v40 }
  0xa8   :  { %v291_v44 = vsel %vm275_vm6, %v229_v32, %v283_v39  ;;  %v425_v13 = vrot.slane %v738_v63, 1  ;;  %v434_v14 = vadd.f32 %v433_v0, %v410_v43  ;;  %v429_v23 = vrot.slane %v428_v8, 2 }
  0xa9   :  { %299 = vst [vmem:[%s792_s3 + $0x20] sm:$0xff] %v291_v44  ;;  %v321_v51 = vsel %vm314_vm2, %v291_v44, 0.0  ;;  %v292_v4 = vsel %vm276_vm7, %v242_v45, %v284_v60  ;;  %v342_v22 = vrot.slane %v341_v7, 1  ;;  %v347_v24 = vadd.f32 %v346_v9, %v345_v56 }
  0xaa   :  { %v254_v46 = vpop.f32.mrf.mxu2  ;;  %v350_v57 = vrot.slane %v321_v51, 4  ;;  %v411_v58 = vmul.f32 %v321_v51, %v321_v51  ;;  %300 = vst [vmem:[%s792_s3 + $0x28] sm:$0xff] %v292_v4  ;;  %v322_v49 = vsel %vm314_vm2, %v292_v4, 0.0  ;;  %v435_v29 = vrot.slane %v434_v14, 2 }
  0xab   :  { %v267_v52 = vpop.f32.mrf.mxu3  ;;  %v230_v54 = vpop.f32.mrf.mxu0  ;;  %v255_v5 = vadd.f32 %v254_v46, %v73_v41  ;;  %v356_v18 = vrot.slane %v322_v49, 4  ;;  %v412_v19 = vmul.f32 %v322_v49, %v322_v49  ;;  %v430_v37 = vadd.f32 %v429_v23, %v428_v8 }
  0xac   :  { %v243_v59 = vpop.f32.mrf.mxu1  ;;  %v351_v1 = vadd.f32 %v350_v57, %v321_v51  ;;  %v439_v3 = vrot.slane %v411_v58, 4  ;;  %v268_v11 = vadd.f32 %v267_v52, %v74_v61  ;;  %v348_v38 = vrot.slane %v347_v24, 1 }
  0xad   :  { %vm277_vm8 = vcmp.ge.f32.partialorder %v255_v5, 0.0  ;;  %v285_v10 = vmul.f32 0.01, %v255_v5  ;;  %v357_v26 = vadd.f32 %v356_v18, %v322_v49  ;;  %v445_v27 = vrot.slane %v412_v19, 4 }
  0xae   :  { %v352_v15 = vrot.slane %v351_v1, 2  ;;  %v440_v17 = vadd.f32 %v439_v3, %v411_v58  ;;  %vm278_vm9 = vcmp.ge.f32.partialorder %v268_v11, 0.0  ;;  %v286_v32 = vmul.f32 0.01, %v268_v11 }
  0xaf   :  { %v293_v20 = vsel %vm277_vm8, %v255_v5, %v285_v10  ;;  %v358_v34 = vrot.slane %v357_v26, 2  ;;  %v446_v35 = vadd.f32 %v445_v27, %v412_v19  ;;  %v436_v45 = vadd.f32 %v435_v29, %v434_v14 }
  0xb0   :  { %301 = vst [vmem:[%s792_s3 + $0x30] sm:$0xff] %v293_v20  ;;  %v323_v25 = vsel %vm314_vm2, %v293_v20, 0.0  ;;  %v353_v30 = vadd.f32 %v352_v15, %v351_v1  ;;  %v441_v33 = vrot.slane %v440_v17, 2  ;;  %v294_v40 = vsel %vm278_vm9, %v268_v11, %v286_v32 }
  0xb1   :  { %v362_v28 = vrot.slane %v323_v25, 4  ;;  %v413_v31 = vmul.f32 %v323_v25, %v323_v25  ;;  %v359_v41 = vadd.f32 %v358_v34, %v357_v26  ;;  %v447_v42 = vrot.slane %v446_v35, 2  ;;  %302 = vst [vmem:[%s792_s3 + $0x38] sm:$0xff] %v294_v40 }
  0xb2   :  { %v256_v16 = vpop.f32.mrf.mxu2  ;;  %v324_v44 = vsel %vm314_vm2, %v294_v40, 0.0  ;;  %v354_v46 = vrot.slane %v353_v30, 1  ;;  %v442_v51 = vadd.f32 %v441_v33, %v440_v17  ;;  %v382_v56 = vrot.slane %v748_v12, 7 }
  0xb3   :  { %v269_v21 = vpop.f32.mrf.mxu3  ;;  %v363_v36 = vadd.f32 %v362_v28, %v323_v25  ;;  %v451_v39 = vrot.slane %v413_v31, 4  ;;  %v368_v50 = vrot.slane %v324_v44, 4  ;;  %v360_v52 = vrot.slane %v359_v41, 1 }
  0xb4   :  { %v448_v54 = vadd.f32 %v447_v42, %v446_v35  ;;  %v414_v59 = vmul.f32 %v324_v44, %v324_v44  ;;  %v343_v60 = vadd.f32 %v342_v22, %v341_v7  ;;  %v431_v61 = vrot.slane %v430_v37, 1 }
  0xb5   :  { %v364_v43 = vrot.slane %v363_v36, 2  ;;  %v452_v47 = vadd.f32 %v451_v39, %v413_v31  ;;  %v369_v58 = vadd.f32 %v368_v50, %v324_v44  ;;  %v349_v62 = vadd.f32 %v348_v38, %v347_v24 }
  0xb6   :  { %v437_v0 = vrot.slane %v436_v45, 1  ;;  %v457_v4 = vrot.slane %v414_v59, 4  ;;  %v355_v5 = vadd.f32 %v354_v46, %v353_v30  ;;  %v443_v8 = vrot.slane %v442_v51, 1 }
  0xb7   :  { %v365_v55 = vadd.f32 %v364_v43, %v363_v36  ;;  %v453_v57 = vrot.slane %v452_v47, 2  ;;  %v370_v3 = vrot.slane %v369_v58, 2  ;;  %v361_v9 = vadd.f32 %v360_v52, %v359_v41 }
  0xb8   :  { %v449_v49 = vrot.slane %v448_v54, 1  ;;  %v458_v14 = vadd.f32 %v457_v4, %v414_v59  ;;  %v426_v7 = vadd.f32 %v425_v13, %v738_v63  ;;  %v383_v15 = vrot.slane %v343_v60, 6 }
  0xb9   :  { %v366_v53 = vrot.slane %v365_v55, 1  ;;  %v454_v1 = vadd.f32 %v453_v57, %v452_v47  ;;  %v371_v12 = vadd.f32 %v370_v3, %v369_v58  ;;  %v432_v16 = vadd.f32 %v431_v61, %v430_v37 }
  0xba   :  { %v384_v17 = vrot.slane %v349_v62, 5  ;;  %v390_v18 = vsel %vm389_vm10, %v740_v2, %v382_v56  ;;  %v438_v19 = vadd.f32 %v437_v0, %v436_v45  ;;  %v459_v21 = vrot.slane %v458_v14, 2 }
  0xbb   :  { %v367_v10 = vadd.f32 %v366_v53, %v365_v55  ;;  %v455_v11 = vrot.slane %v454_v1, 1  ;;  %v372_v20 = vrot.slane %v371_v12, 1  ;;  %v385_v22 = vrot.slane %v355_v5, 4 }
  0xbc   :  { %v444_v23 = vadd.f32 %v443_v8, %v442_v51  ;;  %v386_v24 = vrot.slane %v361_v9, 3  ;;  %v450_v25 = vadd.f32 %v449_v49, %v448_v54  ;;  %v460_v29 = vadd.f32 %v459_v21, %v458_v14 }
  0xbd   :  { %v387_v26 = vrot.slane %v367_v10, 2  ;;  %v456_v27 = vadd.f32 %v455_v11, %v454_v1  ;;  %v373_v28 = vadd.f32 %v372_v20, %v371_v12  ;;  %v471_v30 = vrot.slane %v426_v7, 7 }
  0xbe   :  { %v472_v31 = vrot.slane %v432_v16, 6  ;;  %v392_v63 = vsel %vm391_vm11, %v383_v15, %v384_v17  ;;  %v473_v13 = vrot.slane %v438_v19, 5  ;;  %v461_v2 = vrot.slane %v460_v29, 1 }
  0xbf   :  { %v388_v32 = vrot.slane %v373_v28, 1  ;;  %v474_v33 = vrot.slane %v444_v23, 4  ;;  %v396_v34 = vsel %vm395_vm12, %v385_v22, %v386_v24  ;;  %v475_v35 = vrot.slane %v450_v25, 3 }
  0xc0   :  { %v476_v36 = vrot.slane %v456_v27, 2  ;;  %v462_v38 = vadd.f32 %v461_v2, %v460_v29  ;;  %v394_v39 = vsel %vm393_vm13, %v390_v18, %v392_v63  ;;  %v420_v41 = vadd.f32 %v419_v6, %v730_v48 }
  0xc1   :  { %v398_v37 = vsel %vm397_vm14, %v387_v26, %v388_v32  ;;  %v479_v42 = vsel %vm391_vm11, %v472_v31, %v473_v13  ;;  %v481_v46 = vsel %vm395_vm12, %v474_v33, %v475_v35 }
  0xc2   :  { %v400_v40 = vsel %vm399_vm15, %v396_v34, %v398_v37  ;;  %v477_v44 = vrot.slane %v462_v38, 1  ;;  %v478_v45 = vsel %vm389_vm10, %v420_v41, %v471_v30 }
  0xc3   :  { %v402_v43 = vsel %vm401_vm0, %v394_v39, %v400_v40  ;;  %v480_v50 = vsel %vm393_vm13, %v478_v45, %v479_v42 }
  0xc4   :  { %v482_v47 = vsel %vm397_vm14, %v476_v36, %v477_v44  ;;  %405 = vst [vmem:[%s793_s4] sm:$0xff] %v402_v43 }
  0xc5   :  { %v483_v51 = vsel %vm399_vm15, %v481_v46, %v482_v47 }
  0xc6   :  { %v484_v48 = vsel %vm401_vm0, %v480_v50, %v483_v51 }
  0xc7   :  { %487 = vst [vmem:[%s794_s5] sm:$0xff] %v484_v48 }
  0xc8   :  { %500 = vsyncpa [#allocation3], 1 }
  0xc9   :  { %501 = vsyncpa [#allocation5], 1 }

// kernel: decoder_forward.11
= control target key start
LH: loop header
LB: loop body
LE: loop exit
PB: predicated region body
PF: predicated region fallthrough
CT: control target
= control target key end

     0   :  { %s491_s12 = smov 0   ;;  %s493_s13 = smov 0   ;;  %s545_s0 = inlined_call_operand.vmem [shape: f32[8,6272], index: 0, kind: input, shape index: {}]   ;;  %s546_s1 = inlined_call_operand.vmem [shape: f32[1,6272], index: 1, kind: input, shape index: {}]   ;;  %s547_s2 = inlined_call_operand.vmem [shape: f32[1,6272], index: 2, kind: input, shape index: {}]   ;;  %s548_s3 = inlined_call_operand.vmem [shape: bf16[8,6272], index: 3, kind: output, shape index: {}]  }
   0x1   :  { %s495_s14 = smov 0  }
   0x2 LB: > { %s22_s15 = sadd.s32 1, %s465_s13  ;;  %p418_p0 = scmp.ge.s32.totalorder %s469_s14, 1  ;;  %s469_s14 = sphi %s495_s14, %s13_s14   ;;  %s465_s13 = sphi %s493_s13, %s550_s13   ;;  %s461_s12 = sphi %s491_s12, %s549_s12  }
   0x3   : > { %p23_p1 = scmp.ge.s32.totalorder %s22_s15, 7  ;;  %p178_p2 = scmp.lt.s32.totalorder %s469_s14, 8 }
   0x5   : > { %s552_s15 = smov (%p23_p1, %s22_s15), 0  ;;  %p179_p3 = pnand %p418_p0, %p178_p2 }
   0x6   : > { %s218_s16 = smul.u32 (!%p179_p3), 7, %s461_s12 }
   0x7   : > { %182 = sbr.rel (%p179_p3) target bundleno = 30 (0x1e), region = 32 }
   0x8   : > { %p221_p4 = scmp.lt.s32.totalorder (!%p179_p3), %s218_s16, 48 }
   0xc   : > { %s554_s16 = smov (!%p221_p4, %s218_s16), 48 }
   0xd   : > { %s419_s17 = sshll.u32 %s554_s16, 3  ;;  %s231_s20 = scalar_lea.vmem %s546_s1, %s554_s16 }
   0xe   : > { %s519_s23 = scalar_lea.vmem %s545_s0, %s419_s17  ;;  %s236_s26 = scalar_lea.vmem %s547_s2, %s554_s16  ;;  %v255_v0 = vld [vmem:[%s231_s20] sm:$0xff] }
   0xf   : > { %v248_v1 = vld [vmem:[%s519_s23] sm:$0xff]  ;;  %v249_v2 = vld [vmem:[%s519_s23 + $0x8] sm:$0xff]  ;;  %v257_v3 = vperm.slane %v255_v0, 0  ;;  %v258_v4 = vperm.slane %v255_v0, 1  ;;  %v250_v8 = vld [vmem:[%s519_s23 + $0x10] sm:$0xff]  ;;  %v259_v10 = vperm.slane %v255_v0, 2 }
  0x10   : > { %v278_v5 = vld [vmem:[%s236_s26] sm:$0xff]  ;;  %v251_v9 = vld [vmem:[%s519_s23 + $0x18] sm:$0xff]  ;;  %v260_v11 = vperm.slane %v255_v0, 3  ;;  %s420_s27 = sshll.u32 %s554_s16, 2  ;;  %v253_v17 = vld [vmem:[%s519_s23 + $0x28] sm:$0xff]  ;;  %v261_v20 = vperm.slane %v255_v0, 4 }
  0x11   : > { %v280_v6 = vperm.slane %v278_v5, 0  ;;  %v281_v7 = vperm.slane %v278_v5, 1  ;;  %v271_v12 = vmul.f32 %v257_v3, %v248_v1  ;;  %v272_v13 = vmul.f32 %v258_v4, %v249_v2  ;;  %v252_v16 = vld [vmem:[%s519_s23 + $0x20] sm:$0xff]  ;;  %s246_s30 = scalar_lea.vmem %s548_s3, %s420_s27  ;;  %v254_v30 = vld [vmem:[%s519_s23 + $0x30] sm:$0xff] }
  0x12   : > { %v282_v14 = vperm.slane %v278_v5, 2  ;;  %v283_v15 = vperm.slane %v278_v5, 3  ;;  %v273_v18 = vmul.f32 %v259_v10, %v250_v8  ;;  %v274_v19 = vmul.f32 %v260_v11, %v251_v9 }
  0x13   : > { %v262_v21 = vperm.slane %v255_v0, 5  ;;  %v294_v22 = vadd.f32 %v280_v6, %v271_v12  ;;  %v295_v23 = vadd.f32 %v281_v7, %v272_v13  ;;  %v284_v24 = vperm.slane %v278_v5, 4 }
  0x14   : > { %v285_v25 = vperm.slane %v278_v5, 5  ;;  %v296_v26 = vadd.f32 %v282_v14, %v273_v18  ;;  %v297_v27 = vadd.f32 %v283_v15, %v274_v19  ;;  %v275_v28 = vmul.f32 %v261_v20, %v252_v16 }
  0x15   : > { %v276_v29 = vmul.f32 %v262_v21, %v253_v17  ;;  %v301_v31 = vpack.c.bf16 %v295_v23, %v294_v22  ;;  %v263_v32 = vperm.slane %v255_v0, 6  ;;  %v286_v33 = vperm.slane %v278_v5, 6 }
  0x16   : > { %v302_v34 = vpack.c.bf16 %v297_v27, %v296_v26  ;;  %v298_v35 = vadd.f32 %v284_v24, %v275_v28 }
  0x17   : > { %v299_v36 = vadd.f32 %v285_v25, %v276_v29  ;;  %305 = vst [vmem:[%s246_s30] sm:$0xff] %v301_v31  ;;  %v277_v37 = vmul.f32 %v263_v32, %v254_v30 }
  0x18   : > { %306 = vst [vmem:[%s246_s30 + $0x8] sm:$0xff] %v302_v34 }
  0x19   : > { %v303_v38 = vpack.c.bf16 %v299_v36, %v298_v35  ;;  %v300_v39 = vadd.f32 %v286_v33, %v277_v37 }
  0x1b   : > { %307 = vst [vmem:[%s246_s30 + $0x10] sm:$0xff] %v303_v38  ;;  %v304_v40 = vpack.c.bf16 %v300_v39, %v300_v39 }
  0x1d   : > { %308 = vst [vmem:[%s246_s30 + $0x18] sm:$0xf] %v304_v40 }
  0x1e PF: > { %s13_s14 = sadd.s32 1, %s469_s14   ;;  %s549_s12 = smov %s465_s13 }
  0x1f   : > { %p10_p5 = scmp.ge.s32.totalorder %s13_s14, 9   ;;  %s550_s13 = smov %s552_s15 }
  0x21   :  { %12 = sbr.rel (!%p10_p5) target bundleno = 2 (0x2), region = 68 }

// kernel: decoder_forward.12
= control target key start
LH: loop header
LB: loop body
LE: loop exit
PB: predicated region body
PF: predicated region fallthrough
CT: control target
= control target key end

     0   :  { %8 = vsyncpa [#allocation3], 0  ;;  %s2174_s0 = inlined_call_operand.vmem [shape: bf16[128,512], index: 0, kind: input, shape index: {}]   ;;  %s2175_s1 = inlined_call_operand.hbm [shape: bf16[512,256], index: 1, kind: input, shape index: {}]   ;;  %s2176_s2 = inlined_call_operand.hbm [shape: f32[1,256], index: 2, kind: input, shape index: {}]   ;;  %s2177_s3 = inlined_call_operand.vmem [shape: f32[128,256], index: 3, kind: output, shape index: {}]  }
   0x1   :  { %s16_s14 = sshll.u32 %s2175_s1, 4  ;;  %s17_s14 = int_to_ptr.hbm [resolvable:$true] %s16_s14 }
   0x2   :  { %9 = vsyncpa [#allocation5], 0  ;;  %s1688_s15 = smov [#allocation2]   ;;  %s30_s19 = sshll.u32 %s2176_s2, 4  ;;  %s31_s19 = int_to_ptr.hbm [resolvable:$true] %s30_s19 }
   0x3   :  { %s18_s16 = sshll.u32 %s1688_s15, 4  ;;  %s1689_s20 = smov 128   ;;  %s19_s16 = int_to_ptr.vmem [resolvable:$true] %s18_s16 }
   0x4   :  { %s1690_s21 = smov 8   ;;  %s1691_s22 = smov [#allocation4]  }
   0x5   :  { %24 = dma.hbm_to_vmem [thread:$0]  %s17_s14, 8192, %s19_s16, [#allocation3], %s1689_s20, %s1689_s20, %s1690_s21  }
   0x6   :  { %s32_s23 = sshll.u32 %s1691_s22, 4  ;;  %s33_s23 = int_to_ptr.vmem [resolvable:$true] %s32_s23 }
   0x7   :  { %35 = dma.hbm_to_vmem [thread:$0]  %s31_s19, 32, %s33_s23, [#allocation5]  }
   0x8   :  { %1684 = dma.done.wait [#allocation3], 8192  }
   0x9   :  { %1685 = vsyncadd [#allocation3], 4294959104 }
   0xa   :  { %1686 = dma.done.wait [#allocation5], 32  }
   0xb   :  { %1687 = vsyncadd [#allocation5], 4294967264  ;;  %v1338_v0 = vld [vmem:[#allocation2 + $0x70] sm:$0xf]  ;;  %v1583_v1 = vld [vmem:[#allocation2 + $0x74] sm:$0xf0] }
   0xc   :  { %v1402_v2 = vld [vmem:[#allocation2 + $0xf0] sm:$0xf]  ;;  %v1339_v3 = vor.u32 %v1583_v1, %v1338_v0  ;;  %v1599_v4 = vld [vmem:[#allocation2 + $0xf4] sm:$0xf0]  ;;  %v1330_v11 = vld [vmem:[#allocation2 + $0x60] sm:$0xf] }
   0xd   :  { %v1466_v5 = vld [vmem:[#allocation2 + $0x170] sm:$0xf]  ;;  %v1615_v6 = vld [vmem:[#allocation2 + $0x174] sm:$0xf0]  ;;  %v1403_v7 = vor.u32 %v1599_v4, %v1402_v2  ;;  %v1581_v13 = vld [vmem:[#allocation2 + $0x64] sm:$0xf0] }
   0xe   :  { %v1467_v8 = vor.u32 %v1615_v6, %v1466_v5  ;;  %v1530_v9 = vld [vmem:[#allocation2 + $0x1f0] sm:$0xf]  ;;  %v1631_v10 = vld [vmem:[#allocation2 + $0x1f4] sm:$0xf0]  ;;  %626 = vmatpush.bf16.msra.mxu0 %v1339_v3  ;;  %v1394_v14 = vld [vmem:[#allocation2 + $0xe0] sm:$0xf]  ;;  %v1331_v16 = vor.u32 %v1581_v13, %v1330_v11 }
   0xf   :  { %v1531_v12 = vor.u32 %v1631_v10, %v1530_v9  ;;  %v1597_v15 = vld [vmem:[#allocation2 + $0xe4] sm:$0xf0]  ;;  %675 = vmatpush.bf16.msra.mxu1 %v1403_v7  ;;  %v1458_v18 = vld [vmem:[#allocation2 + $0x160] sm:$0xf]  ;;  %v1322_v23 = vld [vmem:[#allocation2 + $0x50] sm:$0xf] }
  0x10   :  { %724 = vmatpush.bf16.msra.mxu2 %v1467_v8  ;;  %v1395_v17 = vor.u32 %v1597_v15, %v1394_v14  ;;  %v1613_v19 = vld [vmem:[#allocation2 + $0x164] sm:$0xf0]  ;;  %v1522_v20 = vld [vmem:[#allocation2 + $0x1e0] sm:$0xf]  ;;  %v1579_v24 = vld [vmem:[#allocation2 + $0x54] sm:$0xf0] }
  0x11   :  { %773 = vmatpush.bf16.msra.mxu3 %v1531_v12  ;;  %v1459_v21 = vor.u32 %v1613_v19, %v1458_v18  ;;  %v1629_v22 = vld [vmem:[#allocation2 + $0x1e4] sm:$0xf0]  ;;  %v1386_v26 = vld [vmem:[#allocation2 + $0xd0] sm:$0xf]  ;;  %v1595_v27 = vld [vmem:[#allocation2 + $0xd4] sm:$0xf0]  ;;  %v1323_v29 = vor.u32 %v1579_v24, %v1322_v23 }
  0x12   :  { %v1523_v25 = vor.u32 %v1629_v22, %v1522_v20  ;;  %v1450_v28 = vld [vmem:[#allocation2 + $0x150] sm:$0xf]  ;;  %627 = vmatpush.bf16.msra.mxu0 %v1331_v16  ;;  %v1611_v30 = vld [vmem:[#allocation2 + $0x154] sm:$0xf0]  ;;  %v1387_v33 = vor.u32 %v1595_v27, %v1386_v26  ;;  %v1314_v35 = vld [vmem:[#allocation2 + $0x40] sm:$0xf] }
  0x13   :  { %v1514_v31 = vld [vmem:[#allocation2 + $0x1d0] sm:$0xf]  ;;  %v1627_v32 = vld [vmem:[#allocation2 + $0x1d4] sm:$0xf0]  ;;  %676 = vmatpush.bf16.msra.mxu1 %v1395_v17  ;;  %v1451_v34 = vor.u32 %v1611_v30, %v1450_v28  ;;  %v1577_v36 = vld [vmem:[#allocation2 + $0x44] sm:$0xf0] }
  0x14   :  { %725 = vmatpush.bf16.msra.mxu2 %v1459_v21  ;;  %v1378_v37 = vld [vmem:[#allocation2 + $0xc0] sm:$0xf]  ;;  %v1515_v38 = vor.u32 %v1627_v32, %v1514_v31  ;;  %v1593_v39 = vld [vmem:[#allocation2 + $0xc4] sm:$0xf0]  ;;  %v1315_v44 = vor.u32 %v1577_v36, %v1314_v35  ;;  %v1306_v47 = vld [vmem:[#allocation2 + $0x30] sm:$0xf] }
  0x15   :  { %774 = vmatpush.bf16.msra.mxu3 %v1523_v25  ;;  %v1442_v40 = vld [vmem:[#allocation2 + $0x140] sm:$0xf]  ;;  %v1609_v41 = vld [vmem:[#allocation2 + $0x144] sm:$0xf0]  ;;  %v1379_v45 = vor.u32 %v1593_v39, %v1378_v37  ;;  %v1575_v48 = vld [vmem:[#allocation2 + $0x34] sm:$0xf0] }
  0x16   :  { %v1506_v42 = vld [vmem:[#allocation2 + $0x1c0] sm:$0xf]  ;;  %v1625_v43 = vld [vmem:[#allocation2 + $0x1c4] sm:$0xf0]  ;;  %628 = vmatpush.bf16.msra.mxu0 %v1323_v29  ;;  %v1443_v46 = vor.u32 %v1609_v41, %v1442_v40  ;;  %v1370_v49 = vld [vmem:[#allocation2 + $0xb0] sm:$0xf]  ;;  %v1307_v56 = vor.u32 %v1575_v48, %v1306_v47 }
  0x17   :  { %677 = vmatpush.bf16.msra.mxu1 %v1387_v33  ;;  %v1507_v50 = vor.u32 %v1625_v43, %v1506_v42  ;;  %v1591_v51 = vld [vmem:[#allocation2 + $0xb4] sm:$0xf0]  ;;  %v1434_v52 = vld [vmem:[#allocation2 + $0x130] sm:$0xf]  ;;  %v1298_v59 = vld [vmem:[#allocation2 + $0x20] sm:$0xf] }
  0x18   :  { %726 = vmatpush.bf16.msra.mxu2 %v1451_v34  ;;  %v1607_v53 = vld [vmem:[#allocation2 + $0x134] sm:$0xf0]  ;;  %v1498_v54 = vld [vmem:[#allocation2 + $0x1b0] sm:$0xf]  ;;  %v1371_v57 = vor.u32 %v1591_v51, %v1370_v49  ;;  %v1573_v60 = vld [vmem:[#allocation2 + $0x24] sm:$0xf0] }
  0x19   :  { %775 = vmatpush.bf16.msra.mxu3 %v1515_v38  ;;  %v1623_v55 = vld [vmem:[#allocation2 + $0x1b4] sm:$0xf0]  ;;  %v1435_v58 = vor.u32 %v1607_v53, %v1434_v52  ;;  %v1362_v61 = vld [vmem:[#allocation2 + $0xa0] sm:$0xf]  ;;  %v1589_v63 = vld [vmem:[#allocation2 + $0xa4] sm:$0xf0]  ;;  %v1299_v4 = vor.u32 %v1573_v60, %v1298_v59 }
  0x1a   :  { %629 = vmatpush.bf16.msra.mxu0 %v1315_v44  ;;  %v1499_v62 = vor.u32 %v1623_v55, %v1498_v54  ;;  %v1426_v0 = vld [vmem:[#allocation2 + $0x120] sm:$0xf]  ;;  %v1605_v1 = vld [vmem:[#allocation2 + $0x124] sm:$0xf0]  ;;  %v1363_v5 = vor.u32 %v1589_v63, %v1362_v61  ;;  %v1290_v7 = vld [vmem:[#allocation2 + $0x10] sm:$0xf] }
  0x1b   :  { %678 = vmatpush.bf16.msra.mxu1 %v1379_v45  ;;  %v1490_v2 = vld [vmem:[#allocation2 + $0x1a0] sm:$0xf]  ;;  %v1621_v3 = vld [vmem:[#allocation2 + $0x1a4] sm:$0xf0]  ;;  %v1427_v6 = vor.u32 %v1605_v1, %v1426_v0  ;;  %v1571_v8 = vld [vmem:[#allocation2 + $0x14] sm:$0xf0] }
  0x1c   :  { %727 = vmatpush.bf16.msra.mxu2 %v1443_v46  ;;  %v1354_v9 = vld [vmem:[#allocation2 + $0x90] sm:$0xf]  ;;  %v1491_v10 = vor.u32 %v1621_v3, %v1490_v2  ;;  %v1587_v11 = vld [vmem:[#allocation2 + $0x94] sm:$0xf0]  ;;  %v1282_v16 = vld [vmem:[#allocation2] sm:$0xf]  ;;  %v1291_v17 = vor.u32 %v1571_v8, %v1290_v7 }
  0x1d   :  { %776 = vmatpush.bf16.msra.mxu3 %v1507_v50  ;;  %v1418_v12 = vld [vmem:[#allocation2 + $0x110] sm:$0xf]  ;;  %v1603_v13 = vld [vmem:[#allocation2 + $0x114] sm:$0xf0]  ;;  %v1569_v18 = vld [vmem:[#allocation2 + $0x4] sm:$0xf0]  ;;  %v1355_v21 = vor.u32 %v1587_v11, %v1354_v9 }
  0x1e   :  { %630 = vmatpush.bf16.msra.mxu0 %v1307_v56  ;;  %v1482_v14 = vld [vmem:[#allocation2 + $0x190] sm:$0xf]  ;;  %v1619_v15 = vld [vmem:[#allocation2 + $0x194] sm:$0xf0]  ;;  %v1346_v19 = vld [vmem:[#allocation2 + $0x80] sm:$0xf]  ;;  %v1419_v22 = vor.u32 %v1603_v13, %v1418_v12  ;;  %v1283_v34 = vor.u32 %v1569_v18, %v1282_v16 }
  0x1f   :  { %679 = vmatpush.bf16.msra.mxu1 %v1371_v57  ;;  %v1585_v20 = vld [vmem:[#allocation2 + $0x84] sm:$0xf0]  ;;  %v1410_v23 = vld [vmem:[#allocation2 + $0x100] sm:$0xf]  ;;  %v1483_v26 = vor.u32 %v1619_v15, %v1482_v14  ;;  %v1538_v29 = vld [vmem:[%s2174_s0 + $0xc] sm:$0xf0] }
  0x20   :  { %728 = vmatpush.bf16.msra.mxu2 %v1435_v58  ;;  %v1601_v24 = vld [vmem:[#allocation2 + $0x104] sm:$0xf0]  ;;  %v1474_v25 = vld [vmem:[#allocation2 + $0x180] sm:$0xf]  ;;  %v1536_v30 = vld [vmem:[%s2174_s0 + $0x4] sm:$0xf]  ;;  %v1347_v38 = vor.u32 %v1585_v20, %v1346_v19 }
  0x21   :  { %777 = vmatpush.bf16.msra.mxu3 %v1499_v62  ;;  %v1617_v27 = vld [vmem:[#allocation2 + $0x184] sm:$0xf0]  ;;  %v1154_v28 = vld [vmem:[%s2174_s0] sm:$0xf]  ;;  %v1156_v31 = vld [vmem:[%s2174_s0 + $0x10] sm:$0xf0]  ;;  %v1411_v39 = vor.u32 %v1601_v24, %v1410_v23 }
  0x22   :  { %631 = vmatpush.bf16.msra.mxu0 %v1299_v4  ;;  %v1614_v32 = vld [vmem:[#allocation2 + $0x174] sm:$0xf]  ;;  %v1468_v33 = vld [vmem:[#allocation2 + $0x178] sm:$0xf0]  ;;  %v1162_v35 = vld [vmem:[%s2174_s0 + $0x8] sm:$0xf]  ;;  %v1475_v43 = vor.u32 %v1617_v27, %v1474_v25  ;;  %v1742_v48 = vor.u32 %v1538_v29, %v1154_v28  ;;  %v1744_v53 = vor.u32 %v1536_v30, %v1156_v31 }
  0x23   :  { %680 = vmatpush.bf16.msra.mxu1 %v1363_v5  ;;  %v1630_v36 = vld [vmem:[#allocation2 + $0x1f4] sm:$0xf]  ;;  %v1532_v37 = vld [vmem:[#allocation2 + $0x1f8] sm:$0xf0]  ;;  %v1539_v40 = vld [vmem:[%s2174_s0 + $0x14] sm:$0xf0]  ;;  %v1471_v44 = vor.u32 %v1614_v32, %v1468_v33 }
  0x24   :  { %729 = vmatpush.bf16.msra.mxu2 %v1427_v6  ;;  %v1537_v41 = vld [vmem:[%s2174_s0 + $0xc] sm:$0xf]  ;;  %v1164_v42 = vld [vmem:[%s2174_s0 + $0x18] sm:$0xf0]  ;;  %v1582_v45 = vld [vmem:[#allocation2 + $0x74] sm:$0xf]  ;;  %v1535_v49 = vor.u32 %v1630_v36, %v1532_v37  ;;  %v1746_v54 = vor.u32 %v1539_v40, %v1162_v35 }
  0x25   :  { %778 = vmatpush.bf16.msra.mxu3 %v1491_v10  ;;  %v1340_v46 = vld [vmem:[#allocation2 + $0x78] sm:$0xf0]  ;;  %v1598_v47 = vld [vmem:[#allocation2 + $0xf4] sm:$0xf]  ;;  %v1612_v51 = vld [vmem:[#allocation2 + $0x164] sm:$0xf]  ;;  %v1748_v57 = vor.u32 %v1537_v41, %v1164_v42 }
  0x26   :  { %632 = vmatpush.bf16.msra.mxu0 %v1291_v17  ;;  %v1404_v50 = vld [vmem:[#allocation2 + $0xf8] sm:$0xf0]  ;;  %v1460_v52 = vld [vmem:[#allocation2 + $0x168] sm:$0xf0]  ;;  %v1628_v55 = vld [vmem:[#allocation2 + $0x1e4] sm:$0xf]  ;;  %v1343_v58 = vor.u32 %v1582_v45, %v1340_v46 }
  0x27   :  { %681 = vmatpush.bf16.msra.mxu1 %v1355_v21  ;;  %v1524_v56 = vld [vmem:[#allocation2 + $0x1e8] sm:$0xf0]  ;;  %v1407_v59 = vor.u32 %v1598_v47, %v1404_v50  ;;  %v1463_v60 = vor.u32 %v1612_v51, %v1460_v52  ;;  %v1580_v61 = vld [vmem:[#allocation2 + $0x64] sm:$0xf]  ;;  %v1610_v3 = vld [vmem:[#allocation2 + $0x154] sm:$0xf] }
  0x28   :  { %730 = vmatpush.bf16.msra.mxu2 %v1419_v22  ;;  %v1332_v62 = vld [vmem:[#allocation2 + $0x68] sm:$0xf0]  ;;  %v1527_v63 = vor.u32 %v1628_v55, %v1524_v56  ;;  %v1596_v0 = vld [vmem:[#allocation2 + $0xe4] sm:$0xf]  ;;  %v1452_v4 = vld [vmem:[#allocation2 + $0x158] sm:$0xf0] }
  0x29   :  { %779 = vmatpush.bf16.msra.mxu3 %v1483_v26  ;;  %v1396_v1 = vld [vmem:[#allocation2 + $0xe8] sm:$0xf0]  ;;  %v1335_v2 = vor.u32 %v1580_v61, %v1332_v62  ;;  %v1578_v5 = vld [vmem:[#allocation2 + $0x54] sm:$0xf]  ;;  %v1455_v7 = vor.u32 %v1610_v3, %v1452_v4  ;;  %v1324_v8 = vld [vmem:[#allocation2 + $0x58] sm:$0xf0] }
  0x2a   :  { %633 = vmatpush.bf16.msra.mxu0 %v1283_v34  ;;  %v1399_v6 = vor.u32 %v1596_v0, %v1396_v1  ;;  %v1626_v9 = vld [vmem:[#allocation2 + $0x1d4] sm:$0xf]  ;;  %v1516_v10 = vld [vmem:[#allocation2 + $0x1d8] sm:$0xf0]  ;;  %v1327_v14 = vor.u32 %v1578_v5, %v1324_v8  ;;  %v1170_v16 = vld [vmem:[%s2174_s0 + $0x20] sm:$0xf] }
  0x2b   :  { %682 = vmatpush.bf16.msra.mxu1 %v1347_v38  ;;  %v1519_v11 = vor.u32 %v1626_v9, %v1516_v10  ;;  %v1594_v12 = vld [vmem:[#allocation2 + $0xd4] sm:$0xf]  ;;  %v1388_v13 = vld [vmem:[#allocation2 + $0xd8] sm:$0xf0]  ;;  %v1542_v17 = vld [vmem:[%s2174_s0 + $0x2c] sm:$0xf0] }
  0x2c   :  { %731 = vmatpush.bf16.msra.mxu2 %v1411_v39  ;;  %v1391_v15 = vor.u32 %v1594_v12, %v1388_v13  ;;  %v1540_v18 = vld [vmem:[%s2174_s0 + $0x24] sm:$0xf]  ;;  %v1172_v19 = vld [vmem:[%s2174_s0 + $0x30] sm:$0xf0]  ;;  %v1178_v20 = vld [vmem:[%s2174_s0 + $0x28] sm:$0xf]  ;;  %v1778_v24 = vor.u32 %v1542_v17, %v1170_v16 }
  0x2d   :  { %780 = vmatpush.bf16.msra.mxu3 %v1475_v43  ;;  %634 = vmatmul.bf16.vlgmr.msra.gmra.mxu0 %v1742_v48  ;;  %v1543_v21 = vld [vmem:[%s2174_s0 + $0x34] sm:$0xf0]  ;;  %v1541_v22 = vld [vmem:[%s2174_s0 + $0x2c] sm:$0xf]  ;;  %v1180_v23 = vld [vmem:[%s2174_s0 + $0x38] sm:$0xf0]  ;;  %v1780_v25 = vor.u32 %v1540_v18, %v1172_v19 }
  0x2e   :  { %683 = vmatmul.bf16.vlgmr.msra.gmra.mxu1 %v1744_v53  ;;  %822 = vmatpush.bf16.msrb.mxu0 %v1343_v58  ;;  %v1782_v26 = vor.u32 %v1543_v21, %v1178_v20  ;;  %v1784_v27 = vor.u32 %v1541_v22, %v1180_v23  ;;  %v1608_v28 = vld [vmem:[#allocation2 + $0x144] sm:$0xf]  ;;  %v1444_v29 = vld [vmem:[#allocation2 + $0x148] sm:$0xf0]  ;;  %v1186_v40 = vld [vmem:[%s2174_s0 + $0x40] sm:$0xf] }
  0x2f   :  { %732 = vmatmul.bf16.vlgmr.msra.gmra.mxu2 %v1746_v54  ;;  %871 = vmatpush.bf16.msrb.mxu1 %v1407_v59  ;;  %v1576_v30 = vld [vmem:[#allocation2 + $0x44] sm:$0xf]  ;;  %v1447_v31 = vor.u32 %v1608_v28, %v1444_v29  ;;  %v1316_v32 = vld [vmem:[#allocation2 + $0x48] sm:$0xf0]  ;;  %v1546_v41 = vld [vmem:[%s2174_s0 + $0x4c] sm:$0xf0] }
  0x30   :  { %920 = vmatpush.bf16.msrb.mxu2 %v1471_v44  ;;  %781 = vmatmul.bf16.vlgmr.msra.gmra.mxu3 %v1748_v57  ;;  %v1624_v33 = vld [vmem:[#allocation2 + $0x1c4] sm:$0xf]  ;;  %v1508_v34 = vld [vmem:[#allocation2 + $0x1c8] sm:$0xf0]  ;;  %v1319_v35 = vor.u32 %v1576_v30, %v1316_v32  ;;  %v1188_v43 = vld [vmem:[%s2174_s0 + $0x50] sm:$0xf0] }
  0x31   :  { %969 = vmatpush.bf16.msrb.mxu3 %v1535_v49  ;;  %v1511_v36 = vor.u32 %v1624_v33, %v1508_v34  ;;  %v1592_v37 = vld [vmem:[#allocation2 + $0xc4] sm:$0xf]  ;;  %v1380_v38 = vld [vmem:[#allocation2 + $0xc8] sm:$0xf0]  ;;  %v1194_v44 = vld [vmem:[%s2174_s0 + $0x48] sm:$0xf]  ;;  %v1814_v49 = vor.u32 %v1546_v41, %v1186_v40 }
  0x32   :  { %823 = vmatpush.bf16.msrb.mxu0 %v1335_v2  ;;  %v1383_v39 = vor.u32 %v1592_v37, %v1380_v38  ;;  %v1544_v42 = vld [vmem:[%s2174_s0 + $0x44] sm:$0xf]  ;;  %v1547_v45 = vld [vmem:[%s2174_s0 + $0x54] sm:$0xf0]  ;;  %v1545_v46 = vld [vmem:[%s2174_s0 + $0x4c] sm:$0xf] }
  0x33   :  { %872 = vmatpush.bf16.msrb.mxu1 %v1399_v6  ;;  %v1196_v47 = vld [vmem:[%s2174_s0 + $0x58] sm:$0xf0]  ;;  %v1816_v50 = vor.u32 %v1544_v42, %v1188_v43  ;;  %v1818_v51 = vor.u32 %v1547_v45, %v1194_v44  ;;  %v1606_v55 = vld [vmem:[#allocation2 + $0x134] sm:$0xf]  ;;  %v1202_v4 = vld [vmem:[%s2174_s0 + $0x60] sm:$0xf] }
  0x34   :  { %921 = vmatpush.bf16.msrb.mxu2 %v1463_v60  ;;  %v1820_v52 = vor.u32 %v1545_v46, %v1196_v47  ;;  %v1436_v56 = vld [vmem:[#allocation2 + $0x138] sm:$0xf0]  ;;  %v1574_v58 = vld [vmem:[#allocation2 + $0x34] sm:$0xf]  ;;  %v1550_v5 = vld [vmem:[%s2174_s0 + $0x6c] sm:$0xf0] }
  0x35   :  { %970 = vmatpush.bf16.msrb.mxu3 %v1527_v63  ;;  %v1439_v59 = vor.u32 %v1606_v55, %v1436_v56  ;;  %v1308_v60 = vld [vmem:[#allocation2 + $0x38] sm:$0xf0]  ;;  %v1622_v61 = vld [vmem:[#allocation2 + $0x1b4] sm:$0xf]  ;;  %v1548_v6 = vld [vmem:[%s2174_s0 + $0x64] sm:$0xf]  ;;  %v1850_v12 = vor.u32 %v1550_v5, %v1202_v4 }
  0x36   :  { %824 = vmatpush.bf16.msrb.mxu0 %v1327_v14  ;;  %v1500_v62 = vld [vmem:[#allocation2 + $0x1b8] sm:$0xf0]  ;;  %v1311_v63 = vor.u32 %v1574_v58, %v1308_v60  ;;  %v1590_v1 = vld [vmem:[#allocation2 + $0xb4] sm:$0xf]  ;;  %v1210_v8 = vld [vmem:[%s2174_s0 + $0x68] sm:$0xf] }
  0x37   :  { %873 = vmatpush.bf16.msrb.mxu1 %v1391_v15  ;;  %v1503_v0 = vor.u32 %v1622_v61, %v1500_v62  ;;  %v1372_v2 = vld [vmem:[#allocation2 + $0xb8] sm:$0xf0]  ;;  %v1551_v9 = vld [vmem:[%s2174_s0 + $0x74] sm:$0xf0]  ;;  %v1549_v10 = vld [vmem:[%s2174_s0 + $0x6c] sm:$0xf] }
  0x38   :  { %922 = vmatpush.bf16.msrb.mxu2 %v1455_v7  ;;  %v1375_v3 = vor.u32 %v1590_v1, %v1372_v2  ;;  %v1204_v7 = vld [vmem:[%s2174_s0 + $0x70] sm:$0xf0]  ;;  %v1854_v14 = vor.u32 %v1551_v9, %v1210_v8  ;;  %v1604_v16 = vld [vmem:[#allocation2 + $0x124] sm:$0xf]  ;;  %v1428_v17 = vld [vmem:[#allocation2 + $0x128] sm:$0xf0] }
  0x39   :  { %971 = vmatpush.bf16.msrb.mxu3 %v1519_v11  ;;  %v1212_v11 = vld [vmem:[%s2174_s0 + $0x78] sm:$0xf0]  ;;  %v1852_v13 = vor.u32 %v1548_v6, %v1204_v7  ;;  %v1572_v18 = vld [vmem:[#allocation2 + $0x24] sm:$0xf]  ;;  %v1431_v19 = vor.u32 %v1604_v16, %v1428_v17  ;;  %v1300_v20 = vld [vmem:[#allocation2 + $0x28] sm:$0xf0] }
  0x3a   :  { %825 = vmatpush.bf16.msrb.mxu0 %v1319_v35  ;;  %v1856_v15 = vor.u32 %v1549_v10, %v1212_v11  ;;  %v1620_v21 = vld [vmem:[#allocation2 + $0x1a4] sm:$0xf]  ;;  %v1492_v22 = vld [vmem:[#allocation2 + $0x1a8] sm:$0xf0]  ;;  %v1303_v23 = vor.u32 %v1572_v18, %v1300_v20  ;;  %v1218_v32 = vld [vmem:[%s2174_s0 + $0x80] sm:$0xf] }
  0x3b   :  { %874 = vmatpush.bf16.msrb.mxu1 %v1383_v39  ;;  %v1495_v28 = vor.u32 %v1620_v21, %v1492_v22  ;;  %v1588_v29 = vld [vmem:[#allocation2 + $0xa4] sm:$0xf]  ;;  %v1364_v30 = vld [vmem:[#allocation2 + $0xa8] sm:$0xf0]  ;;  %v1554_v33 = vld [vmem:[%s2174_s0 + $0x8c] sm:$0xf0] }
  0x3c   :  { %923 = vmatpush.bf16.msrb.mxu2 %v1447_v31  ;;  %v1367_v31 = vor.u32 %v1588_v29, %v1364_v30  ;;  %v1552_v34 = vld [vmem:[%s2174_s0 + $0x84] sm:$0xf]  ;;  %v1220_v35 = vld [vmem:[%s2174_s0 + $0x90] sm:$0xf0]  ;;  %v1555_v37 = vld [vmem:[%s2174_s0 + $0x94] sm:$0xf0]  ;;  %v1886_v40 = vor.u32 %v1554_v33, %v1218_v32 }
  0x3d   :  { %639 = vmatmul.bf16.gmra.mxu0 %v1778_v24  ;;  %972 = vmatpush.bf16.msrb.mxu3 %v1511_v36  ;;  %v1226_v36 = vld [vmem:[%s2174_s0 + $0x88] sm:$0xf]  ;;  %v1553_v38 = vld [vmem:[%s2174_s0 + $0x8c] sm:$0xf]  ;;  %v1228_v39 = vld [vmem:[%s2174_s0 + $0x98] sm:$0xf0]  ;;  %v1888_v41 = vor.u32 %v1552_v34, %v1220_v35 }
  0x3e   :  { %688 = vmatmul.bf16.gmra.mxu1 %v1780_v25  ;;  %826 = vmatpush.bf16.msrb.mxu0 %v1311_v63  ;;  %v1890_v42 = vor.u32 %v1555_v37, %v1226_v36  ;;  %v1892_v43 = vor.u32 %v1553_v38, %v1228_v39  ;;  %v1602_v44 = vld [vmem:[#allocation2 + $0x114] sm:$0xf]  ;;  %v1420_v45 = vld [vmem:[#allocation2 + $0x118] sm:$0xf0]  ;;  %v1558_v1 = vld [vmem:[%s2174_s0 + $0xac] sm:$0xf0] }
  0x3f   :  { %737 = vmatmul.bf16.gmra.mxu2 %v1782_v26  ;;  %875 = vmatpush.bf16.msrb.mxu1 %v1375_v3  ;;  %v1570_v46 = vld [vmem:[#allocation2 + $0x14] sm:$0xf]  ;;  %v1423_v47 = vor.u32 %v1602_v44, %v1420_v45  ;;  %v1292_v55 = vld [vmem:[#allocation2 + $0x18] sm:$0xf0]  ;;  %v1556_v2 = vld [vmem:[%s2174_s0 + $0xa4] sm:$0xf] }
  0x40   :  { %786 = vmatmul.bf16.gmra.mxu3 %v1784_v27  ;;  %924 = vmatpush.bf16.msrb.mxu2 %v1439_v59  ;;  %v1618_v56 = vld [vmem:[#allocation2 + $0x194] sm:$0xf]  ;;  %v1484_v58 = vld [vmem:[#allocation2 + $0x198] sm:$0xf0]  ;;  %v1295_v59 = vor.u32 %v1570_v46, %v1292_v55  ;;  %v1242_v4 = vld [vmem:[%s2174_s0 + $0xa8] sm:$0xf] }
  0x41   :  { %973 = vmatpush.bf16.msrb.mxu3 %v1503_v0  ;;  %v1487_v60 = vor.u32 %v1618_v56, %v1484_v58  ;;  %v1586_v61 = vld [vmem:[#allocation2 + $0x94] sm:$0xf]  ;;  %v1356_v62 = vld [vmem:[#allocation2 + $0x98] sm:$0xf0]  ;;  %v1234_v0 = vld [vmem:[%s2174_s0 + $0xa0] sm:$0xf] }
  0x42   :  { %827 = vmatpush.bf16.msrb.mxu0 %v1303_v23  ;;  %v1359_v63 = vor.u32 %v1586_v61, %v1356_v62  ;;  %v1236_v3 = vld [vmem:[%s2174_s0 + $0xb0] sm:$0xf0]  ;;  %v1559_v5 = vld [vmem:[%s2174_s0 + $0xb4] sm:$0xf0]  ;;  %v1557_v6 = vld [vmem:[%s2174_s0 + $0xac] sm:$0xf]  ;;  %v1922_v8 = vor.u32 %v1558_v1, %v1234_v0 }
  0x43   :  { %876 = vmatpush.bf16.msrb.mxu1 %v1367_v31  ;;  %v1244_v7 = vld [vmem:[%s2174_s0 + $0xb8] sm:$0xf0]  ;;  %v1924_v9 = vor.u32 %v1556_v2, %v1236_v3  ;;  %v1926_v10 = vor.u32 %v1559_v5, %v1242_v4  ;;  %v1600_v16 = vld [vmem:[#allocation2 + $0x104] sm:$0xf]  ;;  %v1412_v17 = vld [vmem:[#allocation2 + $0x108] sm:$0xf0] }
  0x44   :  { %925 = vmatpush.bf16.msrb.mxu2 %v1431_v19  ;;  %v1928_v11 = vor.u32 %v1557_v6, %v1244_v7  ;;  %v1568_v18 = vld [vmem:[#allocation2 + $0x4] sm:$0xf]  ;;  %v1415_v19 = vor.u32 %v1600_v16, %v1412_v17  ;;  %v1284_v20 = vld [vmem:[#allocation2 + $0x8] sm:$0xf0]  ;;  %v1250_v32 = vld [vmem:[%s2174_s0 + $0xc0] sm:$0xf] }
  0x45   :  { %974 = vmatpush.bf16.msrb.mxu3 %v1495_v28  ;;  %v1616_v21 = vld [vmem:[#allocation2 + $0x184] sm:$0xf]  ;;  %v1476_v22 = vld [vmem:[#allocation2 + $0x188] sm:$0xf0]  ;;  %v1287_v23 = vor.u32 %v1568_v18, %v1284_v20  ;;  %v1562_v33 = vld [vmem:[%s2174_s0 + $0xcc] sm:$0xf0] }
  0x46   :  { %828 = vmatpush.bf16.msrb.mxu0 %v1295_v59  ;;  %v1479_v28 = vor.u32 %v1616_v21, %v1476_v22  ;;  %v1584_v29 = vld [vmem:[#allocation2 + $0x84] sm:$0xf]  ;;  %v1348_v30 = vld [vmem:[#allocation2 + $0x88] sm:$0xf0]  ;;  %v1252_v35 = vld [vmem:[%s2174_s0 + $0xd0] sm:$0xf0]  ;;  %v1958_v44 = vor.u32 %v1562_v33, %v1250_v32 }
  0x47   :  { %877 = vmatpush.bf16.msrb.mxu1 %v1359_v63  ;;  %v1351_v31 = vor.u32 %v1584_v29, %v1348_v30  ;;  %v1560_v34 = vld [vmem:[%s2174_s0 + $0xc4] sm:$0xf]  ;;  %v1258_v36 = vld [vmem:[%s2174_s0 + $0xc8] sm:$0xf]  ;;  %v1563_v37 = vld [vmem:[%s2174_s0 + $0xd4] sm:$0xf0] }
  0x48   :  { %926 = vmatpush.bf16.msrb.mxu2 %v1423_v47  ;;  %v1561_v38 = vld [vmem:[%s2174_s0 + $0xcc] sm:$0xf]  ;;  %v1260_v39 = vld [vmem:[%s2174_s0 + $0xd8] sm:$0xf0]  ;;  %v1960_v45 = vor.u32 %v1560_v34, %v1252_v35  ;;  %v1962_v46 = vor.u32 %v1563_v37, %v1258_v36  ;;  %v1266_v55 = vld [vmem:[%s2174_s0 + $0xe0] sm:$0xf] }
  0x49   :  { %975 = vmatpush.bf16.msrb.mxu3 %v1487_v60  ;;  %v1964_v47 = vor.u32 %v1561_v38, %v1260_v39  ;;  %v1566_v56 = vld [vmem:[%s2174_s0 + $0xec] sm:$0xf0]  ;;  %v1564_v58 = vld [vmem:[%s2174_s0 + $0xe4] sm:$0xf]  ;;  %v1268_v59 = vld [vmem:[%s2174_s0 + $0xf0] sm:$0xf0] }
  0x4a   :  { %829 = vmatpush.bf16.msrb.mxu0 %v1287_v23  ;;  %v1274_v60 = vld [vmem:[%s2174_s0 + $0xe8] sm:$0xf]  ;;  %v1567_v61 = vld [vmem:[%s2174_s0 + $0xf4] sm:$0xf0]  ;;  %v1565_v62 = vld [vmem:[%s2174_s0 + $0xec] sm:$0xf]  ;;  %v1994_v0 = vor.u32 %v1566_v56, %v1266_v55  ;;  %v1996_v1 = vor.u32 %v1564_v58, %v1268_v59 }
  0x4b   :  { %878 = vmatpush.bf16.msrb.mxu1 %v1351_v31  ;;  %v1276_v63 = vld [vmem:[%s2174_s0 + $0xf8] sm:$0xf0]  ;;  %v1998_v2 = vor.u32 %v1567_v61, %v1274_v60  ;;  %v2006_v4 = vld [vmem:[#allocation4] sm:$0x3] }
  0x4c   :  { %927 = vmatpush.bf16.msrb.mxu2 %v1415_v19  ;;  %v2000_v3 = vor.u32 %v1565_v62, %v1276_v63  ;;  %v2009_v5 = vperm.slane %v2006_v4, 0 }
  0x4d   :  { %644 = vmatmul.bf16.gmra.mxu0 %v1814_v49  ;;  %976 = vmatpush.bf16.msrb.mxu3 %v1479_v28 }
  0x4e   :  { %693 = vmatmul.bf16.gmra.mxu1 %v1816_v50 }
  0x4f   :  { %742 = vmatmul.bf16.gmra.mxu2 %v1818_v51 }
  0x50   :  { %791 = vmatmul.bf16.gmra.mxu3 %v1820_v52 }
  0x5d   :  { %649 = vmatmul.bf16.gmra.mxu0 %v1850_v12 }
  0x5e   :  { %698 = vmatmul.bf16.gmra.mxu1 %v1852_v13 }
  0x5f   :  { %747 = vmatmul.bf16.gmra.mxu2 %v1854_v14 }
  0x60   :  { %796 = vmatmul.bf16.gmra.mxu3 %v1856_v15 }
  0x6d   :  { %654 = vmatmul.bf16.gmra.mxu0 %v1886_v40 }
  0x6e   :  { %703 = vmatmul.bf16.gmra.mxu1 %v1888_v41 }
  0x6f   :  { %752 = vmatmul.bf16.gmra.mxu2 %v1890_v42 }
  0x70   :  { %801 = vmatmul.bf16.gmra.mxu3 %v1892_v43 }
  0x7d   :  { %659 = vmatmul.bf16.gmra.mxu0 %v1922_v8 }
  0x7e   :  { %708 = vmatmul.bf16.gmra.mxu1 %v1924_v9 }
  0x7f   :  { %757 = vmatmul.bf16.gmra.mxu2 %v1926_v10 }
  0x80   :  { %806 = vmatmul.bf16.gmra.mxu3 %v1928_v11 }
  0x8d   :  { %664 = vmatmul.bf16.gmra.mxu0 %v1958_v44 }
  0x8e   :  { %713 = vmatmul.bf16.gmra.mxu1 %v1960_v45 }
  0x8f   :  { %762 = vmatmul.bf16.gmra.mxu2 %v1962_v46 }
  0x90   :  { %811 = vmatmul.bf16.gmra.mxu3 %v1964_v47 }
  0x9d   :  { %669 = vmatmul.bf16.gmra.mxu0 %v1994_v0 }
  0x9e   :  { %718 = vmatmul.bf16.gmra.mxu1 %v1996_v1 }
  0x9f   :  { %767 = vmatmul.bf16.gmra.mxu2 %v1998_v2 }
  0xa0   :  { %816 = vmatmul.bf16.gmra.mxu3 %v2000_v3 }
  0xaa   :  { %v635_v6 = vpop.f32.mrf.mxu0 }
  0xab   :  { %v636_v7 = vadd.f32 %v635_v6, %v2009_v5  ;;  %v684_v16 = vpop.f32.mrf.mxu1 }
  0xad   :  { %830 = vmatmul.bf16.vlgmr.msrb.gmra.mxu0 %v1742_v48  ;;  %v685_v17 = vadd.f32 %v684_v16, %v636_v7 }
  0xae   :  { %879 = vmatmul.bf16.vlgmr.msrb.gmra.mxu1 %v1744_v53 }
  0xaf   :  { %928 = vmatmul.bf16.vlgmr.msrb.gmra.mxu2 %v1746_v54 }
  0xb0   :  { %977 = vmatmul.bf16.vlgmr.msrb.gmra.mxu3 %v1748_v57 }
  0xb2   :  { %v733_v18 = vpop.f32.mrf.mxu2  ;;  %v637_v21 = vpop.f32.mrf.mxu0 }
  0xb3   :  { %v734_v19 = vadd.f32 %v733_v18, %v685_v17  ;;  %v782_v20 = vpop.f32.mrf.mxu3  ;;  %v686_v22 = vpop.f32.mrf.mxu1  ;;  %v638_v28 = vadd.f32 %v637_v21, %v2009_v5 }
  0xb5   :  { %v783_v23 = vadd.f32 %v782_v20, %v734_v19  ;;  %v687_v31 = vadd.f32 %v686_v22, %v638_v28 }
  0xb7   :  { %vm1018_vm0 = vcmp.ge.f32.partialorder %v783_v23, 0.0  ;;  %v1050_v29 = vmul.f32 0.01, %v783_v23 }
  0xb9   :  { %v1082_v30 = vsel %vm1018_vm0, %v783_v23, %v1050_v29 }
  0xba   :  { %1114 = vst [vmem:[%s2177_s3] sm:$0xff] %v1082_v30  ;;  %v735_v48 = vpop.f32.mrf.mxu2  ;;  %v640_v57 = vpop.f32.mrf.mxu0 }
  0xbb   :  { %v736_v53 = vadd.f32 %v735_v48, %v687_v31  ;;  %v784_v54 = vpop.f32.mrf.mxu3  ;;  %v641_v32 = vadd.f32 %v640_v57, %v2009_v5  ;;  %v689_v33 = vpop.f32.mrf.mxu1 }
  0xbd   :  { %v785_v34 = vadd.f32 %v784_v54, %v736_v53  ;;  %835 = vmatmul.bf16.gmra.mxu0 %v1778_v24  ;;  %v690_v36 = vadd.f32 %v689_v33, %v641_v32 }
  0xbe   :  { %884 = vmatmul.bf16.gmra.mxu1 %v1780_v25 }
  0xbf   :  { %vm1020_vm1 = vcmp.ge.f32.partialorder %v785_v34, 0.0  ;;  %v1052_v35 = vmul.f32 0.01, %v785_v34  ;;  %933 = vmatmul.bf16.gmra.mxu2 %v1782_v26 }
  0xc0   :  { %982 = vmatmul.bf16.gmra.mxu3 %v1784_v27 }
  0xc1   :  { %v1084_v37 = vsel %vm1020_vm1, %v785_v34, %v1052_v35 }
  0xc2   :  { %1116 = vst [vmem:[%s2177_s3 + $0x10] sm:$0xff] %v1084_v37  ;;  %v738_v38 = vpop.f32.mrf.mxu2  ;;  %v642_v56 = vpop.f32.mrf.mxu0 }
  0xc3   :  { %v739_v39 = vadd.f32 %v738_v38, %v690_v36  ;;  %v787_v55 = vpop.f32.mrf.mxu3  ;;  %v691_v58 = vpop.f32.mrf.mxu1  ;;  %v643_v59 = vadd.f32 %v642_v56, %v2009_v5 }
  0xc5   :  { %v788_v24 = vadd.f32 %v787_v55, %v739_v39  ;;  %v692_v61 = vadd.f32 %v691_v58, %v643_v59 }
  0xc7   :  { %vm1022_vm2 = vcmp.ge.f32.partialorder %v788_v24, 0.0  ;;  %v1054_v60 = vmul.f32 0.01, %v788_v24 }
  0xc9   :  { %v1086_v25 = vsel %vm1022_vm2, %v788_v24, %v1054_v60 }
  0xca   :  { %1118 = vst [vmem:[%s2177_s3 + $0x20] sm:$0xff] %v1086_v25  ;;  %v740_v26 = vpop.f32.mrf.mxu2  ;;  %v645_v63 = vpop.f32.mrf.mxu0 }
  0xcb   :  { %v741_v27 = vadd.f32 %v740_v26, %v692_v61  ;;  %v789_v62 = vpop.f32.mrf.mxu3  ;;  %v646_v6 = vadd.f32 %v645_v63, %v2009_v5  ;;  %v694_v7 = vpop.f32.mrf.mxu1 }
  0xcd   :  { %v790_v16 = vadd.f32 %v789_v62, %v741_v27  ;;  %840 = vmatmul.bf16.gmra.mxu0 %v1814_v49  ;;  %v695_v18 = vadd.f32 %v694_v7, %v646_v6 }
  0xce   :  { %889 = vmatmul.bf16.gmra.mxu1 %v1816_v50 }
  0xcf   :  { %vm1024_vm3 = vcmp.ge.f32.partialorder %v790_v16, 0.0  ;;  %v1056_v17 = vmul.f32 0.01, %v790_v16  ;;  %938 = vmatmul.bf16.gmra.mxu2 %v1818_v51 }
  0xd0   :  { %987 = vmatmul.bf16.gmra.mxu3 %v1820_v52 }
  0xd1   :  { %v1088_v19 = vsel %vm1024_vm3, %v790_v16, %v1056_v17 }
  0xd2   :  { %1120 = vst [vmem:[%s2177_s3 + $0x30] sm:$0xff] %v1088_v19  ;;  %v743_v20 = vpop.f32.mrf.mxu2  ;;  %v647_v23 = vpop.f32.mrf.mxu0 }
  0xd3   :  { %v744_v21 = vadd.f32 %v743_v20, %v695_v18  ;;  %v792_v22 = vpop.f32.mrf.mxu3  ;;  %v696_v28 = vpop.f32.mrf.mxu1  ;;  %v648_v29 = vadd.f32 %v647_v23, %v2009_v5 }
  0xd5   :  { %v793_v49 = vadd.f32 %v792_v22, %v744_v21  ;;  %v697_v31 = vadd.f32 %v696_v28, %v648_v29 }
  0xd7   :  { %vm1026_vm4 = vcmp.ge.f32.partialorder %v793_v49, 0.0  ;;  %v1058_v30 = vmul.f32 0.01, %v793_v49 }
  0xd9   :  { %v1090_v50 = vsel %vm1026_vm4, %v793_v49, %v1058_v30 }
  0xda   :  { %1122 = vst [vmem:[%s2177_s3 + $0x40] sm:$0xff] %v1090_v50  ;;  %v745_v51 = vpop.f32.mrf.mxu2  ;;  %v650_v53 = vpop.f32.mrf.mxu0 }
  0xdb   :  { %v746_v52 = vadd.f32 %v745_v51, %v697_v31  ;;  %v794_v48 = vpop.f32.mrf.mxu3  ;;  %v651_v54 = vadd.f32 %v650_v53, %v2009_v5  ;;  %v699_v57 = vpop.f32.mrf.mxu1 }
  0xdd   :  { %v795_v32 = vadd.f32 %v794_v48, %v746_v52  ;;  %845 = vmatmul.bf16.gmra.mxu0 %v1850_v12  ;;  %v700_v34 = vadd.f32 %v699_v57, %v651_v54 }
  0xde   :  { %894 = vmatmul.bf16.gmra.mxu1 %v1852_v13 }
  0xdf   :  { %vm1028_vm5 = vcmp.ge.f32.partialorder %v795_v32, 0.0  ;;  %v1060_v33 = vmul.f32 0.01, %v795_v32  ;;  %943 = vmatmul.bf16.gmra.mxu2 %v1854_v14 }
  0xe0   :  { %992 = vmatmul.bf16.gmra.mxu3 %v1856_v15 }
  0xe1   :  { %v1092_v35 = vsel %vm1028_vm5, %v795_v32, %v1060_v33 }
  0xe2   :  { %1124 = vst [vmem:[%s2177_s3 + $0x50] sm:$0xff] %v1092_v35  ;;  %v748_v36 = vpop.f32.mrf.mxu2  ;;  %v652_v39 = vpop.f32.mrf.mxu0 }
  0xe3   :  { %v749_v37 = vadd.f32 %v748_v36, %v700_v34  ;;  %v797_v38 = vpop.f32.mrf.mxu3  ;;  %v701_v55 = vpop.f32.mrf.mxu1  ;;  %v653_v56 = vadd.f32 %v652_v39, %v2009_v5 }
  0xe5   :  { %v798_v12 = vadd.f32 %v797_v38, %v749_v37  ;;  %v702_v24 = vadd.f32 %v701_v55, %v653_v56 }
  0xe7   :  { %vm1030_vm6 = vcmp.ge.f32.partialorder %v798_v12, 0.0  ;;  %v1062_v58 = vmul.f32 0.01, %v798_v12 }
  0xe9   :  { %v1094_v13 = vsel %vm1030_vm6, %v798_v12, %v1062_v58 }
  0xea   :  { %1126 = vst [vmem:[%s2177_s3 + $0x60] sm:$0xff] %v1094_v13  ;;  %v750_v14 = vpop.f32.mrf.mxu2  ;;  %v655_v60 = vpop.f32.mrf.mxu0 }
  0xeb   :  { %v751_v15 = vadd.f32 %v750_v14, %v702_v24  ;;  %v799_v59 = vpop.f32.mrf.mxu3  ;;  %v656_v25 = vadd.f32 %v655_v60, %v2009_v5  ;;  %v704_v61 = vpop.f32.mrf.mxu1 }
  0xed   :  { %v800_v26 = vadd.f32 %v799_v59, %v751_v15  ;;  %850 = vmatmul.bf16.gmra.mxu0 %v1886_v40  ;;  %v705_v62 = vadd.f32 %v704_v61, %v656_v25 }
  0xee   :  { %899 = vmatmul.bf16.gmra.mxu1 %v1888_v41 }
  0xef   :  { %vm1032_vm7 = vcmp.ge.f32.partialorder %v800_v26, 0.0  ;;  %v1064_v27 = vmul.f32 0.01, %v800_v26  ;;  %948 = vmatmul.bf16.gmra.mxu2 %v1890_v42 }
  0xf0   :  { %997 = vmatmul.bf16.gmra.mxu3 %v1892_v43 }
  0xf1   :  { %v1096_v63 = vsel %vm1032_vm7, %v800_v26, %v1064_v27 }
  0xf2   :  { %1128 = vst [vmem:[%s2177_s3 + $0x70] sm:$0xff] %v1096_v63  ;;  %v753_v6 = vpop.f32.mrf.mxu2  ;;  %v657_v17 = vpop.f32.mrf.mxu0 }
  0xf3   :  { %v754_v7 = vadd.f32 %v753_v6, %v705_v62  ;;  %v802_v16 = vpop.f32.mrf.mxu3  ;;  %v706_v18 = vpop.f32.mrf.mxu1  ;;  %v658_v19 = vadd.f32 %v657_v17, %v2009_v5 }
  0xf5   :  { %v803_v40 = vadd.f32 %v802_v16, %v754_v7  ;;  %v707_v21 = vadd.f32 %v706_v18, %v658_v19 }
  0xf7   :  { %vm1034_vm8 = vcmp.ge.f32.partialorder %v803_v40, 0.0  ;;  %v1066_v20 = vmul.f32 0.01, %v803_v40 }
  0xf9   :  { %v1098_v41 = vsel %vm1034_vm8, %v803_v40, %v1066_v20 }
  0xfa   :  { %1130 = vst [vmem:[%s2177_s3 + $0x80] sm:$0xff] %v1098_v41  ;;  %v755_v42 = vpop.f32.mrf.mxu2  ;;  %v660_v23 = vpop.f32.mrf.mxu0 }
  0xfb   :  { %v756_v43 = vadd.f32 %v755_v42, %v707_v21  ;;  %v804_v22 = vpop.f32.mrf.mxu3  ;;  %v661_v28 = vadd.f32 %v660_v23, %v2009_v5  ;;  %v709_v49 = vpop.f32.mrf.mxu1 }
  0xfd   :  { %v805_v29 = vadd.f32 %v804_v22, %v756_v43  ;;  %855 = vmatmul.bf16.gmra.mxu0 %v1922_v8  ;;  %v710_v50 = vadd.f32 %v709_v49, %v661_v28 }
  0xfe   :  { %904 = vmatmul.bf16.gmra.mxu1 %v1924_v9 }
  0xff   :  { %vm1036_vm9 = vcmp.ge.f32.partialorder %v805_v29, 0.0  ;;  %v1068_v30 = vmul.f32 0.01, %v805_v29  ;;  %953 = vmatmul.bf16.gmra.mxu2 %v1926_v10 }
 0x100   :  { %1002 = vmatmul.bf16.gmra.mxu3 %v1928_v11 }
 0x101   :  { %v1100_v31 = vsel %vm1036_vm9, %v805_v29, %v1068_v30 }
 0x102   :  { %1132 = vst [vmem:[%s2177_s3 + $0x90] sm:$0xff] %v1100_v31  ;;  %v758_v51 = vpop.f32.mrf.mxu2  ;;  %v662_v53 = vpop.f32.mrf.mxu0 }
 0x103   :  { %v759_v52 = vadd.f32 %v758_v51, %v710_v50  ;;  %v807_v48 = vpop.f32.mrf.mxu3  ;;  %v711_v54 = vpop.f32.mrf.mxu1  ;;  %v663_v57 = vadd.f32 %v662_v53, %v2009_v5 }
 0x105   :  { %v808_v8 = vadd.f32 %v807_v48, %v759_v52  ;;  %v712_v33 = vadd.f32 %v711_v54, %v663_v57 }
 0x107   :  { %vm1038_vm10 = vcmp.ge.f32.partialorder %v808_v8, 0.0  ;;  %v1070_v32 = vmul.f32 0.01, %v808_v8 }
 0x109   :  { %v1102_v9 = vsel %vm1038_vm10, %v808_v8, %v1070_v32 }
 0x10a   :  { %1134 = vst [vmem:[%s2177_s3 + $0xa0] sm:$0xff] %v1102_v9  ;;  %v760_v10 = vpop.f32.mrf.mxu2  ;;  %v665_v35 = vpop.f32.mrf.mxu0 }
 0x10b   :  { %v761_v11 = vadd.f32 %v760_v10, %v712_v33  ;;  %v809_v34 = vpop.f32.mrf.mxu3  ;;  %v666_v36 = vadd.f32 %v665_v35, %v2009_v5  ;;  %v714_v37 = vpop.f32.mrf.mxu1 }
 0x10d   :  { %v810_v38 = vadd.f32 %v809_v34, %v761_v11  ;;  %860 = vmatmul.bf16.gmra.mxu0 %v1958_v44  ;;  %v715_v55 = vadd.f32 %v714_v37, %v666_v36 }
 0x10e   :  { %909 = vmatmul.bf16.gmra.mxu1 %v1960_v45 }
 0x10f   :  { %vm1040_vm11 = vcmp.ge.f32.partialorder %v810_v38, 0.0  ;;  %v1072_v39 = vmul.f32 0.01, %v810_v38  ;;  %958 = vmatmul.bf16.gmra.mxu2 %v1962_v46 }
 0x110   :  { %1007 = vmatmul.bf16.gmra.mxu3 %v1964_v47 }
 0x111   :  { %v1104_v12 = vsel %vm1040_vm11, %v810_v38, %v1072_v39 }
 0x112   :  { %1136 = vst [vmem:[%s2177_s3 + $0xb0] sm:$0xff] %v1104_v12  ;;  %v763_v56 = vpop.f32.mrf.mxu2  ;;  %v667_v24 = vpop.f32.mrf.mxu0 }
 0x113   :  { %v764_v58 = vadd.f32 %v763_v56, %v715_v55  ;;  %v812_v13 = vpop.f32.mrf.mxu3  ;;  %v716_v14 = vpop.f32.mrf.mxu1  ;;  %v668_v15 = vadd.f32 %v667_v24, %v2009_v5 }
 0x115   :  { %v813_v44 = vadd.f32 %v812_v13, %v764_v58  ;;  %v717_v60 = vadd.f32 %v716_v14, %v668_v15 }
 0x117   :  { %vm1042_vm12 = vcmp.ge.f32.partialorder %v813_v44, 0.0  ;;  %v1074_v59 = vmul.f32 0.01, %v813_v44 }
 0x119   :  { %v1106_v45 = vsel %vm1042_vm12, %v813_v44, %v1074_v59 }
 0x11a   :  { %1138 = vst [vmem:[%s2177_s3 + $0xc0] sm:$0xff] %v1106_v45  ;;  %v765_v46 = vpop.f32.mrf.mxu2  ;;  %v670_v61 = vpop.f32.mrf.mxu0 }
 0x11b   :  { %v766_v47 = vadd.f32 %v765_v46, %v717_v60  ;;  %v814_v25 = vpop.f32.mrf.mxu3  ;;  %v671_v26 = vadd.f32 %v670_v61, %v2009_v5  ;;  %v719_v27 = vpop.f32.mrf.mxu1 }
 0x11d   :  { %v815_v62 = vadd.f32 %v814_v25, %v766_v47  ;;  %865 = vmatmul.bf16.gmra.mxu0 %v1994_v0  ;;  %v720_v6 = vadd.f32 %v719_v27, %v671_v26 }
 0x11e   :  { %914 = vmatmul.bf16.gmra.mxu1 %v1996_v1  ;;  %v2102_v1 = vperm.slane %v2006_v4, 1 }
 0x11f   :  { %vm1044_vm13 = vcmp.ge.f32.partialorder %v815_v62, 0.0  ;;  %v1076_v63 = vmul.f32 0.01, %v815_v62  ;;  %963 = vmatmul.bf16.gmra.mxu2 %v1998_v2 }
 0x120   :  { %1012 = vmatmul.bf16.gmra.mxu3 %v2000_v3 }
 0x121   :  { %v1108_v7 = vsel %vm1044_vm13, %v815_v62, %v1076_v63 }
 0x122   :  { %1140 = vst [vmem:[%s2177_s3 + $0xd0] sm:$0xff] %v1108_v7  ;;  %v768_v16 = vpop.f32.mrf.mxu2  ;;  %v672_v40 = vpop.f32.mrf.mxu0 }
 0x123   :  { %v769_v17 = vadd.f32 %v768_v16, %v720_v6  ;;  %v817_v18 = vpop.f32.mrf.mxu3  ;;  %v721_v19 = vpop.f32.mrf.mxu1  ;;  %v673_v20 = vadd.f32 %v672_v40, %v2009_v5 }
 0x125   :  { %v818_v0 = vadd.f32 %v817_v18, %v769_v17  ;;  %v722_v3 = vadd.f32 %v721_v19, %v673_v20 }
 0x127   :  { %vm1046_vm14 = vcmp.ge.f32.partialorder %v818_v0, 0.0  ;;  %v1078_v41 = vmul.f32 0.01, %v818_v0 }
 0x129   :  { %v1110_v2 = vsel %vm1046_vm14, %v818_v0, %v1078_v41 }
 0x12a   :  { %1142 = vst [vmem:[%s2177_s3 + $0xe0] sm:$0xff] %v1110_v2  ;;  %v770_v21 = vpop.f32.mrf.mxu2  ;;  %v831_v22 = vpop.f32.mrf.mxu0 }
 0x12b   :  { %v771_v42 = vadd.f32 %v770_v21, %v722_v3  ;;  %v819_v43 = vpop.f32.mrf.mxu3  ;;  %v832_v23 = vadd.f32 %v831_v22, %v2102_v1  ;;  %v880_v28 = vpop.f32.mrf.mxu1 }
 0x12d   :  { %v820_v49 = vadd.f32 %v819_v43, %v771_v42  ;;  %v881_v29 = vadd.f32 %v880_v28, %v832_v23 }
 0x12f   :  { %vm1048_vm15 = vcmp.ge.f32.partialorder %v820_v49, 0.0  ;;  %v1080_v5 = vmul.f32 0.01, %v820_v49 }
 0x131   :  { %v1112_v30 = vsel %vm1048_vm15, %v820_v49, %v1080_v5 }
 0x132   :  { %1144 = vst [vmem:[%s2177_s3 + $0xf0] sm:$0xff] %v1112_v30  ;;  %v929_v4 = vpop.f32.mrf.mxu2  ;;  %v833_v51 = vpop.f32.mrf.mxu0 }
 0x133   :  { %v930_v50 = vadd.f32 %v929_v4, %v881_v29  ;;  %v978_v31 = vpop.f32.mrf.mxu3  ;;  %v882_v52 = vpop.f32.mrf.mxu1  ;;  %v834_v53 = vadd.f32 %v833_v51, %v2102_v1 }
 0x135   :  { %v979_v48 = vadd.f32 %v978_v31, %v930_v50  ;;  %v883_v57 = vadd.f32 %v882_v52, %v834_v53 }
 0x137   :  { %vm1019_vm0 = vcmp.ge.f32.partialorder %v979_v48, 0.0  ;;  %v1051_v54 = vmul.f32 0.01, %v979_v48 }
 0x139   :  { %v1083_v8 = vsel %vm1019_vm0, %v979_v48, %v1051_v54 }
 0x13a   :  { %1115 = vst [vmem:[%s2177_s3 + $0x8] sm:$0xff] %v1083_v8  ;;  %v931_v32 = vpop.f32.mrf.mxu2  ;;  %v836_v10 = vpop.f32.mrf.mxu0 }
 0x13b   :  { %v932_v9 = vadd.f32 %v931_v32, %v883_v57  ;;  %v980_v33 = vpop.f32.mrf.mxu3  ;;  %v837_v11 = vadd.f32 %v836_v10, %v2102_v1  ;;  %v885_v34 = vpop.f32.mrf.mxu1 }
 0x13d   :  { %v981_v35 = vadd.f32 %v980_v33, %v932_v9  ;;  %v886_v37 = vadd.f32 %v885_v34, %v837_v11 }
 0x13f   :  { %vm1021_vm1 = vcmp.ge.f32.partialorder %v981_v35, 0.0  ;;  %v1053_v36 = vmul.f32 0.01, %v981_v35 }
 0x141   :  { %v1085_v38 = vsel %vm1021_vm1, %v981_v35, %v1053_v36 }
 0x142   :  { %1117 = vst [vmem:[%s2177_s3 + $0x18] sm:$0xff] %v1085_v38  ;;  %v934_v39 = vpop.f32.mrf.mxu2  ;;  %v838_v56 = vpop.f32.mrf.mxu0 }
 0x143   :  { %v935_v55 = vadd.f32 %v934_v39, %v886_v37  ;;  %v983_v12 = vpop.f32.mrf.mxu3  ;;  %v887_v58 = vpop.f32.mrf.mxu1  ;;  %v839_v24 = vadd.f32 %v838_v56, %v2102_v1 }
 0x145   :  { %v984_v13 = vadd.f32 %v983_v12, %v935_v55  ;;  %v888_v15 = vadd.f32 %v887_v58, %v839_v24 }
 0x147   :  { %vm1023_vm2 = vcmp.ge.f32.partialorder %v984_v13, 0.0  ;;  %v1055_v14 = vmul.f32 0.01, %v984_v13 }
 0x149   :  { %v1087_v44 = vsel %vm1023_vm2, %v984_v13, %v1055_v14 }
 0x14a   :  { %1119 = vst [vmem:[%s2177_s3 + $0x28] sm:$0xff] %v1087_v44  ;;  %v936_v59 = vpop.f32.mrf.mxu2  ;;  %v841_v46 = vpop.f32.mrf.mxu0 }
 0x14b   :  { %v937_v45 = vadd.f32 %v936_v59, %v888_v15  ;;  %v985_v60 = vpop.f32.mrf.mxu3  ;;  %v842_v47 = vadd.f32 %v841_v46, %v2102_v1  ;;  %v890_v25 = vpop.f32.mrf.mxu1 }
 0x14d   :  { %v986_v61 = vadd.f32 %v985_v60, %v937_v45  ;;  %v891_v27 = vadd.f32 %v890_v25, %v842_v47 }
 0x14f   :  { %vm1025_vm3 = vcmp.ge.f32.partialorder %v986_v61, 0.0  ;;  %v1057_v26 = vmul.f32 0.01, %v986_v61 }
 0x151   :  { %v1089_v62 = vsel %vm1025_vm3, %v986_v61, %v1057_v26 }
 0x152   :  { %1121 = vst [vmem:[%s2177_s3 + $0x38] sm:$0xff] %v1089_v62  ;;  %v939_v63 = vpop.f32.mrf.mxu2  ;;  %v843_v16 = vpop.f32.mrf.mxu0 }
 0x153   :  { %v940_v6 = vadd.f32 %v939_v63, %v891_v27  ;;  %v988_v7 = vpop.f32.mrf.mxu3  ;;  %v892_v17 = vpop.f32.mrf.mxu1  ;;  %v844_v40 = vadd.f32 %v843_v16, %v2102_v1 }
 0x155   :  { %v989_v18 = vadd.f32 %v988_v7, %v940_v6  ;;  %v893_v20 = vadd.f32 %v892_v17, %v844_v40 }
 0x157   :  { %vm1027_vm4 = vcmp.ge.f32.partialorder %v989_v18, 0.0  ;;  %v1059_v19 = vmul.f32 0.01, %v989_v18 }
 0x159   :  { %v1091_v0 = vsel %vm1027_vm4, %v989_v18, %v1059_v19 }
 0x15a   :  { %1123 = vst [vmem:[%s2177_s3 + $0x48] sm:$0xff] %v1091_v0  ;;  %v941_v41 = vpop.f32.mrf.mxu2  ;;  %v846_v21 = vpop.f32.mrf.mxu0 }
 0x15b   :  { %v942_v2 = vadd.f32 %v941_v41, %v893_v20  ;;  %v990_v3 = vpop.f32.mrf.mxu3  ;;  %v847_v42 = vadd.f32 %v846_v21, %v2102_v1  ;;  %v895_v43 = vpop.f32.mrf.mxu1 }
 0x15d   :  { %v991_v22 = vadd.f32 %v990_v3, %v942_v2  ;;  %v896_v28 = vadd.f32 %v895_v43, %v847_v42 }
 0x15f   :  { %vm1029_vm5 = vcmp.ge.f32.partialorder %v991_v22, 0.0  ;;  %v1061_v23 = vmul.f32 0.01, %v991_v22 }
 0x161   :  { %v1093_v49 = vsel %vm1029_vm5, %v991_v22, %v1061_v23 }
 0x162   :  { %1125 = vst [vmem:[%s2177_s3 + $0x58] sm:$0xff] %v1093_v49  ;;  %v944_v5 = vpop.f32.mrf.mxu2  ;;  %v848_v4 = vpop.f32.mrf.mxu0 }
 0x163   :  { %v945_v29 = vadd.f32 %v944_v5, %v896_v28  ;;  %v993_v30 = vpop.f32.mrf.mxu3  ;;  %v897_v50 = vpop.f32.mrf.mxu1  ;;  %v849_v51 = vadd.f32 %v848_v4, %v2102_v1 }
 0x165   :  { %v994_v31 = vadd.f32 %v993_v30, %v945_v29  ;;  %v898_v53 = vadd.f32 %v897_v50, %v849_v51 }
 0x167   :  { %vm1031_vm6 = vcmp.ge.f32.partialorder %v994_v31, 0.0  ;;  %v1063_v52 = vmul.f32 0.01, %v994_v31 }
 0x169   :  { %v1095_v48 = vsel %vm1031_vm6, %v994_v31, %v1063_v52 }
 0x16a   :  { %1127 = vst [vmem:[%s2177_s3 + $0x68] sm:$0xff] %v1095_v48  ;;  %v946_v54 = vpop.f32.mrf.mxu2  ;;  %v851_v32 = vpop.f32.mrf.mxu0 }
 0x16b   :  { %v947_v8 = vadd.f32 %v946_v54, %v898_v53  ;;  %v995_v57 = vpop.f32.mrf.mxu3  ;;  %v852_v9 = vadd.f32 %v851_v32, %v2102_v1  ;;  %v900_v33 = vpop.f32.mrf.mxu1 }
 0x16d   :  { %v996_v10 = vadd.f32 %v995_v57, %v947_v8  ;;  %v901_v34 = vadd.f32 %v900_v33, %v852_v9 }
 0x16f   :  { %vm1033_vm7 = vcmp.ge.f32.partialorder %v996_v10, 0.0  ;;  %v1065_v11 = vmul.f32 0.01, %v996_v10 }
 0x171   :  { %v1097_v35 = vsel %vm1033_vm7, %v996_v10, %v1065_v11 }
 0x172   :  { %1129 = vst [vmem:[%s2177_s3 + $0x78] sm:$0xff] %v1097_v35  ;;  %v949_v36 = vpop.f32.mrf.mxu2  ;;  %v853_v39 = vpop.f32.mrf.mxu0 }
 0x173   :  { %v950_v37 = vadd.f32 %v949_v36, %v901_v34  ;;  %v998_v38 = vpop.f32.mrf.mxu3  ;;  %v902_v55 = vpop.f32.mrf.mxu1  ;;  %v854_v56 = vadd.f32 %v853_v39, %v2102_v1 }
 0x175   :  { %v999_v12 = vadd.f32 %v998_v38, %v950_v37  ;;  %v903_v24 = vadd.f32 %v902_v55, %v854_v56 }
 0x177   :  { %vm1035_vm8 = vcmp.ge.f32.partialorder %v999_v12, 0.0  ;;  %v1067_v58 = vmul.f32 0.01, %v999_v12 }
 0x179   :  { %v1099_v13 = vsel %vm1035_vm8, %v999_v12, %v1067_v58 }
 0x17a   :  { %1131 = vst [vmem:[%s2177_s3 + $0x88] sm:$0xff] %v1099_v13  ;;  %v951_v14 = vpop.f32.mrf.mxu2  ;;  %v856_v59 = vpop.f32.mrf.mxu0 }
 0x17b   :  { %v952_v44 = vadd.f32 %v951_v14, %v903_v24  ;;  %v1000_v15 = vpop.f32.mrf.mxu3  ;;  %v857_v45 = vadd.f32 %v856_v59, %v2102_v1  ;;  %v905_v60 = vpop.f32.mrf.mxu1 }
 0x17d   :  { %v1001_v46 = vadd.f32 %v1000_v15, %v952_v44  ;;  %v906_v25 = vadd.f32 %v905_v60, %v857_v45 }
 0x17f   :  { %vm1037_vm9 = vcmp.ge.f32.partialorder %v1001_v46, 0.0  ;;  %v1069_v47 = vmul.f32 0.01, %v1001_v46 }
 0x181   :  { %v1101_v61 = vsel %vm1037_vm9, %v1001_v46, %v1069_v47 }
 0x182   :  { %1133 = vst [vmem:[%s2177_s3 + $0x98] sm:$0xff] %v1101_v61  ;;  %v954_v26 = vpop.f32.mrf.mxu2  ;;  %v858_v63 = vpop.f32.mrf.mxu0 }
 0x183   :  { %v955_v27 = vadd.f32 %v954_v26, %v906_v25  ;;  %v1003_v62 = vpop.f32.mrf.mxu3  ;;  %v907_v6 = vpop.f32.mrf.mxu1  ;;  %v859_v16 = vadd.f32 %v858_v63, %v2102_v1 }
 0x185   :  { %v1004_v7 = vadd.f32 %v1003_v62, %v955_v27  ;;  %v908_v40 = vadd.f32 %v907_v6, %v859_v16 }
 0x187   :  { %vm1039_vm10 = vcmp.ge.f32.partialorder %v1004_v7, 0.0  ;;  %v1071_v17 = vmul.f32 0.01, %v1004_v7 }
 0x189   :  { %v1103_v18 = vsel %vm1039_vm10, %v1004_v7, %v1071_v17 }
 0x18a   :  { %1135 = vst [vmem:[%s2177_s3 + $0xa8] sm:$0xff] %v1103_v18  ;;  %v956_v19 = vpop.f32.mrf.mxu2  ;;  %v861_v41 = vpop.f32.mrf.mxu0 }
 0x18b   :  { %v957_v0 = vadd.f32 %v956_v19, %v908_v40  ;;  %v1005_v20 = vpop.f32.mrf.mxu3  ;;  %v862_v2 = vadd.f32 %v861_v41, %v2102_v1  ;;  %v910_v3 = vpop.f32.mrf.mxu1 }
 0x18d   :  { %v1006_v21 = vadd.f32 %v1005_v20, %v957_v0  ;;  %v911_v43 = vadd.f32 %v910_v3, %v862_v2 }
 0x18f   :  { %vm1041_vm11 = vcmp.ge.f32.partialorder %v1006_v21, 0.0  ;;  %v1073_v42 = vmul.f32 0.01, %v1006_v21 }
 0x191   :  { %v1105_v22 = vsel %vm1041_vm11, %v1006_v21, %v1073_v42 }
 0x192   :  { %1137 = vst [vmem:[%s2177_s3 + $0xb8] sm:$0xff] %v1105_v22  ;;  %v959_v23 = vpop.f32.mrf.mxu2  ;;  %v863_v5 = vpop.f32.mrf.mxu0 }
 0x193   :  { %v960_v28 = vadd.f32 %v959_v23, %v911_v43  ;;  %v1008_v49 = vpop.f32.mrf.mxu3  ;;  %v912_v29 = vpop.f32.mrf.mxu1  ;;  %v864_v4 = vadd.f32 %v863_v5, %v2102_v1 }
 0x195   :  { %v1009_v30 = vadd.f32 %v1008_v49, %v960_v28  ;;  %v913_v51 = vadd.f32 %v912_v29, %v864_v4 }
 0x197   :  { %vm1043_vm12 = vcmp.ge.f32.partialorder %v1009_v30, 0.0  ;;  %v1075_v50 = vmul.f32 0.01, %v1009_v30 }
 0x199   :  { %v1107_v31 = vsel %vm1043_vm12, %v1009_v30, %v1075_v50 }
 0x19a   :  { %1139 = vst [vmem:[%s2177_s3 + $0xc8] sm:$0xff] %v1107_v31  ;;  %v961_v52 = vpop.f32.mrf.mxu2  ;;  %v866_v54 = vpop.f32.mrf.mxu0 }
 0x19b   :  { %v962_v48 = vadd.f32 %v961_v52, %v913_v51  ;;  %v1010_v53 = vpop.f32.mrf.mxu3  ;;  %v867_v8 = vadd.f32 %v866_v54, %v2102_v1  ;;  %v915_v32 = vpop.f32.mrf.mxu1 }
 0x19d   :  { %v1011_v57 = vadd.f32 %v1010_v53, %v962_v48  ;;  %v916_v33 = vadd.f32 %v915_v32, %v867_v8 }
 0x19f   :  { %vm1045_vm13 = vcmp.ge.f32.partialorder %v1011_v57, 0.0  ;;  %v1077_v9 = vmul.f32 0.01, %v1011_v57 }
 0x1a1   :  { %v1109_v10 = vsel %vm1045_vm13, %v1011_v57, %v1077_v9 }
 0x1a2   :  { %1141 = vst [vmem:[%s2177_s3 + $0xd8] sm:$0xff] %v1109_v10  ;;  %v964_v11 = vpop.f32.mrf.mxu2  ;;  %v868_v36 = vpop.f32.mrf.mxu0 }
 0x1a3   :  { %v965_v34 = vadd.f32 %v964_v11, %v916_v33  ;;  %v1013_v35 = vpop.f32.mrf.mxu3  ;;  %v869_v38 = vadd.f32 %v868_v36, %v2102_v1  ;;  %v917_v55 = vpop.f32.mrf.mxu1 }
 0x1a5   :  { %v1014_v37 = vadd.f32 %v1013_v35, %v965_v34  ;;  %v918_v56 = vadd.f32 %v917_v55, %v869_v38 }
 0x1a7   :  { %vm1047_vm14 = vcmp.ge.f32.partialorder %v1014_v37, 0.0  ;;  %v1079_v39 = vmul.f32 0.01, %v1014_v37 }
 0x1a9   :  { %v1111_v12 = vsel %vm1047_vm14, %v1014_v37, %v1079_v39 }
 0x1aa   :  { %1143 = vst [vmem:[%s2177_s3 + $0xe8] sm:$0xff] %v1111_v12  ;;  %v966_v58 = vpop.f32.mrf.mxu2 }
 0x1ab   :  { %v967_v13 = vadd.f32 %v966_v58, %v918_v56  ;;  %v1015_v24 = vpop.f32.mrf.mxu3 }
 0x1ad   :  { %v1016_v14 = vadd.f32 %v1015_v24, %v967_v13 }
 0x1af   :  { %vm1049_vm15 = vcmp.ge.f32.partialorder %v1016_v14, 0.0  ;;  %v1081_v44 = vmul.f32 0.01, %v1016_v14 }
 0x1b1   :  { %v1113_v15 = vsel %vm1049_vm15, %v1016_v14, %v1081_v44 }
 0x1b2   :  { %1145 = vst [vmem:[%s2177_s3 + $0xf8] sm:$0xff] %v1113_v15 }
 0x1b3   :  { %1150 = vsyncpa [#allocation3], 1 }
 0x1b4   :  { %1151 = vsyncpa [#allocation5], 1 }

// kernel: decoder_forward.13
= control target key start
LH: loop header
LB: loop body
LE: loop exit
PB: predicated region body
PF: predicated region fallthrough
CT: control target
= control target key end

     0   :  { %vm14_vm0 = vcmask 516096   ;;  %vm67_vm1 = vcmask 523264   ;;  %v338_v0 = vmov 0.0   ;;  %s621_s0 = inlined_call_operand.vmem [shape: f32[392,64], index: 0, kind: input, shape index: {}]   ;;  %s622_s1 = inlined_call_operand.vmem [shape: f32[1,64], index: 1, kind: output, shape index: {0}]   ;;  %s623_s2 = inlined_call_operand.vmem [shape: f32[1,64], index: 2, kind: output, shape index: {1}]  }
   0x1   :  { %15 = vst.msk [vmem:[%s622_s1] sm:$0x1] %vm14_vm0, %v338_v0  ;;  %v17_v1 = vld [vmem:[%s621_s0] sm:$0xff]  ;;  %v18_v2 = vld [vmem:[%s621_s0 + $0x8] sm:$0xff]  ;;  %v19_v3 = vld [vmem:[%s621_s0 + $0x10] sm:$0xff] }
   0x2   :  { %16 = vst.msk [vmem:[%s623_s2] sm:$0x1] %vm14_vm0, %v338_v0  ;;  %v68_v4 = vsel %vm67_vm1, %v17_v1, 0.0  ;;  %v69_v5 = vsel %vm67_vm1, %v18_v2, 0.0  ;;  %v71_v6 = vsel %vm67_vm1, %v19_v3, 0.0  ;;  %v20_v7 = vld [vmem:[%s621_s0 + $0x18] sm:$0xff]  ;;  %v175_v19 = vmul.f32 %v17_v1, %v17_v1 }
   0x3   :  { %v70_v8 = vadd.f32 %v69_v5, %v68_v4  ;;  %v73_v9 = vsel %vm67_vm1, %v20_v7, 0.0  ;;  %v21_v10 = vld [vmem:[%s621_s0 + $0x20] sm:$0xff]  ;;  %v22_v13 = vld [vmem:[%s621_s0 + $0x28] sm:$0xff]  ;;  %v23_v16 = vld [vmem:[%s621_s0 + $0x30] sm:$0xff]  ;;  %v176_v20 = vmul.f32 %v18_v2, %v18_v2  ;;  %v177_v24 = vmul.f32 %v19_v3, %v19_v3 }
   0x4   :  { %v75_v12 = vsel %vm67_vm1, %v21_v10, 0.0  ;;  %v77_v15 = vsel %vm67_vm1, %v22_v13, 0.0  ;;  %v79_v18 = vsel %vm67_vm1, %v23_v16, 0.0  ;;  %v24_v21 = vld [vmem:[%s621_s0 + $0x38] sm:$0xff]  ;;  %v178_v25 = vmul.f32 %v20_v7, %v20_v7  ;;  %v25_v26 = vld [vmem:[%s621_s0 + $0x40] sm:$0xff]  ;;  %v26_v32 = vld [vmem:[%s621_s0 + $0x48] sm:$0xff] }
   0x5   :  { %v72_v11 = vadd.f32 %v71_v6, %v70_v8  ;;  %v81_v23 = vsel %vm67_vm1, %v24_v21, 0.0  ;;  %v83_v28 = vsel %vm67_vm1, %v25_v26, 0.0  ;;  %v179_v29 = vmul.f32 %v21_v10, %v21_v10  ;;  %v27_v39 = vld [vmem:[%s621_s0 + $0x50] sm:$0xff]  ;;  %v28_v45 = vld [vmem:[%s621_s0 + $0x58] sm:$0xff]  ;;  %v29_v51 = vld [vmem:[%s621_s0 + $0x60] sm:$0xff] }
   0x6   :  { %v224_v30 = vsel %vm67_vm1, %v175_v19, 0.0  ;;  %v225_v31 = vsel %vm67_vm1, %v176_v20, 0.0  ;;  %v85_v35 = vsel %vm67_vm1, %v26_v32, 0.0  ;;  %v180_v36 = vmul.f32 %v22_v13, %v22_v13  ;;  %v30_v57 = vld [vmem:[%s621_s0 + $0x68] sm:$0xff]  ;;  %v31_v63 = vld [vmem:[%s621_s0 + $0x70] sm:$0xff]  ;;  %v32_v5 = vld [vmem:[%s621_s0 + $0x78] sm:$0xff] }
   0x7   :  { %v74_v14 = vadd.f32 %v73_v9, %v72_v11  ;;  %v226_v34 = vadd.f32 %v225_v31, %v224_v30  ;;  %v227_v37 = vsel %vm67_vm1, %v177_v24, 0.0  ;;  %v229_v38 = vsel %vm67_vm1, %v178_v25, 0.0  ;;  %v33_v11 = vld [vmem:[%s621_s0 + $0x80] sm:$0xff] }
   0x8   :  { %v87_v42 = vsel %vm67_vm1, %v27_v39, 0.0  ;;  %v181_v43 = vmul.f32 %v23_v16, %v23_v16  ;;  %v231_v44 = vsel %vm67_vm1, %v179_v29, 0.0  ;;  %v89_v48 = vsel %vm67_vm1, %v28_v45, 0.0  ;;  %v36_v29 = vld [vmem:[%s621_s0 + $0x98] sm:$0xff] }
   0x9   :  { %v76_v17 = vadd.f32 %v75_v12, %v74_v14  ;;  %v228_v41 = vadd.f32 %v227_v37, %v226_v34  ;;  %v182_v49 = vmul.f32 %v24_v21, %v24_v21  ;;  %v233_v50 = vsel %vm67_vm1, %v180_v36, 0.0 }
   0xa   :  { %v91_v54 = vsel %vm67_vm1, %v29_v51, 0.0  ;;  %v183_v55 = vmul.f32 %v25_v26, %v25_v26  ;;  %v235_v56 = vsel %vm67_vm1, %v181_v43, 0.0  ;;  %v93_v60 = vsel %vm67_vm1, %v30_v57, 0.0 }
   0xb   :  { %v78_v22 = vadd.f32 %v77_v15, %v76_v17  ;;  %v230_v47 = vadd.f32 %v229_v38, %v228_v41  ;;  %v184_v61 = vmul.f32 %v26_v32, %v26_v32  ;;  %v237_v62 = vsel %vm67_vm1, %v182_v49, 0.0  ;;  %v34_v17 = vld [vmem:[%s621_s0 + $0x88] sm:$0xff] }
   0xc   :  { %v95_v2 = vsel %vm67_vm1, %v31_v63, 0.0  ;;  %v185_v3 = vmul.f32 %v27_v39, %v27_v39  ;;  %v239_v4 = vsel %vm67_vm1, %v183_v55, 0.0  ;;  %v97_v8 = vsel %vm67_vm1, %v32_v5, 0.0  ;;  %v38_v41 = vld [vmem:[%s621_s0 + $0xa8] sm:$0xff] }
   0xd   :  { %v80_v27 = vadd.f32 %v79_v18, %v78_v22  ;;  %v232_v53 = vadd.f32 %v231_v44, %v230_v47  ;;  %v186_v9 = vmul.f32 %v28_v45, %v28_v45  ;;  %v241_v10 = vsel %vm67_vm1, %v184_v61, 0.0  ;;  %v39_v47 = vld [vmem:[%s621_s0 + $0xb0] sm:$0xff] }
   0xe   :  { %v99_v14 = vsel %vm67_vm1, %v33_v11, 0.0  ;;  %v187_v15 = vmul.f32 %v29_v51, %v29_v51  ;;  %v243_v16 = vsel %vm67_vm1, %v185_v3, 0.0  ;;  %v101_v20 = vsel %vm67_vm1, %v34_v17, 0.0 }
   0xf   :  { %v82_v33 = vadd.f32 %v81_v23, %v80_v27  ;;  %v234_v59 = vadd.f32 %v233_v50, %v232_v53  ;;  %v188_v21 = vmul.f32 %v30_v57, %v30_v57  ;;  %v245_v22 = vsel %vm67_vm1, %v186_v9, 0.0  ;;  %v35_v23 = vld [vmem:[%s621_s0 + $0x90] sm:$0xff]  ;;  %v40_v53 = vld [vmem:[%s621_s0 + $0xb8] sm:$0xff] }
  0x10   :  { %v103_v26 = vsel %vm67_vm1, %v35_v23, 0.0  ;;  %v189_v27 = vmul.f32 %v31_v63, %v31_v63  ;;  %v105_v32 = vsel %vm67_vm1, %v36_v29, 0.0  ;;  %v191_v39 = vmul.f32 %v33_v11, %v33_v11 }
  0x11   :  { %v84_v40 = vadd.f32 %v83_v28, %v82_v33  ;;  %v236_v1 = vadd.f32 %v235_v56, %v234_v59  ;;  %v247_v28 = vsel %vm67_vm1, %v187_v15, 0.0  ;;  %v190_v33 = vmul.f32 %v32_v5, %v32_v5  ;;  %v41_v59 = vld [vmem:[%s621_s0 + $0xc0] sm:$0xff] }
  0x12   :  { %v249_v34 = vsel %vm67_vm1, %v188_v21, 0.0  ;;  %v109_v44 = vsel %vm67_vm1, %v38_v41, 0.0  ;;  %v192_v45 = vmul.f32 %v34_v17, %v34_v17  ;;  %v111_v50 = vsel %vm67_vm1, %v39_v47, 0.0 }
  0x13   :  { %v86_v46 = vadd.f32 %v85_v35, %v84_v40  ;;  %v238_v7 = vadd.f32 %v237_v62, %v236_v1  ;;  %v37_v35 = vld [vmem:[%s621_s0 + $0xa0] sm:$0xff]  ;;  %v251_v40 = vsel %vm67_vm1, %v189_v27, 0.0  ;;  %v193_v51 = vmul.f32 %v35_v23, %v35_v23  ;;  %v42_v1 = vld [vmem:[%s621_s0 + $0xc8] sm:$0xff] }
  0x14   :  { %v107_v38 = vsel %vm67_vm1, %v37_v35, 0.0  ;;  %v113_v56 = vsel %vm67_vm1, %v40_v53, 0.0  ;;  %v194_v57 = vmul.f32 %v36_v29, %v36_v29  ;;  %v115_v62 = vsel %vm67_vm1, %v41_v59, 0.0 }
  0x15   :  { %v88_v52 = vadd.f32 %v87_v42, %v86_v46  ;;  %v240_v13 = vadd.f32 %v239_v4, %v238_v7  ;;  %v253_v46 = vsel %vm67_vm1, %v190_v33, 0.0  ;;  %v195_v63 = vmul.f32 %v37_v35, %v37_v35  ;;  %v43_v7 = vld [vmem:[%s621_s0 + $0xd0] sm:$0xff] }
  0x16   :  { %v117_v4 = vsel %vm67_vm1, %v42_v1, 0.0  ;;  %v196_v5 = vmul.f32 %v38_v41, %v38_v41  ;;  %v197_v11 = vmul.f32 %v39_v47, %v39_v47  ;;  %v198_v17 = vmul.f32 %v40_v53, %v40_v53 }
  0x17   :  { %v90_v58 = vadd.f32 %v89_v48, %v88_v52  ;;  %v242_v19 = vadd.f32 %v241_v10, %v240_v13  ;;  %v255_v52 = vsel %vm67_vm1, %v191_v39, 0.0  ;;  %v119_v10 = vsel %vm67_vm1, %v43_v7, 0.0  ;;  %v44_v13 = vld [vmem:[%s621_s0 + $0xd8] sm:$0xff] }
  0x18   :  { %v199_v23 = vmul.f32 %v41_v59, %v41_v59  ;;  %v200_v29 = vmul.f32 %v42_v1, %v42_v1  ;;  %v201_v35 = vmul.f32 %v43_v7, %v43_v7  ;;  %v202_v41 = vmul.f32 %v44_v13, %v44_v13 }
  0x19   :  { %v92_v0 = vadd.f32 %v91_v54, %v90_v58  ;;  %v244_v25 = vadd.f32 %v243_v16, %v242_v19  ;;  %v257_v58 = vsel %vm67_vm1, %v192_v45, 0.0  ;;  %v121_v16 = vsel %vm67_vm1, %v44_v13, 0.0  ;;  %v45_v19 = vld [vmem:[%s621_s0 + $0xe0] sm:$0xff] }
  0x1a   :  { %v203_v47 = vmul.f32 %v45_v19, %v45_v19 }
  0x1b   :  { %v94_v6 = vadd.f32 %v93_v60, %v92_v0  ;;  %v246_v31 = vadd.f32 %v245_v22, %v244_v25  ;;  %v259_v0 = vsel %vm67_vm1, %v193_v51, 0.0  ;;  %v123_v22 = vsel %vm67_vm1, %v45_v19, 0.0  ;;  %v46_v25 = vld [vmem:[%s621_s0 + $0xe8] sm:$0xff] }
  0x1c   :  { %v204_v53 = vmul.f32 %v46_v25, %v46_v25 }
  0x1d   :  { %v96_v12 = vadd.f32 %v95_v2, %v94_v6  ;;  %v248_v37 = vadd.f32 %v247_v28, %v246_v31  ;;  %v261_v6 = vsel %vm67_vm1, %v194_v57, 0.0  ;;  %v125_v28 = vsel %vm67_vm1, %v46_v25, 0.0  ;;  %v47_v31 = vld [vmem:[%s621_s0 + $0xf0] sm:$0xff] }
  0x1e   :  { %v205_v59 = vmul.f32 %v47_v31, %v47_v31 }
  0x1f   :  { %v98_v18 = vadd.f32 %v97_v8, %v96_v12  ;;  %v250_v43 = vadd.f32 %v249_v34, %v248_v37  ;;  %v263_v12 = vsel %vm67_vm1, %v195_v63, 0.0  ;;  %v127_v34 = vsel %vm67_vm1, %v47_v31, 0.0  ;;  %v48_v37 = vld [vmem:[%s621_s0 + $0xf8] sm:$0xff] }
  0x20   :  { %v206_v1 = vmul.f32 %v48_v37, %v48_v37 }
  0x21   :  { %v100_v24 = vadd.f32 %v99_v14, %v98_v18  ;;  %v252_v49 = vadd.f32 %v251_v40, %v250_v43  ;;  %v265_v18 = vsel %vm67_vm1, %v196_v5, 0.0  ;;  %v129_v40 = vsel %vm67_vm1, %v48_v37, 0.0  ;;  %v49_v43 = vld [vmem:[%s621_s0 + $0x100] sm:$0xff] }
  0x22   :  { %v207_v7 = vmul.f32 %v49_v43, %v49_v43 }
  0x23   :  { %v102_v30 = vadd.f32 %v101_v20, %v100_v24  ;;  %v254_v55 = vadd.f32 %v253_v46, %v252_v49  ;;  %v267_v24 = vsel %vm67_vm1, %v197_v11, 0.0  ;;  %v131_v46 = vsel %vm67_vm1, %v49_v43, 0.0  ;;  %v50_v49 = vld [vmem:[%s621_s0 + $0x108] sm:$0xff] }
  0x24   :  { %v208_v13 = vmul.f32 %v50_v49, %v50_v49 }
  0x25   :  { %v104_v36 = vadd.f32 %v103_v26, %v102_v30  ;;  %v256_v61 = vadd.f32 %v255_v52, %v254_v55  ;;  %v269_v30 = vsel %vm67_vm1, %v198_v17, 0.0  ;;  %v133_v52 = vsel %vm67_vm1, %v50_v49, 0.0  ;;  %v51_v55 = vld [vmem:[%s621_s0 + $0x110] sm:$0xff] }
  0x26   :  { %v209_v19 = vmul.f32 %v51_v55, %v51_v55 }
  0x27   :  { %v106_v42 = vadd.f32 %v105_v32, %v104_v36  ;;  %v258_v3 = vadd.f32 %v257_v58, %v256_v61  ;;  %v271_v36 = vsel %vm67_vm1, %v199_v23, 0.0  ;;  %v135_v58 = vsel %vm67_vm1, %v51_v55, 0.0  ;;  %v52_v61 = vld [vmem:[%s621_s0 + $0x118] sm:$0xff] }
  0x28   :  { %v210_v25 = vmul.f32 %v52_v61, %v52_v61 }
  0x29   :  { %v108_v48 = vadd.f32 %v107_v38, %v106_v42  ;;  %v260_v9 = vadd.f32 %v259_v0, %v258_v3  ;;  %v273_v42 = vsel %vm67_vm1, %v200_v29, 0.0  ;;  %v137_v0 = vsel %vm67_vm1, %v52_v61, 0.0  ;;  %v53_v3 = vld [vmem:[%s621_s0 + $0x120] sm:$0xff] }
  0x2a   :  { %v211_v31 = vmul.f32 %v53_v3, %v53_v3 }
  0x2b   :  { %v110_v54 = vadd.f32 %v109_v44, %v108_v48  ;;  %v262_v15 = vadd.f32 %v261_v6, %v260_v9  ;;  %v275_v48 = vsel %vm67_vm1, %v201_v35, 0.0  ;;  %v139_v6 = vsel %vm67_vm1, %v53_v3, 0.0  ;;  %v54_v9 = vld [vmem:[%s621_s0 + $0x128] sm:$0xff] }
  0x2c   :  { %v212_v37 = vmul.f32 %v54_v9, %v54_v9 }
  0x2d   :  { %v112_v60 = vadd.f32 %v111_v50, %v110_v54  ;;  %v264_v21 = vadd.f32 %v263_v12, %v262_v15  ;;  %v277_v54 = vsel %vm67_vm1, %v202_v41, 0.0  ;;  %v141_v12 = vsel %vm67_vm1, %v54_v9, 0.0  ;;  %v55_v15 = vld [vmem:[%s621_s0 + $0x130] sm:$0xff] }
  0x2e   :  { %v213_v43 = vmul.f32 %v55_v15, %v55_v15 }
  0x2f   :  { %v114_v2 = vadd.f32 %v113_v56, %v112_v60  ;;  %v266_v27 = vadd.f32 %v265_v18, %v264_v21  ;;  %v279_v60 = vsel %vm67_vm1, %v203_v47, 0.0  ;;  %v143_v18 = vsel %vm67_vm1, %v55_v15, 0.0  ;;  %v56_v21 = vld [vmem:[%s621_s0 + $0x138] sm:$0xff] }
  0x30   :  { %v214_v49 = vmul.f32 %v56_v21, %v56_v21 }
  0x31   :  { %v116_v8 = vadd.f32 %v115_v62, %v114_v2  ;;  %v268_v33 = vadd.f32 %v267_v24, %v266_v27  ;;  %v281_v2 = vsel %vm67_vm1, %v204_v53, 0.0  ;;  %v145_v24 = vsel %vm67_vm1, %v56_v21, 0.0  ;;  %v57_v27 = vld [vmem:[%s621_s0 + $0x140] sm:$0xff] }
  0x32   :  { %v215_v55 = vmul.f32 %v57_v27, %v57_v27 }
  0x33   :  { %v118_v14 = vadd.f32 %v117_v4, %v116_v8  ;;  %v270_v39 = vadd.f32 %v269_v30, %v268_v33  ;;  %v283_v8 = vsel %vm67_vm1, %v205_v59, 0.0  ;;  %v147_v30 = vsel %vm67_vm1, %v57_v27, 0.0  ;;  %v58_v33 = vld [vmem:[%s621_s0 + $0x148] sm:$0xff] }
  0x34   :  { %v216_v61 = vmul.f32 %v58_v33, %v58_v33 }
  0x35   :  { %v120_v20 = vadd.f32 %v119_v10, %v118_v14  ;;  %v272_v45 = vadd.f32 %v271_v36, %v270_v39  ;;  %v285_v14 = vsel %vm67_vm1, %v206_v1, 0.0  ;;  %v149_v36 = vsel %vm67_vm1, %v58_v33, 0.0  ;;  %v59_v39 = vld [vmem:[%s621_s0 + $0x150] sm:$0xff] }
  0x36   :  { %v217_v3 = vmul.f32 %v59_v39, %v59_v39 }
  0x37   :  { %v122_v26 = vadd.f32 %v121_v16, %v120_v20  ;;  %v274_v51 = vadd.f32 %v273_v42, %v272_v45  ;;  %v287_v20 = vsel %vm67_vm1, %v207_v7, 0.0  ;;  %v151_v42 = vsel %vm67_vm1, %v59_v39, 0.0  ;;  %v60_v45 = vld [vmem:[%s621_s0 + $0x158] sm:$0xff] }
  0x38   :  { %v218_v9 = vmul.f32 %v60_v45, %v60_v45 }
  0x39   :  { %v124_v32 = vadd.f32 %v123_v22, %v122_v26  ;;  %v276_v57 = vadd.f32 %v275_v48, %v274_v51  ;;  %v289_v26 = vsel %vm67_vm1, %v208_v13, 0.0  ;;  %v153_v48 = vsel %vm67_vm1, %v60_v45, 0.0  ;;  %v61_v51 = vld [vmem:[%s621_s0 + $0x160] sm:$0xff] }
  0x3a   :  { %v219_v15 = vmul.f32 %v61_v51, %v61_v51 }
  0x3b   :  { %v126_v38 = vadd.f32 %v125_v28, %v124_v32  ;;  %v278_v63 = vadd.f32 %v277_v54, %v276_v57  ;;  %v291_v32 = vsel %vm67_vm1, %v209_v19, 0.0  ;;  %v155_v54 = vsel %vm67_vm1, %v61_v51, 0.0  ;;  %v62_v57 = vld [vmem:[%s621_s0 + $0x168] sm:$0xff] }
  0x3c   :  { %v220_v19 = vmul.f32 %v62_v57, %v62_v57 }
  0x3d   :  { %v128_v44 = vadd.f32 %v127_v34, %v126_v38  ;;  %v280_v5 = vadd.f32 %v279_v60, %v278_v63  ;;  %v293_v38 = vsel %vm67_vm1, %v210_v25, 0.0  ;;  %v157_v60 = vsel %vm67_vm1, %v62_v57, 0.0  ;;  %v63_v63 = vld [vmem:[%s621_s0 + $0x170] sm:$0xff] }
  0x3f   :  { %v130_v50 = vadd.f32 %v129_v40, %v128_v44  ;;  %v282_v11 = vadd.f32 %v281_v2, %v280_v5  ;;  %v295_v44 = vsel %vm67_vm1, %v211_v31, 0.0  ;;  %v159_v2 = vsel %vm67_vm1, %v63_v63, 0.0  ;;  %v64_v5 = vld [vmem:[%s621_s0 + $0x178] sm:$0xff] }
  0x40   :  { %v222_v27 = vmul.f32 %v64_v5, %v64_v5 }
  0x41   :  { %v132_v56 = vadd.f32 %v131_v46, %v130_v50  ;;  %v284_v17 = vadd.f32 %v283_v8, %v282_v11  ;;  %v297_v50 = vsel %vm67_vm1, %v212_v37, 0.0  ;;  %v161_v8 = vsel %vm67_vm1, %v64_v5, 0.0  ;;  %v65_v11 = vld [vmem:[%s621_s0 + $0x180] sm:$0xff] }
  0x42   :  { %v223_v31 = vmul.f32 %v65_v11, %v65_v11 }
  0x43   :  { %v134_v62 = vadd.f32 %v133_v52, %v132_v56  ;;  %v286_v23 = vadd.f32 %v285_v14, %v284_v17  ;;  %v299_v56 = vsel %vm67_vm1, %v213_v43, 0.0  ;;  %v163_v14 = vsel %vm67_vm1, %v65_v11, 0.0 }
  0x45   :  { %v136_v4 = vadd.f32 %v135_v58, %v134_v62  ;;  %v288_v29 = vadd.f32 %v287_v20, %v286_v23  ;;  %v301_v62 = vsel %vm67_vm1, %v214_v49, 0.0  ;;  %v309_v20 = vsel %vm67_vm1, %v218_v9, 0.0 }
  0x46   :  { %v221_v23 = vmul.f32 %v63_v63, %v63_v63 }
  0x47   :  { %v138_v10 = vadd.f32 %v137_v0, %v136_v4  ;;  %v290_v35 = vadd.f32 %v289_v26, %v288_v29  ;;  %v303_v4 = vsel %vm67_vm1, %v215_v55, 0.0 }
  0x49   :  { %v140_v16 = vadd.f32 %v139_v6, %v138_v10  ;;  %v292_v41 = vadd.f32 %v291_v32, %v290_v35  ;;  %v305_v10 = vsel %vm67_vm1, %v216_v61, 0.0  ;;  %v315_v32 = vsel %vm67_vm1, %v221_v23, 0.0 }
  0x4a   :  { %v317_v35 = vsel %vm67_vm1, %v222_v27, 0.0 }
  0x4b   :  { %v142_v22 = vadd.f32 %v141_v12, %v140_v16  ;;  %v294_v47 = vadd.f32 %v293_v38, %v292_v41  ;;  %v307_v16 = vsel %vm67_vm1, %v217_v3, 0.0  ;;  %v319_v38 = vsel %vm67_vm1, %v223_v31, 0.0  ;;  %v66_v41 = vld [vmem:[%s622_s1] sm:$0x1] }
  0x4d   :  { %v144_v28 = vadd.f32 %v143_v18, %v142_v22  ;;  %v296_v53 = vadd.f32 %v295_v44, %v294_v47 }
  0x4f   :  { %v146_v34 = vadd.f32 %v145_v24, %v144_v28  ;;  %v298_v59 = vadd.f32 %v297_v50, %v296_v53  ;;  %v311_v24 = vsel %vm67_vm1, %v219_v15, 0.0  ;;  %v313_v28 = vsel %vm67_vm1, %v220_v19, 0.0  ;;  %v174_v50 = vld [vmem:[%s623_s2] sm:$0x1] }
  0x51   :  { %v148_v40 = vadd.f32 %v147_v30, %v146_v34  ;;  %v300_v1 = vadd.f32 %v299_v56, %v298_v59 }
  0x53   :  { %v150_v46 = vadd.f32 %v149_v36, %v148_v40  ;;  %v302_v7 = vadd.f32 %v301_v62, %v300_v1 }
  0x55   :  { %v152_v52 = vadd.f32 %v151_v42, %v150_v46  ;;  %v304_v13 = vadd.f32 %v303_v4, %v302_v7 }
  0x57   :  { %v154_v58 = vadd.f32 %v153_v48, %v152_v52  ;;  %v306_v18 = vadd.f32 %v305_v10, %v304_v13 }
  0x59   :  { %v156_v0 = vadd.f32 %v155_v54, %v154_v58  ;;  %v308_v22 = vadd.f32 %v307_v16, %v306_v18 }
  0x5b   :  { %v158_v6 = vadd.f32 %v157_v60, %v156_v0  ;;  %v310_v26 = vadd.f32 %v309_v20, %v308_v22 }
  0x5d   :  { %v160_v12 = vadd.f32 %v159_v2, %v158_v6  ;;  %v312_v30 = vadd.f32 %v311_v24, %v310_v26 }
  0x5f   :  { %v162_v17 = vadd.f32 %v161_v8, %v160_v12  ;;  %v314_v34 = vadd.f32 %v313_v28, %v312_v30 }
  0x61   :  { %v164_v21 = vadd.f32 %v163_v14, %v162_v17  ;;  %v316_v37 = vadd.f32 %v315_v32, %v314_v34 }
  0x63   :  { %v165_v25 = vrot.slane %v164_v21, 4  ;;  %v318_v40 = vadd.f32 %v317_v35, %v316_v37 }
  0x65   :  { %v166_v29 = vadd.f32 %v165_v25, %v164_v21  ;;  %v320_v43 = vadd.f32 %v319_v38, %v318_v40 }
  0x67   :  { %v167_v33 = vrot.slane %v166_v29, 2  ;;  %v321_v45 = vrot.slane %v320_v43, 4 }
  0x69   :  { %v168_v36 = vadd.f32 %v167_v33, %v166_v29  ;;  %v322_v46 = vadd.f32 %v321_v45, %v320_v43 }
  0x6b   :  { %v169_v39 = vrot.slane %v168_v36, 1  ;;  %v323_v47 = vrot.slane %v322_v46, 2 }
  0x6d   :  { %v170_v42 = vadd.f32 %v169_v39, %v168_v36  ;;  %v324_v48 = vadd.f32 %v323_v47, %v322_v46 }
  0x6f   :  { %v171_v44 = vadd.f32 %v170_v42, %v66_v41  ;;  %v325_v49 = vrot.slane %v324_v48, 1 }
  0x71   :  { %173 = vst.msk [vmem:[%s622_s1] sm:$0x1] %vm14_vm0, %v171_v44  ;;  %v326_v51 = vadd.f32 %v325_v49, %v324_v48 }
  0x73   :  { %v327_v52 = vadd.f32 %v326_v51, %v174_v50 }
  0x75   :  { %328 = vst.msk [vmem:[%s623_s2] sm:$0x1] %vm14_vm0, %v327_v52 }

// kernel: decoder_forward.10
= control target key start
LH: loop header
LB: loop body
LE: loop exit
PB: predicated region body
PF: predicated region fallthrough
CT: control target
= control target key end

     0   :  { %11 = vsyncpa [#allocation3], 0  ;;  %s8058_s0 = inlined_call_operand.vmem [shape: bf16[8,1024], index: 0, kind: input, shape index: {}]   ;;  %s8059_s1 = inlined_call_operand.hbm [shape: bf16[1024,6272], index: 1, kind: input, shape index: {}]   ;;  %s8060_s2 = inlined_call_operand.hbm [shape: f32[1,6272], index: 2, kind: input, shape index: {}]   ;;  %s8061_s3 = inlined_call_operand.vmem [shape: f32[8,6272], index: 3, kind: output, shape index: {0}]   ;;  %s8062_s4 = inlined_call_operand.vmem [shape: f32[1,6272], index: 4, kind: output, shape index: {1}]   ;;  %s8063_s5 = inlined_call_operand.vmem [shape: f32[1,6272], index: 5, kind: output, shape index: {2}]  }
   0x1   :  { %13 = vsyncpa [#allocation3 + $0x1], 0 }
   0x2   :  { %14 = vsyncpa [#allocation5], 0 }
   0x3   :  { %16 = vsyncpa [#allocation5 + $0x1], 0  ;;  %s6803_s18 = smov 0   ;;  %s6805_s19 = smov 0  }
   0x4   :  { %s6807_s20 = smov 0   ;;  %s6809_s21 = smov 0  }
   0x5   :  { %s6811_s22 = smov 0   ;;  %s6813_s23 = smov 0  }
   0x6 LB: > { %s4332_s24 = sadd.s32 4294967295, %s6767_s23   ;;  %s34_s25 = sadd.s32 1, %s6763_s22  ;;  %s6767_s23 = sphi %s6813_s23, %s22_s23   ;;  %s6763_s22 = sphi %s6811_s22, %s8073_s22   ;;  %s6759_s21 = sphi %s6809_s21, %s8072_s21   ;;  %s6755_s20 = sphi %s6807_s20, %s8071_s20   ;;  %s6751_s19 = sphi %s6805_s19, %s8070_s19   ;;  %s6747_s18 = sphi %s6803_s18, %s8069_s18  }
   0x7   : > { %p36_p0 = scmp.ge.s32.totalorder %s34_s25, 7  ;;  %s67_s26 = sadd.s32 1, %s6755_s20 }
   0x8   : > { %p74_p1 = scmp.ne.s32.totalorder %s6755_s20, %s6751_s19  ;;  %p75_p2 = scmp.eq.s32.totalorder %s6767_s23, 0 }
   0x9   : > { %s8075_s25 = smov (%p36_p0, %s34_s25), 0  ;;  %p80_p4 = scmp.ne.s32.totalorder %s6751_s19, %s6747_s18 }
   0xa   : > { %p76_p3 = por %p75_p2, %p74_p1  ;;  %s64_s27 = ssub.s32 %s6763_s22, %s8075_s25 }
   0xb   : > { %p81_p5 = scmp.eq.s32.totalorder %s4332_s24, 0  ;;  %p65_p6 = scmp.eq.s32.totalorder %s64_s27, 0 }
   0xc   : > { %p6598_p8 = scmp.lt.s32.totalorder %s6767_s23, 7  ;;  %s6851_s30 = sand.u32 1, %s6755_s20  }
   0xd   : > { %p6842_p7 = por %p81_p5, %p80_p4  ;;  %s6134_s6 = smul.u32 28, %s6763_s22 }
   0xe   : > { %s6848_s29 = scalar_select %p65_p6, %s6755_s20, %s67_s26  }
   0xf   : > { %s6583_s7 = smul.u32 3584, %s6851_s30  ;;  %s227_s10 = scalar_lea.hbm %s8059_s1, %s6134_s6 }
  0x10   : > { %p6858_p9 = pnand %p6598_p8, %p76_p3  ;;  %s228_s12 = sshll.u32 %s227_s10, 4  ;;  %s229_s12 = int_to_ptr.hbm [resolvable:$true] %s228_s12 }
  0x11   : > { %s222_s13 = scalar_lea.vmem [#allocation2], %s6583_s7  ;;  %p4338_p10 = scmp.ge.s32.totalorder %s6767_s23, 1 }
  0x12   : > { %s230_s14 = sshll.u32 %s222_s13, 4  ;;  %s219_s15 = scalar_lea.sflag [#allocation3], %s6851_s30  ;;  %s231_s14 = int_to_ptr.vmem [resolvable:$true] %s230_s14 }
  0x13   : > { %s6769_s16 = smov 3136   ;;  %s6770_s17 = smov 448  }
  0x14   : > { %s6771_s18 = smov 28   ;;  %p257_p11 = scmp.lt.s32.totalorder %s6767_s23, 8 }
  0x15   : > { %6594 = dma.hbm_to_vmem [thread:$0]  (!%p6858_p9), %s229_s12, 57344, %s231_s14, %s219_s15, %s6769_s16, %s6770_s17, %s6771_s18  }
  0x16   : > { %s6584_s24 = smul.u32 7, %s6851_s30  ;;  %p258_p12 = pnand %p4338_p10, %p257_p11 }
  0x17   : > { %s245_s26 = smul.u32 7, %s6763_s22  ;;  %s241_s13 = scalar_lea.sflag [#allocation5], %s6851_s30 }
  0x18   : > { %s244_s7 = scalar_lea.vmem [#allocation4], %s6584_s24  ;;  %261 = sbr.rel (%p258_p12) target bundleno = 649 (0x289), region = 32 }
  0x19   : > { %s248_s8 = scalar_lea.hbm %s8060_s2, %s245_s26  ;;  %s252_s9 = sshll.u32 %s244_s7, 4  ;;  %s253_s9 = int_to_ptr.vmem [resolvable:$true] %s252_s9 }
  0x1a   : > { %s250_s10 = sshll.u32 %s248_s8, 4  ;;  %s263_s12 = sand.u32 (!%p258_p12), 1, %s6751_s19   ;;  %s251_s10 = int_to_ptr.hbm [resolvable:$true] %s250_s10 }
  0x1b   : > { %6597 = dma.hbm_to_vmem [thread:$0]  (!%p6858_p9), %s251_s10, 112, %s253_s9, %s241_s13  }
  0x1c   : > { %s6585_s14 = smul.u32 (!%p258_p12), 3584, %s263_s12  ;;  %s264_s15 = scalar_lea.sflag (!%p258_p12), [#allocation3], %s263_s12 }
  0x1e   : > { %s6876_s16 = scalar_lea.vmem [#allocation2], %s6585_s14 }
  0x1f   : > { %6738 = dma.done.wait (%p6842_p7), %s264_s15, 57344  }
  0x20   : > { %6740 = vsyncadd (%p6842_p7), %s264_s15, 4294909952  ;;  %s6586_s17 = smul.u32 7, %s263_s12  ;;  %s274_s18 = scalar_lea.sflag [#allocation5], %s263_s12 }
  0x22   : > { %s6882_s24 = scalar_lea.vmem [#allocation4], %s6586_s17 }
  0x23   : > { %6742 = dma.done.wait (%p6842_p7), %s274_s18, 112  }
  0x24   : > { %6744 = vsyncadd (%p6842_p7), %s274_s18, 4294967184  ;;  %v4538_v0 = vld [vmem:[%s6876_s16 + $0x188] sm:$0xf]  ;;  %v6187_v1 = vld [vmem:[%s6876_s16 + $0x1a0] sm:$0xf0]  ;;  %s334_s9 = smul.u32 7, %s6759_s21 }
  0x25   : > { %v4762_v2 = vld [vmem:[%s6876_s16 + $0x348] sm:$0xf]  ;;  %v4539_v3 = vor.u32 %v6187_v1, %v4538_v0  ;;  %v6243_v4 = vld [vmem:[%s6876_s16 + $0x360] sm:$0xf0]  ;;  %v4510_v11 = vld [vmem:[%s6876_s16 + $0x150] sm:$0xf] }
  0x26   : > { %v4986_v5 = vld [vmem:[%s6876_s16 + $0x508] sm:$0xf]  ;;  %v6299_v6 = vld [vmem:[%s6876_s16 + $0x520] sm:$0xf0]  ;;  %v4763_v7 = vor.u32 %v6243_v4, %v4762_v2  ;;  %v6180_v13 = vld [vmem:[%s6876_s16 + $0x168] sm:$0xf0] }
  0x27   : > { %v4987_v8 = vor.u32 %v6299_v6, %v4986_v5  ;;  %v5210_v9 = vld [vmem:[%s6876_s16 + $0x6c8] sm:$0xf]  ;;  %v6355_v10 = vld [vmem:[%s6876_s16 + $0x6e0] sm:$0xf0]  ;;  %3218 = vmatpush.bf16.msra.mxu0 %v4539_v3  ;;  %v4734_v14 = vld [vmem:[%s6876_s16 + $0x310] sm:$0xf]  ;;  %v4511_v16 = vor.u32 %v6180_v13, %v4510_v11 }
  0x28   : > { %v5211_v12 = vor.u32 %v6355_v10, %v5210_v9  ;;  %v6236_v15 = vld [vmem:[%s6876_s16 + $0x328] sm:$0xf0]  ;;  %3231 = vmatpush.bf16.msra.mxu1 %v4763_v7  ;;  %v4958_v18 = vld [vmem:[%s6876_s16 + $0x4d0] sm:$0xf]  ;;  %v4482_v23 = vld [vmem:[%s6876_s16 + $0x118] sm:$0xf] }
  0x29   : > { %3244 = vmatpush.bf16.msra.mxu2 %v4987_v8  ;;  %v4735_v17 = vor.u32 %v6236_v15, %v4734_v14  ;;  %v6292_v19 = vld [vmem:[%s6876_s16 + $0x4e8] sm:$0xf0]  ;;  %v5182_v20 = vld [vmem:[%s6876_s16 + $0x690] sm:$0xf]  ;;  %v6173_v24 = vld [vmem:[%s6876_s16 + $0x130] sm:$0xf0] }
  0x2a   : > { %3257 = vmatpush.bf16.msra.mxu3 %v5211_v12  ;;  %v4959_v21 = vor.u32 %v6292_v19, %v4958_v18  ;;  %v6348_v22 = vld [vmem:[%s6876_s16 + $0x6a8] sm:$0xf0]  ;;  %v4706_v26 = vld [vmem:[%s6876_s16 + $0x2d8] sm:$0xf]  ;;  %v6229_v27 = vld [vmem:[%s6876_s16 + $0x2f0] sm:$0xf0]  ;;  %v4483_v29 = vor.u32 %v6173_v24, %v4482_v23 }
  0x2b   : > { %v5183_v25 = vor.u32 %v6348_v22, %v5182_v20  ;;  %v4930_v28 = vld [vmem:[%s6876_s16 + $0x498] sm:$0xf]  ;;  %3219 = vmatpush.bf16.msra.mxu0 %v4511_v16  ;;  %v6285_v30 = vld [vmem:[%s6876_s16 + $0x4b0] sm:$0xf0]  ;;  %v4707_v33 = vor.u32 %v6229_v27, %v4706_v26  ;;  %v4454_v35 = vld [vmem:[%s6876_s16 + $0xe0] sm:$0xf] }
  0x2c   : > { %v5154_v31 = vld [vmem:[%s6876_s16 + $0x658] sm:$0xf]  ;;  %v6341_v32 = vld [vmem:[%s6876_s16 + $0x670] sm:$0xf0]  ;;  %3232 = vmatpush.bf16.msra.mxu1 %v4735_v17  ;;  %v4931_v34 = vor.u32 %v6285_v30, %v4930_v28  ;;  %v6166_v36 = vld [vmem:[%s6876_s16 + $0xf8] sm:$0xf0] }
  0x2d   : > { %3245 = vmatpush.bf16.msra.mxu2 %v4959_v21  ;;  %v4678_v37 = vld [vmem:[%s6876_s16 + $0x2a0] sm:$0xf]  ;;  %v5155_v38 = vor.u32 %v6341_v32, %v5154_v31  ;;  %v6222_v39 = vld [vmem:[%s6876_s16 + $0x2b8] sm:$0xf0]  ;;  %v4455_v44 = vor.u32 %v6166_v36, %v4454_v35  ;;  %v4426_v47 = vld [vmem:[%s6876_s16 + $0xa8] sm:$0xf] }
  0x2e   : > { %3258 = vmatpush.bf16.msra.mxu3 %v5183_v25  ;;  %v4902_v40 = vld [vmem:[%s6876_s16 + $0x460] sm:$0xf]  ;;  %v6278_v41 = vld [vmem:[%s6876_s16 + $0x478] sm:$0xf0]  ;;  %v4679_v45 = vor.u32 %v6222_v39, %v4678_v37  ;;  %v6159_v48 = vld [vmem:[%s6876_s16 + $0xc0] sm:$0xf0] }
  0x2f   : > { %v5126_v42 = vld [vmem:[%s6876_s16 + $0x620] sm:$0xf]  ;;  %v6334_v43 = vld [vmem:[%s6876_s16 + $0x638] sm:$0xf0]  ;;  %3220 = vmatpush.bf16.msra.mxu0 %v4483_v29  ;;  %v4903_v46 = vor.u32 %v6278_v41, %v4902_v40  ;;  %v4650_v49 = vld [vmem:[%s6876_s16 + $0x268] sm:$0xf]  ;;  %v4427_v56 = vor.u32 %v6159_v48, %v4426_v47 }
  0x30   : > { %3233 = vmatpush.bf16.msra.mxu1 %v4707_v33  ;;  %v5127_v50 = vor.u32 %v6334_v43, %v5126_v42  ;;  %v6215_v51 = vld [vmem:[%s6876_s16 + $0x280] sm:$0xf0]  ;;  %v4874_v52 = vld [vmem:[%s6876_s16 + $0x428] sm:$0xf]  ;;  %v4398_v59 = vld [vmem:[%s6876_s16 + $0x70] sm:$0xf] }
  0x31   : > { %3246 = vmatpush.bf16.msra.mxu2 %v4931_v34  ;;  %v6271_v53 = vld [vmem:[%s6876_s16 + $0x440] sm:$0xf0]  ;;  %v5098_v54 = vld [vmem:[%s6876_s16 + $0x5e8] sm:$0xf]  ;;  %v4651_v57 = vor.u32 %v6215_v51, %v4650_v49  ;;  %v6152_v60 = vld [vmem:[%s6876_s16 + $0x88] sm:$0xf0] }
  0x32   : > { %3259 = vmatpush.bf16.msra.mxu3 %v5155_v38  ;;  %v6327_v55 = vld [vmem:[%s6876_s16 + $0x600] sm:$0xf0]  ;;  %v4875_v58 = vor.u32 %v6271_v53, %v4874_v52  ;;  %v4622_v61 = vld [vmem:[%s6876_s16 + $0x230] sm:$0xf]  ;;  %v6208_v63 = vld [vmem:[%s6876_s16 + $0x248] sm:$0xf0]  ;;  %v4399_v4 = vor.u32 %v6152_v60, %v4398_v59 }
  0x33   : > { %3221 = vmatpush.bf16.msra.mxu0 %v4455_v44  ;;  %v5099_v62 = vor.u32 %v6327_v55, %v5098_v54  ;;  %v4846_v0 = vld [vmem:[%s6876_s16 + $0x3f0] sm:$0xf]  ;;  %v6264_v1 = vld [vmem:[%s6876_s16 + $0x408] sm:$0xf0]  ;;  %v4623_v5 = vor.u32 %v6208_v63, %v4622_v61  ;;  %v4370_v7 = vld [vmem:[%s6876_s16 + $0x38] sm:$0xf] }
  0x34   : > { %3234 = vmatpush.bf16.msra.mxu1 %v4679_v45  ;;  %v5070_v2 = vld [vmem:[%s6876_s16 + $0x5b0] sm:$0xf]  ;;  %v6320_v3 = vld [vmem:[%s6876_s16 + $0x5c8] sm:$0xf0]  ;;  %v4847_v6 = vor.u32 %v6264_v1, %v4846_v0  ;;  %v6145_v8 = vld [vmem:[%s6876_s16 + $0x50] sm:$0xf0] }
  0x35   : > { %3247 = vmatpush.bf16.msra.mxu2 %v4903_v46  ;;  %v4594_v9 = vld [vmem:[%s6876_s16 + $0x1f8] sm:$0xf]  ;;  %v5071_v10 = vor.u32 %v6320_v3, %v5070_v2  ;;  %v6201_v11 = vld [vmem:[%s6876_s16 + $0x210] sm:$0xf0]  ;;  %v4371_v16 = vor.u32 %v6145_v8, %v4370_v7  ;;  %v4342_v17 = vld [vmem:[%s6876_s16] sm:$0xf] }
  0x36   : > { %3260 = vmatpush.bf16.msra.mxu3 %v5127_v50  ;;  %v4818_v12 = vld [vmem:[%s6876_s16 + $0x3b8] sm:$0xf]  ;;  %v6257_v13 = vld [vmem:[%s6876_s16 + $0x3d0] sm:$0xf0]  ;;  %v6138_v18 = vld [vmem:[%s6876_s16 + $0x18] sm:$0xf0]  ;;  %v4595_v19 = vor.u32 %v6201_v11, %v4594_v9 }
  0x37   : > { %3222 = vmatpush.bf16.msra.mxu0 %v4427_v56  ;;  %v5042_v14 = vld [vmem:[%s6876_s16 + $0x578] sm:$0xf]  ;;  %v6313_v15 = vld [vmem:[%s6876_s16 + $0x590] sm:$0xf0]  ;;  %v4819_v20 = vor.u32 %v6257_v13, %v4818_v12  ;;  %v4566_v21 = vld [vmem:[%s6876_s16 + $0x1c0] sm:$0xf]  ;;  %v4343_v31 = vor.u32 %v6138_v18, %v4342_v17 }
  0x38   : > { %3235 = vmatpush.bf16.msra.mxu1 %v4651_v57  ;;  %v6194_v22 = vld [vmem:[%s6876_s16 + $0x1d8] sm:$0xf0]  ;;  %v4790_v23 = vld [vmem:[%s6876_s16 + $0x380] sm:$0xf]  ;;  %v5043_v24 = vor.u32 %v6313_v15, %v5042_v14  ;;  %v5434_v28 = vld [vmem:[%s6876_s16 + $0x888] sm:$0xf] }
  0x39   : > { %3248 = vmatpush.bf16.msra.mxu2 %v4875_v58  ;;  %v6250_v25 = vld [vmem:[%s6876_s16 + $0x398] sm:$0xf0]  ;;  %v5014_v26 = vld [vmem:[%s6876_s16 + $0x540] sm:$0xf]  ;;  %v6411_v29 = vld [vmem:[%s6876_s16 + $0x8a0] sm:$0xf0]  ;;  %v4567_v35 = vor.u32 %v6194_v22, %v4566_v21 }
  0x3a   : > { %3261 = vmatpush.bf16.msra.mxu3 %v5099_v62  ;;  %v6306_v27 = vld [vmem:[%s6876_s16 + $0x558] sm:$0xf0]  ;;  %v5658_v30 = vld [vmem:[%s6876_s16 + $0xa48] sm:$0xf]  ;;  %v6467_v32 = vld [vmem:[%s6876_s16 + $0xa60] sm:$0xf0]  ;;  %v4791_v36 = vor.u32 %v6250_v25, %v4790_v23  ;;  %v5435_v40 = vor.u32 %v6411_v29, %v5434_v28 }
  0x3b   : > { %3223 = vmatpush.bf16.msra.mxu0 %v4399_v4  ;;  %v5882_v33 = vld [vmem:[%s6876_s16 + $0xc08] sm:$0xf]  ;;  %v6523_v34 = vld [vmem:[%s6876_s16 + $0xc20] sm:$0xf0]  ;;  %v5015_v39 = vor.u32 %v6306_v27, %v5014_v26  ;;  %v5659_v41 = vor.u32 %v6467_v32, %v5658_v30  ;;  %v5406_v43 = vld [vmem:[%s6876_s16 + $0x850] sm:$0xf] }
  0x3c   : > { %3236 = vmatpush.bf16.msra.mxu1 %v4623_v5  ;;  %v6106_v37 = vld [vmem:[%s6876_s16 + $0xdc8] sm:$0xf]  ;;  %v6579_v38 = vld [vmem:[%s6876_s16 + $0xde0] sm:$0xf0]  ;;  %v5883_v42 = vor.u32 %v6523_v34, %v5882_v33  ;;  %v6404_v44 = vld [vmem:[%s6876_s16 + $0x868] sm:$0xf0] }
  0x3d   : > { %3249 = vmatpush.bf16.msra.mxu2 %v4847_v6  ;;  %v5630_v45 = vld [vmem:[%s6876_s16 + $0xa10] sm:$0xf]  ;;  %v6107_v46 = vor.u32 %v6579_v38, %v6106_v37  ;;  %v6460_v47 = vld [vmem:[%s6876_s16 + $0xa28] sm:$0xf0]  ;;  %v5407_v53 = vor.u32 %v6404_v44, %v5406_v43  ;;  %v5378_v54 = vld [vmem:[%s6876_s16 + $0x818] sm:$0xf] }
  0x3e   : > { %3262 = vmatpush.bf16.msra.mxu3 %v5071_v10  ;;  %v5854_v48 = vld [vmem:[%s6876_s16 + $0xbd0] sm:$0xf]  ;;  %v6516_v49 = vld [vmem:[%s6876_s16 + $0xbe8] sm:$0xf0]  ;;  %v5631_v57 = vor.u32 %v6460_v47, %v5630_v45  ;;  %v6397_v59 = vld [vmem:[%s6876_s16 + $0x830] sm:$0xf0] }
  0x3f   : > { %3224 = vmatpush.bf16.msra.mxu0 %v4371_v16  ;;  %v6078_v50 = vld [vmem:[%s6876_s16 + $0xd90] sm:$0xf]  ;;  %v6572_v51 = vld [vmem:[%s6876_s16 + $0xda8] sm:$0xf0]  ;;  %v5855_v58 = vor.u32 %v6516_v49, %v5854_v48  ;;  %v5602_v60 = vld [vmem:[%s6876_s16 + $0x9d8] sm:$0xf]  ;;  %v5379_v8 = vor.u32 %v6397_v59, %v5378_v54 }
  0x40   : > { %3237 = vmatpush.bf16.msra.mxu1 %v4595_v19  ;;  %v355_v52 = vld [vmem:[%s8058_s0 + $0x8] sm:$0xff]  ;;  %v6453_v61 = vld [vmem:[%s6876_s16 + $0x9f0] sm:$0xf0]  ;;  %v6079_v62 = vor.u32 %v6572_v51, %v6078_v50  ;;  %v5826_v63 = vld [vmem:[%s6876_s16 + $0xb98] sm:$0xf]  ;;  %p7372_p13 = scmp.lt.s32.totalorder %s334_s9, 48 }
  0x41   : > { %3250 = vmatpush.bf16.msra.mxu2 %v4819_v20  ;;  %v892_v55 = vunpack.c.l.b16 %v355_v52  ;;  %v893_v56 = vunpack.c.h.b16 %v355_v52  ;;  %v6509_v0 = vld [vmem:[%s6876_s16 + $0xbb0] sm:$0xf0]  ;;  %v354_v2 = vld [vmem:[%s8058_s0] sm:$0xff]  ;;  %v6050_v3 = vld [vmem:[%s6876_s16 + $0xd58] sm:$0xf]  ;;  %v5603_v9 = vor.u32 %v6453_v61, %v5602_v60  ;;  %vm4055_vm3 = vcmask 1040384  }
  0x42   : > { %3263 = vmatpush.bf16.msra.mxu3 %v5043_v24  ;;  %v6565_v4 = vld [vmem:[%s6876_s16 + $0xd70] sm:$0xf0]  ;;  %v890_v5 = vunpack.c.l.b16 %v354_v2  ;;  %v891_v7 = vunpack.c.h.b16 %v354_v2  ;;  %v5827_v10 = vor.u32 %v6509_v0, %v5826_v63  ;;  %v5350_v11 = vld [vmem:[%s6876_s16 + $0x7e0] sm:$0xf]  ;;  %v6390_v12 = vld [vmem:[%s6876_s16 + $0x7f8] sm:$0xf0] }
  0x43   : > { %3225 = vmatpush.bf16.msra.mxu0 %v4343_v31  ;;  %v6977_v1 = vpack.c.b16 %v892_v55, %v892_v55  ;;  %v6984_v6 = vpack.c.b16 %v893_v56, %v893_v56  ;;  %v5574_v13 = vld [vmem:[%s6876_s16 + $0x9a0] sm:$0xf]  ;;  %v6051_v16 = vor.u32 %v6565_v4, %v6050_v3  ;;  %v6446_v17 = vld [vmem:[%s6876_s16 + $0x9b8] sm:$0xf0]  ;;  %v5351_v22 = vor.u32 %v6390_v12, %v5350_v11  ;;  %v5322_v25 = vld [vmem:[%s6876_s16 + $0x7a8] sm:$0xf] }
  0x44   : > { %3238 = vmatpush.bf16.msra.mxu1 %v4567_v35  ;;  %v6990_v14 = vpack.c.b16 %v890_v5, %v890_v5  ;;  %v6992_v15 = vpack.c.b16 %v891_v7, %v891_v7  ;;  %v5798_v18 = vld [vmem:[%s6876_s16 + $0xb60] sm:$0xf]  ;;  %v6502_v19 = vld [vmem:[%s6876_s16 + $0xb78] sm:$0xf0]  ;;  %v5575_v23 = vor.u32 %v6446_v17, %v5574_v13  ;;  %v6383_v26 = vld [vmem:[%s6876_s16 + $0x7c0] sm:$0xf0] }
  0x45   : > { %3251 = vmatpush.bf16.msra.mxu2 %v4791_v36  ;;  %v6022_v20 = vld [vmem:[%s6876_s16 + $0xd20] sm:$0xf]  ;;  %v6558_v21 = vld [vmem:[%s6876_s16 + $0xd38] sm:$0xf0]  ;;  %v5799_v24 = vor.u32 %v6502_v19, %v5798_v18  ;;  %v5546_v27 = vld [vmem:[%s6876_s16 + $0x968] sm:$0xf]  ;;  %v5323_v34 = vor.u32 %v6383_v26, %v5322_v25 }
  0x46   : > { %3264 = vmatpush.bf16.msra.mxu3 %v5015_v39  ;;  %3226 = vmatmul.bf16.vlgmr.msra.gmra.mxu0 %v6990_v14  ;;  %v6023_v28 = vor.u32 %v6558_v21, %v6022_v20  ;;  %v6439_v29 = vld [vmem:[%s6876_s16 + $0x980] sm:$0xf0]  ;;  %v5770_v30 = vld [vmem:[%s6876_s16 + $0xb28] sm:$0xf]  ;;  %v5294_v37 = vld [vmem:[%s6876_s16 + $0x770] sm:$0xf] }
  0x47   : > { %3270 = vmatpush.bf16.msrb.mxu0 %v5435_v40  ;;  %3239 = vmatmul.bf16.vlgmr.msra.gmra.mxu1 %v6992_v15  ;;  %v6495_v31 = vld [vmem:[%s6876_s16 + $0xb40] sm:$0xf0]  ;;  %v5994_v32 = vld [vmem:[%s6876_s16 + $0xce8] sm:$0xf]  ;;  %v5547_v35 = vor.u32 %v6439_v29, %v5546_v27  ;;  %v6376_v38 = vld [vmem:[%s6876_s16 + $0x788] sm:$0xf0] }
  0x48   : > { %3283 = vmatpush.bf16.msrb.mxu1 %v5659_v41  ;;  %3252 = vmatmul.bf16.vlgmr.msra.gmra.mxu2 %v6977_v1  ;;  %v6551_v33 = vld [vmem:[%s6876_s16 + $0xd00] sm:$0xf0]  ;;  %v5771_v36 = vor.u32 %v6495_v31, %v5770_v30  ;;  %v5518_v39 = vld [vmem:[%s6876_s16 + $0x930] sm:$0xf]  ;;  %v6432_v41 = vld [vmem:[%s6876_s16 + $0x948] sm:$0xf0] }
  0x49   : > { %3296 = vmatpush.bf16.msrb.mxu2 %v5883_v42  ;;  %3265 = vmatmul.bf16.vlgmr.msra.gmra.mxu3 %v6984_v6  ;;  %v5995_v40 = vor.u32 %v6551_v33, %v5994_v32  ;;  %v5742_v42 = vld [vmem:[%s6876_s16 + $0xaf0] sm:$0xf]  ;;  %v6488_v43 = vld [vmem:[%s6876_s16 + $0xb08] sm:$0xf0]  ;;  %v5519_v47 = vor.u32 %v6432_v41, %v5518_v39  ;;  %v5266_v49 = vld [vmem:[%s6876_s16 + $0x738] sm:$0xf] }
  0x4a   : > { %3309 = vmatpush.bf16.msrb.mxu3 %v6107_v46  ;;  %v5966_v44 = vld [vmem:[%s6876_s16 + $0xcb0] sm:$0xf]  ;;  %v6544_v45 = vld [vmem:[%s6876_s16 + $0xcc8] sm:$0xf0]  ;;  %v5295_v46 = vor.u32 %v6376_v38, %v5294_v37  ;;  %v5743_v48 = vor.u32 %v6488_v43, %v5742_v42  ;;  %v6369_v50 = vld [vmem:[%s6876_s16 + $0x750] sm:$0xf0] }
  0x4b   : > { %3271 = vmatpush.bf16.msrb.mxu0 %v5407_v53  ;;  %v5490_v51 = vld [vmem:[%s6876_s16 + $0x8f8] sm:$0xf]  ;;  %v5967_v52 = vor.u32 %v6544_v45, %v5966_v44  ;;  %v6425_v53 = vld [vmem:[%s6876_s16 + $0x910] sm:$0xf0]  ;;  %v5267_v59 = vor.u32 %v6369_v50, %v5266_v49  ;;  %v6362_v60 = vld [vmem:[%s6876_s16 + $0x718] sm:$0xf0] }
  0x4c   : > { %3284 = vmatpush.bf16.msrb.mxu1 %v5631_v57  ;;  %v5714_v54 = vld [vmem:[%s6876_s16 + $0xab8] sm:$0xf]  ;;  %v6481_v55 = vld [vmem:[%s6876_s16 + $0xad0] sm:$0xf0]  ;;  %v5462_v61 = vld [vmem:[%s6876_s16 + $0x8c0] sm:$0xf]  ;;  %v5491_v63 = vor.u32 %v6425_v53, %v5490_v51 }
  0x4d   : > { %3297 = vmatpush.bf16.msrb.mxu2 %v5855_v58  ;;  %v5938_v56 = vld [vmem:[%s6876_s16 + $0xc78] sm:$0xf]  ;;  %v6537_v57 = vld [vmem:[%s6876_s16 + $0xc90] sm:$0xf0]  ;;  %v5238_v58 = vld [vmem:[%s6876_s16 + $0x700] sm:$0xf]  ;;  %v5715_v0 = vor.u32 %v6481_v55, %v5714_v54 }
  0x4e   : > { %3310 = vmatpush.bf16.msrb.mxu3 %v6079_v62  ;;  %v6418_v62 = vld [vmem:[%s6876_s16 + $0x8d8] sm:$0xf0]  ;;  %v5686_v2 = vld [vmem:[%s6876_s16 + $0xa80] sm:$0xf]  ;;  %v5939_v5 = vor.u32 %v6537_v57, %v5938_v56  ;;  %v4540_v11 = vld [vmem:[%s6876_s16 + $0x1a4] sm:$0xf0]  ;;  %v5239_v13 = vor.u32 %v6362_v60, %v5238_v58 }
  0x4f   : > { %3272 = vmatpush.bf16.msrb.mxu0 %v5379_v8  ;;  %v6474_v3 = vld [vmem:[%s6876_s16 + $0xa98] sm:$0xf0]  ;;  %v5910_v7 = vld [vmem:[%s6876_s16 + $0xc40] sm:$0xf]  ;;  %v6240_v12 = vld [vmem:[%s6876_s16 + $0x34c] sm:$0xf]  ;;  %v5463_v20 = vor.u32 %v6418_v62, %v5462_v61 }
  0x50   : > { %3285 = vmatpush.bf16.msrb.mxu1 %v5603_v9  ;;  %v357_v4 = vld [vmem:[%s8058_s0 + $0x18] sm:$0xff]  ;;  %v356_v9 = vld [vmem:[%s8058_s0 + $0x10] sm:$0xff]  ;;  %v6296_v17 = vld [vmem:[%s6876_s16 + $0x50c] sm:$0xf]  ;;  %v5687_v21 = vor.u32 %v6474_v3, %v5686_v2  ;;  %s8077_s9 = smov (!%p7372_p13, %s334_s9), 48  ;;  %vm4057_vm6 = vcmask 1042434  }
  0x51   : > { %3298 = vmatpush.bf16.msrb.mxu2 %v5827_v10  ;;  %v6530_v8 = vld [vmem:[%s6876_s16 + $0xc58] sm:$0xf0]  ;;  %v6184_v10 = vld [vmem:[%s6876_s16 + $0x18c] sm:$0xf]  ;;  %v4988_v18 = vld [vmem:[%s6876_s16 + $0x524] sm:$0xf0]  ;;  %v896_v19 = vunpack.c.l.b16 %v357_v4  ;;  %v897_v25 = vunpack.c.h.b16 %v357_v4  ;;  %s8008_s17 = scalar_lea.vmem %s8062_s4, %s8077_s9  ;;  %s8014_s28 = scalar_lea.vmem %s8063_s5, %s8077_s9 }
  0x52   : > { %3311 = vmatpush.bf16.msrb.mxu3 %v6051_v16  ;;  %v4764_v16 = vld [vmem:[%s6876_s16 + $0x364] sm:$0xf0]  ;;  %v5911_v26 = vor.u32 %v6530_v8, %v5910_v7  ;;  %v4543_v27 = vor.u32 %v6184_v10, %v4540_v11  ;;  %v4991_v30 = vor.u32 %v6296_v17, %v4988_v18  ;;  %v6177_v31 = vld [vmem:[%s6876_s16 + $0x154] sm:$0xf]  ;;  %v4512_v32 = vld [vmem:[%s6876_s16 + $0x16c] sm:$0xf0] }
  0x53   : > { %3273 = vmatpush.bf16.msrb.mxu0 %v5351_v22  ;;  %v6352_v22 = vld [vmem:[%s6876_s16 + $0x6cc] sm:$0xf]  ;;  %v4767_v29 = vor.u32 %v6240_v12, %v4764_v16  ;;  %v6233_v33 = vld [vmem:[%s6876_s16 + $0x314] sm:$0xf]  ;;  %v4960_v38 = vld [vmem:[%s6876_s16 + $0x4ec] sm:$0xf0]  ;;  %v4515_v43 = vor.u32 %v6177_v31, %v4512_v32 }
  0x54   : > { %3286 = vmatpush.bf16.msrb.mxu1 %v5575_v23  ;;  %v5212_v23 = vld [vmem:[%s6876_s16 + $0x6e4] sm:$0xf0]  ;;  %v6289_v37 = vld [vmem:[%s6876_s16 + $0x4d4] sm:$0xf]  ;;  %v5184_v42 = vld [vmem:[%s6876_s16 + $0x6ac] sm:$0xf0] }
  0x55   : > { %3299 = vmatpush.bf16.msrb.mxu2 %v5799_v24  ;;  %v894_v24 = vunpack.c.l.b16 %v356_v9  ;;  %v6345_v41 = vld [vmem:[%s6876_s16 + $0x694] sm:$0xf]  ;;  %v6226_v49 = vld [vmem:[%s6876_s16 + $0x2dc] sm:$0xf]  ;;  %v4708_v51 = vld [vmem:[%s6876_s16 + $0x2f4] sm:$0xf0] }
  0x56   : > { %3312 = vmatpush.bf16.msrb.mxu3 %v6023_v28  ;;  %v895_v28 = vunpack.c.h.b16 %v356_v9  ;;  %v5187_v50 = vor.u32 %v6345_v41, %v5184_v42  ;;  %v4932_v53 = vld [vmem:[%s6876_s16 + $0x4b4] sm:$0xf0]  ;;  %v6338_v54 = vld [vmem:[%s6876_s16 + $0x65c] sm:$0xf]  ;;  %v4711_v57 = vor.u32 %v6226_v49, %v4708_v51  ;;  %v4456_v60 = vld [vmem:[%s6876_s16 + $0xfc] sm:$0xf0] }
  0x57   : > { %3274 = vmatpush.bf16.msrb.mxu0 %v5323_v34  ;;  %v5215_v34 = vor.u32 %v6352_v22, %v5212_v23  ;;  %v7056_v39 = vpack.c.b16 %v894_v24, %v894_v24  ;;  %v5156_v55 = vld [vmem:[%s6876_s16 + $0x674] sm:$0xf0]  ;;  %v6219_v61 = vld [vmem:[%s6876_s16 + $0x2a4] sm:$0xf]  ;;  %v4904_v2 = vld [vmem:[%s6876_s16 + $0x47c] sm:$0xf0] }
  0x58   : > { %3287 = vmatpush.bf16.msrb.mxu1 %v5547_v35  ;;  %v7051_v35 = vpack.c.b16 %v896_v19, %v896_v19  ;;  %v7062_v44 = vpack.c.b16 %v895_v28, %v895_v28  ;;  %v5159_v62 = vor.u32 %v6338_v54, %v5156_v55  ;;  %v6331_v3 = vld [vmem:[%s6876_s16 + $0x624] sm:$0xf]  ;;  %v5128_v4 = vld [vmem:[%s6876_s16 + $0x63c] sm:$0xf0]  ;;  %v6156_v9 = vld [vmem:[%s6876_s16 + $0xac] sm:$0xf] }
  0x59   : > { %3300 = vmatpush.bf16.msrb.mxu2 %v5771_v36  ;;  %v4736_v36 = vld [vmem:[%s6876_s16 + $0x32c] sm:$0xf0]  ;;  %v4428_v10 = vld [vmem:[%s6876_s16 + $0xc4] sm:$0xf0]  ;;  %v6212_v11 = vld [vmem:[%s6876_s16 + $0x26c] sm:$0xf]  ;;  %v5131_v12 = vor.u32 %v6331_v3, %v5128_v4 }
  0x5a   : > { %3313 = vmatpush.bf16.msrb.mxu3 %v5995_v40  ;;  %v7058_v40 = vpack.c.b16 %v897_v25, %v897_v25  ;;  %v4739_v45 = vor.u32 %v6233_v33, %v4736_v36  ;;  %v6268_v16 = vld [vmem:[%s6876_s16 + $0x42c] sm:$0xf]  ;;  %v4876_v17 = vld [vmem:[%s6876_s16 + $0x444] sm:$0xf0]  ;;  %v6149_v23 = vld [vmem:[%s6876_s16 + $0x74] sm:$0xf] }
  0x5b   : > { %3275 = vmatpush.bf16.msrb.mxu0 %v5295_v46  ;;  %v4963_v46 = vor.u32 %v6289_v37, %v4960_v38  ;;  %v6324_v18 = vld [vmem:[%s6876_s16 + $0x5ec] sm:$0xf]  ;;  %v5100_v19 = vld [vmem:[%s6876_s16 + $0x604] sm:$0xf0]  ;;  %v4879_v22 = vor.u32 %v6268_v16, %v4876_v17  ;;  %v4400_v24 = vld [vmem:[%s6876_s16 + $0x8c] sm:$0xf0] }
  0x5c   : > { %3288 = vmatpush.bf16.msrb.mxu1 %v5519_v47  ;;  %v6170_v47 = vld [vmem:[%s6876_s16 + $0x11c] sm:$0xf]  ;;  %v6205_v25 = vld [vmem:[%s6876_s16 + $0x234] sm:$0xf]  ;;  %v5072_v31 = vld [vmem:[%s6876_s16 + $0x5cc] sm:$0xf0]  ;;  %v4403_v32 = vor.u32 %v6149_v23, %v4400_v24 }
  0x5d   : > { %3301 = vmatpush.bf16.msrb.mxu2 %v5743_v48  ;;  %v4484_v48 = vld [vmem:[%s6876_s16 + $0x134] sm:$0xf0]  ;;  %v6261_v28 = vld [vmem:[%s6876_s16 + $0x3f4] sm:$0xf]  ;;  %v6142_v36 = vld [vmem:[%s6876_s16 + $0x3c] sm:$0xf] }
  0x5e   : > { %3314 = vmatpush.bf16.msrb.mxu3 %v5967_v52  ;;  %v6282_v52 = vld [vmem:[%s6876_s16 + $0x49c] sm:$0xf]  ;;  %v4487_v56 = vor.u32 %v6170_v47, %v4484_v48  ;;  %v4372_v37 = vld [vmem:[%s6876_s16 + $0x54] sm:$0xf0]  ;;  %v6135_v49 = vld [vmem:[%s6876_s16 + $0x4] sm:$0xf] }
  0x5f   : > { %3276 = vmatpush.bf16.msrb.mxu0 %v5267_v59  ;;  %v4935_v58 = vor.u32 %v6282_v52, %v4932_v53  ;;  %v6163_v59 = vld [vmem:[%s6876_s16 + $0xe4] sm:$0xf]  ;;  %v6198_v38 = vld [vmem:[%s6876_s16 + $0x1fc] sm:$0xf]  ;;  %v4596_v42 = vld [vmem:[%s6876_s16 + $0x214] sm:$0xf0]  ;;  %v4375_v48 = vor.u32 %v6142_v36, %v4372_v37 }
  0x60   : > { %3289 = vmatpush.bf16.msrb.mxu1 %v5491_v63  ;;  %v4680_v63 = vld [vmem:[%s6876_s16 + $0x2bc] sm:$0xf0]  ;;  %v5044_v47 = vld [vmem:[%s6876_s16 + $0x594] sm:$0xf0]  ;;  %v4599_v51 = vor.u32 %v6198_v38, %v4596_v42  ;;  %v6191_v53 = vld [vmem:[%s6876_s16 + $0x1c4] sm:$0xf] }
  0x61   : > { %3302 = vmatpush.bf16.msrb.mxu2 %v5715_v0  ;;  %v6275_v0 = vld [vmem:[%s6876_s16 + $0x464] sm:$0xf]  ;;  %v4683_v7 = vor.u32 %v6219_v61, %v4680_v63  ;;  %v4568_v54 = vld [vmem:[%s6876_s16 + $0x1dc] sm:$0xf0]  ;;  %v5436_v61 = vld [vmem:[%s6876_s16 + $0x8a4] sm:$0xf0] }
  0x62   : > { %3315 = vmatpush.bf16.msrb.mxu3 %v5939_v5  ;;  %v4459_v5 = vor.u32 %v6163_v59, %v4456_v60  ;;  %v4907_v8 = vor.u32 %v6275_v0, %v4904_v2  ;;  %v6247_v55 = vld [vmem:[%s6876_s16 + $0x384] sm:$0xf]  ;;  %v5016_v59 = vld [vmem:[%s6876_s16 + $0x55c] sm:$0xf0]  ;;  %v6408_v60 = vld [vmem:[%s6876_s16 + $0x88c] sm:$0xf]  ;;  %v4571_v4 = vor.u32 %v6191_v53, %v4568_v54 }
  0x63   : > { %3277 = vmatpush.bf16.msrb.mxu0 %v5239_v13  ;;  %v4652_v13 = vld [vmem:[%s6876_s16 + $0x284] sm:$0xf0]  ;;  %v6520_v2 = vld [vmem:[%s6876_s16 + $0xc0c] sm:$0xf]  ;;  %v5408_v16 = vld [vmem:[%s6876_s16 + $0x86c] sm:$0xf0] }
  0x64   : > { %3290 = vmatpush.bf16.msrb.mxu1 %v5463_v20  ;;  %v4431_v20 = vor.u32 %v6156_v9, %v4428_v10  ;;  %v5660_v0 = vld [vmem:[%s6876_s16 + $0xa64] sm:$0xf0]  ;;  %v5439_v10 = vor.u32 %v6408_v60, %v5436_v61  ;;  %v6457_v17 = vld [vmem:[%s6876_s16 + $0xa14] sm:$0xf]  ;;  %v6080_v23 = vld [vmem:[%s6876_s16 + $0xdac] sm:$0xf0] }
  0x65   : > { %3303 = vmatpush.bf16.msrb.mxu2 %v5687_v21  ;;  %v4655_v21 = vor.u32 %v6212_v11, %v4652_v13  ;;  %v5884_v3 = vld [vmem:[%s6876_s16 + $0xc24] sm:$0xf0]  ;;  %v6401_v13 = vld [vmem:[%s6876_s16 + $0x854] sm:$0xf]  ;;  %v6052_v36 = vld [vmem:[%s6876_s16 + $0xd74] sm:$0xf0] }
  0x66   : > { %3316 = vmatpush.bf16.msrb.mxu3 %v5911_v26  ;;  %3278 = vmatmul.bf16.vlgmr.msrb.gmra.mxu0 %v7056_v39  ;;  %v5103_v26 = vor.u32 %v6324_v18, %v5100_v19  ;;  %v5632_v19 = vld [vmem:[%s6876_s16 + $0xa2c] sm:$0xf0]  ;;  %v5411_v24 = vor.u32 %v6401_v13, %v5408_v16  ;;  %v6387_v42 = vld [vmem:[%s6876_s16 + $0x7e4] sm:$0xf]  ;;  %v6492_v60 = vld [vmem:[%s6876_s16 + $0xb2c] sm:$0xf] }
  0x67   : > { %3322 = vmatpush.bf16.msra.mxu0 %v4543_v27  ;;  %3291 = vmatmul.bf16.vlgmr.msrb.gmra.mxu1 %v7062_v44  ;;  %v4624_v27 = vld [vmem:[%s6876_s16 + $0x24c] sm:$0xf0]  ;;  %v5772_v61 = vld [vmem:[%s6876_s16 + $0xb44] sm:$0xf0]  ;;  %s4339_s21 = sshll.u32 %s8077_s9, 3  ;;  %vm4059_vm7 = vcmask 1041408  }
  0x68   : > { %3335 = vmatpush.bf16.msra.mxu1 %v4767_v29  ;;  %3304 = vmatmul.bf16.vlgmr.msrb.gmra.mxu2 %v7051_v35  ;;  %v4848_v29 = vld [vmem:[%s6876_s16 + $0x40c] sm:$0xf0]  ;;  %v4627_v33 = vor.u32 %v6205_v25, %v4624_v27  ;;  %v5635_v25 = vor.u32 %v6457_v17, %v5632_v19  ;;  %v6394_v27 = vld [vmem:[%s6876_s16 + $0x81c] sm:$0xf]  ;;  %s7407_s14 = scalar_lea.vmem %s8061_s3, %s4339_s21  ;;  %vm4061_vm12 = vcmask 1044484   ;;  %vm4063_vm13 = vcmask 1045508  }
  0x69   : > { %3348 = vmatpush.bf16.msra.mxu2 %v4991_v30  ;;  %3317 = vmatmul.bf16.vlgmr.msrb.gmra.mxu3 %v7058_v40  ;;  %v6317_v30 = vld [vmem:[%s6876_s16 + $0x5b4] sm:$0xf]  ;;  %v5968_v13 = vld [vmem:[%s6876_s16 + $0xccc] sm:$0xf0]  ;;  %v6366_v19 = vld [vmem:[%s6876_s16 + $0x73c] sm:$0xf] }
  0x6a   : > { %3361 = vmatpush.bf16.msra.mxu3 %v5215_v34  ;;  %v4851_v34 = vor.u32 %v6261_v28, %v4848_v29  ;;  %v5075_v41 = vor.u32 %v6317_v30, %v5072_v31  ;;  %v5380_v28 = vld [vmem:[%s6876_s16 + $0x834] sm:$0xf0]  ;;  %v6450_v29 = vld [vmem:[%s6876_s16 + $0x9dc] sm:$0xf]  ;;  %vm4065_vm14 = vcmask 1043456  }
  0x6b   : > { %3323 = vmatpush.bf16.msra.mxu0 %v4515_v43  ;;  %v6254_v43 = vld [vmem:[%s6876_s16 + $0x3bc] sm:$0xf]  ;;  %v5604_v31 = vld [vmem:[%s6876_s16 + $0x9f4] sm:$0xf0]  ;;  %v5383_v37 = vor.u32 %v6394_v27, %v5380_v28 }
  0x6c   : > { %3336 = vmatpush.bf16.msra.mxu1 %v4739_v45  ;;  %v4820_v45 = vld [vmem:[%s6876_s16 + $0x3d4] sm:$0xf0]  ;;  %v5607_v38 = vor.u32 %v6450_v29, %v5604_v31  ;;  %v6359_v29 = vld [vmem:[%s6876_s16 + $0x704] sm:$0xf] }
  0x6d   : > { %3349 = vmatpush.bf16.msra.mxu2 %v4963_v46  ;;  %v6310_v46 = vld [vmem:[%s6876_s16 + $0x57c] sm:$0xf]  ;;  %v4823_v52 = vor.u32 %v6254_v43, %v4820_v45  ;;  %v5352_v43 = vld [vmem:[%s6876_s16 + $0x7fc] sm:$0xf0]  ;;  %v6443_v45 = vld [vmem:[%s6876_s16 + $0x9a4] sm:$0xf] }
  0x6e   : > { %3362 = vmatpush.bf16.msra.mxu3 %v5187_v50  ;;  %v4344_v50 = vld [vmem:[%s6876_s16 + $0x1c] sm:$0xf0]  ;;  %v5940_v27 = vld [vmem:[%s6876_s16 + $0xc94] sm:$0xf0] }
  0x6f   : > { %3324 = vmatpush.bf16.msra.mxu0 %v4487_v56  ;;  %v5047_v56 = vor.u32 %v6310_v46, %v5044_v47  ;;  %v4347_v63 = vor.u32 %v6135_v49, %v4344_v50  ;;  %v5576_v47 = vld [vmem:[%s6876_s16 + $0x9bc] sm:$0xf0]  ;;  %v6555_v50 = vld [vmem:[%s6876_s16 + $0xd24] sm:$0xf] }
  0x70   : > { %3337 = vmatpush.bf16.msra.mxu1 %v4711_v57  ;;  %v4792_v57 = vld [vmem:[%s6876_s16 + $0x39c] sm:$0xf0]  ;;  %v5579_v53 = vor.u32 %v6443_v45, %v5576_v47  ;;  %v6188_v45 = vld [vmem:[%s6876_s16 + $0x1a8] sm:$0xf0] }
  0x71   : > { %3350 = vmatpush.bf16.msra.mxu2 %v4935_v58  ;;  %v6303_v58 = vld [vmem:[%s6876_s16 + $0x544] sm:$0xf]  ;;  %v5800_v49 = vld [vmem:[%s6876_s16 + $0xb7c] sm:$0xf0] }
  0x72   : > { %3363 = vmatpush.bf16.msra.mxu3 %v5159_v62  ;;  %v6464_v62 = vld [vmem:[%s6876_s16 + $0xa4c] sm:$0xf]  ;;  %v5019_v9 = vor.u32 %v6303_v58, %v5016_v59  ;;  %v5548_v59 = vld [vmem:[%s6876_s16 + $0x984] sm:$0xf0] }
  0x73   : > { %3325 = vmatpush.bf16.msra.mxu0 %v4459_v5  ;;  %v4795_v5 = vor.u32 %v6247_v55, %v4792_v57  ;;  %v5663_v11 = vor.u32 %v6464_v62, %v5660_v0  ;;  %v6380_v55 = vld [vmem:[%s6876_s16 + $0x7ac] sm:$0xf] }
  0x74   : > { %3338 = vmatpush.bf16.msra.mxu1 %v4683_v7  ;;  %v6576_v7 = vld [vmem:[%s6876_s16 + $0xdcc] sm:$0xf] }
  0x75   : > { %3351 = vmatpush.bf16.msra.mxu2 %v4907_v8  ;;  %v6108_v8 = vld [vmem:[%s6876_s16 + $0xde4] sm:$0xf0]  ;;  %v6436_v57 = vld [vmem:[%s6876_s16 + $0x96c] sm:$0xf] }
  0x76   : > { %3364 = vmatpush.bf16.msra.mxu3 %v5131_v12  ;;  %v5887_v12 = vor.u32 %v6520_v2, %v5884_v3  ;;  %v6111_v18 = vor.u32 %v6576_v7, %v6108_v8  ;;  %v6548_v62 = vld [vmem:[%s6876_s16 + $0xcec] sm:$0xf]  ;;  %v5551_v2 = vor.u32 %v6436_v57, %v5548_v59  ;;  %v5775_v3 = vor.u32 %v6492_v60, %v5772_v61  ;;  %v6429_v7 = vld [vmem:[%s6876_s16 + $0x934] sm:$0xf]  ;;  %v4518_v59 = vld [vmem:[%s6876_s16 + $0x158] sm:$0xf] }
  0x77   : > { %3326 = vmatpush.bf16.msra.mxu0 %v4431_v20  ;;  %v6513_v20 = vld [vmem:[%s6876_s16 + $0xbd4] sm:$0xf]  ;;  %v4742_v61 = vld [vmem:[%s6876_s16 + $0x318] sm:$0xf] }
  0x78   : > { %3339 = vmatpush.bf16.msra.mxu1 %v4655_v21  ;;  %v5856_v21 = vld [vmem:[%s6876_s16 + $0xbec] sm:$0xf0]  ;;  %v6181_v60 = vld [vmem:[%s6876_s16 + $0x170] sm:$0xf0] }
  0x79   : > { %3352 = vmatpush.bf16.msra.mxu2 %v4879_v22  ;;  %v6569_v22 = vld [vmem:[%s6876_s16 + $0xd94] sm:$0xf] }
  0x7a   : > { %3365 = vmatpush.bf16.msra.mxu3 %v5103_v26  ;;  %v5859_v26 = vor.u32 %v6513_v20, %v5856_v21  ;;  %v6083_v30 = vor.u32 %v6569_v22, %v6080_v23  ;;  %v5268_v20 = vld [vmem:[%s6876_s16 + $0x754] sm:$0xf0]  ;;  %v6422_v21 = vld [vmem:[%s6876_s16 + $0x8fc] sm:$0xf] }
  0x7b   : > { %3327 = vmatpush.bf16.msra.mxu0 %v4403_v32  ;;  %v6506_v32 = vld [vmem:[%s6876_s16 + $0xb9c] sm:$0xf]  ;;  %v5492_v23 = vld [vmem:[%s6876_s16 + $0x914] sm:$0xf0]  ;;  %v5271_v28 = vor.u32 %v6366_v19, %v5268_v20 }
  0x7c   : > { %3340 = vmatpush.bf16.msra.mxu1 %v4627_v33  ;;  %v5828_v33 = vld [vmem:[%s6876_s16 + $0xbb4] sm:$0xf0]  ;;  %v5495_v31 = vor.u32 %v6422_v21, %v5492_v23  ;;  %v6342_v19 = vld [vmem:[%s6876_s16 + $0x678] sm:$0xf0]  ;;  %v4462_v23 = vld [vmem:[%s6876_s16 + $0xe8] sm:$0xf] }
  0x7d   : > { %3353 = vmatpush.bf16.msra.mxu2 %v4851_v34  ;;  %v6562_v34 = vld [vmem:[%s6876_s16 + $0xd5c] sm:$0xf] }
  0x7e   : > { %3366 = vmatpush.bf16.msra.mxu3 %v5075_v41  ;;  %v5831_v41 = vor.u32 %v6506_v32, %v5828_v33  ;;  %v6055_v46 = vor.u32 %v6562_v34, %v6052_v36  ;;  %v6415_v33 = vld [vmem:[%s6876_s16 + $0x8c4] sm:$0xf]  ;;  %v5464_v34 = vld [vmem:[%s6876_s16 + $0x8dc] sm:$0xf0] }
  0x7f   : > { %3328 = vmatpush.bf16.msra.mxu0 %v4375_v48  ;;  %v6499_v48 = vld [vmem:[%s6876_s16 + $0xb64] sm:$0xf] }
  0x80   : > { %3341 = vmatpush.bf16.msra.mxu1 %v4599_v51  ;;  %v6024_v51 = vld [vmem:[%s6876_s16 + $0xd3c] sm:$0xf0]  ;;  %v5803_v54 = vor.u32 %v6499_v48, %v5800_v49  ;;  %v6471_v36 = vld [vmem:[%s6876_s16 + $0xa84] sm:$0xf]  ;;  %v6244_v48 = vld [vmem:[%s6876_s16 + $0x368] sm:$0xf0] }
  0x81   : > { %3354 = vmatpush.bf16.msra.mxu2 %v4823_v52  ;;  %v5355_v52 = vor.u32 %v6387_v42, %v5352_v43  ;;  %v6027_v58 = vor.u32 %v6555_v50, %v6024_v51  ;;  %v5912_v42 = vld [vmem:[%s6876_s16 + $0xc5c] sm:$0xf0]  ;;  %v4546_v43 = vld [vmem:[%s6876_s16 + $0x190] sm:$0xf]  ;;  %v6300_v50 = vld [vmem:[%s6876_s16 + $0x528] sm:$0xf0]  ;;  %v5467_v51 = vor.u32 %v6415_v33, %v5464_v34 }
  0x82   : > { %3367 = vmatpush.bf16.msra.mxu3 %v5047_v56  ;;  %v5324_v56 = vld [vmem:[%s6876_s16 + $0x7c4] sm:$0xf0]  ;;  %v4994_v49 = vld [vmem:[%s6876_s16 + $0x510] sm:$0xf] }
  0x83   : > { %3329 = vmatpush.bf16.msra.mxu0 %v4347_v63  ;;  %v5996_v63 = vld [vmem:[%s6876_s16 + $0xd04] sm:$0xf0]  ;;  %v5327_v0 = vor.u32 %v6380_v55, %v5324_v56  ;;  %v4547_v56 = vor.u32 %v6188_v45, %v4546_v43  ;;  %v4882_v43 = vld [vmem:[%s6876_s16 + $0x430] sm:$0xf]  ;;  %v6272_v45 = vld [vmem:[%s6876_s16 + $0x448] sm:$0xf0] }
  0x84   : > { %3342 = vmatpush.bf16.msra.mxu1 %v4571_v4  ;;  %v6373_v4 = vld [vmem:[%s6876_s16 + $0x774] sm:$0xf]  ;;  %v5999_v8 = vor.u32 %v6548_v62, %v5996_v63 }
  0x85   : > { %3355 = vmatpush.bf16.msra.mxu2 %v4795_v5  ;;  %v5296_v5 = vld [vmem:[%s6876_s16 + $0x78c] sm:$0xf0]  ;;  %v6237_v63 = vld [vmem:[%s6876_s16 + $0x330] sm:$0xf0] }
  0x86   : > { %3368 = vmatpush.bf16.msra.mxu3 %v5019_v9  ;;  %3330 = vmatmul.bf16.vlgmr.msra.gmra.mxu0 %v6990_v14  ;;  %v5520_v9 = vld [vmem:[%s6876_s16 + $0x94c] sm:$0xf0]  ;;  %v5299_v16 = vor.u32 %v6373_v4, %v5296_v5  ;;  %v6349_v4 = vld [vmem:[%s6876_s16 + $0x6b0] sm:$0xf0]  ;;  %v4519_v5 = vor.u32 %v6181_v60, %v4518_v59 }
  0x87   : > { %3374 = vmatpush.bf16.msrb.mxu0 %v5439_v10  ;;  %3343 = vmatmul.bf16.vlgmr.msra.gmra.mxu1 %v6992_v15  ;;  %v6485_v10 = vld [vmem:[%s6876_s16 + $0xaf4] sm:$0xf]  ;;  %v5523_v17 = vor.u32 %v6429_v7, %v5520_v9  ;;  %v4743_v7 = vor.u32 %v6237_v63, %v4742_v61  ;;  %v4490_v9 = vld [vmem:[%s6876_s16 + $0x120] sm:$0xf] }
  0x88   : > { %3387 = vmatpush.bf16.msrb.mxu1 %v5663_v11  ;;  %3356 = vmatmul.bf16.vlgmr.msra.gmra.mxu2 %v6977_v1  ;;  %v5744_v11 = vld [vmem:[%s6876_s16 + $0xb0c] sm:$0xf0]  ;;  %v6321_v59 = vld [vmem:[%s6876_s16 + $0x5d0] sm:$0xf0]  ;;  %v4378_v63 = vld [vmem:[%s6876_s16 + $0x40] sm:$0xf] }
  0x89   : > { %3400 = vmatpush.bf16.msrb.mxu2 %v5887_v12  ;;  %3369 = vmatmul.bf16.vlgmr.msra.gmra.mxu3 %v6984_v6  ;;  %v6541_v12 = vld [vmem:[%s6876_s16 + $0xcb4] sm:$0xf] }
  0x8a   : > { %3413 = vmatpush.bf16.msrb.mxu3 %v6111_v18  ;;  %v5747_v18 = vor.u32 %v6485_v10, %v5744_v11  ;;  %v5971_v22 = vor.u32 %v6541_v12, %v5968_v13  ;;  %v6174_v10 = vld [vmem:[%s6876_s16 + $0x138] sm:$0xf0]  ;;  %v4714_v11 = vld [vmem:[%s6876_s16 + $0x2e0] sm:$0xf] }
  0x8b   : > { %3375 = vmatpush.bf16.msrb.mxu0 %v5411_v24  ;;  %v6478_v24 = vld [vmem:[%s6876_s16 + $0xabc] sm:$0xf]  ;;  %v4491_v20 = vor.u32 %v6174_v10, %v4490_v9 }
  0x8c   : > { %3388 = vmatpush.bf16.msrb.mxu1 %v5635_v25  ;;  %v5716_v25 = vld [vmem:[%s6876_s16 + $0xad4] sm:$0xf0]  ;;  %v6230_v13 = vld [vmem:[%s6876_s16 + $0x2f8] sm:$0xf0] }
  0x8d   : > { %3401 = vmatpush.bf16.msrb.mxu2 %v5859_v26  ;;  %v6534_v26 = vld [vmem:[%s6876_s16 + $0xc7c] sm:$0xf]  ;;  %v5719_v32 = vor.u32 %v6478_v24, %v5716_v25  ;;  %v4715_v21 = vor.u32 %v6230_v13, %v4714_v11  ;;  %v6167_v24 = vld [vmem:[%s6876_s16 + $0x100] sm:$0xf0]  ;;  %v4686_v25 = vld [vmem:[%s6876_s16 + $0x2a8] sm:$0xf] }
  0x8e   : > { %3414 = vmatpush.bf16.msrb.mxu3 %v6083_v30  ;;  %v5240_v30 = vld [vmem:[%s6876_s16 + $0x71c] sm:$0xf0]  ;;  %v6314_v9 = vld [vmem:[%s6876_s16 + $0x598] sm:$0xf0]  ;;  %v4350_v11 = vld [vmem:[%s6876_s16 + $0x8] sm:$0xf] }
  0x8f   : > { %3376 = vmatpush.bf16.msrb.mxu0 %v5383_v37  ;;  %v5943_v37 = vor.u32 %v6534_v26, %v5940_v27  ;;  %v5243_v47 = vor.u32 %v6359_v29, %v5240_v30  ;;  %v6223_v27 = vld [vmem:[%s6876_s16 + $0x2c0] sm:$0xf0]  ;;  %v5134_v30 = vld [vmem:[%s6876_s16 + $0x628] sm:$0xf] }
  0x90   : > { %3389 = vmatpush.bf16.msrb.mxu1 %v5607_v38  ;;  %v5688_v38 = vld [vmem:[%s6876_s16 + $0xa9c] sm:$0xf0]  ;;  %v6279_v29 = vld [vmem:[%s6876_s16 + $0x480] sm:$0xf0]  ;;  %v4687_v33 = vor.u32 %v6223_v27, %v4686_v25  ;;  %v6412_v25 = vld [vmem:[%s6876_s16 + $0x8a8] sm:$0xf0] }
  0x91   : > { %3402 = vmatpush.bf16.msrb.mxu2 %v5831_v41  ;;  %v6527_v41 = vld [vmem:[%s6876_s16 + $0xc44] sm:$0xf] }
  0x92   : > { %3415 = vmatpush.bf16.msrb.mxu3 %v6055_v46  ;;  %v4770_v46 = vld [vmem:[%s6876_s16 + $0x350] sm:$0xf]  ;;  %v5915_v55 = vor.u32 %v6527_v41, %v5912_v42  ;;  %v6216_v42 = vld [vmem:[%s6876_s16 + $0x288] sm:$0xf0] }
  0x93   : > { %3377 = vmatpush.bf16.msrb.mxu0 %v5355_v52  ;;  %v5691_v52 = vor.u32 %v6471_v36, %v5688_v38  ;;  %v4771_v57 = vor.u32 %v6244_v48, %v4770_v46  ;;  %v4434_v36 = vld [vmem:[%s6876_s16 + $0xb0] sm:$0xf] }
  0x94   : > { %3390 = vmatpush.bf16.msrb.mxu1 %v5579_v53  ;;  %v5218_v53 = vld [vmem:[%s6876_s16 + $0x6d0] sm:$0xf] }
  0x95   : > { %3403 = vmatpush.bf16.msrb.mxu2 %v5803_v54  ;;  %v6356_v54 = vld [vmem:[%s6876_s16 + $0x6e8] sm:$0xf0]  ;;  %v4658_v38 = vld [vmem:[%s6876_s16 + $0x270] sm:$0xf] }
  0x96   : > { %3416 = vmatpush.bf16.msrb.mxu3 %v6027_v58  ;;  %v4995_v58 = vor.u32 %v6300_v50, %v4994_v49  ;;  %v5219_v62 = vor.u32 %v6356_v54, %v5218_v53  ;;  %v5106_v46 = vld [vmem:[%s6876_s16 + $0x5f0] sm:$0xf]  ;;  %v4659_v49 = vor.u32 %v6216_v42, %v4658_v38  ;;  %v4883_v50 = vor.u32 %v6272_v45, %v4882_v43  ;;  %v4630_v53 = vld [vmem:[%s6876_s16 + $0x238] sm:$0xf]  ;;  %v6405_v43 = vld [vmem:[%s6876_s16 + $0x870] sm:$0xf0] }
  0x97   : > { %3378 = vmatpush.bf16.msrb.mxu0 %v5327_v0  ;;  %v4966_v0 = vld [vmem:[%s6876_s16 + $0x4d8] sm:$0xf] }
  0x98   : > { %3391 = vmatpush.bf16.msrb.mxu1 %v5551_v2  ;;  %v6293_v2 = vld [vmem:[%s6876_s16 + $0x4f0] sm:$0xf0]  ;;  %v5414_v42 = vld [vmem:[%s6876_s16 + $0x858] sm:$0xf] }
  0x99   : > { %3404 = vmatpush.bf16.msrb.mxu2 %v5775_v3  ;;  %v5190_v3 = vld [vmem:[%s6876_s16 + $0x698] sm:$0xf] }
  0x9a   : > { %3417 = vmatpush.bf16.msrb.mxu3 %v5999_v8  ;;  %v4967_v8 = vor.u32 %v6293_v2, %v4966_v0  ;;  %v5191_v12 = vor.u32 %v6349_v4, %v5190_v3  ;;  %v6146_v0 = vld [vmem:[%s6876_s16 + $0x58] sm:$0xf0]  ;;  %v4602_v2 = vld [vmem:[%s6876_s16 + $0x200] sm:$0xf]  ;;  %v5638_v45 = vld [vmem:[%s6876_s16 + $0xa18] sm:$0xf] }
  0x9b   : > { %3379 = vmatpush.bf16.msrb.mxu0 %v5299_v16  ;;  %v4938_v16 = vld [vmem:[%s6876_s16 + $0x4a0] sm:$0xf]  ;;  %v6202_v4 = vld [vmem:[%s6876_s16 + $0x218] sm:$0xf0]  ;;  %v4379_v10 = vor.u32 %v6146_v0, %v4378_v63 }
  0x9c   : > { %3392 = vmatpush.bf16.msrb.mxu1 %v5523_v17  ;;  %v6286_v17 = vld [vmem:[%s6876_s16 + $0x4b8] sm:$0xf0]  ;;  %v4603_v13 = vor.u32 %v6202_v4, %v4602_v2  ;;  %v5358_v4 = vld [vmem:[%s6876_s16 + $0x7e8] sm:$0xf] }
  0x9d   : > { %3405 = vmatpush.bf16.msrb.mxu2 %v5747_v18  ;;  %v5162_v18 = vld [vmem:[%s6876_s16 + $0x660] sm:$0xf]  ;;  %v6566_v63 = vld [vmem:[%s6876_s16 + $0xd78] sm:$0xf0] }
  0x9e   : > { %3418 = vmatpush.bf16.msrb.mxu3 %v5971_v22  ;;  %v4939_v22 = vor.u32 %v6286_v17, %v4938_v16  ;;  %v5163_v26 = vor.u32 %v6342_v19, %v5162_v18  ;;  %v4574_v17 = vld [vmem:[%s6876_s16 + $0x1c8] sm:$0xf]  ;;  %v6195_v18 = vld [vmem:[%s6876_s16 + $0x1e0] sm:$0xf0] }
  0x9f   : > { %3380 = vmatpush.bf16.msrb.mxu0 %v5271_v28  ;;  %v4910_v28 = vld [vmem:[%s6876_s16 + $0x468] sm:$0xf] }
  0xa0   : > { %3393 = vmatpush.bf16.msrb.mxu1 %v5495_v31  ;;  %v6335_v31 = vld [vmem:[%s6876_s16 + $0x640] sm:$0xf0]  ;;  %v4911_v34 = vor.u32 %v6279_v29, %v4910_v28  ;;  %v4798_v19 = vld [vmem:[%s6876_s16 + $0x388] sm:$0xf]  ;;  %v6468_v28 = vld [vmem:[%s6876_s16 + $0xa68] sm:$0xf0] }
  0xa1   : > { %3406 = vmatpush.bf16.msrb.mxu2 %v5719_v32  ;;  %v4463_v32 = vor.u32 %v6167_v24, %v4462_v23  ;;  %v5135_v41 = vor.u32 %v6335_v31, %v5134_v30  ;;  %v6307_v23 = vld [vmem:[%s6876_s16 + $0x560] sm:$0xf0]  ;;  %v5442_v24 = vld [vmem:[%s6876_s16 + $0x890] sm:$0xf]  ;;  %v6524_v30 = vld [vmem:[%s6876_s16 + $0xc28] sm:$0xf0]  ;;  %v4575_v31 = vor.u32 %v6195_v18, %v4574_v17 }
  0xa2   : > { %3419 = vmatpush.bf16.msrb.mxu3 %v5943_v37  ;;  %v6160_v37 = vld [vmem:[%s6876_s16 + $0xc8] sm:$0xf0]  ;;  %v5890_v29 = vld [vmem:[%s6876_s16 + $0xc10] sm:$0xf] }
  0xa3   : > { %3381 = vmatpush.bf16.msrb.mxu0 %v5243_v47  ;;  %v6328_v47 = vld [vmem:[%s6876_s16 + $0x608] sm:$0xf0]  ;;  %v4435_v48 = vor.u32 %v6160_v37, %v4434_v36  ;;  %v5443_v37 = vor.u32 %v6412_v25, %v5442_v24  ;;  %v5778_v24 = vld [vmem:[%s6876_s16 + $0xb30] sm:$0xf] }
  0xa4   : > { %3394 = vmatpush.bf16.msrb.mxu1 %v5467_v51  ;;  %v4406_v51 = vld [vmem:[%s6876_s16 + $0x78] sm:$0xf]  ;;  %v5107_v54 = vor.u32 %v6328_v47, %v5106_v46  ;;  %v6461_v47 = vld [vmem:[%s6876_s16 + $0xa30] sm:$0xf0]  ;;  %v6496_v25 = vld [vmem:[%s6876_s16 + $0xb48] sm:$0xf0] }
  0xa5   : > { %3407 = vmatpush.bf16.msrb.mxu2 %v5691_v52  ;;  %v6153_v52 = vld [vmem:[%s6876_s16 + $0x90] sm:$0xf0] }
  0xa6   : > { %3420 = vmatpush.bf16.msrb.mxu3 %v5915_v55  ;;  %3382 = vmatmul.bf16.vlgmr.msrb.gmra.mxu0 %v7056_v39  ;;  %v6209_v55 = vld [vmem:[%s6876_s16 + $0x250] sm:$0xf0]  ;;  %v4407_v60 = vor.u32 %v6153_v52, %v4406_v51  ;;  %v5415_v52 = vor.u32 %v6405_v43, %v5414_v42  ;;  %v5974_v43 = vld [vmem:[%s6876_s16 + $0xcb8] sm:$0xf] }
  0xa7   : > { %3426 = vmatpush.bf16.msra.mxu0 %v4547_v56  ;;  %3395 = vmatmul.bf16.vlgmr.msrb.gmra.mxu1 %v7062_v44  ;;  %v4854_v56 = vld [vmem:[%s6876_s16 + $0x3f8] sm:$0xf]  ;;  %v4631_v61 = vor.u32 %v6209_v55, %v4630_v53  ;;  %v6573_v51 = vld [vmem:[%s6876_s16 + $0xdb0] sm:$0xf0]  ;;  %v5639_v53 = vor.u32 %v6461_v47, %v5638_v45  ;;  %v5386_v55 = vld [vmem:[%s6876_s16 + $0x820] sm:$0xf] }
  0xa8   : > { %3439 = vmatpush.bf16.msra.mxu1 %v4771_v57  ;;  %3408 = vmatmul.bf16.vlgmr.msrb.gmra.mxu2 %v7051_v35  ;;  %v6265_v57 = vld [vmem:[%s6876_s16 + $0x410] sm:$0xf0] }
  0xa9   : > { %3452 = vmatpush.bf16.msra.mxu2 %v4995_v58  ;;  %3421 = vmatmul.bf16.vlgmr.msrb.gmra.mxu3 %v7058_v40  ;;  %v5078_v58 = vld [vmem:[%s6876_s16 + $0x5b8] sm:$0xf]  ;;  %v6489_v42 = vld [vmem:[%s6876_s16 + $0xb10] sm:$0xf0] }
  0xaa   : > { %3465 = vmatpush.bf16.msra.mxu3 %v5219_v62  ;;  %v4855_v62 = vor.u32 %v6265_v57, %v4854_v56  ;;  %v5079_v3 = vor.u32 %v6321_v59, %v5078_v58  ;;  %v6398_v56 = vld [vmem:[%s6876_s16 + $0x838] sm:$0xf0]  ;;  %v5610_v57 = vld [vmem:[%s6876_s16 + $0x9e0] sm:$0xf]  ;;  %v6545_v45 = vld [vmem:[%s6876_s16 + $0xcd0] sm:$0xf0] }
  0xab   : > { %3427 = vmatpush.bf16.msra.mxu0 %v4519_v5  ;;  %v4826_v5 = vld [vmem:[%s6876_s16 + $0x3c0] sm:$0xf]  ;;  %v6454_v59 = vld [vmem:[%s6876_s16 + $0x9f8] sm:$0xf0]  ;;  %v5387_v0 = vor.u32 %v6398_v56, %v5386_v55 }
  0xac   : > { %3440 = vmatpush.bf16.msra.mxu1 %v4743_v7  ;;  %v6258_v7 = vld [vmem:[%s6876_s16 + $0x3d8] sm:$0xf0]  ;;  %v5611_v2 = vor.u32 %v6454_v59, %v5610_v57  ;;  %v5722_v56 = vld [vmem:[%s6876_s16 + $0xac0] sm:$0xf] }
  0xad   : > { %3453 = vmatpush.bf16.msra.mxu2 %v4967_v8  ;;  %v5050_v8 = vld [vmem:[%s6876_s16 + $0x580] sm:$0xf]  ;;  %v4827_v16 = vor.u32 %v6258_v7, %v4826_v5  ;;  %v6391_v5 = vld [vmem:[%s6876_s16 + $0x800] sm:$0xf0]  ;;  %v5582_v7 = vld [vmem:[%s6876_s16 + $0x9a8] sm:$0xf] }
  0xae   : > { %3466 = vmatpush.bf16.msra.mxu3 %v5191_v12  ;;  %v6139_v12 = vld [vmem:[%s6876_s16 + $0x20] sm:$0xf0]  ;;  %v6426_v55 = vld [vmem:[%s6876_s16 + $0x918] sm:$0xf0]  ;;  %v5946_v59 = vld [vmem:[%s6876_s16 + $0xc80] sm:$0xf] }
  0xaf   : > { %3428 = vmatpush.bf16.msra.mxu0 %v4491_v20  ;;  %v5051_v20 = vor.u32 %v6314_v9, %v5050_v8  ;;  %v4351_v27 = vor.u32 %v6139_v12, %v4350_v11  ;;  %v6447_v9 = vld [vmem:[%s6876_s16 + $0x9c0] sm:$0xf0]  ;;  %v6030_v12 = vld [vmem:[%s6876_s16 + $0xd28] sm:$0xf]  ;;  %v6482_v57 = vld [vmem:[%s6876_s16 + $0xad8] sm:$0xf0] }
  0xb0   : > { %3441 = vmatpush.bf16.msra.mxu1 %v4715_v21  ;;  %v6251_v21 = vld [vmem:[%s6876_s16 + $0x3a0] sm:$0xf0]  ;;  %v5583_v17 = vor.u32 %v6447_v9, %v5582_v7 }
  0xb1   : > { %3454 = vmatpush.bf16.msra.mxu2 %v4939_v22  ;;  %v5022_v22 = vld [vmem:[%s6876_s16 + $0x548] sm:$0xf]  ;;  %v6503_v11 = vld [vmem:[%s6876_s16 + $0xb80] sm:$0xf0] }
  0xb2   : > { %3467 = vmatpush.bf16.msra.mxu3 %v5163_v26  ;;  %v5666_v26 = vld [vmem:[%s6876_s16 + $0xa50] sm:$0xf]  ;;  %v5023_v36 = vor.u32 %v6307_v23, %v5022_v22  ;;  %v6440_v23 = vld [vmem:[%s6876_s16 + $0x988] sm:$0xf0]  ;;  %v6419_v7 = vld [vmem:[%s6876_s16 + $0x8e0] sm:$0xf0] }
  0xb3   : > { %3429 = vmatpush.bf16.msra.mxu0 %v4463_v32  ;;  %v4799_v32 = vor.u32 %v6251_v21, %v4798_v19  ;;  %v5667_v38 = vor.u32 %v6468_v28, %v5666_v26  ;;  %v5330_v19 = vld [vmem:[%s6876_s16 + $0x7b0] sm:$0xf] }
  0xb4   : > { %3442 = vmatpush.bf16.msra.mxu1 %v4687_v33  ;;  %v6114_v33 = vld [vmem:[%s6876_s16 + $0xdd0] sm:$0xf] }
  0xb5   : > { %3455 = vmatpush.bf16.msra.mxu2 %v4911_v34  ;;  %v6580_v34 = vld [vmem:[%s6876_s16 + $0xde8] sm:$0xf0]  ;;  %v5554_v21 = vld [vmem:[%s6876_s16 + $0x970] sm:$0xf] }
  0xb6   : > { %3468 = vmatpush.bf16.msra.mxu3 %v5135_v41  ;;  %v5891_v41 = vor.u32 %v6524_v30, %v5890_v29  ;;  %v6115_v46 = vor.u32 %v6580_v34, %v6114_v33  ;;  %v6002_v26 = vld [vmem:[%s6876_s16 + $0xcf0] sm:$0xf]  ;;  %v5555_v30 = vor.u32 %v6440_v23, %v5554_v21  ;;  %v6377_v33 = vld [vmem:[%s6876_s16 + $0x790] sm:$0xf0]  ;;  %v5526_v34 = vld [vmem:[%s6876_s16 + $0x938] sm:$0xf] }
  0xb7   : > { %3430 = vmatpush.bf16.msra.mxu0 %v4435_v48  ;;  %v5862_v48 = vld [vmem:[%s6876_s16 + $0xbd8] sm:$0xf]  ;;  %v6297_v23 = vld [vmem:[%s6876_s16 + $0x514] sm:$0xf] }
  0xb8   : > { %3443 = vmatpush.bf16.msra.mxu1 %v4659_v49  ;;  %v6517_v49 = vld [vmem:[%s6876_s16 + $0xbf0] sm:$0xf0] }
  0xb9   : > { %3456 = vmatpush.bf16.msra.mxu2 %v4883_v50  ;;  %v6086_v50 = vld [vmem:[%s6876_s16 + $0xd98] sm:$0xf] }
  0xba   : > { %3469 = vmatpush.bf16.msra.mxu3 %v5107_v54  ;;  %v5863_v54 = vor.u32 %v6517_v49, %v5862_v48  ;;  %v6087_v58 = vor.u32 %v6573_v51, %v6086_v50  ;;  %v7309_v48 = vld [vmem:[%s6882_s24] sm:$0xff] }
  0xbb   : > { %3431 = vmatpush.bf16.msra.mxu0 %v4407_v60  ;;  %v5834_v60 = vld [vmem:[%s6876_s16 + $0xba0] sm:$0xf] }
  0xbc   : > { %3444 = vmatpush.bf16.msra.mxu1 %v4631_v61  ;;  %v6510_v61 = vld [vmem:[%s6876_s16 + $0xbb8] sm:$0xf0]  ;;  %v5274_v51 = vld [vmem:[%s6876_s16 + $0x740] sm:$0xf] }
  0xbd   : > { %3457 = vmatpush.bf16.msra.mxu2 %v4855_v62  ;;  %v6058_v62 = vld [vmem:[%s6876_s16 + $0xd60] sm:$0xf] }
  0xbe   : > { %3470 = vmatpush.bf16.msra.mxu3 %v5079_v3  ;;  %v5835_v3 = vor.u32 %v6510_v61, %v5834_v60  ;;  %v6059_v8 = vor.u32 %v6566_v63, %v6058_v62  ;;  %v6538_v60 = vld [vmem:[%s6876_s16 + $0xc98] sm:$0xf0]  ;;  %v872_v61 = vperm.slane %v7309_v48, 0  ;;  %v5246_v63 = vld [vmem:[%s6876_s16 + $0x708] sm:$0xf] }
  0xbf   : > { %3432 = vmatpush.bf16.msra.mxu0 %v4379_v10  ;;  %v5806_v10 = vld [vmem:[%s6876_s16 + $0xb68] sm:$0xf] }
  0xc0   : > { %3445 = vmatpush.bf16.msra.mxu1 %v4603_v13  ;;  %v6559_v13 = vld [vmem:[%s6876_s16 + $0xd40] sm:$0xf0]  ;;  %v5807_v18 = vor.u32 %v6503_v11, %v5806_v10  ;;  %v5947_v10 = vor.u32 %v6538_v60, %v5946_v59  ;;  %v4716_v59 = vld [vmem:[%s6876_s16 + $0x2fc] sm:$0xf0] }
  0xc1   : > { %3458 = vmatpush.bf16.msra.mxu2 %v4827_v16  ;;  %v5359_v16 = vor.u32 %v6391_v5, %v5358_v4  ;;  %v6031_v22 = vor.u32 %v6559_v13, %v6030_v12  ;;  %v5723_v4 = vor.u32 %v6482_v57, %v5722_v56  ;;  %v5470_v5 = vld [vmem:[%s6876_s16 + $0x8c8] sm:$0xf]  ;;  %v6475_v11 = vld [vmem:[%s6876_s16 + $0xaa0] sm:$0xf0] }
  0xc2   : > { %3471 = vmatpush.bf16.msra.mxu3 %v5051_v20  ;;  %v6384_v20 = vld [vmem:[%s6876_s16 + $0x7c8] sm:$0xf0]  ;;  %v5918_v12 = vld [vmem:[%s6876_s16 + $0xc48] sm:$0xf]  ;;  %v6531_v13 = vld [vmem:[%s6876_s16 + $0xc60] sm:$0xf0] }
  0xc3   : > { %3433 = vmatpush.bf16.msra.mxu0 %v4351_v27  ;;  %v6552_v27 = vld [vmem:[%s6876_s16 + $0xd08] sm:$0xf0]  ;;  %v5331_v28 = vor.u32 %v6384_v20, %v5330_v19  ;;  %v3227_v29 = vpop.f32.mrf.mxu0  ;;  %v6241_v19 = vld [vmem:[%s6876_s16 + $0x354] sm:$0xf]  ;;  %v6227_v56 = vld [vmem:[%s6876_s16 + $0x2e4] sm:$0xf] }
  0xc4   : > { %3446 = vmatpush.bf16.msra.mxu1 %v4575_v31  ;;  %v5779_v31 = vor.u32 %v6496_v25, %v5778_v24  ;;  %v4996_v24 = vld [vmem:[%s6876_s16 + $0x52c] sm:$0xf0]  ;;  %v5471_v25 = vor.u32 %v6419_v7, %v5470_v5  ;;  %v6283_v60 = vld [vmem:[%s6876_s16 + $0x4a4] sm:$0xf]  ;;  %v4464_v5 = vld [vmem:[%s6876_s16 + $0x104] sm:$0xf0] }
  0xc5   : > { %3459 = vmatpush.bf16.msra.mxu2 %v4799_v32  ;;  %v5302_v32 = vld [vmem:[%s6876_s16 + $0x778] sm:$0xf]  ;;  %v6220_v7 = vld [vmem:[%s6876_s16 + $0x2ac] sm:$0xf] }
  0xc6   : > { %3472 = vmatpush.bf16.msra.mxu3 %v5023_v36  ;;  %3434 = vmatmul.bf16.vlgmr.msra.gmra.mxu0 %v6990_v14  ;;  %v7299_v36 = vpop.f32.mrf.mxu1  ;;  %v5303_v47 = vor.u32 %v6377_v33, %v5302_v32 }
  0xc7   : > { %3478 = vmatpush.bf16.msrb.mxu0 %v5443_v37  ;;  %3447 = vmatmul.bf16.vlgmr.msra.gmra.mxu1 %v6992_v15  ;;  %v6003_v37 = vor.u32 %v6552_v27, %v6002_v26  ;;  %v6353_v27 = vld [vmem:[%s6876_s16 + $0x6d4] sm:$0xf] }
  0xc8   : > { %3491 = vmatpush.bf16.msrb.mxu1 %v5667_v38  ;;  %3460 = vmatmul.bf16.vlgmr.msra.gmra.mxu2 %v6977_v1  ;;  %v6433_v38 = vld [vmem:[%s6876_s16 + $0x950] sm:$0xf0] }
  0xc9   : > { %3504 = vmatpush.bf16.msrb.mxu2 %v5891_v41  ;;  %3473 = vmatmul.bf16.vlgmr.msra.gmra.mxu3 %v6984_v6  ;;  %v5750_v41 = vld [vmem:[%s6876_s16 + $0xaf8] sm:$0xf]  ;;  %v5527_v49 = vor.u32 %v6433_v38, %v5526_v34  ;;  %v4999_v34 = vor.u32 %v6297_v23, %v4996_v24  ;;  %v6213_v23 = vld [vmem:[%s6876_s16 + $0x274] sm:$0xf] }
  0xca   : > { %3517 = vmatpush.bf16.msrb.mxu3 %v6115_v46  ;;  %v5751_v50 = vor.u32 %v6489_v42, %v5750_v41  ;;  %v4520_v38 = vld [vmem:[%s6876_s16 + $0x174] sm:$0xf0]  ;;  %v6234_v41 = vld [vmem:[%s6876_s16 + $0x31c] sm:$0xf] }
  0xcb   : > { %3479 = vmatpush.bf16.msrb.mxu0 %v5415_v52  ;;  %v7306_v46 = vpop.f32.mrf.mxu2  ;;  %v6370_v52 = vld [vmem:[%s6876_s16 + $0x758] sm:$0xf0] }
  0xcc   : > { %3492 = vmatpush.bf16.msrb.mxu1 %v5639_v53  ;;  %v5498_v53 = vld [vmem:[%s6876_s16 + $0x900] sm:$0xf]  ;;  %v5275_v62 = vor.u32 %v6370_v52, %v5274_v51 }
  0xcd   : > { %3505 = vmatpush.bf16.msrb.mxu2 %v5863_v54  ;;  %v5975_v54 = vor.u32 %v6545_v45, %v5974_v43  ;;  %v4744_v43 = vld [vmem:[%s6876_s16 + $0x334] sm:$0xf0]  ;;  %v6290_v45 = vld [vmem:[%s6876_s16 + $0x4dc] sm:$0xf] }
  0xce   : > { %3518 = vmatpush.bf16.msrb.mxu3 %v6087_v58  ;;  %v7317_v58 = vpop.f32.mrf.mxu3  ;;  %v3242_v9 = vpop.f32.mrf.mxu1  ;;  %v4747_v52 = vor.u32 %v6234_v41, %v4744_v43  ;;  %v6206_v41 = vld [vmem:[%s6876_s16 + $0x23c] sm:$0xf] }
  0xcf   : > { %3480 = vmatpush.bf16.msrb.mxu0 %v5387_v0  ;;  %v6363_v0 = vld [vmem:[%s6876_s16 + $0x720] sm:$0xf0]  ;;  %v4688_v9 = vld [vmem:[%s6876_s16 + $0x2c4] sm:$0xf0] }
  0xd0   : > { %3493 = vmatpush.bf16.msrb.mxu1 %v5611_v2  ;;  %v3229_v2 = vpop.f32.mrf.mxu0  ;;  %v5247_v21 = vor.u32 %v6363_v0, %v5246_v63 }
  0xd1   : > { %3506 = vmatpush.bf16.msrb.mxu2 %v5835_v3  ;;  %v5499_v3 = vor.u32 %v6426_v55, %v5498_v53  ;;  %v4492_v55 = vld [vmem:[%s6876_s16 + $0x13c] sm:$0xf0]  ;;  %v4719_v2 = vor.u32 %v6227_v56, %v4716_v59 }
  0xd2   : > { %3519 = vmatpush.bf16.msrb.mxu3 %v6059_v8  ;;  %v5694_v8 = vld [vmem:[%s6876_s16 + $0xa88] sm:$0xf] }
  0xd3   : > { %3481 = vmatpush.bf16.msrb.mxu0 %v5359_v16  ;;  %v3228_v16 = vadd.f32 %v3227_v29, %v872_v61  ;;  %v3255_v20 = vpop.f32.mrf.mxu2  ;;  %v5695_v26 = vor.u32 %v6475_v11, %v5694_v8  ;;  %v5919_v29 = vor.u32 %v6531_v13, %v5918_v12  ;;  %v4940_v61 = vld [vmem:[%s6876_s16 + $0x4bc] sm:$0xf0]  ;;  %v4912_v11 = vld [vmem:[%s6876_s16 + $0x484] sm:$0xf0]  ;;  %v6332_v12 = vld [vmem:[%s6876_s16 + $0x62c] sm:$0xf] }
  0xd4   : > { %3494 = vmatpush.bf16.msrb.mxu1 %v5583_v17  ;;  %v6185_v17 = vld [vmem:[%s6876_s16 + $0x194] sm:$0xf]  ;;  %v5136_v13 = vld [vmem:[%s6876_s16 + $0x644] sm:$0xf0] }
  0xd5   : > { %3507 = vmatpush.bf16.msrb.mxu2 %v5807_v18  ;;  %v4548_v18 = vld [vmem:[%s6876_s16 + $0x1ac] sm:$0xf0]  ;;  %v3241_v32 = vadd.f32 %v7299_v36, %v3228_v16  ;;  %v5139_v24 = vor.u32 %v6332_v12, %v5136_v13  ;;  %v6192_v12 = vld [vmem:[%s6876_s16 + $0x1cc] sm:$0xf]  ;;  %v4576_v13 = vld [vmem:[%s6876_s16 + $0x1e4] sm:$0xf0] }
  0xd6   : > { %3520 = vmatpush.bf16.msrb.mxu3 %v6031_v22  ;;  %v4772_v22 = vld [vmem:[%s6876_s16 + $0x36c] sm:$0xf0] }
  0xd7   : > { %3482 = vmatpush.bf16.msrb.mxu0 %v5331_v28  ;;  %v5220_v28 = vld [vmem:[%s6876_s16 + $0x6ec] sm:$0xf0]  ;;  %v4775_v33 = vor.u32 %v6241_v19, %v4772_v22  ;;  %v3254_v51 = vadd.f32 %v7306_v46, %v3241_v32  ;;  %v6339_v46 = vld [vmem:[%s6876_s16 + $0x664] sm:$0xf] }
  0xd8   : > { %3495 = vmatpush.bf16.msrb.mxu1 %v5555_v30  ;;  %v4551_v30 = vor.u32 %v6185_v17, %v4548_v18  ;;  %v5223_v42 = vor.u32 %v6353_v27, %v5220_v28  ;;  %v4691_v17 = vor.u32 %v6220_v7, %v4688_v9  ;;  %v4436_v22 = vld [vmem:[%s6876_s16 + $0xcc] sm:$0xf0]  ;;  %v4352_v9 = vld [vmem:[%s6876_s16 + $0x24] sm:$0xf0] }
  0xd9   : > { %3508 = vmatpush.bf16.msrb.mxu2 %v5779_v31  ;;  %v3268_v31 = vpop.f32.mrf.mxu3  ;;  %v3267_v0 = vadd.f32 %v7317_v58, %v3254_v51  ;;  %v4884_v27 = vld [vmem:[%s6876_s16 + $0x44c] sm:$0xf0]  ;;  %v5080_v51 = vld [vmem:[%s6876_s16 + $0x5d4] sm:$0xf0] }
  0xda   : > { %3521 = vmatpush.bf16.msrb.mxu3 %v6003_v37  ;;  %v6178_v37 = vld [vmem:[%s6876_s16 + $0x15c] sm:$0xf] }
  0xdb   : > { %3483 = vmatpush.bf16.msrb.mxu0 %v5303_v47  ;;  %v4968_v47 = vld [vmem:[%s6876_s16 + $0x4f4] sm:$0xf0]  ;;  %v4523_v36 = vor.u32 %v6178_v37, %v4520_v38  ;;  %v6150_v37 = vld [vmem:[%s6876_s16 + $0x7c] sm:$0xf] }
  0xdc   : > { %3496 = vmatpush.bf16.msrb.mxu1 %v5527_v49  ;;  %v6346_v49 = vld [vmem:[%s6876_s16 + $0x69c] sm:$0xf]  ;;  %v4971_v53 = vor.u32 %v6290_v45, %v4968_v47  ;;  %v4408_v38 = vld [vmem:[%s6876_s16 + $0x94] sm:$0xf0] }
  0xdd   : > { %3509 = vmatpush.bf16.msrb.mxu2 %v5751_v50  ;;  %v5192_v50 = vld [vmem:[%s6876_s16 + $0x6b4] sm:$0xf0] }
  0xde   : > { %3522 = vmatpush.bf16.msrb.mxu3 %v5975_v54  ;;  %v6171_v54 = vld [vmem:[%s6876_s16 + $0x124] sm:$0xf]  ;;  %v5195_v57 = vor.u32 %v6346_v49, %v5192_v50  ;;  %v4632_v47 = vld [vmem:[%s6876_s16 + $0x254] sm:$0xf0]  ;;  %v6262_v49 = vld [vmem:[%s6876_s16 + $0x3fc] sm:$0xf] }
  0xdf   : > { %3484 = vmatpush.bf16.msrb.mxu0 %v5275_v62  ;;  %v5164_v62 = vld [vmem:[%s6876_s16 + $0x67c] sm:$0xf0]  ;;  %v4495_v63 = vor.u32 %v6171_v54, %v4492_v55  ;;  %v4856_v50 = vld [vmem:[%s6876_s16 + $0x414] sm:$0xf0]  ;;  %v6143_v54 = vld [vmem:[%s6876_s16 + $0x44] sm:$0xf] }
  0xe0   : > { %3497 = vmatpush.bf16.msrb.mxu1 %v5499_v3  ;;  %v4943_v3 = vor.u32 %v6283_v60, %v4940_v61  ;;  %v5167_v8 = vor.u32 %v6339_v46, %v5164_v62  ;;  %v4380_v55 = vld [vmem:[%s6876_s16 + $0x5c] sm:$0xf0]  ;;  %v4859_v59 = vor.u32 %v6262_v49, %v4856_v50  ;;  %v6199_v60 = vld [vmem:[%s6876_s16 + $0x204] sm:$0xf]  ;;  %v6514_v49 = vld [vmem:[%s6876_s16 + $0xbdc] sm:$0xf] }
  0xe1   : > { %3510 = vmatpush.bf16.msrb.mxu2 %v5723_v4  ;;  %v6164_v4 = vld [vmem:[%s6876_s16 + $0xec] sm:$0xf]  ;;  %v4604_v61 = vld [vmem:[%s6876_s16 + $0x21c] sm:$0xf0]  ;;  %v6255_v46 = vld [vmem:[%s6876_s16 + $0x3c4] sm:$0xf]  ;;  %v4383_v7 = vor.u32 %v6143_v54, %v4380_v55 }
  0xe2   : > { %3523 = vmatpush.bf16.msrb.mxu3 %v5947_v10  ;;  %v6276_v10 = vld [vmem:[%s6876_s16 + $0x46c] sm:$0xf]  ;;  %v4467_v58 = vor.u32 %v6164_v4, %v4464_v5  ;;  %v5052_v4 = vld [vmem:[%s6876_s16 + $0x59c] sm:$0xf0]  ;;  %v5864_v50 = vld [vmem:[%s6876_s16 + $0xbf4] sm:$0xf0] }
  0xe3   : > { %3485 = vmatpush.bf16.msrb.mxu0 %v5247_v21  ;;  %v3279_v16 = vpop.f32.mrf.mxu0  ;;  %v4915_v18 = vor.u32 %v6276_v10, %v4912_v11  ;;  %v6157_v21 = vld [vmem:[%s6876_s16 + $0xb4] sm:$0xf]  ;;  %v4607_v10 = vor.u32 %v6199_v60, %v4604_v61  ;;  %v5867_v54 = vor.u32 %v6514_v49, %v5864_v50  ;;  %v6395_v55 = vld [vmem:[%s6876_s16 + $0x824] sm:$0xf]  ;;  %v5612_v60 = vld [vmem:[%s6876_s16 + $0x9fc] sm:$0xf0] }
  0xe4   : > { %3498 = vmatpush.bf16.msrb.mxu1 %v5471_v25  ;;  %v3280_v19 = vadd.f32 %v3279_v16, %v3267_v0  ;;  %v3292_v20 = vpop.f32.mrf.mxu1  ;;  %v4660_v25 = vld [vmem:[%s6876_s16 + $0x28c] sm:$0xf0]  ;;  %v4439_v31 = vor.u32 %v6157_v21, %v4436_v22  ;;  %v6409_v22 = vld [vmem:[%s6876_s16 + $0x894] sm:$0xf]  ;;  %v6507_v61 = vld [vmem:[%s6876_s16 + $0xba4] sm:$0xf] }
  0xe5   : > { %3511 = vmatpush.bf16.msrb.mxu2 %v5695_v26  ;;  %v6269_v26 = vld [vmem:[%s6876_s16 + $0x434] sm:$0xf]  ;;  %v4663_v32 = vor.u32 %v6213_v23, %v4660_v25  ;;  %v5444_v23 = vld [vmem:[%s6876_s16 + $0x8ac] sm:$0xf0]  ;;  %v6542_v49 = vld [vmem:[%s6876_s16 + $0xcbc] sm:$0xf] }
  0xe6   : > { %3524 = vmatpush.bf16.msrb.mxu3 %v5919_v29  ;;  %3486 = vmatmul.bf16.vlgmr.msrb.gmra.mxu0 %v7056_v39  ;;  %v3293_v28 = vadd.f32 %v3292_v20, %v3280_v19  ;;  %v6325_v29 = vld [vmem:[%s6876_s16 + $0x5f4] sm:$0xf]  ;;  %v6304_v19 = vld [vmem:[%s6876_s16 + $0x54c] sm:$0xf]  ;;  %v5024_v20 = vld [vmem:[%s6876_s16 + $0x564] sm:$0xf0] }
  0xe7   : > { %3530 = vmatpush.bf16.msra.mxu0 %v4551_v30  ;;  %3499 = vmatmul.bf16.vlgmr.msrb.gmra.mxu1 %v7062_v44  ;;  %v5108_v30 = vld [vmem:[%s6876_s16 + $0x60c] sm:$0xf0]  ;;  %v5976_v50 = vld [vmem:[%s6876_s16 + $0xcd4] sm:$0xf0] }
  0xe8   : > { %3543 = vmatpush.bf16.msra.mxu1 %v4775_v33  ;;  %3512 = vmatmul.bf16.vlgmr.msrb.gmra.mxu2 %v7051_v35  ;;  %v4887_v33 = vor.u32 %v6269_v26, %v4884_v27  ;;  %v5668_v26 = vld [vmem:[%s6876_s16 + $0xa6c] sm:$0xf0]  ;;  %v6521_v27 = vld [vmem:[%s6876_s16 + $0xc14] sm:$0xf] }
  0xe9   : > { %3556 = vmatpush.bf16.msra.mxu2 %v4999_v34  ;;  %3525 = vmatmul.bf16.vlgmr.msrb.gmra.mxu3 %v7058_v40 }
  0xea   : > { %3569 = vmatpush.bf16.msra.mxu3 %v5223_v42  ;;  %v5111_v42 = vor.u32 %v6325_v29, %v5108_v30  ;;  %v4579_v29 = vor.u32 %v6192_v12, %v4576_v13  ;;  %v5808_v12 = vld [vmem:[%s6876_s16 + $0xb84] sm:$0xf0]  ;;  %v6556_v13 = vld [vmem:[%s6876_s16 + $0xd2c] sm:$0xf] }
  0xeb   : > { %3531 = vmatpush.bf16.msra.mxu0 %v4523_v36  ;;  %v3305_v34 = vpop.f32.mrf.mxu2  ;;  %v6318_v36 = vld [vmem:[%s6876_s16 + $0x5bc] sm:$0xf]  ;;  %v3281_v56 = vpop.f32.mrf.mxu0 }
  0xec   : > { %3544 = vmatpush.bf16.msra.mxu1 %v4747_v52  ;;  %v3306_v43 = vadd.f32 %v3305_v34, %v3293_v28  ;;  %v3318_v45 = vpop.f32.mrf.mxu3  ;;  %v3294_v62 = vpop.f32.mrf.mxu1  ;;  %v5083_v0 = vor.u32 %v6318_v36, %v5080_v51  ;;  %v5892_v28 = vld [vmem:[%s6876_s16 + $0xc2c] sm:$0xf0]  ;;  %v5447_v34 = vor.u32 %v6409_v22, %v5444_v23  ;;  %v6570_v36 = vld [vmem:[%s6876_s16 + $0xd9c] sm:$0xf]  ;;  %v6088_v51 = vld [vmem:[%s6876_s16 + $0xdb4] sm:$0xf0] }
  0xed   : > { %3557 = vmatpush.bf16.msra.mxu2 %v4971_v53  ;;  %v4411_v53 = vor.u32 %v6150_v37, %v4408_v38  ;;  %v5895_v38 = vor.u32 %v6521_v27, %v5892_v28  ;;  %v5388_v56 = vld [vmem:[%s6876_s16 + $0x83c] sm:$0xf0]  ;;  %v6563_v62 = vld [vmem:[%s6876_s16 + $0xd64] sm:$0xf]  ;;  %v6437_v22 = vld [vmem:[%s6876_s16 + $0x974] sm:$0xf] }
  0xee   : > { %3570 = vmatpush.bf16.msra.mxu3 %v5195_v57  ;;  %v3319_v52 = vadd.f32 %v3318_v45, %v3306_v43  ;;  %v4635_v57 = vor.u32 %v6206_v41, %v4632_v47  ;;  %v6402_v41 = vld [vmem:[%s6876_s16 + $0x85c] sm:$0xf]  ;;  %v5640_v47 = vld [vmem:[%s6876_s16 + $0xa34] sm:$0xf0]  ;;  %v5780_v27 = vld [vmem:[%s6876_s16 + $0xb4c] sm:$0xf0] }
  0xef   : > { %3532 = vmatpush.bf16.msra.mxu0 %v4495_v63  ;;  %v6458_v43 = vld [vmem:[%s6876_s16 + $0xa1c] sm:$0xf]  ;;  %v6549_v28 = vld [vmem:[%s6876_s16 + $0xcf4] sm:$0xf] }
  0xf0   : > { %3545 = vmatpush.bf16.msra.mxu1 %v4719_v2  ;;  %vm3946_vm0 = vcmp.ge.f32.partialorder %v3319_v52, 0.0  ;;  %v3953_v63 = vmul.f32 0.01, %v3319_v52  ;;  %v4828_v2 = vld [vmem:[%s6876_s16 + $0x3dc] sm:$0xf0] }
  0xf1   : > { %3558 = vmatpush.bf16.msra.mxu2 %v4943_v3  ;;  %v6311_v3 = vld [vmem:[%s6876_s16 + $0x584] sm:$0xf]  ;;  %v4831_v11 = vor.u32 %v6255_v46, %v4828_v2  ;;  %v5836_v46 = vld [vmem:[%s6876_s16 + $0xbbc] sm:$0xf0] }
  0xf2   : > { %3571 = vmatpush.bf16.msra.mxu3 %v5167_v8  ;;  %v7412_v5 = vsel %vm3946_vm0, %v3319_v52, %v3953_v63  ;;  %v6136_v8 = vld [vmem:[%s6876_s16 + $0xc] sm:$0xf]  ;;  %v6060_v63 = vld [vmem:[%s6876_s16 + $0xd7c] sm:$0xf0] }
  0xf3   : > { %3533 = vmatpush.bf16.msra.mxu0 %v4467_v58  ;;  %3967 = vst [vmem:[%s7407_s14] sm:$0xff] %v7412_v5  ;;  %v6248_v58 = vld [vmem:[%s6876_s16 + $0x38c] sm:$0xf]  ;;  %v3307_v16 = vpop.f32.mrf.mxu2  ;;  %v4355_v25 = vor.u32 %v6136_v8, %v4352_v9  ;;  %v6063_v9 = vor.u32 %v6563_v62, %v6060_v63  ;;  %v6535_v62 = vld [vmem:[%s6876_s16 + $0xc84] sm:$0xf]  ;;  %v5948_v63 = vld [vmem:[%s6876_s16 + $0xc9c] sm:$0xf0] }
  0xf4   : > { %3546 = vmatpush.bf16.msra.mxu1 %v4691_v17  ;;  %v5055_v17 = vor.u32 %v6311_v3, %v5052_v4  ;;  %v3320_v21 = vpop.f32.mrf.mxu3  ;;  %v5839_v3 = vor.u32 %v6507_v61, %v5836_v46  ;;  %v6388_v4 = vld [vmem:[%s6876_s16 + $0x7ec] sm:$0xf]  ;;  %v6479_v61 = vld [vmem:[%s6876_s16 + $0xac4] sm:$0xf]  ;;  %v5724_v46 = vld [vmem:[%s6876_s16 + $0xadc] sm:$0xf0] }
  0xf5   : > { %3559 = vmatpush.bf16.msra.mxu2 %v4915_v18  ;;  %v4800_v18 = vld [vmem:[%s6876_s16 + $0x3a4] sm:$0xf0]  ;;  %v6444_v8 = vld [vmem:[%s6876_s16 + $0x9ac] sm:$0xf]  ;;  %v5332_v21 = vld [vmem:[%s6876_s16 + $0x7cc] sm:$0xf0] }
  0xf6   : > { %3572 = vmatpush.bf16.msra.mxu3 %v5139_v24  ;;  %v6465_v24 = vld [vmem:[%s6876_s16 + $0xa54] sm:$0xf]  ;;  %v4803_v30 = vor.u32 %v6248_v58, %v4800_v18  ;;  %v6032_v58 = vld [vmem:[%s6876_s16 + $0xd44] sm:$0xf0] }
  0xf7   : > { %3534 = vmatpush.bf16.msra.mxu0 %v4439_v31  ;;  %v6577_v31 = vld [vmem:[%s6876_s16 + $0xdd4] sm:$0xf]  ;;  %v5671_v37 = vor.u32 %v6465_v24, %v5668_v26  ;;  %v6035_v24 = vor.u32 %v6556_v13, %v6032_v58  ;;  %v5951_v13 = vor.u32 %v6535_v62, %v5948_v63  ;;  %v5696_v58 = vld [vmem:[%s6876_s16 + $0xaa4] sm:$0xf0]  ;;  %v6231_v62 = vld [vmem:[%s6876_s16 + $0x300] sm:$0xf0] }
  0xf8   : > { %3547 = vmatpush.bf16.msra.mxu1 %v4663_v32  ;;  %v6116_v32 = vld [vmem:[%s6876_s16 + $0xdec] sm:$0xf0]  ;;  %v6493_v26 = vld [vmem:[%s6876_s16 + $0xb34] sm:$0xf]  ;;  %v4946_v63 = vld [vmem:[%s6876_s16 + $0x4a8] sm:$0xf] }
  0xf9   : > { %3560 = vmatpush.bf16.msra.mxu2 %v4887_v33  ;;  %v5027_v33 = vor.u32 %v6304_v19, %v5024_v20  ;;  %v6119_v45 = vor.u32 %v6577_v31, %v6116_v32  ;;  %v6381_v20 = vld [vmem:[%s6876_s16 + $0x7b4] sm:$0xf]  ;;  %v5783_v32 = vor.u32 %v6493_v26, %v5780_v27  ;;  %v5002_v27 = vld [vmem:[%s6876_s16 + $0x518] sm:$0xf] }
  0xfa   : > { %3573 = vmatpush.bf16.msra.mxu3 %v5111_v42  ;;  %v5416_v42 = vld [vmem:[%s6876_s16 + $0x874] sm:$0xf0]  ;;  %v6245_v26 = vld [vmem:[%s6876_s16 + $0x370] sm:$0xf0] }
  0xfb   : > { %3535 = vmatpush.bf16.msra.mxu0 %v4411_v53  ;;  %v5419_v52 = vor.u32 %v6402_v41, %v5416_v42  ;;  %v5643_v53 = vor.u32 %v6458_v43, %v5640_v47  ;;  %v5528_v42 = vld [vmem:[%s6876_s16 + $0x954] sm:$0xf0]  ;;  %v6486_v43 = vld [vmem:[%s6876_s16 + $0xafc] sm:$0xf] }
  0xfc   : > { %3548 = vmatpush.bf16.msra.mxu1 %v4635_v57  ;;  %v6451_v57 = vld [vmem:[%s6876_s16 + $0x9e4] sm:$0xf] }
  0xfd   : > { %3561 = vmatpush.bf16.msra.mxu2 %v4859_v59  ;;  %v6091_v59 = vor.u32 %v6570_v36, %v6088_v51  ;;  %v5615_v2 = vor.u32 %v6451_v57, %v5612_v60  ;;  %v5500_v60 = vld [vmem:[%s6876_s16 + $0x91c] sm:$0xf0] }
  0xfe   : > { %3574 = vmatpush.bf16.msra.mxu3 %v5083_v0  ;;  %v5391_v0 = vor.u32 %v6395_v55, %v5388_v56  ;;  %v5276_v55 = vld [vmem:[%s6876_s16 + $0x75c] sm:$0xf0]  ;;  %v6423_v56 = vld [vmem:[%s6876_s16 + $0x904] sm:$0xf] }
  0xff   : > { %3536 = vmatpush.bf16.msra.mxu0 %v4383_v7  ;;  %v5360_v7 = vld [vmem:[%s6876_s16 + $0x804] sm:$0xf0] }
 0x100   : > { %3549 = vmatpush.bf16.msra.mxu1 %v4607_v10  ;;  %v5584_v10 = vld [vmem:[%s6876_s16 + $0x9c4] sm:$0xf0]  ;;  %v5363_v16 = vor.u32 %v6388_v4, %v5360_v7  ;;  %v5503_v7 = vor.u32 %v6423_v56, %v5500_v60  ;;  %v6175_v60 = vld [vmem:[%s6876_s16 + $0x140] sm:$0xf0] }
 0x101   : > { %3562 = vmatpush.bf16.msra.mxu2 %v4831_v11  ;;  %v6500_v11 = vld [vmem:[%s6876_s16 + $0xb6c] sm:$0xf]  ;;  %v5587_v18 = vor.u32 %v6444_v8, %v5584_v10  ;;  %v5248_v4 = vld [vmem:[%s6876_s16 + $0x724] sm:$0xf0]  ;;  %v5727_v8 = vor.u32 %v6479_v61, %v5724_v46 }
 0x102   : > { %3575 = vmatpush.bf16.msra.mxu3 %v5055_v17  ;;  %v5811_v19 = vor.u32 %v6500_v11, %v5808_v12  ;;  %v5472_v10 = vld [vmem:[%s6876_s16 + $0x8e4] sm:$0xf0]  ;;  %v6472_v11 = vld [vmem:[%s6876_s16 + $0xa8c] sm:$0xf]  ;;  %v3978_v12 = vlaneseq }
 0x103   : > { %3537 = vmatpush.bf16.msra.mxu0 %v4355_v25  ;;  %v7460_v17 = vpop.f32.mrf.mxu0  ;;  %v5556_v25 = vld [vmem:[%s6876_s16 + $0x98c] sm:$0xf0]  ;;  %v4722_v61 = vld [vmem:[%s6876_s16 + $0x2e8] sm:$0xf] }
 0x104   : > { %3550 = vmatpush.bf16.msra.mxu1 %v4579_v29  ;;  %v7465_v23 = vpop.f32.mrf.mxu1  ;;  %v6004_v29 = vld [vmem:[%s6876_s16 + $0xd0c] sm:$0xf0]  ;;  %v5559_v31 = vor.u32 %v6437_v22, %v5556_v25  ;;  %v6189_v22 = vld [vmem:[%s6876_s16 + $0x1b0] sm:$0xf0]  ;;  %vm8000_vm10 = vcmp.lt.s32.totalorder %v3978_v12, 896 }
 0x105   : > { %3563 = vmatpush.bf16.msra.mxu2 %v4803_v30  ;;  %v5335_v30 = vor.u32 %v6381_v20, %v5332_v21  ;;  %v6007_v41 = vor.u32 %v6549_v28, %v6004_v29  ;;  %v4554_v21 = vld [vmem:[%s6876_s16 + $0x198] sm:$0xf]  ;;  %v6301_v28 = vld [vmem:[%s6876_s16 + $0x530] sm:$0xf0] }
 0x106   : > { %3576 = vmatpush.bf16.msra.mxu3 %v5027_v33  ;;  %3538 = vmatmul.bf16.vlgmr.msra.gmra.mxu0 %v6990_v14  ;;  %v6374_v33 = vld [vmem:[%s6876_s16 + $0x77c] sm:$0xf] }
 0x107   : > { %3582 = vmatpush.bf16.msrb.mxu0 %v5447_v34  ;;  %3551 = vmatmul.bf16.vlgmr.msra.gmra.mxu1 %v6992_v15  ;;  %v5304_v34 = vld [vmem:[%s6876_s16 + $0x794] sm:$0xf0] }
 0x108   : > { %3595 = vmatpush.bf16.msrb.mxu1 %v5671_v37  ;;  %3564 = vmatmul.bf16.vlgmr.msra.gmra.mxu2 %v6977_v1  ;;  %v6430_v37 = vld [vmem:[%s6876_s16 + $0x93c] sm:$0xf]  ;;  %v5307_v36 = vor.u32 %v6374_v33, %v5304_v34  ;;  %v4555_v34 = vor.u32 %v6189_v22, %v4554_v21 }
 0x109   : > { %3608 = vmatpush.bf16.msrb.mxu2 %v5895_v38  ;;  %3577 = vmatmul.bf16.vlgmr.msra.gmra.mxu3 %v6984_v6 }
 0x10a   : > { %3621 = vmatpush.bf16.msrb.mxu3 %v6119_v45  ;;  %v5752_v45 = vld [vmem:[%s6876_s16 + $0xb14] sm:$0xf0] }
 0x10b   : > { %3583 = vmatpush.bf16.msrb.mxu0 %v5419_v52  ;;  %v7475_v38 = vpop.f32.mrf.mxu2  ;;  %v3333_v51 = vpop.f32.mrf.mxu0  ;;  %v5531_v52 = vor.u32 %v6430_v37, %v5528_v42  ;;  %v5003_v42 = vor.u32 %v6301_v28, %v5002_v27  ;;  %v4442_v27 = vld [vmem:[%s6876_s16 + $0xb8] sm:$0xf]  ;;  %v6161_v28 = vld [vmem:[%s6876_s16 + $0xd0] sm:$0xf0] }
 0x10c   : > { %3596 = vmatpush.bf16.msrb.mxu1 %v5643_v53  ;;  %v7480_v47 = vpop.f32.mrf.mxu3  ;;  %v5755_v53 = vor.u32 %v6486_v43, %v5752_v45  ;;  %v3346_v57 = vpop.f32.mrf.mxu1  ;;  %v4526_v43 = vld [vmem:[%s6876_s16 + $0x160] sm:$0xf]  ;;  %v6182_v45 = vld [vmem:[%s6876_s16 + $0x178] sm:$0xf0] }
 0x10d   : > { %3609 = vmatpush.bf16.msrb.mxu2 %v5867_v54  ;;  %v6367_v54 = vld [vmem:[%s6876_s16 + $0x744] sm:$0xf]  ;;  %v4974_v51 = vld [vmem:[%s6876_s16 + $0x4e0] sm:$0xf] }
 0x10e   : > { %3622 = vmatpush.bf16.msrb.mxu3 %v6091_v59  ;;  %v5979_v59 = vor.u32 %v6542_v49, %v5976_v50  ;;  %v4750_v49 = vld [vmem:[%s6876_s16 + $0x320] sm:$0xf] }
 0x10f   : > { %3584 = vmatpush.bf16.msrb.mxu0 %v5391_v0  ;;  %v873_v0 = vperm.slane %v7309_v48, 1 }
 0x110   : > { %3597 = vmatpush.bf16.msrb.mxu1 %v5615_v2  ;;  %v5279_v2 = vor.u32 %v6367_v54, %v5276_v55  ;;  %v6350_v54 = vld [vmem:[%s6876_s16 + $0x6b8] sm:$0xf0] }
 0x111   : > { %3610 = vmatpush.bf16.msrb.mxu2 %v5839_v3  ;;  %v6360_v3 = vld [vmem:[%s6876_s16 + $0x70c] sm:$0xf]  ;;  %v3332_v20 = vadd.f32 %v7460_v17, %v873_v0  ;;  %v6357_v17 = vld [vmem:[%s6876_s16 + $0x6f0] sm:$0xf0]  ;;  %v6287_v0 = vld [vmem:[%s6876_s16 + $0x4c0] sm:$0xf0] }
 0x112   : > { %3623 = vmatpush.bf16.msrb.mxu3 %v6063_v9  ;;  %v6416_v9 = vld [vmem:[%s6876_s16 + $0x8cc] sm:$0xf]  ;;  %v5251_v25 = vor.u32 %v6360_v3, %v5248_v4 }
 0x113   : > { %3585 = vmatpush.bf16.msrb.mxu0 %v5363_v16  ;;  %v3359_v48 = vpop.f32.mrf.mxu2  ;;  %v6528_v16 = vld [vmem:[%s6876_s16 + $0xc4c] sm:$0xf]  ;;  %v5475_v29 = vor.u32 %v6416_v9, %v5472_v10  ;;  %v3345_v37 = vadd.f32 %v7465_v23, %v3332_v20  ;;  %v4527_v23 = vor.u32 %v6182_v45, %v4526_v43  ;;  %v4947_v9 = vor.u32 %v6287_v0, %v4946_v63  ;;  %v4470_v10 = vld [vmem:[%s6876_s16 + $0xf0] sm:$0xf]  ;;  %v4386_v0 = vld [vmem:[%s6876_s16 + $0x48] sm:$0xf] }
 0x114   : > { %3598 = vmatpush.bf16.msrb.mxu1 %v5587_v18  ;;  %v5920_v18 = vld [vmem:[%s6876_s16 + $0xc64] sm:$0xf0]  ;;  %v4694_v48 = vld [vmem:[%s6876_s16 + $0x2b0] sm:$0xf]  ;;  %v4443_v43 = vor.u32 %v6161_v28, %v4442_v27 }
 0x115   : > { %3611 = vmatpush.bf16.msrb.mxu2 %v5811_v19  ;;  %v3372_v19 = vpop.f32.mrf.mxu3  ;;  %v5923_v33 = vor.u32 %v6528_v16, %v5920_v18  ;;  %v3358_v55 = vadd.f32 %v7475_v38, %v3345_v37  ;;  %v5170_v38 = vld [vmem:[%s6876_s16 + $0x668] sm:$0xf]  ;;  %v6280_v16 = vld [vmem:[%s6876_s16 + $0x488] sm:$0xf0]  ;;  %v5142_v18 = vld [vmem:[%s6876_s16 + $0x630] sm:$0xf] }
 0x116   : > { %3624 = vmatpush.bf16.msrb.mxu3 %v6035_v24  ;;  %v4778_v24 = vld [vmem:[%s6876_s16 + $0x358] sm:$0xf]  ;;  %v6336_v19 = vld [vmem:[%s6876_s16 + $0x648] sm:$0xf0] }
 0x117   : > { %3586 = vmatpush.bf16.msrb.mxu0 %v5335_v30  ;;  %v5699_v30 = vor.u32 %v6472_v11, %v5696_v58  ;;  %v6168_v11 = vld [vmem:[%s6876_s16 + $0x108] sm:$0xf0]  ;;  %v4918_v58 = vld [vmem:[%s6876_s16 + $0x470] sm:$0xf] }
 0x118   : > { %3599 = vmatpush.bf16.msrb.mxu1 %v5559_v31  ;;  %v5226_v31 = vld [vmem:[%s6876_s16 + $0x6d8] sm:$0xf] }
 0x119   : > { %3612 = vmatpush.bf16.msrb.mxu2 %v5783_v32  ;;  %v7511_v32 = vshrl.u32 %v3978_v12, 7  ;;  %v5227_v50 = vor.u32 %v6357_v17, %v5226_v31  ;;  %v6217_v31 = vld [vmem:[%s6876_s16 + $0x290] sm:$0xf0]  ;;  %v4890_v17 = vld [vmem:[%s6876_s16 + $0x438] sm:$0xf] }
 0x11a   : > { %3625 = vmatpush.bf16.msrb.mxu3 %v6007_v41  ;;  %v4779_v41 = vor.u32 %v6245_v26, %v4778_v24  ;;  %v4919_v24 = vor.u32 %v6280_v16, %v4918_v58  ;;  %v5058_v58 = vld [vmem:[%s6876_s16 + $0x588] sm:$0xf]  ;;  %v6315_v16 = vld [vmem:[%s6876_s16 + $0x5a0] sm:$0xf0] }
 0x11b   : > { %3587 = vmatpush.bf16.msrb.mxu0 %v5307_v36  ;;  %v6238_v36 = vld [vmem:[%s6876_s16 + $0x338] sm:$0xf0]  ;;  %vm3989_vm1 = vcmp.lt.s32.totalorder %v7511_v32, 2 }
 0x11c   : > { %3600 = vmatpush.bf16.msrb.mxu1 %v5531_v52  ;;  %v6294_v52 = vld [vmem:[%s6876_s16 + $0x4f8] sm:$0xf0]  ;;  %v4751_v56 = vor.u32 %v6238_v36, %v4750_v49  ;;  %v3992_v3 = vsel %vm3989_vm1, %v7412_v5, 0.0  ;;  %v6224_v5 = vld [vmem:[%s6876_s16 + $0x2c8] sm:$0xf0] }
 0x11d   : > { %3613 = vmatpush.bf16.msrb.mxu2 %v5755_v53  ;;  %v5198_v53 = vld [vmem:[%s6876_s16 + $0x6a0] sm:$0xf]  ;;  %v4975_v57 = vor.u32 %v6294_v52, %v4974_v51  ;;  %v4000_v20 = vrot.slane %v3992_v3, 4  ;;  %v4695_v22 = vor.u32 %v6224_v5, %v4694_v48  ;;  %v6154_v51 = vld [vmem:[%s6876_s16 + $0x98] sm:$0xf0] }
 0x11e   : > { %3626 = vmatpush.bf16.msrb.mxu3 %v5979_v59  ;;  %v4498_v59 = vld [vmem:[%s6876_s16 + $0x128] sm:$0xf]  ;;  %v5199_v46 = vor.u32 %v6350_v54, %v5198_v53  ;;  %v4414_v36 = vld [vmem:[%s6876_s16 + $0x80] sm:$0xf] }
 0x11f   : > { %3588 = vmatpush.bf16.msrb.mxu0 %v5279_v2  ;;  %v6343_v2 = vld [vmem:[%s6876_s16 + $0x680] sm:$0xf0]  ;;  %v4499_v4 = vor.u32 %v6175_v60, %v4498_v59  ;;  %v4638_v52 = vld [vmem:[%s6876_s16 + $0x240] sm:$0xf]  ;;  %v7559_v53 = vadd.f32 %v4000_v20, %v3992_v3  ;;  %v6266_v59 = vld [vmem:[%s6876_s16 + $0x418] sm:$0xf0]  ;;  %v4415_v63 = vor.u32 %v6154_v51, %v4414_v36 }
 0x120   : > { %3601 = vmatpush.bf16.msrb.mxu1 %v5503_v7  ;;  %v3371_v7 = vadd.f32 %v7480_v47, %v3358_v55  ;;  %v4471_v47 = vor.u32 %v6168_v11, %v4470_v10  ;;  %v6259_v10 = vld [vmem:[%s6876_s16 + $0x3e0] sm:$0xf0] }
 0x121   : > { %3614 = vmatpush.bf16.msrb.mxu2 %v5727_v8  ;;  %v4723_v8 = vor.u32 %v6231_v62, %v4722_v61  ;;  %v5086_v61 = vld [vmem:[%s6876_s16 + $0x5c0] sm:$0xf]  ;;  %v4002_v48 = vrot.slane %v7559_v53, 2 }
 0x122   : > { %3627 = vmatpush.bf16.msrb.mxu3 %v5951_v13  ;;  %v5171_v13 = vor.u32 %v6343_v2, %v5170_v38  ;;  %v6147_v38 = vld [vmem:[%s6876_s16 + $0x60] sm:$0xf0]  ;;  %v4610_v2 = vld [vmem:[%s6876_s16 + $0x208] sm:$0xf] }
 0x123   : > { %3589 = vmatpush.bf16.msrb.mxu0 %v5251_v25  ;;  %v3383_v21 = vpop.f32.mrf.mxu0 }
 0x124   : > { %3602 = vmatpush.bf16.msrb.mxu1 %v5475_v29  ;;  %v3384_v25 = vadd.f32 %v3383_v21, %v3371_v7  ;;  %v3396_v26 = vpop.f32.mrf.mxu1  ;;  %v4666_v29 = vld [vmem:[%s6876_s16 + $0x278] sm:$0xf]  ;;  %v4387_v21 = vor.u32 %v6147_v38, %v4386_v0  ;;  %v5422_v0 = vld [vmem:[%s6876_s16 + $0x860] sm:$0xf] }
 0x125   : > { %3615 = vmatpush.bf16.msrb.mxu2 %v5699_v30  ;;  %v5143_v30 = vor.u32 %v6336_v19, %v5142_v18  ;;  %v4667_v45 = vor.u32 %v6217_v31, %v4666_v29  ;;  %v4358_v18 = vld [vmem:[%s6876_s16 + $0x10] sm:$0xf]  ;;  %v6140_v19 = vld [vmem:[%s6876_s16 + $0x28] sm:$0xf0] }
 0x126   : > { %3628 = vmatpush.bf16.msrb.mxu3 %v5923_v33  ;;  %3590 = vmatmul.bf16.vlgmr.msrb.gmra.mxu0 %v7056_v39  ;;  %v6273_v33 = vld [vmem:[%s6876_s16 + $0x450] sm:$0xf0]  ;;  %v3397_v37 = vadd.f32 %v3396_v26, %v3384_v25  ;;  %v4806_v25 = vld [vmem:[%s6876_s16 + $0x390] sm:$0xf]  ;;  %v6252_v29 = vld [vmem:[%s6876_s16 + $0x3a8] sm:$0xf0] }
 0x127   : > { %3634 = vmatpush.bf16.msra.mxu0 %v4555_v34  ;;  %3603 = vmatmul.bf16.vlgmr.msrb.gmra.mxu1 %v7062_v44  ;;  %v4075_v34 = vmul.f32 %v3992_v3, %v3992_v3  ;;  %v4891_v49 = vor.u32 %v6273_v33, %v4890_v17 }
 0x128   : > { %3647 = vmatpush.bf16.msra.mxu1 %v4779_v41  ;;  %3616 = vmatmul.bf16.vlgmr.msrb.gmra.mxu2 %v7051_v35  ;;  %v5114_v41 = vld [vmem:[%s6876_s16 + $0x5f8] sm:$0xf] }
 0x129   : > { %3660 = vmatpush.bf16.msra.mxu2 %v5003_v42  ;;  %3629 = vmatmul.bf16.vlgmr.msrb.gmra.mxu3 %v7058_v40  ;;  %v6329_v42 = vld [vmem:[%s6876_s16 + $0x610] sm:$0xf0]  ;;  %v4082_v60 = vrot.slane %v4075_v34, 4 }
 0x12a   : > { %3673 = vmatpush.bf16.msra.mxu3 %v5227_v50  ;;  %v5115_v54 = vor.u32 %v6329_v42, %v5114_v41  ;;  %v5450_v41 = vld [vmem:[%s6876_s16 + $0x898] sm:$0xf] }
 0x12b   : > { %3635 = vmatpush.bf16.msra.mxu0 %v4527_v23  ;;  %v3409_v50 = vpop.f32.mrf.mxu2  ;;  %v3385_v3 = vpop.f32.mrf.mxu0  ;;  %v4083_v20 = vadd.f32 %v4082_v60, %v4075_v34  ;;  %v5059_v34 = vor.u32 %v6315_v16, %v5058_v58  ;;  %v6581_v60 = vld [vmem:[%s6876_s16 + $0xdf0] sm:$0xf0] }
 0x12c   : > { %3648 = vmatpush.bf16.msra.mxu1 %v4751_v56  ;;  %v3410_v23 = vadd.f32 %v3409_v50, %v3397_v37  ;;  %v3422_v55 = vpop.f32.mrf.mxu3  ;;  %v6210_v56 = vld [vmem:[%s6876_s16 + $0x258] sm:$0xf0]  ;;  %v3398_v11 = vpop.f32.mrf.mxu1  ;;  %v6308_v37 = vld [vmem:[%s6876_s16 + $0x568] sm:$0xf0]  ;;  %v5646_v3 = vld [vmem:[%s6876_s16 + $0xa20] sm:$0xf] }
 0x12d   : > { %3661 = vmatpush.bf16.msra.mxu2 %v4975_v57  ;;  %v4862_v57 = vld [vmem:[%s6876_s16 + $0x400] sm:$0xf]  ;;  %v4084_v50 = vrot.slane %v4083_v20, 2 }
 0x12e   : > { %3674 = vmatpush.bf16.msra.mxu3 %v5199_v46  ;;  %v6322_v46 = vld [vmem:[%s6876_s16 + $0x5d8] sm:$0xf0]  ;;  %v3423_v62 = vadd.f32 %v3422_v55, %v3410_v23  ;;  %v4863_v7 = vor.u32 %v6266_v59, %v4862_v57  ;;  %v6525_v23 = vld [vmem:[%s6876_s16 + $0xc30] sm:$0xf0]  ;;  %v4003_v55 = vadd.f32 %v4002_v48, %v7559_v53  ;;  %v4807_v57 = vor.u32 %v6252_v29, %v4806_v25  ;;  %v6122_v59 = vld [vmem:[%s6876_s16 + $0xdd8] sm:$0xf] }
 0x12f   : > { %3636 = vmatpush.bf16.msra.mxu0 %v4499_v4  ;;  %v4639_v4 = vor.u32 %v6210_v56, %v4638_v52  ;;  %v5087_v5 = vor.u32 %v6322_v46, %v5086_v61  ;;  %v4359_v52 = vor.u32 %v6140_v19, %v4358_v18  ;;  %v5870_v11 = vld [vmem:[%s6876_s16 + $0xbe0] sm:$0xf]  ;;  %v6518_v48 = vld [vmem:[%s6876_s16 + $0xbf8] sm:$0xf0]  ;;  %v6455_v25 = vld [vmem:[%s6876_s16 + $0xa00] sm:$0xf0] }
 0x130   : > { %3649 = vmatpush.bf16.msra.mxu1 %v4723_v8  ;;  %v6203_v8 = vld [vmem:[%s6876_s16 + $0x220] sm:$0xf0]  ;;  %vm3947_vm2 = vcmp.ge.f32.partialorder %v3423_v62, 0.0  ;;  %v4004_v58 = vrot.slane %v4003_v55, 1 }
 0x131   : > { %3662 = vmatpush.bf16.msra.mxu2 %v4947_v9  ;;  %v4834_v9 = vld [vmem:[%s6876_s16 + $0x3c8] sm:$0xf]  ;;  %v4611_v27 = vor.u32 %v6203_v8, %v4610_v2  ;;  %v6406_v2 = vld [vmem:[%s6876_s16 + $0x878] sm:$0xf0] }
 0x132   : > { %3675 = vmatpush.bf16.msra.mxu3 %v5171_v13  ;;  %v3954_v13 = vmul.f32 0.01, %v3423_v62  ;;  %v4835_v28 = vor.u32 %v6259_v10, %v4834_v9  ;;  %v6123_v10 = vor.u32 %v6581_v60, %v6122_v59  ;;  %v5423_v19 = vor.u32 %v6406_v2, %v5422_v0  ;;  %v6038_v59 = vld [vmem:[%s6876_s16 + $0xd30] sm:$0xf]  ;;  %v6560_v60 = vld [vmem:[%s6876_s16 + $0xd48] sm:$0xf0] }
 0x133   : > { %3637 = vmatpush.bf16.msra.mxu0 %v4471_v47  ;;  %v3411_v31 = vpop.f32.mrf.mxu2  ;;  %v5562_v2 = vld [vmem:[%s6876_s16 + $0x978] sm:$0xf] }
 0x134   : > { %3650 = vmatpush.bf16.msra.mxu1 %v4695_v22  ;;  %v3961_v47 = vsel %vm3947_vm2, %v3423_v62, %v3954_v13  ;;  %v4582_v22 = vld [vmem:[%s6876_s16 + $0x1d0] sm:$0xf]  ;;  %v3424_v42 = vpop.f32.mrf.mxu3  ;;  %v6094_v13 = vld [vmem:[%s6876_s16 + $0xda0] sm:$0xf]  ;;  %v6511_v31 = vld [vmem:[%s6876_s16 + $0xbc0] sm:$0xf0] }
 0x135   : > { %3663 = vmatpush.bf16.msra.mxu2 %v4919_v24  ;;  %v6196_v24 = vld [vmem:[%s6876_s16 + $0x1e8] sm:$0xf0]  ;;  %3968 = vst [vmem:[%s7407_s14 + $0x8] sm:$0xff] %v3961_v47  ;;  %v3993_v26 = vsel %vm3989_vm1, %v3961_v47, 0.0 }
 0x136   : > { %3676 = vmatpush.bf16.msra.mxu3 %v5143_v30  ;;  %v5030_v30 = vld [vmem:[%s6876_s16 + $0x550] sm:$0xf]  ;;  %v4006_v17 = vrot.slane %v3993_v26, 4  ;;  %v4076_v33 = vmul.f32 %v3993_v26, %v3993_v26  ;;  %v4583_v56 = vor.u32 %v6196_v24, %v4582_v22  ;;  %v6399_v22 = vld [vmem:[%s6876_s16 + $0x840] sm:$0xf0] }
 0x137   : > { %3638 = vmatpush.bf16.msra.mxu0 %v4443_v43  ;;  %v6413_v43 = vld [vmem:[%s6876_s16 + $0x8b0] sm:$0xf0]  ;;  %v5031_v62 = vor.u32 %v6308_v37, %v5030_v30  ;;  %v5618_v24 = vld [vmem:[%s6876_s16 + $0x9e8] sm:$0xf] }
 0x138   : > { %3651 = vmatpush.bf16.msra.mxu1 %v4667_v45  ;;  %v5674_v45 = vld [vmem:[%s6876_s16 + $0xa58] sm:$0xf]  ;;  %v4007_v36 = vadd.f32 %v4006_v17, %v3993_v26  ;;  %v4088_v51 = vrot.slane %v4076_v33, 4  ;;  %v5842_v30 = vld [vmem:[%s6876_s16 + $0xba8] sm:$0xf] }
 0x139   : > { %3664 = vmatpush.bf16.msra.mxu2 %v4891_v49  ;;  %v6469_v49 = vld [vmem:[%s6876_s16 + $0xa70] sm:$0xf0]  ;;  %v6066_v17 = vld [vmem:[%s6876_s16 + $0xd68] sm:$0xf] }
 0x13a   : > { %3677 = vmatpush.bf16.msra.mxu3 %v5115_v54  ;;  %v5898_v54 = vld [vmem:[%s6876_s16 + $0xc18] sm:$0xf]  ;;  %v4008_v61 = vrot.slane %v4007_v36, 2  ;;  %v4089_v46 = vadd.f32 %v4088_v51, %v4076_v33  ;;  %v5675_v38 = vor.u32 %v6469_v49, %v5674_v45  ;;  %v6567_v33 = vld [vmem:[%s6876_s16 + $0xd80] sm:$0xf0]  ;;  %v5619_v45 = vor.u32 %v6455_v25, %v5618_v24 }
 0x13b   : > { %3639 = vmatpush.bf16.msra.mxu0 %v4415_v63  ;;  %v5451_v63 = vor.u32 %v6413_v43, %v5450_v41  ;;  %v5899_v53 = vor.u32 %v6525_v23, %v5898_v54  ;;  %v5366_v43 = vld [vmem:[%s6876_s16 + $0x7f0] sm:$0xf]  ;;  %v5843_v49 = vor.u32 %v6511_v31, %v5842_v30  ;;  %v6448_v51 = vld [vmem:[%s6876_s16 + $0x9c8] sm:$0xf0]  ;;  %v5982_v25 = vld [vmem:[%s6876_s16 + $0xcc0] sm:$0xf] }
 0x13c   : > { %3652 = vmatpush.bf16.msra.mxu1 %v4639_v4  ;;  %v6462_v4 = vld [vmem:[%s6876_s16 + $0xa38] sm:$0xf0]  ;;  %v4009_v8 = vadd.f32 %v4008_v61, %v4007_v36  ;;  %v4090_v9 = vrot.slane %v4089_v46, 2  ;;  %v5590_v36 = vld [vmem:[%s6876_s16 + $0x9b0] sm:$0xf] }
 0x13d   : > { %3665 = vmatpush.bf16.msra.mxu2 %v4863_v7  ;;  %v4085_v7 = vadd.f32 %v4084_v50, %v4083_v20  ;;  %v5394_v20 = vld [vmem:[%s6876_s16 + $0x828] sm:$0xf]  ;;  %v5647_v47 = vor.u32 %v6462_v4, %v5646_v3  ;;  %v6392_v50 = vld [vmem:[%s6876_s16 + $0x808] sm:$0xf0]  ;;  %v6039_v4 = vor.u32 %v6560_v60, %v6038_v59  ;;  %v5702_v60 = vld [vmem:[%s6876_s16 + $0xa90] sm:$0xf] }
 0x13e   : > { %3678 = vmatpush.bf16.msra.mxu3 %v5087_v5  ;;  %v6574_v5 = vld [vmem:[%s6876_s16 + $0xdb8] sm:$0xf0]  ;;  %v4010_v16 = vrot.slane %v4009_v8, 1  ;;  %v4091_v18 = vadd.f32 %v4090_v9, %v4089_v46  ;;  %v5395_v42 = vor.u32 %v6399_v22, %v5394_v20  ;;  %v5367_v46 = vor.u32 %v6392_v50, %v5366_v43  ;;  %v6497_v9 = vld [vmem:[%s6876_s16 + $0xb50] sm:$0xf0]  ;;  %v7662_v50 = vld [vmem:[%s6882_s24] sm:$0xff] }
 0x13f   : > { %3640 = vmatpush.bf16.msra.mxu0 %v4387_v21  ;;  %v5871_v21 = vor.u32 %v6518_v48, %v5870_v11  ;;  %v4086_v26 = vrot.slane %v4085_v7, 1  ;;  %v6095_v29 = vor.u32 %v6574_v5, %v6094_v13  ;;  %v6553_v11 = vld [vmem:[%s6876_s16 + $0xd10] sm:$0xf0]  ;;  %v6490_v22 = vld [vmem:[%s6876_s16 + $0xb18] sm:$0xf0] }
 0x140   : > { %3653 = vmatpush.bf16.msra.mxu1 %v4611_v27  ;;  %v4011_v27 = vadd.f32 %v4010_v16, %v4009_v8  ;;  %v5786_v8 = vld [vmem:[%s6876_s16 + $0xb38] sm:$0xf]  ;;  %v6378_v16 = vld [vmem:[%s6876_s16 + $0x798] sm:$0xf0]  ;;  %v5282_v31 = vld [vmem:[%s6876_s16 + $0x748] sm:$0xf] }
 0x141   : > { %3666 = vmatpush.bf16.msra.mxu2 %v4835_v28  ;;  %v4092_v28 = vrot.slane %v4091_v18, 1  ;;  %v5787_v5 = vor.u32 %v6497_v9, %v5786_v8  ;;  %v6483_v43 = vld [vmem:[%s6876_s16 + $0xae0] sm:$0xf0]  ;;  %v6420_v59 = vld [vmem:[%s6876_s16 + $0x8e8] sm:$0xf0] }
 0x142   : > { %3679 = vmatpush.bf16.msra.mxu3 %v5059_v34  ;;  %v4005_v34 = vadd.f32 %v4004_v58, %v4003_v55  ;;  %v4049_v37 = vrot.slane %v4011_v27, 7  ;;  %v6067_v55 = vor.u32 %v6567_v33, %v6066_v17  ;;  %v5310_v58 = vld [vmem:[%s6876_s16 + $0x780] sm:$0xf]  ;;  %v6371_v17 = vld [vmem:[%s6876_s16 + $0x760] sm:$0xf0] }
 0x143   : > { %3641 = vmatpush.bf16.msra.mxu0 %v4359_v52  ;;  %v4093_v41 = vadd.f32 %v4092_v28, %v4091_v18  ;;  %v4087_v52 = vadd.f32 %v4086_v26, %v4085_v7  ;;  %v6441_v7 = vld [vmem:[%s6876_s16 + $0x990] sm:$0xf0]  ;;  %v5534_v18 = vld [vmem:[%s6876_s16 + $0x940] sm:$0xf]  ;;  %v6546_v26 = vld [vmem:[%s6876_s16 + $0xcd8] sm:$0xf0]  ;;  %v5311_v27 = vor.u32 %v6378_v16, %v5310_v58 }
 0x144   : > { %3654 = vmatpush.bf16.msra.mxu1 %v4583_v56  ;;  %v7620_v54 = vsel %vm4055_vm3, %v4005_v34, %v4049_v37  ;;  %v5814_v56 = vld [vmem:[%s6876_s16 + $0xb70] sm:$0xf]  ;;  %v7634_v3 = vpop.f32.mrf.mxu1  ;;  %v5563_v13 = vor.u32 %v6441_v7, %v5562_v2  ;;  %v5506_v33 = vld [vmem:[%s6876_s16 + $0x908] sm:$0xf]  ;;  %v5983_v37 = vor.u32 %v6546_v26, %v5982_v25  ;;  %v6186_v7 = vld [vmem:[%s6876_s16 + $0x19c] sm:$0xf] }
 0x145   : > { %3667 = vmatpush.bf16.msra.mxu2 %v4807_v57  ;;  %v4131_v23 = vrot.slane %v4093_v41, 7  ;;  %v6504_v57 = vld [vmem:[%s6876_s16 + $0xb88] sm:$0xf0]  ;;  %v6427_v41 = vld [vmem:[%s6876_s16 + $0x920] sm:$0xf0] }
 0x146   : > { %3680 = vmatpush.bf16.msra.mxu3 %v5031_v62  ;;  %3642 = vmatmul.bf16.vlgmr.msra.gmra.mxu0 %v6990_v14  ;;  %v7629_v62 = vpop.f32.mrf.mxu0  ;;  %v5815_v0 = vor.u32 %v6504_v57, %v5814_v56  ;;  %v5478_v57 = vld [vmem:[%s6876_s16 + $0x8d0] sm:$0xf]  ;;  %v4556_v8 = vld [vmem:[%s6876_s16 + $0x1b4] sm:$0xf0]  ;;  %v6242_v9 = vld [vmem:[%s6876_s16 + $0x35c] sm:$0xf] }
 0x147   : > { %3686 = vmatpush.bf16.msrb.mxu0 %v5451_v63  ;;  %3655 = vmatmul.bf16.vlgmr.msra.gmra.mxu1 %v6992_v15  ;;  %v7627_v61 = vsel %vm4055_vm3, %v4087_v52, %v4131_v23  ;;  %v5591_v63 = vor.u32 %v6448_v51, %v5590_v36  ;;  %v874_v36 = vperm.slane %v7662_v50, 2  ;;  %v5283_v51 = vor.u32 %v6371_v17, %v5282_v31  ;;  %v5254_v52 = vld [vmem:[%s6876_s16 + $0x710] sm:$0xf]  ;;  %v6364_v23 = vld [vmem:[%s6876_s16 + $0x728] sm:$0xf0] }
 0x148   : > { %3699 = vmatpush.bf16.msrb.mxu1 %v5675_v38  ;;  %3668 = vmatmul.bf16.vlgmr.msra.gmra.mxu2 %v6977_v1  ;;  %v5338_v38 = vld [vmem:[%s6876_s16 + $0x7b8] sm:$0xf]  ;;  %v6354_v16 = vld [vmem:[%s6876_s16 + $0x6dc] sm:$0xf]  ;;  %v6179_v25 = vld [vmem:[%s6876_s16 + $0x164] sm:$0xf] }
 0x149   : > { %3712 = vmatpush.bf16.msrb.mxu2 %v5899_v53  ;;  %3681 = vmatmul.bf16.vlgmr.msra.gmra.mxu3 %v6984_v6  ;;  %v6385_v53 = vld [vmem:[%s6876_s16 + $0x7d0] sm:$0xf0]  ;;  %v4528_v26 = vld [vmem:[%s6876_s16 + $0x17c] sm:$0xf0]  ;;  %v6347_v17 = vld [vmem:[%s6876_s16 + $0x6a4] sm:$0xf] }
 0x14a   : > { %3725 = vmatpush.bf16.msrb.mxu3 %v6123_v10  ;;  %v6010_v10 = vld [vmem:[%s6876_s16 + $0xcf8] sm:$0xf]  ;;  %v5339_v48 = vor.u32 %v6385_v53, %v5338_v38  ;;  %v5926_v38 = vld [vmem:[%s6876_s16 + $0xc50] sm:$0xf]  ;;  %v6532_v53 = vld [vmem:[%s6876_s16 + $0xc68] sm:$0xf0] }
 0x14b   : > { %3687 = vmatpush.bf16.msrb.mxu0 %v5423_v19  ;;  %v7644_v19 = vpop.f32.mrf.mxu2  ;;  %v6011_v20 = vor.u32 %v6553_v11, %v6010_v10  ;;  %v5255_v10 = vor.u32 %v6364_v23, %v5254_v52  ;;  %v4780_v11 = vld [vmem:[%s6876_s16 + $0x374] sm:$0xf0]  ;;  %v4976_v31 = vld [vmem:[%s6876_s16 + $0x4fc] sm:$0xf0]  ;;  %v4948_v52 = vld [vmem:[%s6876_s16 + $0x4c4] sm:$0xf0] }
 0x14c   : > { %3700 = vmatpush.bf16.msrb.mxu1 %v5647_v47  ;;  %v6434_v47 = vld [vmem:[%s6876_s16 + $0x958] sm:$0xf0]  ;;  %v7649_v24 = vpop.f32.mrf.mxu3  ;;  %v3450_v34 = vpop.f32.mrf.mxu1  ;;  %v5172_v23 = vld [vmem:[%s6876_s16 + $0x684] sm:$0xf0] }
 0x14d   : > { %3713 = vmatpush.bf16.msrb.mxu2 %v5871_v21  ;;  %v5758_v21 = vld [vmem:[%s6876_s16 + $0xb00] sm:$0xf] }
 0x14e   : > { %3726 = vmatpush.bf16.msrb.mxu3 %v6095_v29  ;;  %v3437_v28 = vpop.f32.mrf.mxu0  ;;  %v5535_v29 = vor.u32 %v6434_v47, %v5534_v18  ;;  %v5759_v30 = vor.u32 %v6490_v22, %v5758_v21  ;;  %v5927_v18 = vor.u32 %v6532_v53, %v5926_v38  ;;  %v4783_v21 = vor.u32 %v6242_v9, %v4780_v11  ;;  %v4696_v38 = vld [vmem:[%s6876_s16 + $0x2cc] sm:$0xf0]  ;;  %v6277_v53 = vld [vmem:[%s6876_s16 + $0x474] sm:$0xf] }
 0x14f   : > { %3688 = vmatpush.bf16.msrb.mxu0 %v5395_v42  ;;  %v5730_v42 = vld [vmem:[%s6876_s16 + $0xac8] sm:$0xf] }
 0x150   : > { %3701 = vmatpush.bf16.msrb.mxu1 %v5619_v45  ;;  %v5954_v45 = vld [vmem:[%s6876_s16 + $0xc88] sm:$0xf]  ;;  %v5731_v56 = vor.u32 %v6483_v43, %v5730_v42  ;;  %v6172_v42 = vld [vmem:[%s6876_s16 + $0x12c] sm:$0xf] }
 0x151   : > { %3714 = vmatpush.bf16.msrb.mxu2 %v5843_v49  ;;  %v6539_v49 = vld [vmem:[%s6876_s16 + $0xca0] sm:$0xf0]  ;;  %v4500_v43 = vld [vmem:[%s6876_s16 + $0x144] sm:$0xf0] }
 0x152   : > { %3727 = vmatpush.bf16.msrb.mxu3 %v6067_v55  ;;  %v5507_v55 = vor.u32 %v6427_v41, %v5506_v33  ;;  %v5200_v33 = vld [vmem:[%s6876_s16 + $0x6bc] sm:$0xf0] }
 0x153   : > { %3689 = vmatpush.bf16.msrb.mxu0 %v5367_v46  ;;  %v3463_v46 = vpop.f32.mrf.mxu2 }
 0x154   : > { %3702 = vmatpush.bf16.msrb.mxu1 %v5591_v63  ;;  %v5955_v63 = vor.u32 %v6539_v49, %v5954_v45  ;;  %v3476_v2 = vpop.f32.mrf.mxu3  ;;  %v6228_v45 = vld [vmem:[%s6876_s16 + $0x2ec] sm:$0xf]  ;;  %v5203_v49 = vor.u32 %v6347_v17, %v5200_v33  ;;  %v4472_v46 = vld [vmem:[%s6876_s16 + $0x10c] sm:$0xf0] }
 0x155   : > { %3715 = vmatpush.bf16.msrb.mxu2 %v5815_v0  ;;  %v6476_v0 = vld [vmem:[%s6876_s16 + $0xaa8] sm:$0xf0]  ;;  %v4920_v2 = vld [vmem:[%s6876_s16 + $0x48c] sm:$0xf0] }
 0x156   : > { %3728 = vmatpush.bf16.msrb.mxu3 %v6039_v4  ;;  %v3436_v4 = vadd.f32 %v7629_v62, %v874_v36  ;;  %v5703_v58 = vor.u32 %v6476_v0, %v5702_v60  ;;  %v5228_v62 = vld [vmem:[%s6876_s16 + $0x6f4] sm:$0xf0]  ;;  %v4724_v36 = vld [vmem:[%s6876_s16 + $0x304] sm:$0xf0]  ;;  %v6165_v60 = vld [vmem:[%s6876_s16 + $0xf4] sm:$0xf] }
 0x157   : > { %3690 = vmatpush.bf16.msrb.mxu0 %v5339_v48  ;;  %v6298_v48 = vld [vmem:[%s6876_s16 + $0x51c] sm:$0xf]  ;;  %v5231_v28 = vor.u32 %v6354_v16, %v5228_v62  ;;  %v4668_v62 = vld [vmem:[%s6876_s16 + $0x294] sm:$0xf0] }
 0x158   : > { %3703 = vmatpush.bf16.msrb.mxu1 %v5563_v13  ;;  %v5004_v13 = vld [vmem:[%s6876_s16 + $0x534] sm:$0xf0]  ;;  %v3449_v47 = vadd.f32 %v7634_v3, %v3436_v4  ;;  %v4531_v3 = vor.u32 %v6179_v25, %v4528_v26  ;;  %v6333_v4 = vld [vmem:[%s6876_s16 + $0x634] sm:$0xf] }
 0x159   : > { %3716 = vmatpush.bf16.msrb.mxu2 %v5787_v5  ;;  %v5479_v5 = vor.u32 %v6420_v59, %v5478_v57  ;;  %v5007_v22 = vor.u32 %v6298_v48, %v5004_v13  ;;  %v4727_v57 = vor.u32 %v6228_v45, %v4724_v36  ;;  %v6158_v13 = vld [vmem:[%s6876_s16 + $0xbc] sm:$0xf]  ;;  %v6144_v36 = vld [vmem:[%s6876_s16 + $0x4c] sm:$0xf] }
 0x15a   : > { %3729 = vmatpush.bf16.msrb.mxu3 %v6011_v20  ;;  %v4559_v20 = vor.u32 %v6186_v7, %v4556_v8  ;;  %v3462_v34 = vadd.f32 %v7644_v19, %v3449_v47  ;;  %v6340_v19 = vld [vmem:[%s6876_s16 + $0x66c] sm:$0xf]  ;;  %v5144_v7 = vld [vmem:[%s6876_s16 + $0x64c] sm:$0xf0] }
 0x15b   : > { %3691 = vmatpush.bf16.msrb.mxu0 %v5311_v27  ;;  %v6235_v27 = vld [vmem:[%s6876_s16 + $0x324] sm:$0xf]  ;;  %v5175_v0 = vor.u32 %v6340_v19, %v5172_v23  ;;  %v5147_v16 = vor.u32 %v6333_v4, %v5144_v7  ;;  %v6137_v4 = vld [vmem:[%s6876_s16 + $0x14] sm:$0xf]  ;;  %v4360_v7 = vld [vmem:[%s6876_s16 + $0x2c] sm:$0xf0] }
 0x15c   : > { %3704 = vmatpush.bf16.msrb.mxu1 %v5535_v29  ;;  %v4752_v29 = vld [vmem:[%s6876_s16 + $0x33c] sm:$0xf0] }
 0x15d   : > { %3717 = vmatpush.bf16.msrb.mxu2 %v5759_v30  ;;  %v6291_v30 = vld [vmem:[%s6876_s16 + $0x4e4] sm:$0xf] }
 0x15e   : > { %3730 = vmatpush.bf16.msrb.mxu3 %v5983_v37  ;;  %v4755_v37 = vor.u32 %v6235_v27, %v4752_v29  ;;  %v4979_v41 = vor.u32 %v6291_v30, %v4976_v31  ;;  %v6151_v29 = vld [vmem:[%s6876_s16 + $0x84] sm:$0xf]  ;;  %v4416_v30 = vld [vmem:[%s6876_s16 + $0x9c] sm:$0xf0] }
 0x15f   : > { %3692 = vmatpush.bf16.msrb.mxu0 %v5283_v51  ;;  %v6284_v51 = vld [vmem:[%s6876_s16 + $0x4ac] sm:$0xf]  ;;  %v6207_v31 = vld [vmem:[%s6876_s16 + $0x244] sm:$0xf] }
 0x160   : > { %3705 = vmatpush.bf16.msrb.mxu1 %v5507_v55  ;;  %v4503_v55 = vor.u32 %v6172_v42, %v4500_v43  ;;  %v4951_v59 = vor.u32 %v6284_v51, %v4948_v52  ;;  %v6319_v42 = vld [vmem:[%s6876_s16 + $0x5c4] sm:$0xf]  ;;  %v5088_v43 = vld [vmem:[%s6876_s16 + $0x5dc] sm:$0xf0]  ;;  %v4388_v51 = vld [vmem:[%s6876_s16 + $0x64] sm:$0xf0] }
 0x161   : > { %3718 = vmatpush.bf16.msrb.mxu2 %v5731_v56  ;;  %v3475_v56 = vadd.f32 %v7649_v24, %v3462_v34  ;;  %v4475_v24 = vor.u32 %v6165_v60, %v4472_v46  ;;  %v4640_v34 = vld [vmem:[%s6876_s16 + $0x25c] sm:$0xf0]  ;;  %v5091_v46 = vor.u32 %v6319_v42, %v5088_v43 }
 0x162   : > { %3731 = vmatpush.bf16.msrb.mxu3 %v5955_v63  ;;  %v6221_v63 = vld [vmem:[%s6876_s16 + $0x2b4] sm:$0xf]  ;;  %v4643_v19 = vor.u32 %v6207_v31, %v4640_v34  ;;  %v6403_v34 = vld [vmem:[%s6876_s16 + $0x864] sm:$0xf]  ;;  %v5648_v43 = vld [vmem:[%s6876_s16 + $0xa3c] sm:$0xf0] }
 0x163   : > { %3693 = vmatpush.bf16.msrb.mxu0 %v5255_v10  ;;  %v3487_v8 = vpop.f32.mrf.mxu0  ;;  %v4699_v9 = vor.u32 %v6221_v63, %v4696_v38  ;;  %v4923_v10 = vor.u32 %v6277_v53, %v4920_v2  ;;  %v4836_v63 = vld [vmem:[%s6876_s16 + $0x3e4] sm:$0xf0]  ;;  %v4391_v2 = vor.u32 %v6144_v36, %v4388_v51  ;;  %v6571_v36 = vld [vmem:[%s6876_s16 + $0xda4] sm:$0xf]  ;;  %v6096_v51 = vld [vmem:[%s6876_s16 + $0xdbc] sm:$0xf0] }
 0x164   : > { %3706 = vmatpush.bf16.msrb.mxu1 %v5479_v5  ;;  %v3488_v11 = vadd.f32 %v3487_v8, %v3475_v56  ;;  %v3500_v48 = vpop.f32.mrf.mxu1  ;;  %v4444_v5 = vld [vmem:[%s6876_s16 + $0xd4] sm:$0xf0]  ;;  %v4612_v56 = vld [vmem:[%s6876_s16 + $0x224] sm:$0xf0] }
 0x165   : > { %3719 = vmatpush.bf16.msrb.mxu2 %v5703_v58  ;;  %v6214_v58 = vld [vmem:[%s6876_s16 + $0x27c] sm:$0xf]  ;;  %v4447_v25 = vor.u32 %v6158_v13, %v4444_v5  ;;  %v5060_v38 = vld [vmem:[%s6876_s16 + $0x5a4] sm:$0xf0]  ;;  %v4808_v5 = vld [vmem:[%s6876_s16 + $0x3ac] sm:$0xf0] }
 0x166   : > { %3732 = vmatpush.bf16.msrb.mxu3 %v5927_v18  ;;  %3694 = vmatmul.bf16.vlgmr.msrb.gmra.mxu0 %v7056_v39  ;;  %v6270_v18 = vld [vmem:[%s6876_s16 + $0x43c] sm:$0xf]  ;;  %v3501_v47 = vadd.f32 %v3500_v48, %v3488_v11  ;;  %v4671_v26 = vor.u32 %v6214_v58, %v4668_v62  ;;  %v6249_v11 = vld [vmem:[%s6876_s16 + $0x394] sm:$0xf] }
 0x167   : > { %3738 = vmatpush.bf16.msra.mxu0 %v4559_v20  ;;  %3707 = vmatmul.bf16.vlgmr.msrb.gmra.mxu1 %v7062_v44  ;;  %v4892_v20 = vld [vmem:[%s6876_s16 + $0x454] sm:$0xf0]  ;;  %v6305_v58 = vld [vmem:[%s6876_s16 + $0x554] sm:$0xf] }
 0x168   : > { %3751 = vmatpush.bf16.msra.mxu1 %v4783_v21  ;;  %3720 = vmatmul.bf16.vlgmr.msrb.gmra.mxu2 %v7051_v35  ;;  %v6326_v21 = vld [vmem:[%s6876_s16 + $0x5fc] sm:$0xf]  ;;  %v4895_v27 = vor.u32 %v6270_v18, %v4892_v20  ;;  %v5452_v20 = vld [vmem:[%s6876_s16 + $0x8b4] sm:$0xf0] }
 0x169   : > { %3764 = vmatpush.bf16.msra.mxu2 %v5007_v22  ;;  %3733 = vmatmul.bf16.vlgmr.msrb.gmra.mxu3 %v7058_v40  ;;  %v5116_v22 = vld [vmem:[%s6876_s16 + $0x614] sm:$0xf0]  ;;  %v6410_v18 = vld [vmem:[%s6876_s16 + $0x89c] sm:$0xf] }
 0x16a   : > { %3777 = vmatpush.bf16.msra.mxu3 %v5231_v28  ;;  %v5119_v17 = vor.u32 %v6326_v21, %v5116_v22  ;;  %v4363_v21 = vor.u32 %v6137_v4, %v4360_v7  ;;  %v5676_v22 = vld [vmem:[%s6876_s16 + $0xa74] sm:$0xf0] }
 0x16b   : > { %3739 = vmatpush.bf16.msra.mxu0 %v4531_v3  ;;  %v3513_v28 = vpop.f32.mrf.mxu2  ;;  %v3489_v52 = vpop.f32.mrf.mxu0 }
 0x16c   : > { %3752 = vmatpush.bf16.msra.mxu1 %v4755_v37  ;;  %v3514_v33 = vadd.f32 %v3513_v28, %v3501_v47  ;;  %v3526_v3 = vpop.f32.mrf.mxu3  ;;  %v6263_v37 = vld [vmem:[%s6876_s16 + $0x404] sm:$0xf]  ;;  %v6466_v47 = vld [vmem:[%s6876_s16 + $0xa5c] sm:$0xf]  ;;  %v4811_v28 = vor.u32 %v6249_v11, %v4808_v5  ;;  %v5592_v11 = vld [vmem:[%s6876_s16 + $0x9cc] sm:$0xf0] }
 0x16d   : > { %3765 = vmatpush.bf16.msra.mxu2 %v4979_v41  ;;  %v4864_v41 = vld [vmem:[%s6876_s16 + $0x41c] sm:$0xf0]  ;;  %v6557_v5 = vld [vmem:[%s6876_s16 + $0xd34] sm:$0xf] }
 0x16e   : > { %3778 = vmatpush.bf16.msra.mxu3 %v5203_v49  ;;  %v3527_v45 = vadd.f32 %v3526_v3, %v3514_v33  ;;  %v4419_v49 = vor.u32 %v6151_v29, %v4416_v30  ;;  %v4867_v23 = vor.u32 %v6263_v37, %v4864_v41  ;;  %v6578_v29 = vld [vmem:[%s6876_s16 + $0xddc] sm:$0xf]  ;;  %v6124_v30 = vld [vmem:[%s6876_s16 + $0xdf4] sm:$0xf0]  ;;  %v5679_v33 = vor.u32 %v6466_v47, %v5676_v22  ;;  %v5424_v37 = vld [vmem:[%s6876_s16 + $0x87c] sm:$0xf0] }
 0x16f   : > { %3740 = vmatpush.bf16.msra.mxu0 %v4503_v55  ;;  %v6200_v55 = vld [vmem:[%s6876_s16 + $0x20c] sm:$0xf]  ;;  %v6459_v41 = vld [vmem:[%s6876_s16 + $0xa24] sm:$0xf]  ;;  %v6127_v42 = vor.u32 %v6578_v29, %v6124_v30  ;;  %v5427_v52 = vor.u32 %v6403_v34, %v5424_v37  ;;  %v6382_v47 = vld [vmem:[%s6876_s16 + $0x7bc] sm:$0xf] }
 0x170   : > { %3753 = vmatpush.bf16.msra.mxu1 %v4727_v57  ;;  %v6256_v57 = vld [vmem:[%s6876_s16 + $0x3cc] sm:$0xf]  ;;  %vm3948_vm4 = vcmp.ge.f32.partialorder %v3527_v45, 0.0  ;;  %v3955_v60 = vmul.f32 0.01, %v3527_v45  ;;  %v4615_v8 = vor.u32 %v6200_v55, %v4612_v56 }
 0x171   : > { %3766 = vmatpush.bf16.msra.mxu2 %v4951_v59  ;;  %v3502_v59 = vpop.f32.mrf.mxu1  ;;  %v6396_v55 = vld [vmem:[%s6876_s16 + $0x82c] sm:$0xf]  ;;  %v5396_v56 = vld [vmem:[%s6876_s16 + $0x844] sm:$0xf0]  ;;  %v6438_v22 = vld [vmem:[%s6876_s16 + $0x97c] sm:$0xf] }
 0x172   : > { %3779 = vmatpush.bf16.msra.mxu3 %v5175_v0  ;;  %v6312_v0 = vld [vmem:[%s6876_s16 + $0x58c] sm:$0xf]  ;;  %v7737_v53 = vsel %vm3948_vm4, %v3527_v45, %v3955_v60  ;;  %v6515_v45 = vld [vmem:[%s6876_s16 + $0xbe4] sm:$0xf]  ;;  %v6099_v59 = vor.u32 %v6571_v36, %v6096_v51  ;;  %v5620_v60 = vld [vmem:[%s6876_s16 + $0xa04] sm:$0xf0] }
 0x173   : > { %3741 = vmatpush.bf16.msra.mxu0 %v4475_v24  ;;  %v6193_v24 = vld [vmem:[%s6876_s16 + $0x1d4] sm:$0xf]  ;;  %3969 = vst [vmem:[%s7407_s14 + $0x10] sm:$0xff] %v7737_v53  ;;  %v3515_v48 = vpop.f32.mrf.mxu2  ;;  %v5063_v13 = vor.u32 %v6312_v0, %v5060_v38  ;;  %v6564_v0 = vld [vmem:[%s6876_s16 + $0xd6c] sm:$0xf] }
 0x174   : > { %3754 = vmatpush.bf16.msra.mxu1 %v4699_v9  ;;  %v4839_v9 = vor.u32 %v6256_v57, %v4836_v63  ;;  %v3528_v62 = vpop.f32.mrf.mxu3  ;;  %v6452_v57 = vld [vmem:[%s6876_s16 + $0x9ec] sm:$0xf]  ;;  %v5844_v63 = vld [vmem:[%s6876_s16 + $0xbc4] sm:$0xf0]  ;;  %v6501_v48 = vld [vmem:[%s6876_s16 + $0xb74] sm:$0xf] }
 0x175   : > { %3767 = vmatpush.bf16.msra.mxu2 %v4923_v10  ;;  %v4584_v10 = vld [vmem:[%s6876_s16 + $0x1ec] sm:$0xf0]  ;;  %v6068_v38 = vld [vmem:[%s6876_s16 + $0xd84] sm:$0xf0]  ;;  %v5623_v4 = vor.u32 %v6452_v57, %v5620_v60  ;;  %v5788_v29 = vld [vmem:[%s6876_s16 + $0xb54] sm:$0xf0] }
 0x176   : > { %3780 = vmatpush.bf16.msra.mxu3 %v5147_v16  ;;  %v5032_v16 = vld [vmem:[%s6876_s16 + $0x56c] sm:$0xf0]  ;;  %v6550_v30 = vld [vmem:[%s6876_s16 + $0xcfc] sm:$0xf]  ;;  %v6375_v34 = vld [vmem:[%s6876_s16 + $0x784] sm:$0xf] }
 0x177   : > { %3742 = vmatpush.bf16.msra.mxu0 %v4447_v25  ;;  %v6522_v25 = vld [vmem:[%s6876_s16 + $0xc1c] sm:$0xf]  ;;  %v5035_v31 = vor.u32 %v6305_v58, %v5032_v16  ;;  %v6040_v58 = vld [vmem:[%s6876_s16 + $0xd4c] sm:$0xf0]  ;;  %v5312_v37 = vld [vmem:[%s6876_s16 + $0x79c] sm:$0xf0] }
 0x178   : > { %3755 = vmatpush.bf16.msra.mxu1 %v4671_v26  ;;  %v5900_v26 = vld [vmem:[%s6876_s16 + $0xc34] sm:$0xf0]  ;;  %v5760_v36 = vld [vmem:[%s6876_s16 + $0xb1c] sm:$0xf0]  ;;  %v5284_v60 = vld [vmem:[%s6876_s16 + $0x764] sm:$0xf0] }
 0x179   : > { %3768 = vmatpush.bf16.msra.mxu2 %v4895_v27  ;;  %v4587_v27 = vor.u32 %v6193_v24, %v4584_v10  ;;  %v5903_v3 = vor.u32 %v6522_v25, %v5900_v26  ;;  %v6389_v24 = vld [vmem:[%s6876_s16 + $0x7f4] sm:$0xf]  ;;  %v6071_v10 = vor.u32 %v6564_v0, %v6068_v38  ;;  %v6043_v26 = vor.u32 %v6557_v5, %v6040_v58  ;;  %v5508_v38 = vld [vmem:[%s6876_s16 + $0x924] sm:$0xf0]  ;;  %v5480_v58 = vld [vmem:[%s6876_s16 + $0x8ec] sm:$0xf0] }
 0x17a   : > { %3781 = vmatpush.bf16.msra.mxu3 %v5119_v17  ;;  %v5455_v17 = vor.u32 %v6410_v18, %v5452_v20  ;;  %v6417_v5 = vld [vmem:[%s6876_s16 + $0x8d4] sm:$0xf] }
 0x17b   : > { %3743 = vmatpush.bf16.msra.mxu0 %v4419_v49  ;;  %v5872_v49 = vld [vmem:[%s6876_s16 + $0xbfc] sm:$0xf0] }
 0x17c   : > { %3756 = vmatpush.bf16.msra.mxu1 %v4643_v19  ;;  %v5651_v19 = vor.u32 %v6459_v41, %v5648_v43  ;;  %v6431_v41 = vld [vmem:[%s6876_s16 + $0x944] sm:$0xf] }
 0x17d   : > { %3769 = vmatpush.bf16.msra.mxu2 %v4867_v23  ;;  %v5875_v23 = vor.u32 %v6515_v45, %v5872_v49  ;;  %v5536_v45 = vld [vmem:[%s6876_s16 + $0x95c] sm:$0xf0]  ;;  %v6487_v49 = vld [vmem:[%s6876_s16 + $0xb04] sm:$0xf] }
 0x17e   : > { %3782 = vmatpush.bf16.msra.mxu3 %v5091_v46  ;;  %v6508_v46 = vld [vmem:[%s6876_s16 + $0xbac] sm:$0xf]  ;;  %v5763_v57 = vor.u32 %v6487_v49, %v5760_v36 }
 0x17f   : > { %3744 = vmatpush.bf16.msra.mxu0 %v4391_v2  ;;  %v5399_v2 = vor.u32 %v6396_v55, %v5396_v56  ;;  %v5847_v7 = vor.u32 %v6508_v46, %v5844_v63  ;;  %v5539_v56 = vor.u32 %v6431_v41, %v5536_v45  ;;  %v6424_v46 = vld [vmem:[%s6876_s16 + $0x90c] sm:$0xf] }
 0x180   : > { %3757 = vmatpush.bf16.msra.mxu1 %v4615_v8  ;;  %v5368_v8 = vld [vmem:[%s6876_s16 + $0x80c] sm:$0xf0] }
 0x181   : > { %3770 = vmatpush.bf16.msra.mxu2 %v4839_v9  ;;  %v6445_v9 = vld [vmem:[%s6876_s16 + $0x9b4] sm:$0xf]  ;;  %v5371_v16 = vor.u32 %v6389_v24, %v5368_v8  ;;  %v5956_v24 = vld [vmem:[%s6876_s16 + $0xca4] sm:$0xf0]  ;;  %v875_v8 = vperm.slane %v7662_v50, 3 }
 0x182   : > { %3783 = vmatpush.bf16.msra.mxu3 %v5063_v13  ;;  %v5816_v13 = vld [vmem:[%s6876_s16 + $0xb8c] sm:$0xf0]  ;;  %v5595_v18 = vor.u32 %v6445_v9, %v5592_v11 }
 0x183   : > { %3745 = vmatpush.bf16.msra.mxu0 %v4363_v21  ;;  %v7785_v62 = vpop.f32.mrf.mxu0  ;;  %v5819_v20 = vor.u32 %v6501_v48, %v5816_v13  ;;  %v5340_v21 = vld [vmem:[%s6876_s16 + $0x7d4] sm:$0xf0]  ;;  %v5256_v11 = vld [vmem:[%s6876_s16 + $0x72c] sm:$0xf0]  ;;  %v5511_v48 = vor.u32 %v6424_v46, %v5508_v38  ;;  %v6351_v46 = vld [vmem:[%s6876_s16 + $0x6c0] sm:$0xf0] }
 0x184   : > { %3758 = vmatpush.bf16.msra.mxu1 %v4587_v27  ;;  %v7790_v25 = vpop.f32.mrf.mxu1  ;;  %v5564_v27 = vld [vmem:[%s6876_s16 + $0x994] sm:$0xf0] }
 0x185   : > { %3771 = vmatpush.bf16.msra.mxu2 %v4811_v28  ;;  %v6494_v28 = vld [vmem:[%s6876_s16 + $0xb3c] sm:$0xf] }
 0x186   : > { %3784 = vmatpush.bf16.msra.mxu3 %v5035_v31  ;;  %3746 = vmatmul.bf16.vlgmr.msra.gmra.mxu0 %v6990_v14  ;;  %v6012_v31 = vld [vmem:[%s6876_s16 + $0xd14] sm:$0xf0] }
 0x187   : > { %3790 = vmatpush.bf16.msrb.mxu0 %v5455_v17  ;;  %3759 = vmatmul.bf16.vlgmr.msra.gmra.mxu1 %v6992_v15  ;;  %v5343_v17 = vor.u32 %v6382_v47, %v5340_v21  ;;  %v6015_v43 = vor.u32 %v6550_v30, %v6012_v31  ;;  %v6529_v47 = vld [vmem:[%s6876_s16 + $0xc54] sm:$0xf]  ;;  %v5928_v21 = vld [vmem:[%s6876_s16 + $0xc6c] sm:$0xf0]  ;;  %v6246_v31 = vld [vmem:[%s6876_s16 + $0x378] sm:$0xf0] }
 0x188   : > { %3803 = vmatpush.bf16.msrb.mxu1 %v5679_v33  ;;  %3772 = vmatmul.bf16.vlgmr.msra.gmra.mxu2 %v6977_v1  ;;  %v5567_v33 = vor.u32 %v6438_v22, %v5564_v27  ;;  %v4562_v27 = vld [vmem:[%s6876_s16 + $0x1a0] sm:$0xf]  ;;  %v5931_v41 = vor.u32 %v6529_v47, %v5928_v21  ;;  %v6225_v21 = vld [vmem:[%s6876_s16 + $0x2d0] sm:$0xf0] }
 0x189   : > { %3816 = vmatpush.bf16.msrb.mxu2 %v5903_v3  ;;  %3785 = vmatmul.bf16.vlgmr.msra.gmra.mxu3 %v6984_v6  ;;  %v5791_v3 = vor.u32 %v6494_v28, %v5788_v29  ;;  %v6190_v28 = vld [vmem:[%s6876_s16 + $0x1b8] sm:$0xf0]  ;;  %v4786_v29 = vld [vmem:[%s6876_s16 + $0x360] sm:$0xf] }
 0x18a   : > { %3829 = vmatpush.bf16.msrb.mxu3 %v6127_v42  ;;  %v4787_v49 = vor.u32 %v6246_v31, %v4786_v29  ;;  %v6337_v29 = vld [vmem:[%s6876_s16 + $0x650] sm:$0xf0] }
 0x18b   : > { %3791 = vmatpush.bf16.msrb.mxu0 %v5427_v52  ;;  %v7800_v42 = vpop.f32.mrf.mxu2  ;;  %v6543_v52 = vld [vmem:[%s6876_s16 + $0xcc4] sm:$0xf]  ;;  %v3541_v55 = vpop.f32.mrf.mxu0 }
 0x18c   : > { %3804 = vmatpush.bf16.msrb.mxu1 %v5651_v19  ;;  %v7805_v51 = vpop.f32.mrf.mxu3  ;;  %v5984_v19 = vld [vmem:[%s6876_s16 + $0xcdc] sm:$0xf0]  ;;  %v3554_v63 = vpop.f32.mrf.mxu1 }
 0x18d   : > { %3817 = vmatpush.bf16.msrb.mxu2 %v5875_v23  ;;  %v5315_v23 = vor.u32 %v6375_v34, %v5312_v37  ;;  %v5987_v0 = vor.u32 %v6543_v52, %v5984_v19  ;;  %v5234_v37 = vld [vmem:[%s6876_s16 + $0x6e0] sm:$0xf]  ;;  %v4534_v52 = vld [vmem:[%s6876_s16 + $0x168] sm:$0xf]  ;;  %v6183_v19 = vld [vmem:[%s6876_s16 + $0x180] sm:$0xf0] }
 0x18e   : > { %3830 = vmatpush.bf16.msrb.mxu3 %v6099_v59  ;;  %v6368_v59 = vld [vmem:[%s6876_s16 + $0x74c] sm:$0xf]  ;;  %v4535_v63 = vor.u32 %v6183_v19, %v4534_v52 }
 0x18f   : > { %3792 = vmatpush.bf16.msrb.mxu0 %v5399_v2  ;;  %v6480_v2 = vld [vmem:[%s6876_s16 + $0xacc] sm:$0xf]  ;;  %v5287_v9 = vor.u32 %v6368_v59, %v5284_v60  ;;  %v6295_v59 = vld [vmem:[%s6876_s16 + $0x500] sm:$0xf0]  ;;  %v5206_v60 = vld [vmem:[%s6876_s16 + $0x6a8] sm:$0xf] }
 0x190   : > { %3805 = vmatpush.bf16.msrb.mxu1 %v5623_v4  ;;  %v5732_v4 = vld [vmem:[%s6876_s16 + $0xae4] sm:$0xf0] }
 0x191   : > { %3818 = vmatpush.bf16.msrb.mxu2 %v5847_v7  ;;  %v6536_v7 = vld [vmem:[%s6876_s16 + $0xc8c] sm:$0xf]  ;;  %v5735_v13 = vor.u32 %v6480_v2, %v5732_v4  ;;  %v4506_v4 = vld [vmem:[%s6876_s16 + $0x130] sm:$0xf] }
 0x192   : > { %3831 = vmatpush.bf16.msrb.mxu3 %v6071_v10  ;;  %v6361_v10 = vld [vmem:[%s6876_s16 + $0x714] sm:$0xf] }
 0x193   : > { %3793 = vmatpush.bf16.msrb.mxu0 %v5371_v16  ;;  %v6473_v16 = vld [vmem:[%s6876_s16 + $0xa94] sm:$0xf]  ;;  %v3567_v50 = vpop.f32.mrf.mxu2  ;;  %v5259_v30 = vor.u32 %v6361_v10, %v5256_v11  ;;  %v6288_v10 = vld [vmem:[%s6876_s16 + $0x4c8] sm:$0xf0] }
 0x194   : > { %3806 = vmatpush.bf16.msrb.mxu1 %v5595_v18  ;;  %v5959_v18 = vor.u32 %v6536_v7, %v5956_v24  ;;  %v3580_v22 = vpop.f32.mrf.mxu3  ;;  %v6176_v7 = vld [vmem:[%s6876_s16 + $0x148] sm:$0xf0]  ;;  %v4730_v24 = vld [vmem:[%s6876_s16 + $0x2f0] sm:$0xf]  ;;  %v4478_v50 = vld [vmem:[%s6876_s16 + $0xf8] sm:$0xf] }
 0x195   : > { %3819 = vmatpush.bf16.msrb.mxu2 %v5819_v20  ;;  %v5704_v20 = vld [vmem:[%s6876_s16 + $0xaac] sm:$0xf0]  ;;  %v6344_v11 = vld [vmem:[%s6876_s16 + $0x688] sm:$0xf0]  ;;  %v4926_v22 = vld [vmem:[%s6876_s16 + $0x478] sm:$0xf] }
 0x196   : > { %3832 = vmatpush.bf16.msrb.mxu3 %v6043_v26  ;;  %v3540_v26 = vadd.f32 %v7785_v62, %v875_v8  ;;  %v5707_v34 = vor.u32 %v6473_v16, %v5704_v20  ;;  %v6358_v62 = vld [vmem:[%s6876_s16 + $0x6f8] sm:$0xf0]  ;;  %v6232_v8 = vld [vmem:[%s6876_s16 + $0x308] sm:$0xf0]  ;;  %v4702_v20 = vld [vmem:[%s6876_s16 + $0x2b8] sm:$0xf] }
 0x197   : > { %3794 = vmatpush.bf16.msrb.mxu0 %v5343_v17  ;;  %v5010_v17 = vld [vmem:[%s6876_s16 + $0x520] sm:$0xf]  ;;  %v5235_v55 = vor.u32 %v6358_v62, %v5234_v37  ;;  %v6162_v62 = vld [vmem:[%s6876_s16 + $0xd8] sm:$0xf0] }
 0x198   : > { %3807 = vmatpush.bf16.msrb.mxu1 %v5567_v33  ;;  %v6302_v33 = vld [vmem:[%s6876_s16 + $0x538] sm:$0xf0]  ;;  %v3553_v45 = vadd.f32 %v7790_v25, %v3540_v26  ;;  %v3994_v25 = vsel %vm3989_vm1, %v7737_v53, 0.0  ;;  %v5207_v53 = vor.u32 %v6351_v46, %v5206_v60  ;;  %v6281_v26 = vld [vmem:[%s6876_s16 + $0x490] sm:$0xf0] }
 0x199   : > { %3820 = vmatpush.bf16.msrb.mxu2 %v5791_v3  ;;  %v5483_v3 = vor.u32 %v6417_v5, %v5480_v58  ;;  %v5011_v36 = vor.u32 %v6302_v33, %v5010_v17  ;;  %v4731_v58 = vor.u32 %v6232_v8, %v4730_v24  ;;  %v4703_v17 = vor.u32 %v6225_v21, %v4702_v20  ;;  %v4450_v37 = vld [vmem:[%s6876_s16 + $0xc0] sm:$0xf]  ;;  %v4422_v46 = vld [vmem:[%s6876_s16 + $0x88] sm:$0xf]  ;;  %v4842_v20 = vld [vmem:[%s6876_s16 + $0x3d0] sm:$0xf] }
 0x19a   : > { %3833 = vmatpush.bf16.msrb.mxu3 %v6015_v43  ;;  %v4563_v43 = vor.u32 %v6190_v28, %v4562_v27  ;;  %v4012_v27 = vrot.slane %v3994_v25, 4  ;;  %v5150_v28 = vld [vmem:[%s6876_s16 + $0x638] sm:$0xf]  ;;  %v4927_v33 = vor.u32 %v6281_v26, %v4926_v22  ;;  %v4870_v24 = vld [vmem:[%s6876_s16 + $0x408] sm:$0xf] }
 0x19b   : > { %3795 = vmatpush.bf16.msrb.mxu0 %v5315_v23  ;;  %v4758_v23 = vld [vmem:[%s6876_s16 + $0x328] sm:$0xf] }
 0x19c   : > { %3808 = vmatpush.bf16.msrb.mxu1 %v5539_v56  ;;  %v6239_v56 = vld [vmem:[%s6876_s16 + $0x340] sm:$0xf0]  ;;  %v4013_v52 = vadd.f32 %v4012_v27, %v3994_v25 }
 0x19d   : > { %3821 = vmatpush.bf16.msrb.mxu2 %v5763_v57  ;;  %v4982_v57 = vld [vmem:[%s6876_s16 + $0x4e8] sm:$0xf]  ;;  %v4759_v38 = vor.u32 %v6239_v56, %v4758_v23  ;;  %v5122_v23 = vld [vmem:[%s6876_s16 + $0x600] sm:$0xf]  ;;  %v4451_v56 = vor.u32 %v6162_v62, %v4450_v37  ;;  %v4814_v37 = vld [vmem:[%s6876_s16 + $0x398] sm:$0xf] }
 0x19e   : > { %3834 = vmatpush.bf16.msrb.mxu3 %v5987_v0  ;;  %v3566_v0 = vadd.f32 %v7800_v42, %v3553_v45  ;;  %v4983_v2 = vor.u32 %v6295_v59, %v4982_v57  ;;  %v5178_v42 = vld [vmem:[%s6876_s16 + $0x670] sm:$0xf]  ;;  %v6218_v45 = vld [vmem:[%s6876_s16 + $0x298] sm:$0xf0]  ;;  %v4014_v8 = vrot.slane %v4013_v52, 2 }
 0x19f   : > { %3796 = vmatpush.bf16.msrb.mxu0 %v5287_v9  ;;  %v4954_v9 = vld [vmem:[%s6876_s16 + $0x4b0] sm:$0xf]  ;;  %v5179_v47 = vor.u32 %v6344_v11, %v5178_v42 }
 0x1a0   : > { %3809 = vmatpush.bf16.msrb.mxu1 %v5511_v48  ;;  %v4077_v48 = vmul.f32 %v3994_v25, %v3994_v25  ;;  %v3579_v5 = vadd.f32 %v7805_v51, %v3566_v0  ;;  %v4955_v16 = vor.u32 %v6288_v10, %v4954_v9  ;;  %v4646_v0 = vld [vmem:[%s6876_s16 + $0x248] sm:$0xf]  ;;  %v6323_v10 = vld [vmem:[%s6876_s16 + $0x5e0] sm:$0xf0] }
 0x1a1   : > { %3822 = vmatpush.bf16.msrb.mxu2 %v5735_v13  ;;  %v4507_v13 = vor.u32 %v6176_v7, %v4506_v4  ;;  %v6211_v7 = vld [vmem:[%s6876_s16 + $0x260] sm:$0xf0]  ;;  %v5094_v9 = vld [vmem:[%s6876_s16 + $0x5c8] sm:$0xf] }
 0x1a2   : > { %3835 = vmatpush.bf16.msrb.mxu3 %v5959_v18  ;;  %v6169_v18 = vld [vmem:[%s6876_s16 + $0x110] sm:$0xf0]  ;;  %v4094_v51 = vrot.slane %v4077_v48, 4  ;;  %v5095_v27 = vor.u32 %v6323_v10, %v5094_v9  ;;  %v6130_v9 = vld [vmem:[%s6876_s16 + $0xde0] sm:$0xf] }
 0x1a3   : > { %3797 = vmatpush.bf16.msrb.mxu0 %v5259_v30  ;;  %v4479_v30 = vor.u32 %v6169_v18, %v4478_v50  ;;  %v3591_v31 = vpop.f32.mrf.mxu0  ;;  %v6204_v18 = vld [vmem:[%s6876_s16 + $0x228] sm:$0xf0]  ;;  %v6582_v10 = vld [vmem:[%s6876_s16 + $0xdf8] sm:$0xf0] }
 0x1a4   : > { %3810 = vmatpush.bf16.msrb.mxu1 %v5483_v3  ;;  %v3592_v3 = vadd.f32 %v3591_v31, %v3579_v5  ;;  %v4095_v25 = vadd.f32 %v4094_v51, %v4077_v48  ;;  %v6148_v5 = vld [vmem:[%s6876_s16 + $0x68] sm:$0xf0]  ;;  %v4618_v48 = vld [vmem:[%s6876_s16 + $0x210] sm:$0xf]  ;;  %v4366_v51 = vld [vmem:[%s6876_s16 + $0x18] sm:$0xf]  ;;  %v4015_v31 = vadd.f32 %v4014_v8, %v4013_v52 }
 0x1a5   : > { %3823 = vmatpush.bf16.msrb.mxu2 %v5707_v34  ;;  %v3604_v34 = vpop.f32.mrf.mxu1 }
 0x1a6   : > { %3836 = vmatpush.bf16.msrb.mxu3 %v5931_v41  ;;  %3798 = vmatmul.bf16.vlgmr.msrb.gmra.mxu0 %v7056_v39  ;;  %v4674_v41 = vld [vmem:[%s6876_s16 + $0x280] sm:$0xf]  ;;  %v3605_v19 = vadd.f32 %v3604_v34, %v3592_v3  ;;  %v4096_v22 = vrot.slane %v4095_v25, 2  ;;  %v4590_v3 = vld [vmem:[%s6876_s16 + $0x1d8] sm:$0xf] }
 0x1a7   : > { %3842 = vmatpush.bf16.msra.mxu0 %v4563_v43  ;;  %3811 = vmatmul.bf16.vlgmr.msrb.gmra.mxu1 %v7062_v44  ;;  %v5151_v43 = vor.u32 %v6337_v29, %v5150_v28  ;;  %v4675_v57 = vor.u32 %v6218_v45, %v4674_v41  ;;  %v5066_v28 = vld [vmem:[%s6876_s16 + $0x590] sm:$0xf]  ;;  %v6316_v29 = vld [vmem:[%s6876_s16 + $0x5a8] sm:$0xf0]  ;;  %v6197_v34 = vld [vmem:[%s6876_s16 + $0x1f0] sm:$0xf0]  ;;  %v4619_v41 = vor.u32 %v6204_v18, %v4618_v48 }
 0x1a8   : > { %3855 = vmatpush.bf16.msra.mxu1 %v4787_v49  ;;  %3824 = vmatmul.bf16.vlgmr.msrb.gmra.mxu2 %v7051_v35  ;;  %v4898_v49 = vld [vmem:[%s6876_s16 + $0x440] sm:$0xf]  ;;  %v6253_v45 = vld [vmem:[%s6876_s16 + $0x3b0] sm:$0xf0]  ;;  %v6463_v18 = vld [vmem:[%s6876_s16 + $0xa40] sm:$0xf0] }
 0x1a9   : > { %3868 = vmatpush.bf16.msra.mxu2 %v5011_v36  ;;  %3837 = vmatmul.bf16.vlgmr.msrb.gmra.mxu3 %v7058_v40  ;;  %v6274_v36 = vld [vmem:[%s6876_s16 + $0x458] sm:$0xf0]  ;;  %v4815_v8 = vor.u32 %v6253_v45, %v4814_v37  ;;  %v6400_v37 = vld [vmem:[%s6876_s16 + $0x848] sm:$0xf0] }
 0x1aa   : > { %3881 = vmatpush.bf16.msra.mxu3 %v5235_v55  ;;  %v6330_v55 = vld [vmem:[%s6876_s16 + $0x618] sm:$0xf0]  ;;  %v4899_v59 = vor.u32 %v6274_v36, %v4898_v49  ;;  %v5038_v49 = vld [vmem:[%s6876_s16 + $0x558] sm:$0xf] }
 0x1ab   : > { %3843 = vmatpush.bf16.msra.mxu0 %v4535_v63  ;;  %v3617_v60 = vpop.f32.mrf.mxu2  ;;  %v6155_v63 = vld [vmem:[%s6876_s16 + $0xa0] sm:$0xf0] }
 0x1ac   : > { %3856 = vmatpush.bf16.msra.mxu1 %v4759_v38  ;;  %v5123_v38 = vor.u32 %v6330_v55, %v5122_v23  ;;  %v3630_v4 = vpop.f32.mrf.mxu3  ;;  %v4423_v11 = vor.u32 %v6155_v63, %v4422_v46  ;;  %v5067_v23 = vor.u32 %v6316_v29, %v5066_v28  ;;  %v6309_v55 = vld [vmem:[%s6876_s16 + $0x570] sm:$0xf0]  ;;  %v6470_v46 = vld [vmem:[%s6876_s16 + $0xa78] sm:$0xf0]  ;;  %v4097_v63 = vadd.f32 %v4096_v22, %v4095_v25  ;;  %v6102_v29 = vld [vmem:[%s6876_s16 + $0xda8] sm:$0xf] }
 0x1ad   : > { %3869 = vmatpush.bf16.msra.mxu2 %v4983_v2  ;;  %v3618_v2 = vadd.f32 %v3617_v60, %v3605_v19  ;;  %v3606_v21 = vpop.f32.mrf.mxu1  ;;  %v5682_v60 = vld [vmem:[%s6876_s16 + $0xa60] sm:$0xf]  ;;  %v6131_v22 = vor.u32 %v6582_v10, %v6130_v9  ;;  %v6561_v9 = vld [vmem:[%s6876_s16 + $0xd50] sm:$0xf0] }
 0x1ae   : > { %3882 = vmatpush.bf16.msra.mxu3 %v5207_v53  ;;  %v6267_v53 = vld [vmem:[%s6876_s16 + $0x420] sm:$0xf0]  ;;  %v5683_v48 = vor.u32 %v6470_v46, %v5682_v60 }
 0x1af   : > { %3844 = vmatpush.bf16.msra.mxu0 %v4507_v13  ;;  %v3631_v42 = vadd.f32 %v3630_v4, %v3618_v2  ;;  %v4394_v13 = vld [vmem:[%s6876_s16 + $0x50] sm:$0xf]  ;;  %v4871_v50 = vor.u32 %v6267_v53, %v4870_v24  ;;  %v5906_v4 = vld [vmem:[%s6876_s16 + $0xc20] sm:$0xf]  ;;  %v4016_v24 = vrot.slane %v4015_v31, 1  ;;  %v4591_v53 = vor.u32 %v6197_v34, %v4590_v3 }
 0x1b0   : > { %3857 = vmatpush.bf16.msra.mxu1 %v4731_v58  ;;  %v3593_v58 = vpop.f32.mrf.mxu0  ;;  %v5402_v3 = vld [vmem:[%s6876_s16 + $0x830] sm:$0xf] }
 0x1b1   : > { %3870 = vmatpush.bf16.msra.mxu2 %v4955_v16  ;;  %v4647_v16 = vor.u32 %v6211_v7, %v4646_v0  ;;  %vm3949_vm5 = vcmp.ge.f32.partialorder %v3631_v42, 0.0  ;;  %v3956_v26 = vmul.f32 0.01, %v3631_v42  ;;  %v6526_v7 = vld [vmem:[%s6876_s16 + $0xc38] sm:$0xf0]  ;;  %v4017_v28 = vadd.f32 %v4016_v24, %v4015_v31 }
 0x1b2   : > { %3883 = vmatpush.bf16.msra.mxu3 %v5179_v47  ;;  %v6260_v47 = vld [vmem:[%s6876_s16 + $0x3e8] sm:$0xf0]  ;;  %v5907_v58 = vor.u32 %v6526_v7, %v5906_v4  ;;  %v5403_v60 = vor.u32 %v6400_v37, %v5402_v3  ;;  %v5822_v24 = vld [vmem:[%s6876_s16 + $0xb78] sm:$0xf]  ;;  %v5766_v3 = vld [vmem:[%s6876_s16 + $0xb08] sm:$0xf] }
 0x1b3   : > { %3845 = vmatpush.bf16.msra.mxu0 %v4479_v30  ;;  %v6141_v30 = vld [vmem:[%s6876_s16 + $0x30] sm:$0xf0]  ;;  %v3619_v36 = vpop.f32.mrf.mxu2  ;;  %v5990_v37 = vld [vmem:[%s6876_s16 + $0xcc8] sm:$0xf] }
 0x1b4   : > { %3858 = vmatpush.bf16.msra.mxu1 %v4703_v17  ;;  %v3963_v17 = vsel %vm3949_vm5, %v3631_v42, %v3956_v26  ;;  %v4367_v2 = vor.u32 %v6141_v30, %v4366_v51  ;;  %v5878_v26 = vld [vmem:[%s6876_s16 + $0xbe8] sm:$0xf]  ;;  %v6575_v51 = vld [vmem:[%s6876_s16 + $0xdc0] sm:$0xf0] }
 0x1b5   : > { %3871 = vmatpush.bf16.msra.mxu2 %v4927_v33  ;;  %v4395_v33 = vor.u32 %v6148_v5, %v4394_v13  ;;  %3970 = vst [vmem:[%s7407_s14 + $0x18] sm:$0xff] %v3963_v17  ;;  %v3995_v62 = vsel %vm3989_vm1, %v3963_v17, 0.0  ;;  %v5430_v5 = vld [vmem:[%s6876_s16 + $0x868] sm:$0xf]  ;;  %v6103_v36 = vor.u32 %v6575_v51, %v6102_v29  ;;  %v6379_v29 = vld [vmem:[%s6876_s16 + $0x7a0] sm:$0xf0] }
 0x1b6   : > { %3884 = vmatpush.bf16.msra.mxu3 %v5151_v43  ;;  %v4843_v43 = vor.u32 %v6260_v47, %v4842_v20  ;;  %v4018_v52 = vrot.slane %v3995_v62, 4  ;;  %v4078_v19 = vmul.f32 %v3995_v62, %v3995_v62  ;;  %v4098_v20 = vrot.slane %v4097_v63, 1  ;;  %v5542_v51 = vld [vmem:[%s6876_s16 + $0x948] sm:$0xf] }
 0x1b7   : > { %3846 = vmatpush.bf16.msra.mxu0 %v4451_v56  ;;  %v5458_v56 = vld [vmem:[%s6876_s16 + $0x8a0] sm:$0xf] }
 0x1b8   : > { %3859 = vmatpush.bf16.msra.mxu1 %v4675_v57  ;;  %v3632_v57 = vpop.f32.mrf.mxu3  ;;  %v4019_v0 = vadd.f32 %v4018_v52, %v3995_v62  ;;  %v5626_v62 = vld [vmem:[%s6876_s16 + $0x9f0] sm:$0xf] }
 0x1b9   : > { %3872 = vmatpush.bf16.msra.mxu2 %v4899_v59  ;;  %v6414_v59 = vld [vmem:[%s6876_s16 + $0x8b8] sm:$0xf0]  ;;  %v5850_v52 = vld [vmem:[%s6876_s16 + $0xbb0] sm:$0xf] }
 0x1ba   : > { %3885 = vmatpush.bf16.msra.mxu3 %v5123_v38  ;;  %v4100_v38 = vrot.slane %v4078_v19, 4  ;;  %v4020_v42 = vrot.slane %v4019_v0, 2  ;;  %v5459_v13 = vor.u32 %v6414_v59, %v5458_v56  ;;  %v6568_v56 = vld [vmem:[%s6876_s16 + $0xd88] sm:$0xf0] }
 0x1bb   : > { %3847 = vmatpush.bf16.msra.mxu0 %v4423_v11  ;;  %v5039_v11 = vor.u32 %v6309_v55, %v5038_v49  ;;  %v6074_v55 = vld [vmem:[%s6876_s16 + $0xd70] sm:$0xf] }
 0x1bc   : > { %3860 = vmatpush.bf16.msra.mxu1 %v4647_v16  ;;  %v4101_v25 = vadd.f32 %v4100_v38, %v4078_v19  ;;  %v6407_v16 = vld [vmem:[%s6876_s16 + $0x880] sm:$0xf0]  ;;  %v4021_v47 = vadd.f32 %v4020_v42, %v4019_v0  ;;  %v6512_v19 = vld [vmem:[%s6876_s16 + $0xbc8] sm:$0xf0]  ;;  %v6393_v0 = vld [vmem:[%s6876_s16 + $0x810] sm:$0xf0]  ;;  %v6075_v7 = vor.u32 %v6568_v56, %v6074_v55 }
 0x1bd   : > { %3873 = vmatpush.bf16.msra.mxu2 %v4871_v50  ;;  %v5654_v50 = vld [vmem:[%s6876_s16 + $0xa28] sm:$0xf]  ;;  %v6449_v38 = vld [vmem:[%s6876_s16 + $0x9d0] sm:$0xf0]  ;;  %v6428_v56 = vld [vmem:[%s6876_s16 + $0x928] sm:$0xf0] }
 0x1be   : > { %3886 = vmatpush.bf16.msra.mxu3 %v5095_v27  ;;  %v4102_v21 = vrot.slane %v4101_v25, 2  ;;  %v6519_v27 = vld [vmem:[%s6876_s16 + $0xc00] sm:$0xf0]  ;;  %v4022_v30 = vrot.slane %v4021_v47, 1  ;;  %v5655_v34 = vor.u32 %v6463_v18, %v5654_v50  ;;  %v6442_v18 = vld [vmem:[%s6876_s16 + $0x998] sm:$0xf0] }
 0x1bf   : > { %3848 = vmatpush.bf16.msra.mxu0 %v4395_v33  ;;  %v5431_v33 = vor.u32 %v6407_v16, %v5430_v5  ;;  %v5879_v31 = vor.u32 %v6519_v27, %v5878_v26  ;;  %v5346_v5 = vld [vmem:[%s6876_s16 + $0x7c0] sm:$0xf] }
 0x1c0   : > { %3861 = vmatpush.bf16.msra.mxu1 %v4619_v41  ;;  %v4103_v17 = vadd.f32 %v4102_v21, %v4101_v25  ;;  %v6456_v41 = vld [vmem:[%s6876_s16 + $0xa08] sm:$0xf0]  ;;  %v4023_v45 = vadd.f32 %v4022_v30, %v4021_v47  ;;  %v6498_v47 = vld [vmem:[%s6876_s16 + $0xb58] sm:$0xf0] }
 0x1c1   : > { %3874 = vmatpush.bf16.msra.mxu2 %v4843_v43  ;;  %v4099_v43 = vadd.f32 %v4098_v20, %v4097_v63  ;;  %v5627_v46 = vor.u32 %v6456_v41, %v5626_v62  ;;  %v5851_v63 = vor.u32 %v6512_v19, %v5850_v52  ;;  %v5794_v20 = vld [vmem:[%s6876_s16 + $0xb40] sm:$0xf]  ;;  %v6554_v21 = vld [vmem:[%s6876_s16 + $0xd18] sm:$0xf0]  ;;  %v6547_v62 = vld [vmem:[%s6876_s16 + $0xce0] sm:$0xf0] }
 0x1c2   : > { %3887 = vmatpush.bf16.msra.mxu3 %v5067_v23  ;;  %v4104_v49 = vrot.slane %v4103_v17, 1  ;;  %v4050_v23 = vrot.slane %v4017_v28, 6  ;;  %v4051_v57 = vrot.slane %v4023_v45, 5  ;;  %v5795_v27 = vor.u32 %v6498_v47, %v5794_v20  ;;  %v5318_v28 = vld [vmem:[%s6876_s16 + $0x788] sm:$0xf] }
 0x1c3   : > { %3849 = vmatpush.bf16.msra.mxu0 %v4367_v2  ;;  %v7946_v25 = vpop.f32.mrf.mxu0  ;;  %v5319_v41 = vor.u32 %v6379_v29, %v5318_v28  ;;  %v6372_v52 = vld [vmem:[%s6876_s16 + $0x768] sm:$0xf0]  ;;  %v5514_v19 = vld [vmem:[%s6876_s16 + $0x910] sm:$0xf]  ;;  %v5991_v55 = vor.u32 %v6547_v62, %v5990_v37 }
 0x1c4   : > { %3862 = vmatpush.bf16.msra.mxu1 %v4591_v53  ;;  %v4105_v59 = vadd.f32 %v4104_v49, %v4103_v17  ;;  %v4058_v2 = vsel %vm4057_vm6, %v4050_v23, %v4051_v57  ;;  %v7955_v16 = vpop.f32.mrf.mxu1  ;;  %v5738_v57 = vld [vmem:[%s6876_s16 + $0xad0] sm:$0xf] }
 0x1c5   : > { %3875 = vmatpush.bf16.msra.mxu2 %v4815_v8  ;;  %v7941_v53 = vsel %vm4059_vm7, %v7620_v54, %v4058_v2  ;;  %v6046_v8 = vld [vmem:[%s6876_s16 + $0xd38] sm:$0xf]  ;;  %v6365_v2 = vld [vmem:[%s6876_s16 + $0x730] sm:$0xf0] }
 0x1c6   : > { %3888 = vmatpush.bf16.msra.mxu3 %v5039_v11  ;;  %3850 = vmatmul.bf16.vlgmr.msra.gmra.mxu0 %v6990_v14  ;;  %v5598_v14 = vld [vmem:[%s6876_s16 + $0x9b8] sm:$0xf]  ;;  %v4133_v4 = vrot.slane %v4105_v59, 5  ;;  %v6047_v50 = vor.u32 %v6561_v9, %v6046_v8  ;;  %v6484_v59 = vld [vmem:[%s6876_s16 + $0xae8] sm:$0xf0] }
 0x1c7   : > { %3894 = vmatpush.bf16.msrb.mxu0 %v5459_v13  ;;  %3863 = vmatmul.bf16.vlgmr.msra.gmra.mxu1 %v6992_v15  ;;  %v6505_v15 = vld [vmem:[%s6876_s16 + $0xb90] sm:$0xf0]  ;;  %v5599_v54 = vor.u32 %v6449_v38, %v5598_v14  ;;  %v5515_v14 = vor.u32 %v6428_v56, %v5514_v19  ;;  %v5739_v38 = vor.u32 %v6484_v59, %v5738_v57  ;;  %v5710_v8 = vld [vmem:[%s6876_s16 + $0xa98] sm:$0xf] }
 0x1c8   : > { %3907 = vmatpush.bf16.msrb.mxu1 %v5683_v48  ;;  %3876 = vmatmul.bf16.vlgmr.msra.gmra.mxu2 %v6977_v1  ;;  %v5374_v1 = vld [vmem:[%s6876_s16 + $0x7f8] sm:$0xf]  ;;  %v5823_v13 = vor.u32 %v6505_v15, %v5822_v24  ;;  %v6386_v48 = vld [vmem:[%s6876_s16 + $0x7d8] sm:$0xf0]  ;;  %v6421_v15 = vld [vmem:[%s6876_s16 + $0x8f0] sm:$0xf0] }
 0x1c9   : > { %3920 = vmatpush.bf16.msrb.mxu2 %v5907_v58  ;;  %3889 = vmatmul.bf16.vlgmr.msra.gmra.mxu3 %v6984_v6  ;;  %v4132_v6 = vrot.slane %v4099_v43, 6  ;;  %v5375_v42 = vor.u32 %v6393_v0, %v5374_v1  ;;  %v5570_v58 = vld [vmem:[%s6876_s16 + $0x980] sm:$0xf]  ;;  %v6540_v1 = vld [vmem:[%s6876_s16 + $0xca8] sm:$0xf0] }
 0x1ca   : > { %3933 = vmatpush.bf16.msrb.mxu3 %v6131_v22  ;;  %v5347_v22 = vor.u32 %v6386_v48, %v5346_v5  ;;  %v5571_v26 = vor.u32 %v6442_v18, %v5570_v58  ;;  %v6477_v9 = vld [vmem:[%s6876_s16 + $0xab0] sm:$0xf0] }
 0x1cb   : > { %3895 = vmatpush.bf16.msrb.mxu0 %v5431_v33  ;;  %v4138_v10 = vsel %vm4057_vm6, %v4132_v6, %v4133_v4  ;;  %v3669_v30 = vpop.f32.mrf.mxu2  ;;  %v6435_v33 = vld [vmem:[%s6876_s16 + $0x960] sm:$0xf0]  ;;  %v3645_v43 = vpop.f32.mrf.mxu0  ;;  %v5262_v6 = vld [vmem:[%s6876_s16 + $0x718] sm:$0xf]  ;;  %v5711_v58 = vor.u32 %v6477_v9, %v5710_v8 }
 0x1cc   : > { %3908 = vmatpush.bf16.msrb.mxu1 %v5655_v34  ;;  %v7950_v11 = vsel %vm4059_vm7, %v7627_v61, %v4138_v10  ;;  %v6018_v61 = vld [vmem:[%s6876_s16 + $0xd00] sm:$0xf]  ;;  %v6491_v34 = vld [vmem:[%s6876_s16 + $0xb20] sm:$0xf0]  ;;  %v5543_v45 = vor.u32 %v6435_v33, %v5542_v51  ;;  %v3658_v23 = vpop.f32.mrf.mxu1  ;;  %v5486_v4 = vld [vmem:[%s6876_s16 + $0x8d8] sm:$0xf]  ;;  %v5263_v5 = vor.u32 %v6365_v2, %v5262_v6 }
 0x1cd   : > { %3921 = vmatpush.bf16.msrb.mxu2 %v5879_v31  ;;  %v6019_v17 = vor.u32 %v6554_v21, %v6018_v61  ;;  %v3682_v31 = vpop.f32.mrf.mxu3  ;;  %v5767_v49 = vor.u32 %v6491_v34, %v5766_v3  ;;  %v5487_v48 = vor.u32 %v6421_v15, %v5486_v4 }
 0x1ce   : > { %3934 = vmatpush.bf16.msrb.mxu3 %v6103_v36  ;;  %v5290_v36 = vld [vmem:[%s6876_s16 + $0x750] sm:$0xf] }
 0x1cf   : > { %3896 = vmatpush.bf16.msrb.mxu0 %v5403_v60  ;;  %v5962_v60 = vld [vmem:[%s6876_s16 + $0xc90] sm:$0xf]  ;;  %v5291_v0 = vor.u32 %v6372_v52, %v5290_v36 }
 0x1d0   : > { %3909 = vmatpush.bf16.msrb.mxu1 %v5627_v46  ;;  %v7979_v46 = vld [vmem:[%s6882_s24] sm:$0xff]  ;;  %v5963_v24 = vor.u32 %v6540_v1, %v5962_v60 }
 0x1d1   : > { %3922 = vmatpush.bf16.msrb.mxu2 %v5851_v63  ;;  %v876_v63 = vperm.slane %v7979_v46, 4  ;;  %v877_v37 = vperm.slane %v7979_v46, 5 }
 0x1d2   : > { %3935 = vmatpush.bf16.msrb.mxu3 %v6075_v7 }
 0x1d3   : > { %3897 = vmatpush.bf16.msrb.mxu0 %v5375_v42  ;;  %v3671_v7 = vpop.f32.mrf.mxu2  ;;  %v3644_v42 = vadd.f32 %v7946_v25, %v876_v63 }
 0x1d4   : > { %3910 = vmatpush.bf16.msrb.mxu1 %v5599_v54  ;;  %v5934_v54 = vld [vmem:[%s6876_s16 + $0xc58] sm:$0xf] }
 0x1d5   : > { %3923 = vmatpush.bf16.msrb.mxu2 %v5823_v13  ;;  %v3684_v10 = vpop.f32.mrf.mxu3  ;;  %v6533_v13 = vld [vmem:[%s6876_s16 + $0xc70] sm:$0xf0]  ;;  %v3657_v18 = vadd.f32 %v7955_v16, %v3644_v42  ;;  %v6772_v42 = vmov 0.0  }
 0x1d6   : > { %3936 = vmatpush.bf16.msrb.mxu3 %v6047_v50  ;;  %v5935_v50 = vor.u32 %v6533_v13, %v5934_v54  ;;  %v878_v10 = vperm.slane %v7979_v46, 6  ;;  %3982 = vst.msk [vmem:[%s8008_s17] sm:$0x7f] %vm8000_vm10, %v6772_v42 }
 0x1d7   : > { %3898 = vmatpush.bf16.msrb.mxu0 %v5347_v22  ;;  %v3670_v20 = vadd.f32 %v3669_v30, %v3657_v18  ;;  %3983 = vst.msk [vmem:[%s8014_s28] sm:$0x7f] %vm8000_vm10, %v6772_v42 }
 0x1d8   : > { %3911 = vmatpush.bf16.msrb.mxu1 %v5571_v26 }
 0x1d9   : > { %3924 = vmatpush.bf16.msrb.mxu2 %v5795_v27  ;;  %v3683_v25 = vadd.f32 %v3682_v31, %v3670_v20 }
 0x1da   : > { %3937 = vmatpush.bf16.msrb.mxu3 %v6019_v17 }
 0x1db   : > { %3899 = vmatpush.bf16.msrb.mxu0 %v5319_v41 }
 0x1dc   : > { %3912 = vmatpush.bf16.msrb.mxu1 %v5543_v45 }
 0x1dd   : > { %3925 = vmatpush.bf16.msrb.mxu2 %v5767_v49 }
 0x1de   : > { %3938 = vmatpush.bf16.msrb.mxu3 %v5991_v55 }
 0x1df   : > { %3900 = vmatpush.bf16.msrb.mxu0 %v5291_v0 }
 0x1e0   : > { %3913 = vmatpush.bf16.msrb.mxu1 %v5515_v14 }
 0x1e1   : > { %3926 = vmatpush.bf16.msrb.mxu2 %v5739_v38 }
 0x1e2   : > { %3939 = vmatpush.bf16.msrb.mxu3 %v5963_v24 }
 0x1e3   : > { %3901 = vmatpush.bf16.msrb.mxu0 %v5263_v5  ;;  %v3695_v47 = vpop.f32.mrf.mxu0 }
 0x1e4   : > { %3914 = vmatpush.bf16.msrb.mxu1 %v5487_v48  ;;  %v3696_v61 = vadd.f32 %v3695_v47, %v3683_v25  ;;  %v3708_v21 = vpop.f32.mrf.mxu1 }
 0x1e5   : > { %3927 = vmatpush.bf16.msrb.mxu2 %v5711_v58 }
 0x1e6   : > { %3940 = vmatpush.bf16.msrb.mxu3 %v5935_v50  ;;  %3902 = vmatmul.bf16.vlgmr.msrb.gmra.mxu0 %v7056_v39  ;;  %v3709_v22 = vadd.f32 %v3708_v21, %v3696_v61 }
 0x1e7   : > { %3915 = vmatmul.bf16.vlgmr.msrb.gmra.mxu1 %v7062_v44 }
 0x1e8   : > { %3928 = vmatmul.bf16.vlgmr.msrb.gmra.mxu2 %v7051_v35 }
 0x1e9   : > { %3941 = vmatmul.bf16.vlgmr.msrb.gmra.mxu3 %v7058_v40 }
 0x1eb   : > { %v3721_v16 = vpop.f32.mrf.mxu2  ;;  %v3697_v29 = vpop.f32.mrf.mxu0 }
 0x1ec   : > { %v3722_v26 = vadd.f32 %v3721_v16, %v3709_v22  ;;  %v3734_v27 = vpop.f32.mrf.mxu3  ;;  %v3710_v51 = vpop.f32.mrf.mxu1 }
 0x1ee   : > { %v3735_v28 = vadd.f32 %v3734_v27, %v3722_v26 }
 0x1f0   : > { %vm3950_vm8 = vcmp.ge.f32.partialorder %v3735_v28, 0.0  ;;  %v3957_v39 = vmul.f32 0.01, %v3735_v28 }
 0x1f2   : > { %v3964_v30 = vsel %vm3950_vm8, %v3735_v28, %v3957_v39 }
 0x1f3   : > { %3971 = vst [vmem:[%s7407_s14 + $0x20] sm:$0xff] %v3964_v30  ;;  %v3723_v44 = vpop.f32.mrf.mxu2  ;;  %v3996_v50 = vsel %vm3989_vm1, %v3964_v30, 0.0 }
 0x1f4   : > { %v3736_v35 = vpop.f32.mrf.mxu3  ;;  %v4079_v25 = vmul.f32 %v3996_v50, %v3996_v50  ;;  %v4024_v22 = vrot.slane %v3996_v50, 4 }
 0x1f6   : > { %v4106_v26 = vrot.slane %v4079_v25, 4  ;;  %v4025_v29 = vadd.f32 %v4024_v22, %v3996_v50 }
 0x1f8   : > { %v4107_v30 = vadd.f32 %v4106_v26, %v4079_v25 }
 0x203   : > { %v3747_v17 = vpop.f32.mrf.mxu0 }
 0x204   : > { %v3760_v33 = vpop.f32.mrf.mxu1  ;;  %v3748_v43 = vadd.f32 %v3747_v17, %v877_v37 }
 0x206   : > { %v3761_v45 = vadd.f32 %v3760_v33, %v3748_v43 }
 0x20b   : > { %v3773_v40 = vpop.f32.mrf.mxu2  ;;  %v3749_v34 = vpop.f32.mrf.mxu0 }
 0x20c   : > { %v3786_v3 = vpop.f32.mrf.mxu3  ;;  %v3762_v31 = vpop.f32.mrf.mxu1  ;;  %v3774_v49 = vadd.f32 %v3773_v40, %v3761_v45  ;;  %v4026_v34 = vrot.slane %v4025_v29, 2 }
 0x20e   : > { %v3787_v36 = vadd.f32 %v3786_v3, %v3774_v49  ;;  %v4027_v45 = vadd.f32 %v4026_v34, %v4025_v29 }
 0x213   : > { %v3775_v62 = vpop.f32.mrf.mxu2 }
 0x214   : > { %v3788_v41 = vpop.f32.mrf.mxu3  ;;  %v4108_v62 = vrot.slane %v4107_v30, 2 }
 0x223   : > { %v3799_v52 = vpop.f32.mrf.mxu0 }
 0x224   : > { %v3800_v19 = vadd.f32 %v3799_v52, %v3787_v36  ;;  %v3812_v23 = vpop.f32.mrf.mxu1 }
 0x226   : > { %v3813_v55 = vadd.f32 %v3812_v23, %v3800_v19 }
 0x22b   : > { %v3825_v56 = vpop.f32.mrf.mxu2  ;;  %v3801_v1 = vpop.f32.mrf.mxu0 }
 0x22c   : > { %v3826_v57 = vadd.f32 %v3825_v56, %v3813_v55  ;;  %v3838_v59 = vpop.f32.mrf.mxu3  ;;  %v3814_v63 = vpop.f32.mrf.mxu1  ;;  %v4109_v56 = vadd.f32 %v4108_v62, %v4107_v30  ;;  %v4028_v1 = vrot.slane %v4027_v45, 1 }
 0x22e   : > { %v3839_v60 = vadd.f32 %v3838_v59, %v3826_v57 }
 0x230   : > { %vm3951_vm9 = vcmp.ge.f32.partialorder %v3839_v60, 0.0  ;;  %v3958_v0 = vmul.f32 0.01, %v3839_v60 }
 0x232   : > { %v3965_v14 = vsel %vm3951_vm9, %v3839_v60, %v3958_v0 }
 0x233   : > { %3972 = vst [vmem:[%s7407_s14 + $0x28] sm:$0xff] %v3965_v14  ;;  %v3827_v38 = vpop.f32.mrf.mxu2  ;;  %v3997_v48 = vsel %vm3989_vm1, %v3965_v14, 0.0 }
 0x234   : > { %v3840_v6 = vpop.f32.mrf.mxu3  ;;  %v4080_v18 = vmul.f32 %v3997_v48, %v3997_v48  ;;  %v4030_v47 = vrot.slane %v3997_v48, 4  ;;  %v4110_v38 = vrot.slane %v4109_v56, 1 }
 0x236   : > { %v4112_v16 = vrot.slane %v4080_v18, 4  ;;  %v4031_v27 = vadd.f32 %v4030_v47, %v3997_v48 }
 0x238   : > { %v4113_v51 = vadd.f32 %v4112_v16, %v4080_v18  ;;  %v4032_v33 = vrot.slane %v4031_v27, 2  ;;  %v3999_v18 = vld [vmem:[%s8008_s17] sm:$0xff] }
 0x23a   : > { %v4114_v31 = vrot.slane %v4113_v51, 2  ;;  %v4033_v41 = vadd.f32 %v4032_v33, %v4031_v27 }
 0x23c   : > { %v4115_v49 = vadd.f32 %v4114_v31, %v4113_v51  ;;  %v4034_v57 = vrot.slane %v4033_v41, 1 }
 0x23e   : > { %v4116_v63 = vrot.slane %v4115_v49, 1  ;;  %v4035_v6 = vadd.f32 %v4034_v57, %v4033_v41 }
 0x243   : > { %v3851_v2 = vpop.f32.mrf.mxu0 }
 0x244   : > { %v3864_v4 = vpop.f32.mrf.mxu1  ;;  %v3852_v13 = vadd.f32 %v3851_v2, %v878_v10  ;;  %v4053_v10 = vrot.slane %v4035_v6, 3 }
 0x246   : > { %v3865_v5 = vadd.f32 %v3864_v4, %v3852_v13 }
 0x24b   : > { %v3877_v7 = vpop.f32.mrf.mxu2  ;;  %v3853_v15 = vpop.f32.mrf.mxu0 }
 0x24c   : > { %v3890_v24 = vpop.f32.mrf.mxu3  ;;  %v3866_v9 = vpop.f32.mrf.mxu1  ;;  %v3878_v58 = vadd.f32 %v3877_v7, %v3865_v5  ;;  %v4029_v7 = vadd.f32 %v4028_v1, %v4027_v45 }
 0x24d   : > { %v4111_v9 = vadd.f32 %v4110_v38, %v4109_v56 }
 0x24e   : > { %v3891_v46 = vadd.f32 %v3890_v24, %v3878_v58  ;;  %v4117_v24 = vadd.f32 %v4116_v63, %v4115_v49 }
 0x24f   : > { %v4134_v58 = vrot.slane %v4111_v9, 4 }
 0x250   : > { %v4135_v13 = vrot.slane %v4117_v24, 3 }
 0x252   : > { %v4140_v25 = vsel %vm4061_vm12, %v4134_v58, %v4135_v13 }
 0x253   : > { %v3879_v12 = vpop.f32.mrf.mxu2 }
 0x254   : > { %v3892_v54 = vpop.f32.mrf.mxu3 }
 0x255   : > { %v4052_v54 = vrot.slane %v4029_v7, 4 }
 0x257   : > { %v4062_v50 = vsel %vm4061_vm12, %v4052_v54, %v4053_v10 }
 0x263   : > { %v3903_v20 = vpop.f32.mrf.mxu0 }
 0x264   : > { %v3916_v61 = vpop.f32.mrf.mxu1  ;;  %v3904_v21 = vadd.f32 %v3903_v20, %v3891_v46 }
 0x266   : > { %v3917_v28 = vadd.f32 %v3916_v61, %v3904_v21  ;;  %v4074_v61 = vld [vmem:[%s8014_s28] sm:$0xff] }
 0x26b   : > { %v3929_v39 = vpop.f32.mrf.mxu2  ;;  %v3905_v17 = vpop.f32.mrf.mxu0 }
 0x26c   : > { %v3930_v44 = vadd.f32 %v3929_v39, %v3917_v28  ;;  %v3942_v35 = vpop.f32.mrf.mxu3  ;;  %v3918_v40 = vpop.f32.mrf.mxu1 }
 0x26e   : > { %v3943_v3 = vadd.f32 %v3942_v35, %v3930_v44 }
 0x270   : > { %vm3952_vm11 = vcmp.ge.f32.partialorder %v3943_v3, 0.0  ;;  %v3959_v37 = vmul.f32 0.01, %v3943_v3 }
 0x272   : > { %v3966_v43 = vsel %vm3952_vm11, %v3943_v3, %v3959_v37 }
 0x273   : > { %3973 = vst [vmem:[%s7407_s14 + $0x30] sm:$0xff] %v3966_v43  ;;  %v3998_v36 = vsel %vm3989_vm1, %v3966_v43, 0.0  ;;  %v3931_v52 = vpop.f32.mrf.mxu2 }
 0x274   : > { %v4036_v19 = vrot.slane %v3998_v36, 4  ;;  %v4081_v23 = vmul.f32 %v3998_v36, %v3998_v36  ;;  %v3944_v55 = vpop.f32.mrf.mxu3 }
 0x276   : > { %v4037_v59 = vadd.f32 %v4036_v19, %v3998_v36  ;;  %v4118_v60 = vrot.slane %v4081_v23, 4 }
 0x278   : > { %v4038_v0 = vrot.slane %v4037_v59, 2  ;;  %v4119_v14 = vadd.f32 %v4118_v60, %v4081_v23 }
 0x27a   : > { %v4039_v2 = vadd.f32 %v4038_v0, %v4037_v59  ;;  %v4120_v4 = vrot.slane %v4119_v14, 2 }
 0x27c   : > { %v4040_v32 = vrot.slane %v4039_v2, 1  ;;  %v4121_v15 = vadd.f32 %v4120_v4, %v4119_v14 }
 0x27e   : > { %v4041_v42 = vadd.f32 %v4040_v32, %v4039_v2  ;;  %v4122_v12 = vrot.slane %v4121_v15, 1 }
 0x280   : > { %v4054_v5 = vrot.slane %v4041_v42, 2  ;;  %v4123_v48 = vadd.f32 %v4122_v12, %v4121_v15 }
 0x282   : > { %v4064_v46 = vsel %vm4063_vm13, %v4062_v50, %v4054_v5  ;;  %v4136_v20 = vrot.slane %v4123_v48, 2 }
 0x283   : > { %v4066_v47 = vsel %vm4065_vm14, %v7941_v53, %v4064_v46 }
 0x284   : > { %v4068_v21 = vadd.f32 %v4066_v47, %v3999_v18  ;;  %v4141_v22 = vsel %vm4063_vm13, %v4140_v25, %v4136_v20 }
 0x285   : > { %v4142_v16 = vsel %vm4065_vm14, %v7950_v11, %v4141_v22 }
 0x286   : > { %4073 = vst.msk [vmem:[%s8008_s17] sm:$0x7f] %vm8000_vm10, %v4068_v21  ;;  %v4144_v26 = vadd.f32 %v4142_v16, %v4074_v61 }
 0x288   : > { %4145 = vst.msk [vmem:[%s8014_s28] sm:$0x7f] %vm8000_vm10, %v4144_v26 }
 0x289 PF: > { %s22_s23 = sadd.s32 1, %s6767_s23   ;;  %s8069_s18 = smov %s6751_s19 }
 0x28a   : > { %p19_p0 = scmp.ge.s32.totalorder %s22_s23, 9   ;;  %s8070_s19 = smov %s6755_s20 }
 0x28b   : > { %s8071_s20 = smov %s6848_s29  ;;  %s8072_s21 = smov %s6763_s22 }
 0x28c   : > { %s8073_s22 = smov %s8075_s25  ;;  %21 = sbr.rel (!%p19_p0) target bundleno = 6 (0x6), region = 116 }
 0x291   :  { %4206 = vsyncpa [#allocation3], 1 }
 0x292   :  { %4208 = vsyncpa [#allocation3 + $0x1], 1 }
 0x293   :  { %4209 = vsyncpa [#allocation5], 1 }
 0x294   :  { %4211 = vsyncpa [#allocation5 + $0x1], 1 }

// kernel: decoder_forward.14
= control target key start
LH: loop header
LB: loop body
LE: loop exit
PB: predicated region body
PF: predicated region fallthrough
CT: control target
= control target key end

     0   :  { %vm218_vm0 = vcmask 519168   ;;  %s745_s0 = inlined_call_operand.vmem [shape: f32[392,64], index: 0, kind: input, shape index: {}]   ;;  %s746_s1 = inlined_call_operand.vmem [shape: f32[1,64], index: 1, kind: input, shape index: {}]   ;;  %s747_s2 = inlined_call_operand.vmem [shape: f32[1,64], index: 2, kind: input, shape index: {}]   ;;  %s748_s3 = inlined_call_operand.vmem [shape: bf16[392,64], index: 3, kind: output, shape index: {}]  }
   0x1   :  { %v14_v0 = vld [vmem:[%s745_s0] sm:$0xff]  ;;  %v15_v3 = vld [vmem:[%s745_s0 + $0x8] sm:$0xff]  ;;  %v16_v6 = vld [vmem:[%s745_s0 + $0x10] sm:$0xff] }
   0x2   :  { %v300_v1 = vld [vmem:[%s746_s1] ss:$0 sm:$0xff]  ;;  %v17_v7 = vld [vmem:[%s745_s0 + $0x18] sm:$0xff]  ;;  %v19_v12 = vld [vmem:[%s745_s0 + $0x28] sm:$0xff] }
   0x3   :  { %v305_v2 = vld [vmem:[%s747_s2] ss:$0 sm:$0xff]  ;;  %v67_v4 = vmul.f32 %v300_v1, %v14_v0  ;;  %v68_v5 = vmul.f32 %v300_v1, %v15_v3  ;;  %v69_v9 = vmul.f32 %v300_v1, %v16_v6  ;;  %v70_v10 = vmul.f32 %v300_v1, %v17_v7  ;;  %v20_v13 = vld [vmem:[%s745_s0 + $0x30] sm:$0xff]  ;;  %v21_v14 = vld [vmem:[%s745_s0 + $0x38] sm:$0xff] }
   0x4   :  { %v18_v8 = vld [vmem:[%s745_s0 + $0x20] sm:$0xff]  ;;  %v72_v17 = vmul.f32 %v300_v1, %v19_v12  ;;  %v73_v18 = vmul.f32 %v300_v1, %v20_v13  ;;  %v74_v22 = vmul.f32 %v300_v1, %v21_v14  ;;  %v23_v24 = vld [vmem:[%s745_s0 + $0x48] sm:$0xff]  ;;  %v24_v29 = vld [vmem:[%s745_s0 + $0x50] sm:$0xff] }
   0x5   :  { %v71_v11 = vmul.f32 %v300_v1, %v18_v8  ;;  %v120_v15 = vadd.f32 %v305_v2, %v67_v4  ;;  %v121_v16 = vadd.f32 %v305_v2, %v68_v5  ;;  %v122_v19 = vadd.f32 %v305_v2, %v69_v9  ;;  %v22_v23 = vld [vmem:[%s745_s0 + $0x40] sm:$0xff]  ;;  %v25_v30 = vld [vmem:[%s745_s0 + $0x58] sm:$0xff]  ;;  %v27_v35 = vld [vmem:[%s745_s0 + $0x68] sm:$0xff] }
   0x6   :  { %v123_v20 = vadd.f32 %v305_v2, %v70_v10  ;;  %v125_v27 = vadd.f32 %v305_v2, %v72_v17  ;;  %v126_v28 = vadd.f32 %v305_v2, %v73_v18  ;;  %v26_v31 = vld [vmem:[%s745_s0 + $0x60] sm:$0xff]  ;;  %v127_v34 = vadd.f32 %v305_v2, %v74_v22  ;;  %v28_v36 = vld [vmem:[%s745_s0 + $0x70] sm:$0xff]  ;;  %v29_v41 = vld [vmem:[%s745_s0 + $0x78] sm:$0xff] }
   0x7   :  { %v124_v21 = vadd.f32 %v305_v2, %v71_v11  ;;  %v169_v25 = vpack.c.bf16 %v120_v15, %v120_v15  ;;  %v170_v26 = vpack.c.bf16 %v121_v16, %v121_v16  ;;  %v171_v32 = vpack.c.bf16 %v122_v19, %v122_v19  ;;  %v30_v54 = vld [vmem:[%s745_s0 + $0x80] sm:$0xff]  ;;  %v31_v55 = vld [vmem:[%s745_s0 + $0x88] sm:$0xff]  ;;  %v32_v58 = vld [vmem:[%s745_s0 + $0x90] sm:$0xff] }
   0x8   :  { %v172_v33 = vpack.c.bf16 %v123_v20, %v123_v20  ;;  %v174_v38 = vpack.c.bf16 %v125_v27, %v125_v27  ;;  %v75_v39 = vmul.f32 %v300_v1, %v22_v23  ;;  %v76_v40 = vmul.f32 %v300_v1, %v23_v24  ;;  %v33_v59 = vld [vmem:[%s745_s0 + $0x98] sm:$0xff]  ;;  %v34_v62 = vld [vmem:[%s745_s0 + $0xa0] sm:$0xff]  ;;  %v35_v5 = vld [vmem:[%s745_s0 + $0xa8] sm:$0xff] }
   0x9   :  { %219 = vst.msk [vmem:[%s748_s3] sm:$0xf] %vm218_vm0, %v169_v25  ;;  %v173_v37 = vpack.c.bf16 %v124_v21, %v124_v21  ;;  %v175_v42 = vpack.c.bf16 %v126_v28, %v126_v28  ;;  %v77_v43 = vmul.f32 %v300_v1, %v24_v29  ;;  %v78_v44 = vmul.f32 %v300_v1, %v25_v30  ;;  %v36_v10 = vld [vmem:[%s745_s0 + $0xb0] sm:$0xff]  ;;  %v37_v14 = vld [vmem:[%s745_s0 + $0xb8] sm:$0xff]  ;;  %v38_v18 = vld [vmem:[%s745_s0 + $0xc0] sm:$0xff] }
   0xa   :  { %220 = vst.msk [vmem:[%s748_s3 + $0x4] sm:$0xf] %vm218_vm0, %v170_v26  ;;  %v79_v45 = vmul.f32 %v300_v1, %v26_v31  ;;  %v128_v46 = vadd.f32 %v305_v2, %v75_v39  ;;  %v129_v47 = vadd.f32 %v305_v2, %v76_v40  ;;  %v80_v48 = vmul.f32 %v300_v1, %v27_v35  ;;  %v39_v22 = vld [vmem:[%s745_s0 + $0xc8] sm:$0xff]  ;;  %v40_v26 = vld [vmem:[%s745_s0 + $0xd0] sm:$0xff]  ;;  %v41_v30 = vld [vmem:[%s745_s0 + $0xd8] sm:$0xff] }
   0xb   :  { %221 = vst.msk [vmem:[%s748_s3 + $0x8] sm:$0xf] %vm218_vm0, %v171_v32  ;;  %v81_v49 = vmul.f32 %v300_v1, %v28_v36  ;;  %v176_v50 = vpack.c.bf16 %v127_v34, %v127_v34  ;;  %v130_v51 = vadd.f32 %v305_v2, %v77_v43  ;;  %v131_v52 = vadd.f32 %v305_v2, %v78_v44  ;;  %v42_v34 = vld [vmem:[%s745_s0 + $0xe0] sm:$0xff] }
   0xc   :  { %222 = vst.msk [vmem:[%s748_s3 + $0xc] sm:$0xf] %vm218_vm0, %v172_v33  ;;  %v82_v53 = vmul.f32 %v300_v1, %v29_v41  ;;  %v177_v56 = vpack.c.bf16 %v128_v46, %v128_v46  ;;  %v132_v57 = vadd.f32 %v305_v2, %v79_v45  ;;  %v178_v60 = vpack.c.bf16 %v129_v47, %v129_v47  ;;  %v45_v46 = vld [vmem:[%s745_s0 + $0xf8] sm:$0xff] }
   0xd   :  { %223 = vst.msk [vmem:[%s748_s3 + $0x10] sm:$0xf] %vm218_vm0, %v173_v37  ;;  %v133_v61 = vadd.f32 %v305_v2, %v80_v48  ;;  %v179_v63 = vpack.c.bf16 %v130_v51, %v130_v51  ;;  %v134_v0 = vadd.f32 %v305_v2, %v81_v49  ;;  %v83_v3 = vmul.f32 %v300_v1, %v30_v54  ;;  %v47_v54 = vld [vmem:[%s745_s0 + $0x108] sm:$0xff] }
   0xe   :  { %224 = vst.msk [vmem:[%s748_s3 + $0x14] sm:$0xf] %vm218_vm0, %v174_v38  ;;  %v84_v4 = vmul.f32 %v300_v1, %v31_v55  ;;  %v180_v6 = vpack.c.bf16 %v131_v52, %v131_v52  ;;  %v135_v7 = vadd.f32 %v305_v2, %v82_v53  ;;  %v85_v8 = vmul.f32 %v300_v1, %v32_v58  ;;  %v43_v38 = vld [vmem:[%s745_s0 + $0xe8] sm:$0xff]  ;;  %v48_v58 = vld [vmem:[%s745_s0 + $0x110] sm:$0xff] }
   0xf   :  { %225 = vst.msk [vmem:[%s748_s3 + $0x18] sm:$0xf] %vm218_vm0, %v175_v42  ;;  %v86_v9 = vmul.f32 %v300_v1, %v33_v59  ;;  %v181_v11 = vpack.c.bf16 %v132_v57, %v132_v57  ;;  %v136_v12 = vadd.f32 %v305_v2, %v83_v3  ;;  %v87_v13 = vmul.f32 %v300_v1, %v34_v62  ;;  %v44_v42 = vld [vmem:[%s745_s0 + $0xf0] sm:$0xff]  ;;  %v49_v62 = vld [vmem:[%s745_s0 + $0x118] sm:$0xff] }
  0x10   :  { %226 = vst.msk [vmem:[%s748_s3 + $0x1c] sm:$0xf] %vm218_vm0, %v176_v50  ;;  %v182_v15 = vpack.c.bf16 %v133_v61, %v133_v61  ;;  %v137_v16 = vadd.f32 %v305_v2, %v84_v4  ;;  %v88_v17 = vmul.f32 %v300_v1, %v35_v5  ;;  %v183_v19 = vpack.c.bf16 %v134_v0, %v134_v0  ;;  %v46_v50 = vld [vmem:[%s745_s0 + $0x100] sm:$0xff] }
  0x11   :  { %227 = vst.msk [vmem:[%s748_s3 + $0x20] sm:$0xf] %vm218_vm0, %v177_v56  ;;  %v138_v20 = vadd.f32 %v305_v2, %v85_v8  ;;  %v89_v21 = vmul.f32 %v300_v1, %v36_v10  ;;  %v184_v23 = vpack.c.bf16 %v135_v7, %v135_v7  ;;  %v139_v24 = vadd.f32 %v305_v2, %v86_v9  ;;  %v50_v4 = vld [vmem:[%s745_s0 + $0x120] sm:$0xff]  ;;  %v51_v8 = vld [vmem:[%s745_s0 + $0x128] sm:$0xff] }
  0x12   :  { %228 = vst.msk [vmem:[%s748_s3 + $0x24] sm:$0xf] %vm218_vm0, %v178_v60  ;;  %v90_v25 = vmul.f32 %v300_v1, %v37_v14  ;;  %v185_v27 = vpack.c.bf16 %v136_v12, %v136_v12  ;;  %v140_v28 = vadd.f32 %v305_v2, %v87_v13  ;;  %v91_v29 = vmul.f32 %v300_v1, %v38_v18  ;;  %v52_v12 = vld [vmem:[%s745_s0 + $0x130] sm:$0xff] }
  0x13   :  { %229 = vst.msk [vmem:[%s748_s3 + $0x28] sm:$0xf] %vm218_vm0, %v179_v63  ;;  %v186_v31 = vpack.c.bf16 %v137_v16, %v137_v16  ;;  %v141_v32 = vadd.f32 %v305_v2, %v88_v17  ;;  %v92_v33 = vmul.f32 %v300_v1, %v39_v22  ;;  %v187_v35 = vpack.c.bf16 %v138_v20, %v138_v20  ;;  %v53_v16 = vld [vmem:[%s745_s0 + $0x138] sm:$0xff]  ;;  %v54_v20 = vld [vmem:[%s745_s0 + $0x140] sm:$0xff] }
  0x14   :  { %230 = vst.msk [vmem:[%s748_s3 + $0x2c] sm:$0xf] %vm218_vm0, %v180_v6  ;;  %v142_v36 = vadd.f32 %v305_v2, %v89_v21  ;;  %v93_v37 = vmul.f32 %v300_v1, %v40_v26  ;;  %v188_v39 = vpack.c.bf16 %v139_v24, %v139_v24  ;;  %v143_v40 = vadd.f32 %v305_v2, %v90_v25  ;;  %v55_v24 = vld [vmem:[%s745_s0 + $0x148] sm:$0xff] }
  0x15   :  { %231 = vst.msk [vmem:[%s748_s3 + $0x30] sm:$0xf] %vm218_vm0, %v181_v11  ;;  %v94_v41 = vmul.f32 %v300_v1, %v41_v30  ;;  %v189_v43 = vpack.c.bf16 %v140_v28, %v140_v28  ;;  %v144_v44 = vadd.f32 %v305_v2, %v91_v29  ;;  %v95_v45 = vmul.f32 %v300_v1, %v42_v34  ;;  %v56_v28 = vld [vmem:[%s745_s0 + $0x150] sm:$0xff] }
  0x16   :  { %232 = vst.msk [vmem:[%s748_s3 + $0x34] sm:$0xf] %vm218_vm0, %v182_v15  ;;  %v190_v47 = vpack.c.bf16 %v141_v32, %v141_v32  ;;  %v145_v48 = vadd.f32 %v305_v2, %v92_v33  ;;  %v96_v49 = vmul.f32 %v300_v1, %v43_v38  ;;  %v191_v51 = vpack.c.bf16 %v142_v36, %v142_v36  ;;  %v57_v32 = vld [vmem:[%s745_s0 + $0x158] sm:$0xff]  ;;  %v58_v36 = vld [vmem:[%s745_s0 + $0x160] sm:$0xff] }
  0x17   :  { %233 = vst.msk [vmem:[%s748_s3 + $0x38] sm:$0xf] %vm218_vm0, %v183_v19  ;;  %v146_v52 = vadd.f32 %v305_v2, %v93_v37  ;;  %v97_v53 = vmul.f32 %v300_v1, %v44_v42  ;;  %v192_v55 = vpack.c.bf16 %v143_v40, %v143_v40  ;;  %v147_v56 = vadd.f32 %v305_v2, %v94_v41  ;;  %v59_v40 = vld [vmem:[%s745_s0 + $0x168] sm:$0xff] }
  0x18   :  { %234 = vst.msk [vmem:[%s748_s3 + $0x3c] sm:$0xf] %vm218_vm0, %v184_v23  ;;  %v98_v57 = vmul.f32 %v300_v1, %v45_v46  ;;  %v193_v59 = vpack.c.bf16 %v144_v44, %v144_v44  ;;  %v148_v60 = vadd.f32 %v305_v2, %v95_v45  ;;  %v99_v61 = vmul.f32 %v300_v1, %v46_v50  ;;  %v60_v44 = vld [vmem:[%s745_s0 + $0x170] sm:$0xff] }
  0x19   :  { %235 = vst.msk [vmem:[%s748_s3 + $0x40] sm:$0xf] %vm218_vm0, %v185_v27  ;;  %v194_v63 = vpack.c.bf16 %v145_v48, %v145_v48  ;;  %v149_v0 = vadd.f32 %v305_v2, %v96_v49  ;;  %v100_v3 = vmul.f32 %v300_v1, %v47_v54  ;;  %v195_v5 = vpack.c.bf16 %v146_v52, %v146_v52  ;;  %v61_v48 = vld [vmem:[%s745_s0 + $0x178] sm:$0xff]  ;;  %v62_v52 = vld [vmem:[%s745_s0 + $0x180] sm:$0xff] }
  0x1a   :  { %236 = vst.msk [vmem:[%s748_s3 + $0x44] sm:$0xf] %vm218_vm0, %v186_v31  ;;  %v150_v6 = vadd.f32 %v305_v2, %v97_v53  ;;  %v101_v7 = vmul.f32 %v300_v1, %v48_v58  ;;  %v196_v9 = vpack.c.bf16 %v147_v56, %v147_v56  ;;  %v151_v10 = vadd.f32 %v305_v2, %v98_v57 }
  0x1b   :  { %237 = vst.msk [vmem:[%s748_s3 + $0x48] sm:$0xf] %vm218_vm0, %v187_v35  ;;  %v102_v11 = vmul.f32 %v300_v1, %v49_v62  ;;  %v197_v13 = vpack.c.bf16 %v148_v60, %v148_v60  ;;  %v152_v14 = vadd.f32 %v305_v2, %v99_v61  ;;  %v103_v15 = vmul.f32 %v300_v1, %v50_v4 }
  0x1c   :  { %238 = vst.msk [vmem:[%s748_s3 + $0x4c] sm:$0xf] %vm218_vm0, %v188_v39  ;;  %v198_v17 = vpack.c.bf16 %v149_v0, %v149_v0  ;;  %v153_v18 = vadd.f32 %v305_v2, %v100_v3  ;;  %v104_v19 = vmul.f32 %v300_v1, %v51_v8  ;;  %v199_v21 = vpack.c.bf16 %v150_v6, %v150_v6 }
  0x1d   :  { %239 = vst.msk [vmem:[%s748_s3 + $0x50] sm:$0xf] %vm218_vm0, %v189_v43  ;;  %v154_v22 = vadd.f32 %v305_v2, %v101_v7  ;;  %v105_v23 = vmul.f32 %v300_v1, %v52_v12  ;;  %v200_v25 = vpack.c.bf16 %v151_v10, %v151_v10  ;;  %v155_v26 = vadd.f32 %v305_v2, %v102_v11 }
  0x1e   :  { %240 = vst.msk [vmem:[%s748_s3 + $0x54] sm:$0xf] %vm218_vm0, %v190_v47  ;;  %v106_v27 = vmul.f32 %v300_v1, %v53_v16  ;;  %v201_v29 = vpack.c.bf16 %v152_v14, %v152_v14  ;;  %v156_v30 = vadd.f32 %v305_v2, %v103_v15  ;;  %v107_v31 = vmul.f32 %v300_v1, %v54_v20 }
  0x1f   :  { %241 = vst.msk [vmem:[%s748_s3 + $0x58] sm:$0xf] %vm218_vm0, %v191_v51  ;;  %v202_v33 = vpack.c.bf16 %v153_v18, %v153_v18  ;;  %v157_v34 = vadd.f32 %v305_v2, %v104_v19  ;;  %v108_v35 = vmul.f32 %v300_v1, %v55_v24  ;;  %v203_v37 = vpack.c.bf16 %v154_v22, %v154_v22 }
  0x20   :  { %242 = vst.msk [vmem:[%s748_s3 + $0x5c] sm:$0xf] %vm218_vm0, %v192_v55  ;;  %v158_v38 = vadd.f32 %v305_v2, %v105_v23  ;;  %v109_v39 = vmul.f32 %v300_v1, %v56_v28  ;;  %v204_v41 = vpack.c.bf16 %v155_v26, %v155_v26  ;;  %v159_v42 = vadd.f32 %v305_v2, %v106_v27 }
  0x21   :  { %243 = vst.msk [vmem:[%s748_s3 + $0x60] sm:$0xf] %vm218_vm0, %v193_v59  ;;  %v110_v43 = vmul.f32 %v300_v1, %v57_v32  ;;  %v205_v45 = vpack.c.bf16 %v156_v30, %v156_v30  ;;  %v160_v46 = vadd.f32 %v305_v2, %v107_v31  ;;  %v111_v47 = vmul.f32 %v300_v1, %v58_v36 }
  0x22   :  { %244 = vst.msk [vmem:[%s748_s3 + $0x64] sm:$0xf] %vm218_vm0, %v194_v63  ;;  %v206_v49 = vpack.c.bf16 %v157_v34, %v157_v34  ;;  %v161_v50 = vadd.f32 %v305_v2, %v108_v35  ;;  %v112_v51 = vmul.f32 %v300_v1, %v59_v40  ;;  %v207_v53 = vpack.c.bf16 %v158_v38, %v158_v38 }
  0x23   :  { %245 = vst.msk [vmem:[%s748_s3 + $0x68] sm:$0xf] %vm218_vm0, %v195_v5  ;;  %v162_v54 = vadd.f32 %v305_v2, %v109_v39  ;;  %v113_v55 = vmul.f32 %v300_v1, %v60_v44  ;;  %v208_v56 = vpack.c.bf16 %v159_v42, %v159_v42  ;;  %v163_v57 = vadd.f32 %v305_v2, %v110_v43 }
  0x24   :  { %246 = vst.msk [vmem:[%s748_s3 + $0x6c] sm:$0xf] %vm218_vm0, %v196_v9  ;;  %v114_v58 = vmul.f32 %v300_v1, %v61_v48  ;;  %v209_v59 = vpack.c.bf16 %v160_v46, %v160_v46  ;;  %v164_v60 = vadd.f32 %v305_v2, %v111_v47  ;;  %v115_v61 = vmul.f32 %v300_v1, %v62_v52 }
  0x25   :  { %247 = vst.msk [vmem:[%s748_s3 + $0x70] sm:$0xf] %vm218_vm0, %v197_v13  ;;  %v210_v62 = vpack.c.bf16 %v161_v50, %v161_v50  ;;  %v165_v63 = vadd.f32 %v305_v2, %v112_v51  ;;  %v211_v0 = vpack.c.bf16 %v162_v54, %v162_v54  ;;  %v166_v3 = vadd.f32 %v305_v2, %v113_v55 }
  0x26   :  { %248 = vst.msk [vmem:[%s748_s3 + $0x74] sm:$0xf] %vm218_vm0, %v198_v17  ;;  %v212_v1 = vpack.c.bf16 %v163_v57, %v163_v57  ;;  %v167_v4 = vadd.f32 %v305_v2, %v114_v58  ;;  %v213_v5 = vpack.c.bf16 %v164_v60, %v164_v60  ;;  %v168_v6 = vadd.f32 %v305_v2, %v115_v61 }
  0x27   :  { %249 = vst.msk [vmem:[%s748_s3 + $0x78] sm:$0xf] %vm218_vm0, %v199_v21  ;;  %v214_v7 = vpack.c.bf16 %v165_v63, %v165_v63  ;;  %v215_v8 = vpack.c.bf16 %v166_v3, %v166_v3 }
  0x28   :  { %250 = vst.msk [vmem:[%s748_s3 + $0x7c] sm:$0xf] %vm218_vm0, %v200_v25  ;;  %v216_v9 = vpack.c.bf16 %v167_v4, %v167_v4  ;;  %v217_v2 = vpack.c.bf16 %v168_v6, %v168_v6 }
  0x29   :  { %251 = vst.msk [vmem:[%s748_s3 + $0x80] sm:$0xf] %vm218_vm0, %v201_v29 }
  0x2a   :  { %252 = vst.msk [vmem:[%s748_s3 + $0x84] sm:$0xf] %vm218_vm0, %v202_v33 }
  0x2b   :  { %253 = vst.msk [vmem:[%s748_s3 + $0x88] sm:$0xf] %vm218_vm0, %v203_v37 }
  0x2c   :  { %254 = vst.msk [vmem:[%s748_s3 + $0x8c] sm:$0xf] %vm218_vm0, %v204_v41 }
  0x2d   :  { %255 = vst.msk [vmem:[%s748_s3 + $0x90] sm:$0xf] %vm218_vm0, %v205_v45 }
  0x2e   :  { %256 = vst.msk [vmem:[%s748_s3 + $0x94] sm:$0xf] %vm218_vm0, %v206_v49 }
  0x2f   :  { %257 = vst.msk [vmem:[%s748_s3 + $0x98] sm:$0xf] %vm218_vm0, %v207_v53 }
  0x30   :  { %258 = vst.msk [vmem:[%s748_s3 + $0x9c] sm:$0xf] %vm218_vm0, %v208_v56 }
  0x31   :  { %259 = vst.msk [vmem:[%s748_s3 + $0xa0] sm:$0xf] %vm218_vm0, %v209_v59 }
  0x32   :  { %260 = vst.msk [vmem:[%s748_s3 + $0xa4] sm:$0xf] %vm218_vm0, %v210_v62 }
  0x33   :  { %261 = vst.msk [vmem:[%s748_s3 + $0xa8] sm:$0xf] %vm218_vm0, %v211_v0 }
  0x34   :  { %262 = vst.msk [vmem:[%s748_s3 + $0xac] sm:$0xf] %vm218_vm0, %v212_v1 }
  0x35   :  { %263 = vst.msk [vmem:[%s748_s3 + $0xb0] sm:$0xf] %vm218_vm0, %v213_v5 }
  0x36   :  { %264 = vst.msk [vmem:[%s748_s3 + $0xb4] sm:$0xf] %vm218_vm0, %v214_v7 }
  0x37   :  { %265 = vst.msk [vmem:[%s748_s3 + $0xb8] sm:$0xf] %vm218_vm0, %v215_v8 }
  0x38   :  { %266 = vst.msk [vmem:[%s748_s3 + $0xbc] sm:$0xf] %vm218_vm0, %v216_v9 }
  0x39   :  { %267 = vst.msk [vmem:[%s748_s3 + $0xc0] sm:$0xf] %vm218_vm0, %v217_v2 }

// kernel: decoder_forward.15
= control target key start
LH: loop header
LB: loop body
LE: loop exit
PB: predicated region body
PF: predicated region fallthrough
CT: control target
= control target key end

     0   :  { %8 = vsyncpa [#allocation3], 0  ;;  %s1448_s15 = smov [#allocation2]   ;;  %s2152_s0 = inlined_call_operand.vmem [shape: bf16[456,256], index: 0, kind: input, shape index: {}]   ;;  %s2153_s1 = inlined_call_operand.vmem [shape: bf16[256,4], index: 1, kind: input, shape index: {}]   ;;  %s2154_s2 = inlined_call_operand.hbm [shape: f32[1,4], index: 2, kind: input, shape index: {}]   ;;  %s2155_s3 = inlined_call_operand.vmem [shape: f32[456,4], index: 3, kind: output, shape index: {}]  }
   0x1   :  { %s18_s14 = sshll.u32 %s2154_s2, 4  ;;  %s20_s16 = sshll.u32 %s1448_s15, 4  ;;  %s19_s14 = int_to_ptr.hbm [resolvable:$true] %s18_s14  ;;  %s21_s16 = int_to_ptr.vmem [resolvable:$true] %s20_s16 }
   0x2   :  { %23 = dma.hbm_to_vmem [thread:$0]  %s19_s14, 16, %s21_s16, [#allocation3]  }
   0x3   :  { %1446 = dma.done.wait [#allocation3], 16  }
   0x4   :  { %1447 = vsyncadd [#allocation3], 4294967280  ;;  %v1281_v0 = vld [vmem:[%s2153_s1 + $0x38] sm:$0xff]  ;;  %v1280_v2 = vld [vmem:[%s2153_s1 + $0x30] sm:$0xff]  ;;  %vm867_vm0 = vcmask 31744  }
   0x5   :  { %v1289_v1 = vld [vmem:[%s2153_s1 + $0x78] sm:$0xff]  ;;  %504 = vmatpush.bf16.msra.mxu0 %v1281_v0  ;;  %1290 = vmatpush.bf16.msra.mxu2 %v1281_v0  ;;  %v1288_v3 = vld [vmem:[%s2153_s1 + $0x70] sm:$0xff]  ;;  %v1279_v4 = vld [vmem:[%s2153_s1 + $0x28] sm:$0xff] }
   0x6   :  { %657 = vmatpush.bf16.msra.mxu1 %v1289_v1  ;;  %1298 = vmatpush.bf16.msra.mxu3 %v1289_v1  ;;  %v1287_v5 = vld [vmem:[%s2153_s1 + $0x68] sm:$0xff]  ;;  %v1278_v6 = vld [vmem:[%s2153_s1 + $0x20] sm:$0xff]  ;;  %v1277_v8 = vld [vmem:[%s2153_s1 + $0x18] sm:$0xff] }
   0x7   :  { %v1286_v7 = vld [vmem:[%s2153_s1 + $0x60] sm:$0xff]  ;;  %v1285_v9 = vld [vmem:[%s2153_s1 + $0x58] sm:$0xff]  ;;  %v1276_v10 = vld [vmem:[%s2153_s1 + $0x10] sm:$0xff] }
   0x8   :  { %v1284_v11 = vld [vmem:[%s2153_s1 + $0x50] sm:$0xff]  ;;  %v1275_v12 = vld [vmem:[%s2153_s1 + $0x8] sm:$0xff]  ;;  %v1274_v14 = vld [vmem:[%s2153_s1] sm:$0xff] }
   0x9   :  { %505 = vmatpush.bf16.msra.mxu0 %v1280_v2  ;;  %1291 = vmatpush.bf16.msra.mxu2 %v1280_v2  ;;  %v1283_v13 = vld [vmem:[%s2153_s1 + $0x48] sm:$0xff]  ;;  %v1282_v15 = vld [vmem:[%s2153_s1 + $0x40] sm:$0xff]  ;;  %v1248_v22 = vld [vmem:[%s2152_s0 + $0xf4] sm:$0xf] }
   0xa   :  { %658 = vmatpush.bf16.msra.mxu1 %v1288_v3  ;;  %1299 = vmatpush.bf16.msra.mxu3 %v1288_v3  ;;  %v932_v16 = vld [vmem:[%s2152_s0] sm:$0xf]  ;;  %v1219_v17 = vld [vmem:[%s2152_s0 + $0x4] sm:$0xf0]  ;;  %v1218_v20 = vld [vmem:[%s2152_s0 + $0x4] sm:$0xf] }
   0xb   :  { %v1044_v18 = vld [vmem:[%s2152_s0 + $0xe0] sm:$0xf]  ;;  %v1247_v19 = vld [vmem:[%s2152_s0 + $0xe4] sm:$0xf0]  ;;  %v934_v21 = vld [vmem:[%s2152_s0 + $0x8] sm:$0xf0]  ;;  %v933_v24 = vor.u32 %v1219_v17, %v932_v16 }
   0xc   :  { %v1054_v23 = vld [vmem:[%s2152_s0 + $0xf8] sm:$0xf0]  ;;  %v1045_v25 = vor.u32 %v1247_v19, %v1044_v18  ;;  %v937_v26 = vor.u32 %v1218_v20, %v934_v21  ;;  %v940_v28 = vld [vmem:[%s2152_s0 + $0x10] sm:$0xf]  ;;  %v1221_v29 = vld [vmem:[%s2152_s0 + $0x14] sm:$0xf0] }
   0xd   :  { %506 = vmatpush.bf16.msra.mxu0 %v1279_v4  ;;  %1292 = vmatpush.bf16.msra.mxu2 %v1279_v4  ;;  %v1057_v27 = vor.u32 %v1248_v22, %v1054_v23  ;;  %v1052_v30 = vld [vmem:[%s2152_s0 + $0xf0] sm:$0xf]  ;;  %v1249_v31 = vld [vmem:[%s2152_s0 + $0xf4] sm:$0xf0]  ;;  %v1220_v32 = vld [vmem:[%s2152_s0 + $0x14] sm:$0xf]  ;;  %v941_v36 = vor.u32 %v1221_v29, %v940_v28 }
   0xe   :  { %659 = vmatpush.bf16.msra.mxu1 %v1287_v5  ;;  %1300 = vmatpush.bf16.msra.mxu3 %v1287_v5  ;;  %v942_v33 = vld [vmem:[%s2152_s0 + $0x18] sm:$0xf0]  ;;  %v1250_v34 = vld [vmem:[%s2152_s0 + $0x104] sm:$0xf]  ;;  %v1062_v35 = vld [vmem:[%s2152_s0 + $0x108] sm:$0xf0]  ;;  %v1053_v37 = vor.u32 %v1249_v31, %v1052_v30 }
   0xf   :  { %v945_v38 = vor.u32 %v1220_v32, %v942_v33  ;;  %v1065_v39 = vor.u32 %v1250_v34, %v1062_v35  ;;  %v948_v40 = vld [vmem:[%s2152_s0 + $0x20] sm:$0xf]  ;;  %v1223_v41 = vld [vmem:[%s2152_s0 + $0x24] sm:$0xf0]  ;;  %v1222_v44 = vld [vmem:[%s2152_s0 + $0x24] sm:$0xf] }
  0x10   :  { %v1060_v42 = vld [vmem:[%s2152_s0 + $0x100] sm:$0xf]  ;;  %v1251_v43 = vld [vmem:[%s2152_s0 + $0x104] sm:$0xf0]  ;;  %v950_v45 = vld [vmem:[%s2152_s0 + $0x28] sm:$0xf0]  ;;  %v949_v48 = vor.u32 %v1223_v41, %v948_v40 }
  0x11   :  { %507 = vmatpush.bf16.msra.mxu0 %v1278_v6  ;;  %1293 = vmatpush.bf16.msra.mxu2 %v1278_v6  ;;  %v1252_v46 = vld [vmem:[%s2152_s0 + $0x114] sm:$0xf]  ;;  %v1070_v47 = vld [vmem:[%s2152_s0 + $0x118] sm:$0xf0]  ;;  %v1061_v49 = vor.u32 %v1251_v43, %v1060_v42  ;;  %v953_v50 = vor.u32 %v1222_v44, %v950_v45  ;;  %v956_v52 = vld [vmem:[%s2152_s0 + $0x30] sm:$0xf] }
  0x12   :  { %660 = vmatpush.bf16.msra.mxu1 %v1286_v7  ;;  %1301 = vmatpush.bf16.msra.mxu3 %v1286_v7  ;;  %v1073_v51 = vor.u32 %v1252_v46, %v1070_v47  ;;  %v1225_v53 = vld [vmem:[%s2152_s0 + $0x34] sm:$0xf0]  ;;  %v1068_v54 = vld [vmem:[%s2152_s0 + $0x110] sm:$0xf]  ;;  %v1224_v56 = vld [vmem:[%s2152_s0 + $0x34] sm:$0xf] }
  0x13   :  { %v1253_v55 = vld [vmem:[%s2152_s0 + $0x114] sm:$0xf0]  ;;  %v958_v57 = vld [vmem:[%s2152_s0 + $0x38] sm:$0xf0]  ;;  %v1254_v58 = vld [vmem:[%s2152_s0 + $0x124] sm:$0xf]  ;;  %v957_v60 = vor.u32 %v1225_v53, %v956_v52 }
  0x14   :  { %v1078_v59 = vld [vmem:[%s2152_s0 + $0x128] sm:$0xf0]  ;;  %v1069_v61 = vor.u32 %v1253_v55, %v1068_v54  ;;  %v961_v62 = vor.u32 %v1224_v56, %v958_v57  ;;  %v964_v0 = vld [vmem:[%s2152_s0 + $0x40] sm:$0xf]  ;;  %v1227_v1 = vld [vmem:[%s2152_s0 + $0x44] sm:$0xf0] }
  0x15   :  { %508 = vmatpush.bf16.msra.mxu0 %v1277_v8  ;;  %1294 = vmatpush.bf16.msra.mxu2 %v1277_v8  ;;  %v1081_v63 = vor.u32 %v1254_v58, %v1078_v59  ;;  %v1076_v2 = vld [vmem:[%s2152_s0 + $0x120] sm:$0xf]  ;;  %v1255_v3 = vld [vmem:[%s2152_s0 + $0x124] sm:$0xf0]  ;;  %v1226_v4 = vld [vmem:[%s2152_s0 + $0x44] sm:$0xf]  ;;  %v965_v8 = vor.u32 %v1227_v1, %v964_v0 }
  0x16   :  { %661 = vmatpush.bf16.msra.mxu1 %v1285_v9  ;;  %1302 = vmatpush.bf16.msra.mxu3 %v1285_v9  ;;  %v966_v5 = vld [vmem:[%s2152_s0 + $0x48] sm:$0xf0]  ;;  %v1256_v6 = vld [vmem:[%s2152_s0 + $0x134] sm:$0xf]  ;;  %v1086_v7 = vld [vmem:[%s2152_s0 + $0x138] sm:$0xf0]  ;;  %v1077_v9 = vor.u32 %v1255_v3, %v1076_v2 }
  0x17   :  { %v1228_v16 = vld [vmem:[%s2152_s0 + $0x54] sm:$0xf]  ;;  %v974_v17 = vld [vmem:[%s2152_s0 + $0x58] sm:$0xf0]  ;;  %v1258_v18 = vld [vmem:[%s2152_s0 + $0x144] sm:$0xf] }
  0x18   :  { %v1094_v19 = vld [vmem:[%s2152_s0 + $0x148] sm:$0xf0]  ;;  %v977_v22 = vor.u32 %v1228_v16, %v974_v17  ;;  %v1230_v28 = vld [vmem:[%s2152_s0 + $0x64] sm:$0xf]  ;;  %v1260_v30 = vld [vmem:[%s2152_s0 + $0x154] sm:$0xf] }
  0x19   :  { %509 = vmatpush.bf16.msra.mxu0 %v1276_v10  ;;  %1295 = vmatpush.bf16.msra.mxu2 %v1276_v10  ;;  %v969_v10 = vor.u32 %v1226_v4, %v966_v5  ;;  %v1097_v23 = vor.u32 %v1258_v18, %v1094_v19  ;;  %v982_v29 = vld [vmem:[%s2152_s0 + $0x68] sm:$0xf0]  ;;  %v1102_v31 = vld [vmem:[%s2152_s0 + $0x158] sm:$0xf0]  ;;  %v1232_v40 = vld [vmem:[%s2152_s0 + $0x74] sm:$0xf] }
  0x1a   :  { %662 = vmatpush.bf16.msra.mxu1 %v1284_v11  ;;  %1303 = vmatpush.bf16.msra.mxu3 %v1284_v11  ;;  %v1089_v11 = vor.u32 %v1256_v6, %v1086_v7  ;;  %v985_v34 = vor.u32 %v1230_v28, %v982_v29  ;;  %v1105_v35 = vor.u32 %v1260_v30, %v1102_v31  ;;  %v990_v41 = vld [vmem:[%s2152_s0 + $0x78] sm:$0xf0]  ;;  %v1262_v42 = vld [vmem:[%s2152_s0 + $0x164] sm:$0xf]  ;;  %v1110_v43 = vld [vmem:[%s2152_s0 + $0x168] sm:$0xf0] }
  0x1b   :  { %v993_v46 = vor.u32 %v1232_v40, %v990_v41  ;;  %v1113_v47 = vor.u32 %v1262_v42, %v1110_v43  ;;  %v1263_v52 = vld [vmem:[%s2152_s0 + $0x164] sm:$0xf0]  ;;  %v1234_v53 = vld [vmem:[%s2152_s0 + $0x84] sm:$0xf]  ;;  %v998_v54 = vld [vmem:[%s2152_s0 + $0x88] sm:$0xf0] }
  0x1c   :  { %v1264_v55 = vld [vmem:[%s2152_s0 + $0x174] sm:$0xf]  ;;  %v1118_v56 = vld [vmem:[%s2152_s0 + $0x178] sm:$0xf0]  ;;  %v1238_v40 = vld [vmem:[%s2152_s0 + $0xa4] sm:$0xf] }
  0x1d   :  { %510 = vmatpush.bf16.msra.mxu0 %v1275_v12  ;;  %1296 = vmatpush.bf16.msra.mxu2 %v1275_v12  ;;  %v972_v12 = vld [vmem:[%s2152_s0 + $0x50] sm:$0xf]  ;;  %v1014_v41 = vld [vmem:[%s2152_s0 + $0xa8] sm:$0xf0]  ;;  %v1268_v42 = vld [vmem:[%s2152_s0 + $0x194] sm:$0xf] }
  0x1e   :  { %663 = vmatpush.bf16.msra.mxu1 %v1283_v13  ;;  %1304 = vmatpush.bf16.msra.mxu3 %v1283_v13  ;;  %v1229_v13 = vld [vmem:[%s2152_s0 + $0x54] sm:$0xf0]  ;;  %v1134_v43 = vld [vmem:[%s2152_s0 + $0x198] sm:$0xf0] }
  0x1f   :  { %v973_v20 = vor.u32 %v1229_v13, %v972_v12  ;;  %v1236_v12 = vld [vmem:[%s2152_s0 + $0x94] sm:$0xf]  ;;  %v1006_v13 = vld [vmem:[%s2152_s0 + $0x98] sm:$0xf0] }
  0x21   :  { %511 = vmatpush.bf16.msra.mxu0 %v1274_v14  ;;  %1297 = vmatpush.bf16.msra.mxu2 %v1274_v14  ;;  %v1084_v14 = vld [vmem:[%s2152_s0 + $0x130] sm:$0xf] }
  0x22   :  { %664 = vmatpush.bf16.msra.mxu1 %v1282_v15  ;;  %1305 = vmatpush.bf16.msra.mxu3 %v1282_v15  ;;  %v1257_v15 = vld [vmem:[%s2152_s0 + $0x134] sm:$0xf0] }
  0x23   :  { %v1085_v21 = vor.u32 %v1257_v15, %v1084_v14  ;;  %v1266_v14 = vld [vmem:[%s2152_s0 + $0x184] sm:$0xf]  ;;  %v1126_v15 = vld [vmem:[%s2152_s0 + $0x188] sm:$0xf0] }
  0x24   :  { %512 = vmatmul.bf16.vlgmr.msra.gmra.mxu0 %v933_v24  ;;  %582 = vmatmul.bf16.vlgmr.msra.gmra.mxu2 %v1045_v25  ;;  %v980_v24 = vld [vmem:[%s2152_s0 + $0x60] sm:$0xf]  ;;  %v1231_v25 = vld [vmem:[%s2152_s0 + $0x64] sm:$0xf0] }
  0x25   :  { %665 = vmatmul.bf16.vlgmr.msra.gmra.mxu1 %v937_v26  ;;  %740 = vmatmul.bf16.vlgmr.msra.gmra.mxu3 %v1057_v27  ;;  %v1092_v26 = vld [vmem:[%s2152_s0 + $0x140] sm:$0xf]  ;;  %v1259_v27 = vld [vmem:[%s2152_s0 + $0x144] sm:$0xf0]  ;;  %v981_v32 = vor.u32 %v1231_v25, %v980_v24 }
  0x26   :  { %v1093_v33 = vor.u32 %v1259_v27, %v1092_v26 }
  0x34   :  { %517 = vmatmul.bf16.gmra.mxu0 %v941_v36  ;;  %587 = vmatmul.bf16.gmra.mxu2 %v1053_v37  ;;  %v988_v36 = vld [vmem:[%s2152_s0 + $0x70] sm:$0xf]  ;;  %v1233_v37 = vld [vmem:[%s2152_s0 + $0x74] sm:$0xf0] }
  0x35   :  { %670 = vmatmul.bf16.gmra.mxu1 %v945_v38  ;;  %745 = vmatmul.bf16.gmra.mxu3 %v1065_v39  ;;  %v1100_v38 = vld [vmem:[%s2152_s0 + $0x150] sm:$0xf]  ;;  %v1261_v39 = vld [vmem:[%s2152_s0 + $0x154] sm:$0xf0]  ;;  %v989_v44 = vor.u32 %v1233_v37, %v988_v36  ;;  %v1012_v36 = vld [vmem:[%s2152_s0 + $0xa0] sm:$0xf] }
  0x36   :  { %v1101_v45 = vor.u32 %v1261_v39, %v1100_v38  ;;  %v1239_v37 = vld [vmem:[%s2152_s0 + $0xa4] sm:$0xf0]  ;;  %v1124_v38 = vld [vmem:[%s2152_s0 + $0x180] sm:$0xf] }
  0x37   :  { %v1267_v39 = vld [vmem:[%s2152_s0 + $0x184] sm:$0xf0] }
  0x44   :  { %522 = vmatmul.bf16.gmra.mxu0 %v949_v48  ;;  %592 = vmatmul.bf16.gmra.mxu2 %v1061_v49  ;;  %v1712_v48 = vld [vmem:[#allocation2] ss:$0 sm:$0xff] }
  0x45   :  { %675 = vmatmul.bf16.gmra.mxu1 %v953_v50  ;;  %750 = vmatmul.bf16.gmra.mxu3 %v1073_v51  ;;  %v996_v49 = vld [vmem:[%s2152_s0 + $0x80] sm:$0xf]  ;;  %v1235_v50 = vld [vmem:[%s2152_s0 + $0x84] sm:$0xf0] }
  0x46   :  { %v1108_v51 = vld [vmem:[%s2152_s0 + $0x160] sm:$0xf]  ;;  %v997_v57 = vor.u32 %v1235_v50, %v996_v49 }
  0x47   :  { %v1109_v58 = vor.u32 %v1263_v52, %v1108_v51  ;;  %v1017_v51 = vor.u32 %v1238_v40, %v1014_v41  ;;  %v1137_v52 = vor.u32 %v1268_v42, %v1134_v43  ;;  %v1243_v40 = vld [vmem:[%s2152_s0 + $0xc4] sm:$0xf0]  ;;  %v1140_v41 = vld [vmem:[%s2152_s0 + $0x1a0] sm:$0xf]  ;;  %v1242_v43 = vld [vmem:[%s2152_s0 + $0xc4] sm:$0xf] }
  0x48   :  { %v1271_v42 = vld [vmem:[%s2152_s0 + $0x1a4] sm:$0xf0] }
  0x54   :  { %527 = vmatmul.bf16.gmra.mxu0 %v957_v60  ;;  %597 = vmatmul.bf16.gmra.mxu2 %v1069_v61  ;;  %v1001_v60 = vor.u32 %v1234_v53, %v998_v54  ;;  %v1121_v61 = vor.u32 %v1264_v55, %v1118_v56 }
  0x55   :  { %680 = vmatmul.bf16.gmra.mxu1 %v961_v62  ;;  %755 = vmatmul.bf16.gmra.mxu3 %v1081_v63 }
  0x64   :  { %532 = vmatmul.bf16.gmra.mxu0 %v965_v8  ;;  %602 = vmatmul.bf16.gmra.mxu2 %v1077_v9  ;;  %v1004_v8 = vld [vmem:[%s2152_s0 + $0x90] sm:$0xf]  ;;  %v1237_v9 = vld [vmem:[%s2152_s0 + $0x94] sm:$0xf0] }
  0x65   :  { %685 = vmatmul.bf16.gmra.mxu1 %v969_v10  ;;  %760 = vmatmul.bf16.gmra.mxu3 %v1089_v11  ;;  %v1116_v10 = vld [vmem:[%s2152_s0 + $0x170] sm:$0xf]  ;;  %v1265_v11 = vld [vmem:[%s2152_s0 + $0x174] sm:$0xf0]  ;;  %v1005_v17 = vor.u32 %v1237_v9, %v1004_v8 }
  0x66   :  { %v1117_v18 = vor.u32 %v1265_v11, %v1116_v10  ;;  %v1132_v8 = vld [vmem:[%s2152_s0 + $0x190] sm:$0xf]  ;;  %v1269_v9 = vld [vmem:[%s2152_s0 + $0x194] sm:$0xf0]  ;;  %v1240_v10 = vld [vmem:[%s2152_s0 + $0xb4] sm:$0xf] }
  0x67   :  { %v1022_v11 = vld [vmem:[%s2152_s0 + $0xb8] sm:$0xf0] }
  0x74   :  { %537 = vmatmul.bf16.gmra.mxu0 %v973_v20  ;;  %607 = vmatmul.bf16.gmra.mxu2 %v1085_v21  ;;  %v1009_v21 = vor.u32 %v1236_v12, %v1006_v13  ;;  %v1270_v12 = vld [vmem:[%s2152_s0 + $0x1a4] sm:$0xf]  ;;  %v1142_v13 = vld [vmem:[%s2152_s0 + $0x1a8] sm:$0xf0] }
  0x75   :  { %690 = vmatmul.bf16.gmra.mxu1 %v977_v22  ;;  %765 = vmatmul.bf16.gmra.mxu3 %v1097_v23  ;;  %v1129_v22 = vor.u32 %v1266_v14, %v1126_v15 }
  0x84   :  { %542 = vmatmul.bf16.gmra.mxu0 %v981_v32  ;;  %612 = vmatmul.bf16.gmra.mxu2 %v1093_v33 }
  0x85   :  { %695 = vmatmul.bf16.gmra.mxu1 %v985_v34  ;;  %770 = vmatmul.bf16.gmra.mxu3 %v1105_v35 }
  0x94   :  { %547 = vmatmul.bf16.gmra.mxu0 %v989_v44  ;;  %617 = vmatmul.bf16.gmra.mxu2 %v1101_v45 }
  0x95   :  { %700 = vmatmul.bf16.gmra.mxu1 %v993_v46  ;;  %775 = vmatmul.bf16.gmra.mxu3 %v1113_v47  ;;  %v1013_v46 = vor.u32 %v1239_v37, %v1012_v36  ;;  %v1125_v47 = vor.u32 %v1267_v39, %v1124_v38  ;;  %v1028_v39 = vld [vmem:[%s2152_s0 + $0xc0] sm:$0xf] }
  0xa1   :  { %v513_v59 = vpop.f32.mrf.mxu0 }
  0xa2   :  { %v514_v62 = vadd.f32 %v1712_v48, %v513_v59  ;;  %v666_v63 = vpop.f32.mrf.mxu1 }
  0xa4   :  { %v667_v0 = vadd.f32 %v666_v63, %v514_v62  ;;  %552 = vmatmul.bf16.gmra.mxu0 %v997_v57  ;;  %622 = vmatmul.bf16.gmra.mxu2 %v1109_v58 }
  0xa5   :  { %705 = vmatmul.bf16.gmra.mxu1 %v1001_v60  ;;  %780 = vmatmul.bf16.gmra.mxu3 %v1121_v61 }
  0xa6   :  { %1308 = vtanh.f32 %v667_v0 }
  0xa7   :  { %v1739_v1 = vpop.f32.mrf.mxu2 }
  0xa8   :  { %v741_v2 = vpop.f32.mrf.mxu3 }
  0xa9   :  { %v515_v3 = vpop.f32.mrf.mxu0 }
  0xaa   :  { %v516_v4 = vadd.f32 %v1712_v48, %v515_v3  ;;  %v668_v5 = vpop.f32.mrf.mxu1 }
  0xac   :  { %v1309_v6 = vpop.eup %1308  ;;  %v669_v7 = vadd.f32 %v668_v5, %v516_v4 }
  0xad   :  { %868 = vst.msk [vmem:[%s2155_s3] sm:$0xff] %vm867_vm0, %v1309_v6  ;;  %v1020_v6 = vld [vmem:[%s2152_s0 + $0xb0] sm:$0xf] }
  0xae   :  { %1310 = vtanh.f32 %v669_v7  ;;  %v1241_v7 = vld [vmem:[%s2152_s0 + $0xb4] sm:$0xf0] }
  0xaf   :  { %v1770_v16 = vpop.f32.mrf.mxu2 }
  0xb0   :  { %v743_v19 = vpop.f32.mrf.mxu3 }
  0xb1   :  { %v518_v20 = vpop.f32.mrf.mxu0 }
  0xb2   :  { %v519_v23 = vadd.f32 %v1712_v48, %v518_v20  ;;  %v671_v24 = vpop.f32.mrf.mxu1 }
  0xb4   :  { %v1311_v25 = vpop.eup %1310  ;;  %v672_v26 = vadd.f32 %v671_v24, %v519_v23  ;;  %557 = vmatmul.bf16.gmra.mxu0 %v1005_v17  ;;  %627 = vmatmul.bf16.gmra.mxu2 %v1117_v18  ;;  %v1021_v17 = vor.u32 %v1241_v7, %v1020_v6  ;;  %v1133_v18 = vor.u32 %v1269_v9, %v1132_v8  ;;  %v84_v7 = vld [vmem:[%s2152_s0 + $0x1c0] sm:$0xff] }
  0xb5   :  { %869 = vst.msk [vmem:[%s2155_s3 + $0x8] sm:$0xff] %vm867_vm0, %v1311_v25  ;;  %710 = vmatmul.bf16.gmra.mxu1 %v1009_v21  ;;  %785 = vmatmul.bf16.gmra.mxu3 %v1129_v22  ;;  %v1025_v21 = vor.u32 %v1240_v10, %v1022_v11  ;;  %v1145_v22 = vor.u32 %v1270_v12, %v1142_v13  ;;  %v1036_v10 = vld [vmem:[%s2152_s0 + $0xd0] sm:$0xf]  ;;  %v1245_v11 = vld [vmem:[%s2152_s0 + $0xd4] sm:$0xf0] }
  0xb6   :  { %1312 = vtanh.f32 %v672_v26  ;;  %v1148_v12 = vld [vmem:[%s2152_s0 + $0x1b0] sm:$0xf]  ;;  %v1273_v13 = vld [vmem:[%s2152_s0 + $0x1b4] sm:$0xf0] }
  0xb7   :  { %v588_v27 = vpop.f32.mrf.mxu2 }
  0xb8   :  { %v589_v28 = vadd.f32 %v1712_v48, %v588_v27  ;;  %v746_v29 = vpop.f32.mrf.mxu3 }
  0xb9   :  { %v520_v30 = vpop.f32.mrf.mxu0 }
  0xba   :  { %v742_v31 = vadd.f32 %v741_v2, %v589_v28  ;;  %v521_v32 = vadd.f32 %v1712_v48, %v520_v30  ;;  %v673_v33 = vpop.f32.mrf.mxu1 }
  0xbc   :  { %v1313_v34 = vpop.eup %1312  ;;  %1314 = vtanh.f32 %v742_v31  ;;  %v674_v35 = vadd.f32 %v673_v33, %v521_v32 }
  0xbd   :  { %870 = vst.msk [vmem:[%s2155_s3 + $0x10] sm:$0xff] %vm867_vm0, %v1313_v34 }
  0xbe   :  { %1316 = vtanh.f32 %v674_v35 }
  0xbf   :  { %v590_v44 = vpop.f32.mrf.mxu2 }
  0xc0   :  { %v591_v45 = vadd.f32 %v1712_v48, %v590_v44  ;;  %v748_v49 = vpop.f32.mrf.mxu3  ;;  %v1030_v44 = vld [vmem:[%s2152_s0 + $0xc8] sm:$0xf0] }
  0xc1   :  { %v523_v50 = vpop.f32.mrf.mxu0 }
  0xc2   :  { %v1315_v53 = vpop.eup %1314  ;;  %v744_v54 = vadd.f32 %v743_v19, %v591_v45  ;;  %v524_v55 = vadd.f32 %v1712_v48, %v523_v50  ;;  %v676_v56 = vpop.f32.mrf.mxu1  ;;  %v1272_v45 = vld [vmem:[%s2152_s0 + $0x1b4] sm:$0xf]  ;;  %v1029_v50 = vor.u32 %v1243_v40, %v1028_v39 }
  0xc3   :  { %898 = vst.msk [vmem:[%s2155_s3 + $0xf0] sm:$0xff] %vm867_vm0, %v1315_v53 }
  0xc4   :  { %v1317_v57 = vpop.eup %1316  ;;  %1318 = vtanh.f32 %v744_v54  ;;  %v677_v58 = vadd.f32 %v676_v56, %v524_v55  ;;  %562 = vmatmul.bf16.gmra.mxu0 %v1013_v46  ;;  %632 = vmatmul.bf16.gmra.mxu2 %v1125_v47  ;;  %v1150_v46 = vld [vmem:[%s2152_s0 + $0x1b8] sm:$0xf0]  ;;  %v1033_v54 = vor.u32 %v1242_v43, %v1030_v44  ;;  %v1246_v43 = vld [vmem:[%s2152_s0 + $0xe4] sm:$0xf]  ;;  %v1046_v44 = vld [vmem:[%s2152_s0 + $0xe8] sm:$0xf0] }
  0xc5   :  { %871 = vst.msk [vmem:[%s2155_s3 + $0x18] sm:$0xff] %vm867_vm0, %v1317_v57  ;;  %715 = vmatmul.bf16.gmra.mxu1 %v1017_v51  ;;  %790 = vmatmul.bf16.gmra.mxu3 %v1137_v52  ;;  %v1141_v51 = vor.u32 %v1271_v42, %v1140_v41  ;;  %v1153_v55 = vor.u32 %v1272_v45, %v1150_v46  ;;  %v290_v42 = vunpack.c.l.b16 %v84_v7 }
  0xc6   :  { %1320 = vtanh.f32 %v677_v58 }
  0xc7   :  { %v593_v59 = vpop.f32.mrf.mxu2 }
  0xc8   :  { %v594_v60 = vadd.f32 %v1712_v48, %v593_v59  ;;  %v751_v61 = vpop.f32.mrf.mxu3 }
  0xc9   :  { %v525_v62 = vpop.f32.mrf.mxu0 }
  0xca   :  { %v1319_v63 = vpop.eup %1318  ;;  %v747_v0 = vadd.f32 %v746_v29, %v594_v60  ;;  %v526_v2 = vadd.f32 %v1712_v48, %v525_v62  ;;  %v678_v3 = vpop.f32.mrf.mxu1 }
  0xcb   :  { %899 = vst.msk [vmem:[%s2155_s3 + $0xf8] sm:$0xff] %vm867_vm0, %v1319_v63 }
  0xcc   :  { %v1321_v4 = vpop.eup %1320  ;;  %1322 = vtanh.f32 %v747_v0  ;;  %v679_v5 = vadd.f32 %v678_v3, %v526_v2 }
  0xcd   :  { %872 = vst.msk [vmem:[%s2155_s3 + $0x20] sm:$0xff] %vm867_vm0, %v1321_v4 }
  0xce   :  { %1324 = vtanh.f32 %v679_v5 }
  0xcf   :  { %v595_v14 = vpop.f32.mrf.mxu2 }
  0xd0   :  { %v596_v15 = vadd.f32 %v1712_v48, %v595_v14  ;;  %v753_v19 = vpop.f32.mrf.mxu3  ;;  %v291_v14 = vunpack.c.h.b16 %v84_v7 }
  0xd1   :  { %v528_v20 = vpop.f32.mrf.mxu0 }
  0xd2   :  { %v1323_v23 = vpop.eup %1322  ;;  %v749_v24 = vadd.f32 %v748_v49, %v596_v15  ;;  %v529_v25 = vadd.f32 %v1712_v48, %v528_v20  ;;  %v681_v26 = vpop.f32.mrf.mxu1  ;;  %v1244_v15 = vld [vmem:[%s2152_s0 + $0xd4] sm:$0xf]  ;;  %v1037_v20 = vor.u32 %v1245_v11, %v1036_v10 }
  0xd3   :  { %900 = vst.msk [vmem:[%s2155_s3 + $0x100] sm:$0xff] %vm867_vm0, %v1323_v23 }
  0xd4   :  { %v1325_v27 = vpop.eup %1324  ;;  %1326 = vtanh.f32 %v749_v24  ;;  %v682_v28 = vadd.f32 %v681_v26, %v529_v25  ;;  %567 = vmatmul.bf16.gmra.mxu0 %v1021_v17  ;;  %637 = vmatmul.bf16.gmra.mxu2 %v1133_v18  ;;  %v1038_v17 = vld [vmem:[%s2152_s0 + $0xd8] sm:$0xf0]  ;;  %v349_v25 = vpack.c.b16 %v291_v14, %v291_v14 }
  0xd5   :  { %873 = vst.msk [vmem:[%s2155_s3 + $0x28] sm:$0xff] %vm867_vm0, %v1325_v27  ;;  %720 = vmatmul.bf16.gmra.mxu1 %v1025_v21  ;;  %795 = vmatmul.bf16.gmra.mxu3 %v1145_v22  ;;  %v1149_v21 = vor.u32 %v1273_v13, %v1148_v12  ;;  %v1041_v24 = vor.u32 %v1244_v15, %v1038_v17 }
  0xd6   :  { %1328 = vtanh.f32 %v682_v28 }
  0xd7   :  { %v598_v29 = vpop.f32.mrf.mxu2 }
  0xd8   :  { %v599_v30 = vadd.f32 %v1712_v48, %v598_v29  ;;  %v756_v31 = vpop.f32.mrf.mxu3 }
  0xd9   :  { %v530_v32 = vpop.f32.mrf.mxu0 }
  0xda   :  { %v1327_v33 = vpop.eup %1326  ;;  %v752_v34 = vadd.f32 %v751_v61, %v599_v30  ;;  %v531_v35 = vadd.f32 %v1712_v48, %v530_v32  ;;  %v683_v36 = vpop.f32.mrf.mxu1 }
  0xdb   :  { %901 = vst.msk [vmem:[%s2155_s3 + $0x108] sm:$0xff] %vm867_vm0, %v1327_v33 }
  0xdc   :  { %v1329_v37 = vpop.eup %1328  ;;  %1330 = vtanh.f32 %v752_v34  ;;  %v684_v38 = vadd.f32 %v683_v36, %v531_v35 }
  0xdd   :  { %874 = vst.msk [vmem:[%s2155_s3 + $0x30] sm:$0xff] %vm867_vm0, %v1329_v37 }
  0xde   :  { %1332 = vtanh.f32 %v684_v38 }
  0xdf   :  { %v600_v47 = vpop.f32.mrf.mxu2 }
  0xe0   :  { %v601_v49 = vadd.f32 %v1712_v48, %v600_v47  ;;  %v758_v52 = vpop.f32.mrf.mxu3  ;;  %v348_v47 = vpack.c.b16 %v290_v42, %v290_v42 }
  0xe1   :  { %v533_v53 = vpop.f32.mrf.mxu0 }
  0xe2   :  { %v1331_v56 = vpop.eup %1330  ;;  %v754_v57 = vadd.f32 %v753_v19, %v601_v49  ;;  %v534_v58 = vadd.f32 %v1712_v48, %v533_v53  ;;  %v686_v59 = vpop.f32.mrf.mxu1 }
  0xe3   :  { %902 = vst.msk [vmem:[%s2155_s3 + $0x110] sm:$0xff] %vm867_vm0, %v1331_v56 }
  0xe4   :  { %v1333_v60 = vpop.eup %1332  ;;  %1334 = vtanh.f32 %v754_v57  ;;  %v687_v61 = vadd.f32 %v686_v59, %v534_v58  ;;  %572 = vmatmul.bf16.gmra.mxu0 %v1029_v50  ;;  %642 = vmatmul.bf16.gmra.mxu2 %v1141_v51  ;;  %v1049_v51 = vor.u32 %v1246_v43, %v1046_v44 }
  0xe5   :  { %875 = vst.msk [vmem:[%s2155_s3 + $0x38] sm:$0xff] %vm867_vm0, %v1333_v60  ;;  %725 = vmatmul.bf16.gmra.mxu1 %v1033_v54  ;;  %800 = vmatmul.bf16.gmra.mxu3 %v1153_v55 }
  0xe6   :  { %1336 = vtanh.f32 %v687_v61 }
  0xe7   :  { %v603_v62 = vpop.f32.mrf.mxu2 }
  0xe8   :  { %v604_v63 = vadd.f32 %v1712_v48, %v603_v62  ;;  %v761_v0 = vpop.f32.mrf.mxu3 }
  0xe9   :  { %v535_v2 = vpop.f32.mrf.mxu0 }
  0xea   :  { %v1335_v3 = vpop.eup %1334  ;;  %v757_v4 = vadd.f32 %v756_v31, %v604_v63  ;;  %v536_v5 = vadd.f32 %v1712_v48, %v535_v2  ;;  %v688_v6 = vpop.f32.mrf.mxu1 }
  0xeb   :  { %903 = vst.msk [vmem:[%s2155_s3 + $0x118] sm:$0xff] %vm867_vm0, %v1335_v3 }
  0xec   :  { %v1337_v8 = vpop.eup %1336  ;;  %1338 = vtanh.f32 %v757_v4  ;;  %v689_v9 = vadd.f32 %v688_v6, %v536_v5 }
  0xed   :  { %876 = vst.msk [vmem:[%s2155_s3 + $0x40] sm:$0xff] %vm867_vm0, %v1337_v8 }
  0xee   :  { %1340 = vtanh.f32 %v689_v9 }
  0xef   :  { %v605_v18 = vpop.f32.mrf.mxu2 }
  0xf0   :  { %v606_v19 = vadd.f32 %v1712_v48, %v605_v18  ;;  %v763_v22 = vpop.f32.mrf.mxu3 }
  0xf1   :  { %v538_v23 = vpop.f32.mrf.mxu0 }
  0xf2   :  { %v1339_v26 = vpop.eup %1338  ;;  %v759_v27 = vadd.f32 %v758_v52, %v606_v19  ;;  %v539_v28 = vadd.f32 %v1712_v48, %v538_v23  ;;  %v691_v29 = vpop.f32.mrf.mxu1 }
  0xf3   :  { %904 = vst.msk [vmem:[%s2155_s3 + $0x120] sm:$0xff] %vm867_vm0, %v1339_v26 }
  0xf4   :  { %v1341_v30 = vpop.eup %1340  ;;  %1342 = vtanh.f32 %v759_v27  ;;  %v692_v31 = vadd.f32 %v691_v29, %v539_v28  ;;  %577 = vmatmul.bf16.gmra.mxu0 %v1037_v20  ;;  %647 = vmatmul.bf16.gmra.mxu2 %v1149_v21 }
  0xf5   :  { %877 = vst.msk [vmem:[%s2155_s3 + $0x48] sm:$0xff] %vm867_vm0, %v1341_v30  ;;  %730 = vmatmul.bf16.gmra.mxu1 %v1041_v24  ;;  %805 = vmatmul.bf16.gmra.mxu3 %v349_v25 }
  0xf6   :  { %1344 = vtanh.f32 %v692_v31 }
  0xf7   :  { %v608_v32 = vpop.f32.mrf.mxu2 }
  0xf8   :  { %v609_v33 = vadd.f32 %v1712_v48, %v608_v32  ;;  %v766_v34 = vpop.f32.mrf.mxu3 }
  0xf9   :  { %v540_v35 = vpop.f32.mrf.mxu0 }
  0xfa   :  { %v1343_v36 = vpop.eup %1342  ;;  %v762_v37 = vadd.f32 %v761_v0, %v609_v33  ;;  %v541_v38 = vadd.f32 %v1712_v48, %v540_v35  ;;  %v693_v39 = vpop.f32.mrf.mxu1 }
  0xfb   :  { %905 = vst.msk [vmem:[%s2155_s3 + $0x128] sm:$0xff] %vm867_vm0, %v1343_v36 }
  0xfc   :  { %v1345_v40 = vpop.eup %1344  ;;  %1346 = vtanh.f32 %v762_v37  ;;  %v694_v41 = vadd.f32 %v693_v39, %v541_v38 }
  0xfd   :  { %878 = vst.msk [vmem:[%s2155_s3 + $0x50] sm:$0xff] %vm867_vm0, %v1345_v40 }
  0xfe   :  { %1348 = vtanh.f32 %v694_v41 }
  0xff   :  { %v610_v45 = vpop.f32.mrf.mxu2 }
 0x100   :  { %v611_v46 = vadd.f32 %v1712_v48, %v610_v45  ;;  %v768_v49 = vpop.f32.mrf.mxu3 }
 0x101   :  { %v543_v50 = vpop.f32.mrf.mxu0 }
 0x102   :  { %v1347_v52 = vpop.eup %1346  ;;  %v764_v53 = vadd.f32 %v763_v22, %v611_v46  ;;  %v544_v54 = vadd.f32 %v1712_v48, %v543_v50  ;;  %v696_v55 = vpop.f32.mrf.mxu1 }
 0x103   :  { %906 = vst.msk [vmem:[%s2155_s3 + $0x130] sm:$0xff] %vm867_vm0, %v1347_v52 }
 0x104   :  { %v1349_v56 = vpop.eup %1348  ;;  %1350 = vtanh.f32 %v764_v53  ;;  %v697_v57 = vadd.f32 %v696_v55, %v544_v54  ;;  %652 = vmatmul.bf16.gmra.mxu2 %v348_v47 }
 0x105   :  { %879 = vst.msk [vmem:[%s2155_s3 + $0x58] sm:$0xff] %vm867_vm0, %v1349_v56  ;;  %735 = vmatmul.bf16.gmra.mxu1 %v1049_v51 }
 0x106   :  { %1352 = vtanh.f32 %v697_v57 }
 0x107   :  { %v613_v58 = vpop.f32.mrf.mxu2 }
 0x108   :  { %v614_v59 = vadd.f32 %v1712_v48, %v613_v58  ;;  %v771_v60 = vpop.f32.mrf.mxu3 }
 0x109   :  { %v545_v61 = vpop.f32.mrf.mxu0 }
 0x10a   :  { %v1351_v62 = vpop.eup %1350  ;;  %v767_v63 = vadd.f32 %v766_v34, %v614_v59  ;;  %v546_v0 = vadd.f32 %v1712_v48, %v545_v61  ;;  %v698_v2 = vpop.f32.mrf.mxu1 }
 0x10b   :  { %907 = vst.msk [vmem:[%s2155_s3 + $0x138] sm:$0xff] %vm867_vm0, %v1351_v62 }
 0x10c   :  { %v1353_v3 = vpop.eup %1352  ;;  %1354 = vtanh.f32 %v767_v63  ;;  %v699_v4 = vadd.f32 %v698_v2, %v546_v0 }
 0x10d   :  { %880 = vst.msk [vmem:[%s2155_s3 + $0x60] sm:$0xff] %vm867_vm0, %v1353_v3 }
 0x10e   :  { %1356 = vtanh.f32 %v699_v4 }
 0x10f   :  { %v615_v5 = vpop.f32.mrf.mxu2 }
 0x110   :  { %v616_v6 = vadd.f32 %v1712_v48, %v615_v5  ;;  %v773_v7 = vpop.f32.mrf.mxu3 }
 0x111   :  { %v548_v8 = vpop.f32.mrf.mxu0 }
 0x112   :  { %v1355_v9 = vpop.eup %1354  ;;  %v769_v10 = vadd.f32 %v768_v49, %v616_v6  ;;  %v549_v11 = vadd.f32 %v1712_v48, %v548_v8  ;;  %v701_v12 = vpop.f32.mrf.mxu1 }
 0x113   :  { %908 = vst.msk [vmem:[%s2155_s3 + $0x140] sm:$0xff] %vm867_vm0, %v1355_v9 }
 0x114   :  { %v1357_v13 = vpop.eup %1356  ;;  %1358 = vtanh.f32 %v769_v10  ;;  %v702_v14 = vadd.f32 %v701_v12, %v549_v11 }
 0x115   :  { %881 = vst.msk [vmem:[%s2155_s3 + $0x68] sm:$0xff] %vm867_vm0, %v1357_v13 }
 0x116   :  { %1360 = vtanh.f32 %v702_v14 }
 0x117   :  { %v618_v15 = vpop.f32.mrf.mxu2 }
 0x118   :  { %v619_v17 = vadd.f32 %v1712_v48, %v618_v15  ;;  %v776_v18 = vpop.f32.mrf.mxu3 }
 0x119   :  { %v550_v19 = vpop.f32.mrf.mxu0 }
 0x11a   :  { %v1359_v20 = vpop.eup %1358  ;;  %v772_v21 = vadd.f32 %v771_v60, %v619_v17  ;;  %v551_v22 = vadd.f32 %v1712_v48, %v550_v19  ;;  %v703_v23 = vpop.f32.mrf.mxu1 }
 0x11b   :  { %909 = vst.msk [vmem:[%s2155_s3 + $0x148] sm:$0xff] %vm867_vm0, %v1359_v20 }
 0x11c   :  { %v1361_v24 = vpop.eup %1360  ;;  %1362 = vtanh.f32 %v772_v21  ;;  %v704_v25 = vadd.f32 %v703_v23, %v551_v22 }
 0x11d   :  { %882 = vst.msk [vmem:[%s2155_s3 + $0x70] sm:$0xff] %vm867_vm0, %v1361_v24 }
 0x11e   :  { %1364 = vtanh.f32 %v704_v25 }
 0x11f   :  { %v620_v26 = vpop.f32.mrf.mxu2 }
 0x120   :  { %v621_v27 = vadd.f32 %v1712_v48, %v620_v26  ;;  %v778_v28 = vpop.f32.mrf.mxu3 }
 0x121   :  { %v553_v29 = vpop.f32.mrf.mxu0 }
 0x122   :  { %v1363_v30 = vpop.eup %1362  ;;  %v774_v31 = vadd.f32 %v773_v7, %v621_v27  ;;  %v554_v32 = vadd.f32 %v1712_v48, %v553_v29  ;;  %v706_v33 = vpop.f32.mrf.mxu1 }
 0x123   :  { %910 = vst.msk [vmem:[%s2155_s3 + $0x150] sm:$0xff] %vm867_vm0, %v1363_v30 }
 0x124   :  { %v1365_v34 = vpop.eup %1364  ;;  %1366 = vtanh.f32 %v774_v31  ;;  %v707_v35 = vadd.f32 %v706_v33, %v554_v32 }
 0x125   :  { %883 = vst.msk [vmem:[%s2155_s3 + $0x78] sm:$0xff] %vm867_vm0, %v1365_v34 }
 0x126   :  { %1368 = vtanh.f32 %v707_v35 }
 0x127   :  { %v623_v36 = vpop.f32.mrf.mxu2 }
 0x128   :  { %v624_v37 = vadd.f32 %v1712_v48, %v623_v36  ;;  %v781_v38 = vpop.f32.mrf.mxu3 }
 0x129   :  { %v555_v39 = vpop.f32.mrf.mxu0 }
 0x12a   :  { %v1367_v40 = vpop.eup %1366  ;;  %v777_v41 = vadd.f32 %v776_v18, %v624_v37  ;;  %v556_v42 = vadd.f32 %v1712_v48, %v555_v39  ;;  %v708_v43 = vpop.f32.mrf.mxu1 }
 0x12b   :  { %911 = vst.msk [vmem:[%s2155_s3 + $0x158] sm:$0xff] %vm867_vm0, %v1367_v40 }
 0x12c   :  { %v1369_v44 = vpop.eup %1368  ;;  %1370 = vtanh.f32 %v777_v41  ;;  %v709_v45 = vadd.f32 %v708_v43, %v556_v42 }
 0x12d   :  { %884 = vst.msk [vmem:[%s2155_s3 + $0x80] sm:$0xff] %vm867_vm0, %v1369_v44 }
 0x12e   :  { %1372 = vtanh.f32 %v709_v45 }
 0x12f   :  { %v625_v46 = vpop.f32.mrf.mxu2 }
 0x130   :  { %v626_v47 = vadd.f32 %v1712_v48, %v625_v46  ;;  %v783_v49 = vpop.f32.mrf.mxu3 }
 0x131   :  { %v558_v50 = vpop.f32.mrf.mxu0 }
 0x132   :  { %v1371_v51 = vpop.eup %1370  ;;  %v779_v52 = vadd.f32 %v778_v28, %v626_v47  ;;  %v559_v53 = vadd.f32 %v1712_v48, %v558_v50  ;;  %v711_v54 = vpop.f32.mrf.mxu1 }
 0x133   :  { %912 = vst.msk [vmem:[%s2155_s3 + $0x160] sm:$0xff] %vm867_vm0, %v1371_v51 }
 0x134   :  { %v1373_v55 = vpop.eup %1372  ;;  %1374 = vtanh.f32 %v779_v52  ;;  %v712_v56 = vadd.f32 %v711_v54, %v559_v53 }
 0x135   :  { %885 = vst.msk [vmem:[%s2155_s3 + $0x88] sm:$0xff] %vm867_vm0, %v1373_v55 }
 0x136   :  { %1376 = vtanh.f32 %v712_v56 }
 0x137   :  { %v628_v57 = vpop.f32.mrf.mxu2 }
 0x138   :  { %v629_v58 = vadd.f32 %v1712_v48, %v628_v57  ;;  %v786_v59 = vpop.f32.mrf.mxu3 }
 0x139   :  { %v560_v60 = vpop.f32.mrf.mxu0 }
 0x13a   :  { %v1375_v61 = vpop.eup %1374  ;;  %v782_v62 = vadd.f32 %v781_v38, %v629_v58  ;;  %v561_v63 = vadd.f32 %v1712_v48, %v560_v60  ;;  %v713_v0 = vpop.f32.mrf.mxu1 }
 0x13b   :  { %913 = vst.msk [vmem:[%s2155_s3 + $0x168] sm:$0xff] %vm867_vm0, %v1375_v61 }
 0x13c   :  { %v1377_v2 = vpop.eup %1376  ;;  %1378 = vtanh.f32 %v782_v62  ;;  %v714_v3 = vadd.f32 %v713_v0, %v561_v63 }
 0x13d   :  { %886 = vst.msk [vmem:[%s2155_s3 + $0x90] sm:$0xff] %vm867_vm0, %v1377_v2 }
 0x13e   :  { %1380 = vtanh.f32 %v714_v3 }
 0x13f   :  { %v630_v4 = vpop.f32.mrf.mxu2 }
 0x140   :  { %v631_v5 = vadd.f32 %v1712_v48, %v630_v4  ;;  %v788_v6 = vpop.f32.mrf.mxu3 }
 0x141   :  { %v563_v7 = vpop.f32.mrf.mxu0 }
 0x142   :  { %v1379_v8 = vpop.eup %1378  ;;  %v784_v9 = vadd.f32 %v783_v49, %v631_v5  ;;  %v564_v10 = vadd.f32 %v1712_v48, %v563_v7  ;;  %v716_v11 = vpop.f32.mrf.mxu1 }
 0x143   :  { %914 = vst.msk [vmem:[%s2155_s3 + $0x170] sm:$0xff] %vm867_vm0, %v1379_v8 }
 0x144   :  { %v1381_v12 = vpop.eup %1380  ;;  %1382 = vtanh.f32 %v784_v9  ;;  %v717_v13 = vadd.f32 %v716_v11, %v564_v10 }
 0x145   :  { %887 = vst.msk [vmem:[%s2155_s3 + $0x98] sm:$0xff] %vm867_vm0, %v1381_v12 }
 0x146   :  { %1384 = vtanh.f32 %v717_v13 }
 0x147   :  { %v633_v14 = vpop.f32.mrf.mxu2 }
 0x148   :  { %v634_v15 = vadd.f32 %v1712_v48, %v633_v14  ;;  %v791_v17 = vpop.f32.mrf.mxu3 }
 0x149   :  { %v565_v18 = vpop.f32.mrf.mxu0 }
 0x14a   :  { %v1383_v19 = vpop.eup %1382  ;;  %v787_v20 = vadd.f32 %v786_v59, %v634_v15  ;;  %v566_v21 = vadd.f32 %v1712_v48, %v565_v18  ;;  %v718_v22 = vpop.f32.mrf.mxu1 }
 0x14b   :  { %915 = vst.msk [vmem:[%s2155_s3 + $0x178] sm:$0xff] %vm867_vm0, %v1383_v19 }
 0x14c   :  { %v1385_v23 = vpop.eup %1384  ;;  %1386 = vtanh.f32 %v787_v20  ;;  %v719_v24 = vadd.f32 %v718_v22, %v566_v21 }
 0x14d   :  { %888 = vst.msk [vmem:[%s2155_s3 + $0xa0] sm:$0xff] %vm867_vm0, %v1385_v23 }
 0x14e   :  { %1388 = vtanh.f32 %v719_v24 }
 0x14f   :  { %v635_v25 = vpop.f32.mrf.mxu2 }
 0x150   :  { %v636_v26 = vadd.f32 %v1712_v48, %v635_v25  ;;  %v793_v27 = vpop.f32.mrf.mxu3 }
 0x151   :  { %v568_v28 = vpop.f32.mrf.mxu0 }
 0x152   :  { %v1387_v29 = vpop.eup %1386  ;;  %v789_v30 = vadd.f32 %v788_v6, %v636_v26  ;;  %v569_v31 = vadd.f32 %v1712_v48, %v568_v28  ;;  %v721_v32 = vpop.f32.mrf.mxu1 }
 0x153   :  { %916 = vst.msk [vmem:[%s2155_s3 + $0x180] sm:$0xff] %vm867_vm0, %v1387_v29 }
 0x154   :  { %v1389_v33 = vpop.eup %1388  ;;  %1390 = vtanh.f32 %v789_v30  ;;  %v722_v34 = vadd.f32 %v721_v32, %v569_v31 }
 0x155   :  { %889 = vst.msk [vmem:[%s2155_s3 + $0xa8] sm:$0xff] %vm867_vm0, %v1389_v33 }
 0x156   :  { %1392 = vtanh.f32 %v722_v34  ;;  %v586_v34 = vadd.f32 %v1712_v48, %v1770_v16 }
 0x157   :  { %v638_v35 = vpop.f32.mrf.mxu2 }
 0x158   :  { %v639_v36 = vadd.f32 %v1712_v48, %v638_v35  ;;  %v796_v37 = vpop.f32.mrf.mxu3 }
 0x159   :  { %v570_v38 = vpop.f32.mrf.mxu0 }
 0x15a   :  { %v1391_v39 = vpop.eup %1390  ;;  %v792_v40 = vadd.f32 %v791_v17, %v639_v36  ;;  %v571_v41 = vadd.f32 %v1712_v48, %v570_v38  ;;  %v723_v42 = vpop.f32.mrf.mxu1 }
 0x15b   :  { %917 = vst.msk [vmem:[%s2155_s3 + $0x188] sm:$0xff] %vm867_vm0, %v1391_v39 }
 0x15c   :  { %v1393_v43 = vpop.eup %1392  ;;  %1394 = vtanh.f32 %v792_v40  ;;  %v724_v44 = vadd.f32 %v723_v42, %v571_v41 }
 0x15d   :  { %890 = vst.msk [vmem:[%s2155_s3 + $0xb0] sm:$0xff] %vm867_vm0, %v1393_v43 }
 0x15e   :  { %1396 = vtanh.f32 %v724_v44 }
 0x15f   :  { %v640_v45 = vpop.f32.mrf.mxu2 }
 0x160   :  { %v641_v46 = vadd.f32 %v1712_v48, %v640_v45  ;;  %v798_v47 = vpop.f32.mrf.mxu3 }
 0x161   :  { %v573_v49 = vpop.f32.mrf.mxu0 }
 0x162   :  { %v1395_v50 = vpop.eup %1394  ;;  %v794_v51 = vadd.f32 %v793_v27, %v641_v46  ;;  %v574_v52 = vadd.f32 %v1712_v48, %v573_v49  ;;  %v726_v53 = vpop.f32.mrf.mxu1  ;;  %v584_v27 = vadd.f32 %v1712_v48, %v1739_v1 }
 0x163   :  { %918 = vst.msk [vmem:[%s2155_s3 + $0x190] sm:$0xff] %vm867_vm0, %v1395_v50 }
 0x164   :  { %v1397_v54 = vpop.eup %1396  ;;  %1398 = vtanh.f32 %v794_v51  ;;  %v727_v55 = vadd.f32 %v726_v53, %v574_v52 }
 0x165   :  { %891 = vst.msk [vmem:[%s2155_s3 + $0xb8] sm:$0xff] %vm867_vm0, %v1397_v54 }
 0x166   :  { %1400 = vtanh.f32 %v727_v55 }
 0x167   :  { %v643_v56 = vpop.f32.mrf.mxu2 }
 0x168   :  { %v644_v57 = vadd.f32 %v1712_v48, %v643_v56  ;;  %v801_v58 = vpop.f32.mrf.mxu3 }
 0x169   :  { %v575_v59 = vpop.f32.mrf.mxu0 }
 0x16a   :  { %v1399_v60 = vpop.eup %1398  ;;  %v797_v61 = vadd.f32 %v796_v37, %v644_v57  ;;  %v576_v62 = vadd.f32 %v1712_v48, %v575_v59  ;;  %v728_v63 = vpop.f32.mrf.mxu1 }
 0x16b   :  { %919 = vst.msk [vmem:[%s2155_s3 + $0x198] sm:$0xff] %vm867_vm0, %v1399_v60 }
 0x16c   :  { %v1401_v0 = vpop.eup %1400  ;;  %1402 = vtanh.f32 %v797_v61  ;;  %v729_v2 = vadd.f32 %v728_v63, %v576_v62 }
 0x16d   :  { %892 = vst.msk [vmem:[%s2155_s3 + $0xc0] sm:$0xff] %vm867_vm0, %v1401_v0 }
 0x16e   :  { %1404 = vtanh.f32 %v729_v2 }
 0x16f   :  { %v645_v3 = vpop.f32.mrf.mxu2 }
 0x170   :  { %v646_v4 = vadd.f32 %v1712_v48, %v645_v3  ;;  %v803_v5 = vpop.f32.mrf.mxu3 }
 0x171   :  { %v578_v6 = vpop.f32.mrf.mxu0 }
 0x172   :  { %v1403_v7 = vpop.eup %1402  ;;  %v799_v8 = vadd.f32 %v798_v47, %v646_v4  ;;  %v579_v9 = vadd.f32 %v1712_v48, %v578_v6  ;;  %v731_v10 = vpop.f32.mrf.mxu1 }
 0x173   :  { %920 = vst.msk [vmem:[%s2155_s3 + $0x1a0] sm:$0xff] %vm867_vm0, %v1403_v7 }
 0x174   :  { %v1405_v11 = vpop.eup %1404  ;;  %1406 = vtanh.f32 %v799_v8  ;;  %v732_v12 = vadd.f32 %v731_v10, %v579_v9 }
 0x175   :  { %893 = vst.msk [vmem:[%s2155_s3 + $0xc8] sm:$0xff] %vm867_vm0, %v1405_v11 }
 0x176   :  { %1408 = vtanh.f32 %v732_v12 }
 0x177   :  { %v648_v13 = vpop.f32.mrf.mxu2 }
 0x178   :  { %v649_v14 = vadd.f32 %v1712_v48, %v648_v13  ;;  %v806_v15 = vpop.f32.mrf.mxu3 }
 0x179   :  { %v580_v17 = vpop.f32.mrf.mxu0 }
 0x17a   :  { %v1407_v18 = vpop.eup %1406  ;;  %v802_v19 = vadd.f32 %v801_v58, %v649_v14  ;;  %v581_v20 = vadd.f32 %v1712_v48, %v580_v17  ;;  %v733_v21 = vpop.f32.mrf.mxu1 }
 0x17b   :  { %921 = vst.msk [vmem:[%s2155_s3 + $0x1a8] sm:$0xff] %vm867_vm0, %v1407_v18 }
 0x17c   :  { %v1409_v22 = vpop.eup %1408  ;;  %1410 = vtanh.f32 %v802_v19  ;;  %v734_v23 = vadd.f32 %v733_v21, %v581_v20 }
 0x17d   :  { %894 = vst.msk [vmem:[%s2155_s3 + $0xd0] sm:$0xff] %vm867_vm0, %v1409_v22 }
 0x17e   :  { %1412 = vtanh.f32 %v734_v23 }
 0x17f   :  { %v650_v24 = vpop.f32.mrf.mxu2 }
 0x180   :  { %v651_v25 = vadd.f32 %v1712_v48, %v650_v24  ;;  %v808_v26 = vpop.f32.mrf.mxu3 }
 0x182   :  { %v1411_v28 = vpop.eup %1410  ;;  %v804_v29 = vadd.f32 %v803_v5, %v651_v25  ;;  %v736_v30 = vpop.f32.mrf.mxu1 }
 0x183   :  { %922 = vst.msk [vmem:[%s2155_s3 + $0x1b0] sm:$0xff] %vm867_vm0, %v1411_v28  ;;  %v737_v31 = vadd.f32 %v736_v30, %v584_v27 }
 0x184   :  { %v1413_v32 = vpop.eup %1412  ;;  %1414 = vtanh.f32 %v804_v29 }
 0x185   :  { %895 = vst.msk [vmem:[%s2155_s3 + $0xd8] sm:$0xff] %vm867_vm0, %v1413_v32  ;;  %1416 = vtanh.f32 %v737_v31 }
 0x187   :  { %v653_v33 = vpop.f32.mrf.mxu2 }
 0x188   :  { %v654_v1 = vadd.f32 %v1712_v48, %v653_v33 }
 0x18a   :  { %v1415_v35 = vpop.eup %1414  ;;  %v807_v36 = vadd.f32 %v806_v15, %v654_v1  ;;  %v738_v37 = vpop.f32.mrf.mxu1 }
 0x18b   :  { %v1417_v38 = vpop.eup %1416  ;;  %923 = vst.msk [vmem:[%s2155_s3 + $0x1b8] sm:$0xff] %vm867_vm0, %v1415_v35  ;;  %v739_v39 = vadd.f32 %v738_v37, %v586_v34 }
 0x18c   :  { %896 = vst.msk [vmem:[%s2155_s3 + $0xe0] sm:$0xff] %vm867_vm0, %v1417_v38  ;;  %1418 = vtanh.f32 %v807_v36 }
 0x18d   :  { %1420 = vtanh.f32 %v739_v39 }
 0x18f   :  { %v655_v40 = vpop.f32.mrf.mxu2 }
 0x192   :  { %v1419_v41 = vpop.eup %1418 }
 0x193   :  { %v1421_v48 = vpop.eup %1420  ;;  %924 = vst.msk [vmem:[%s2155_s3 + $0x1c0] sm:$0xff] %vm867_vm0, %v1419_v41 }
 0x194   :  { %897 = vst.msk [vmem:[%s2155_s3 + $0xe8] sm:$0xff] %vm867_vm0, %v1421_v48 }
 0x195   :  { %929 = vsyncpa [#allocation3], 1 }

</bundles_post_ra>
